<compile_context>
chip_gen: v5e
topology: v5e:2x2
jax: 0.10.0
libtpu: 0.0.40
codegen_flags: <defaults>
</compile_context>

<pallas_src>
import functools

import numpy as np
import jax
import jax.numpy as jnp
from jax import lax
from jax.experimental import pallas as pl
from jax.experimental.pallas import tpu as pltpu

jax.config.update("jax_default_matmul_precision", "highest")


def _round_up(x, m):
    return ((x + m - 1) // m) * m


def _pick_tiles(rows, max_tile):
    """8-aligned tile size + padded row count with minimal waste."""
    rp8 = _round_up(max(rows, 8), 8)
    tr = min(max_tile, rp8)            # max_tile is a multiple of 8
    return tr, _round_up(rp8, tr)


# ---------------------------------------------------------------------------
# Host-side n_offset arithmetic (mirrors the .item() loop in TransitionDown)
# ---------------------------------------------------------------------------
def compute_n_offset(offsets, ratio):
    n_offset = [int(offsets[0] * ratio) + 1]
    count = n_offset[0]
    for i in range(1, len(offsets)):
        count += (offsets[i] - offsets[i - 1]) * ratio + 1
        n_offset.append(count)
    return [int(c) for c in n_offset]


def _batch_sizes(cum):
    return [int(cum[0])] + [int(cum[i]) - int(cum[i - 1]) for i in range(1, len(cum))]


# ---------------------------------------------------------------------------
# Furthest point sampling (pointops.furthestsampling semantics).
# TODO(synk): FPS is a sequential, data-dependent scalar-index loop with no clean
#             Pallas equivalent; it is kept in plain JAX (lax.fori_loop) here.
# ---------------------------------------------------------------------------
def furthest_point_sampling(xyz, offsets, n_offsets):
    sel_all = []
    start, nstart = 0, 0
    for b in range(len(offsets)):
        end, nend = int(offsets[b]), int(n_offsets[b])
        nb, mb = end - start, nend - nstart
        pts = xyz[start:end]                              # (nb, 3), static slice

        def body(j, carry):
            dist, last, sel = carry
            d = jnp.sum((pts - pts[last]) ** 2, axis=-1)  # dist^2 to last pick
            dist = jnp.minimum(dist, d)
            nxt = jnp.argmax(dist).astype(jnp.int32)      # farthest remaining point
            return dist, nxt, sel.at[j].set(nxt)

        carry0 = (jnp.full((nb,), 1e10, jnp.float32),
                  jnp.array(0, jnp.int32),
                  jnp.zeros((mb,), jnp.int32))            # seed = first point of batch
        _, _, sel = lax.fori_loop(1, mb, body, carry0)
        sel_all.append(sel + start)
        start, nstart = end, nend
    return jnp.concatenate(sel_all, axis=0)


# ---------------------------------------------------------------------------
# Kernel 1: fused LayerNorm(last dim) + Linear(bias=False)
#   gamma/beta are folded into the weight on the host:
#     y = ((x - mu) * rsqrt(var + eps)) @ Wg + bW
# ---------------------------------------------------------------------------
def _ln_linear_kernel(x_ref, wg_ref, bw_ref, o_ref):
    x = x_ref[...].astype(jnp.float32)                    # (TR, Cin)
    mu = jnp.mean(x, axis=-1, keepdims=True)
    xc = x - mu
    var = jnp.mean(xc * xc, axis=-1, keepdims=True)       # biased, like torch LN
    xn = xc * lax.rsqrt(var + 1e-5)
    o_ref[...] = (jnp.dot(xn, wg_ref[...], preferred_element_type=jnp.float32)
                  + bw_ref[...])


def ln_linear(x_padded, w_gamma, b_w, *, tile_rows):
    Rp, C = x_padded.shape
    Co = w_gamma.shape[1]
    assert Rp % tile_rows == 0
    return pl.pallas_call(
        _ln_linear_kernel,
        out_shape=jax.ShapeDtypeStruct((Rp, Co), jnp.float32),
        grid_spec=pltpu.PrefetchScalarGridSpec(
            num_scalar_prefetch=0,
            grid=(Rp // tile_rows,),
            in_specs=[
                pl.BlockSpec((tile_rows, C), lambda i: (i, 0)),
                pl.BlockSpec((C, Co), lambda i: (0, 0)),
                pl.BlockSpec((1, Co), lambda i: (0, 0)),
            ],
            out_specs=pl.BlockSpec((tile_rows, Co), lambda i: (i, 0)),
        ),
        compiler_params=pltpu.CompilerParams(dimension_semantics=("parallel",)),
    )(x_padded, w_gamma, b_w)


# ---------------------------------------------------------------------------
# Kernel 2: batch-aware k-NN + max pool over the k gathered (LN+Linear) rows
#   spack (8, Np): rows [-2x, -2y, -2z, |s|^2, batch_id, 0, 0, 0]  (lane-dense)
# ---------------------------------------------------------------------------
def _knn_maxpool_kernel(qxyz_ref, qbid_ref, spack_ref, y_ref, o_ref, *, k):
    q = qxyz_ref[...]                                     # (TQ, 3) sampled coords
    sm2 = spack_ref[0:3, :]                               # (3, Np)  -2 * source coords
    snorm = spack_ref[3:4, :]                             # (1, Np)  |s|^2 (precomputed)
    sbid = spack_ref[4:5, :]                              # (1, Np)  source batch ids
    y = y_ref[...]                                        # (Np, Cp) LN+Linear features
    TQ, Np, Cp = q.shape[0], sm2.shape[1], y.shape[1]

    # |q|^2 is constant per row -> irrelevant for per-row argmin; dropped.
    score = snorm + jnp.dot(q, sm2, preferred_element_type=jnp.float32)   # (TQ,Np)
    BIG = jnp.float32(1e30)
    score = jnp.where(qbid_ref[...] == sbid, score, BIG)  # mask other batches / padding

    col = lax.broadcasted_iota(jnp.int32, (1, Np), 1)     # (1,Np), broadcast in compares
    acc = jnp.full((TQ, Cp), -jnp.inf, jnp.float32)
    for _ in range(k):                                    # unrolled k-NN selection
        smin = jnp.min(score, axis=-1, keepdims=True)                      # (TQ,1)
        idx = jnp.min(jnp.where(score == smin, col, jnp.int32(Np)),
                      axis=-1, keepdims=True)             # first arg-min index (TQ,1)
        onehot = col == idx                                                # (TQ,Np)
        gathered = jnp.dot(onehot.astype(jnp.float32), y,
                           preferred_element_type=jnp.float32)             # (TQ,Cp)
        acc = jnp.maximum(acc, gathered)                  # MaxPool1d(k) over neighbours
        score = jnp.where(onehot, BIG, score)             # exclude selected point
    o_ref[...] = acc.astype(o_ref.dtype)


def knn_maxpool(q_xyz, q_bid, spack, y, *, k, tile_q):
    Mp = q_xyz.shape[0]
    Np = spack.shape[1]
    Cp = y.shape[1]
    assert Mp % tile_q == 0
    kernel = functools.partial(_knn_maxpool_kernel, k=k)
    return pl.pallas_call(
        kernel,
        out_shape=jax.ShapeDtypeStruct((Mp, Cp), jnp.float32),
        grid_spec=pltpu.PrefetchScalarGridSpec(
            num_scalar_prefetch=0,
            grid=(Mp // tile_q,),
            in_specs=[
                pl.BlockSpec((tile_q, 3), lambda i: (i, 0)),   # sampled xyz tile
                pl.BlockSpec((tile_q, 1), lambda i: (i, 0)),   # sampled batch ids
                pl.BlockSpec((8, Np), lambda i: (0, 0)),       # packed source slab
                pl.BlockSpec((Np, Cp), lambda i: (0, 0)),      # LN+Linear features
            ],
            out_specs=pl.BlockSpec((tile_q, Cp), lambda i: (i, 0)),
        ),
        compiler_params=pltpu.CompilerParams(dimension_semantics=("parallel",)),
    )(q_xyz, q_bid, spack, y)


# ---------------------------------------------------------------------------
# Full forward pass (TransitionDown)
# ---------------------------------------------------------------------------
def transition_down_forward(params, feats, xyz, offset, *, ratio, k):
    offsets = [int(o) for o in offset]                    # host values (like .item())
    n_offsets = compute_n_offset(offsets, ratio)
    B = len(offsets)
    N = int(offsets[-1])
    M = int(n_offsets[-1])
    Cin = feats.shape[1]
    Cout = params["w"].shape[1]
    Cpad = _round_up(Cout, 128)                           # lane-dense output width

    # furthest point sampling (plain JAX; see TODO above)
    idx = furthest_point_sampling(xyz, offsets, n_offsets)
    n_xyz = xyz[idx]                                      # (M, 3)

    # fold LN affine into the (zero-padded) weight on the host
    w_pad = jnp.zeros((Cin, Cpad), jnp.float32).at[:, :Cout].set(params["w"])
    w_gamma = params["ln_g"][:, None] * w_pad             # (Cin, Cpad)
    b_w = (params["ln_b"] @ w_pad).reshape(1, Cpad)       # (1, Cpad)

    # per-point LayerNorm + Linear over the N source points (Pallas), padded rows
    tr, Np = _pick_tiles(N, 1024)
    feats_p = jnp.pad(feats, ((0, Np - N), (0, 0)))
    y = ln_linear(feats_p, w_gamma, b_w, tile_rows=tr)    # (Np, Cpad)

    # lane-dense packed source slab: -2x, -2y, -2z, |s|^2, batch id
    xyz_p = jnp.pad(xyz, ((0, Np - N), (0, 0)))
    bid_src = np.concatenate(
        [np.repeat(np.arange(B, dtype=np.float32), _batch_sizes(offsets)),
         np.full((Np - N,), -2.0, np.float32)])           # pad bid never matches
    spack = jnp.concatenate(
        [(-2.0 * xyz_p.T).astype(jnp.float32),
         jnp.sum(xyz_p * xyz_p, axis=-1)[None, :],
         jnp.asarray(bid_src)[None, :],
         jnp.zeros((3, Np), jnp.float32)], axis=0)        # (8, Np)

    # query side: pad sampled points to a multiple of the tile (pad bid = -1)
    tq, Mp = _pick_tiles(M, 256)
    bid_q = np.repeat(np.arange(B, dtype=np.float32), _batch_sizes(n_offsets))
    q_xyz = jnp.pad(n_xyz, ((0, Mp - M), (0, 0)))
    q_bid = jnp.concatenate(
        [jnp.asarray(bid_q), jnp.full((Mp - M,), -1.0, jnp.float32)]).reshape(Mp, 1)

    out_p = knn_maxpool(q_xyz, q_bid, spack, y, k=k, tile_q=tq)   # (Mp, Cpad)
    out = out_p[:M, :Cout]
    return out, n_xyz, jnp.asarray(n_offsets, jnp.int32)


# ---------------------------------------------------------------------------
# Pure-JAX reference (literal torch ordering: group -> LN -> Linear -> maxpool)
# ---------------------------------------------------------------------------
def reference_forward(params, feats, xyz, offset, *, ratio, k):
    offsets = [int(o) for o in offset]
    n_offsets = compute_n_offset(offsets, ratio)
    B = len(offsets)
    idx = furthest_point_sampling(xyz, offsets, n_offsets)
    n_xyz = xyz[idx]
    bid_src = jnp.asarray(np.repeat(np.arange(B), _batch_sizes(offsets)))
    bid_q = jnp.asarray(np.repeat(np.arange(B), _batch_sizes(n_offsets)))

    # same ranking expression as the kernel (|q|^2 constant per row is dropped)
    score = jnp.sum(xyz * xyz, -1)[None, :] - 2.0 * n_xyz @ xyz.T
    score = jnp.where(bid_q[:, None] == bid_src[None, :], score, 1e30)
    _, nn = lax.top_k(-score, k)                           # (M, k) nearest neighbours

    grouped = feats[nn]                                    # queryandgroup(use_xyz=False)
    m, kk, c = grouped.shape
    g = grouped.reshape(m * kk, c)
    mu = jnp.mean(g, -1, keepdims=True)
    var = jnp.mean((g - mu) ** 2, -1, keepdims=True)
    ln = (g - mu) / jnp.sqrt(var + 1e-5) * params["ln_g"] + params["ln_b"]
    lin = (ln @ params["w"]).reshape(m, kk, -1)            # (m, k, Cout)
    out = jnp.max(lin, axis=1)                             # MaxPool1d(k)
    return out, n_xyz, jnp.asarray(n_offsets, jnp.int32)


if __name__ == "__main__":
    key = jax.random.PRNGKey(0)
    Cin, Cout = 64, 32
    ratio, k = 0.25, 8
    batch_sizes = [384, 320]                               # two batches
    offset = np.cumsum(batch_sizes).astype(np.int64)       # cumulative counts (host)
    N = int(offset[-1])

    keys = jax.random.split(key, 5)
    xyz = jax.random.uniform(keys[0], (N, 3), jnp.float32)
    feats = jax.random.normal(keys[1], (N, Cin), jnp.float32)
    params = dict(
        ln_g=jnp.ones((Cin,), jnp.float32) + 0.05 * jax.random.normal(keys[2], (Cin,)),
        ln_b=0.05 * jax.random.normal(keys[3], (Cin,)),
        w=jax.random.normal(keys[4], (Cin, Cout), jnp.float32) / jnp.sqrt(Cin),
    )

    out, n_xyz, n_off = transition_down_forward(
        params, feats, xyz, offset, ratio=ratio, k=k)
    jax.block_until_ready(out)

    ref_out, ref_xyz, ref_off = reference_forward(
        params, feats, xyz, offset, ratio=ratio, k=k)

    assert out.shape == (int(n_off[-1]), Cout)
    assert n_off.tolist() == ref_off.tolist()
    assert bool(jnp.all(n_xyz == ref_xyz))
    max_err = float(jnp.max(jnp.abs(out - ref_out)))
    assert max_err < 2e-3, f"mismatch vs reference: max abs err = {max_err}"

    print("KERNEL_OK")
</pallas_src>

<mosaic_0001>
module attributes {stable_mosaic.version = 11 : i64} {
  func.func @_ln_linear_kernel(%arg0: i32, %arg1: memref<704x64xf32, #tpu.memory_space<vmem>>, %arg2: memref<64x128xf32, #tpu.memory_space<vmem>>, %arg3: memref<1x128xf32, #tpu.memory_space<vmem>>, %arg4: memref<704x128xf32, #tpu.memory_space<vmem>>) attributes {dimension_semantics = [#tpu.dimension_semantics<parallel>], iteration_bounds = array<i64: 1>, scalar_prefetch = 0 : i64, scratch_operands = 0 : i64, tpu.core_type = #tpu.core_type<tc>, window_params = [{transform_indices = @transform_0, window_bounds = array<i64: 704, 64>}, {pipeline_mode = #tpu.pipeline_mode<synchronous>, transform_indices = @transform_1, window_bounds = array<i64: 64, 128>}, {pipeline_mode = #tpu.pipeline_mode<synchronous>, transform_indices = @transform_2, window_bounds = array<i64: 1, 128>}, {transform_indices = @transform_3, window_bounds = array<i64: 704, 128>}]} {
    %c0 = arith.constant 0 : index
    %c0_0 = arith.constant 0 : index
    %0 = vector.load %arg1[%c0, %c0_0] : memref<704x64xf32, #tpu.memory_space<vmem>>, vector<704x64xf32>
    %cst = arith.constant dense<0.000000e+00> : vector<704xf32>
    %1 = vector.multi_reduction <add>, %0, %cst [1] : vector<704x64xf32> to vector<704xf32>
    %2 = vector.shape_cast %1 : vector<704xf32> to vector<704x1xf32>
    %cst_1 = arith.constant 6.400000e+01 : f32
    %3 = vector.broadcast %cst_1 : f32 to vector<704x1xf32>
    %4 = arith.divf %2, %3 : vector<704x1xf32>
    %5 = vector.broadcast %4 : vector<704x1xf32> to vector<704x64xf32>
    %6 = arith.subf %0, %5 : vector<704x64xf32>
    %7 = arith.mulf %6, %6 : vector<704x64xf32>
    %cst_2 = arith.constant dense<0.000000e+00> : vector<704xf32>
    %8 = vector.multi_reduction <add>, %7, %cst_2 [1] : vector<704x64xf32> to vector<704xf32>
    %9 = vector.shape_cast %8 : vector<704xf32> to vector<704x1xf32>
    %cst_3 = arith.constant 6.400000e+01 : f32
    %10 = vector.broadcast %cst_3 : f32 to vector<704x1xf32>
    %11 = arith.divf %9, %10 : vector<704x1xf32>
    %cst_4 = arith.constant 9.99999974E-6 : f32
    %12 = vector.broadcast %cst_4 : f32 to vector<704x1xf32>
    %13 = arith.addf %11, %12 : vector<704x1xf32>
    %14 = math.rsqrt %13 : vector<704x1xf32>
    %15 = vector.broadcast %14 : vector<704x1xf32> to vector<704x64xf32>
    %16 = arith.mulf %6, %15 : vector<704x64xf32>
    %c0_5 = arith.constant 0 : index
    %c0_6 = arith.constant 0 : index
    %17 = vector.load %arg2[%c0_5, %c0_6] : memref<64x128xf32, #tpu.memory_space<vmem>>, vector<64x128xf32>
    %cst_7 = arith.constant dense<0.000000e+00> : vector<704x128xf32>
    %18 = tpu.matmul %16, %17, %cst_7 {dimension_numbers = #tpu.dot_dimension_numbers<[1], [0], [0], [1], [0, 0, 1, 1], [], []>, precision = #tpu.contract_precision<fp32>} : vector<704x64xf32>, vector<64x128xf32>, vector<704x128xf32> -> vector<704x128xf32>
    %c0_8 = arith.constant 0 : index
    %c0_9 = arith.constant 0 : index
    %19 = vector.load %arg3[%c0_8, %c0_9] : memref<1x128xf32, #tpu.memory_space<vmem>>, vector<1x128xf32>
    %20 = vector.broadcast %19 : vector<1x128xf32> to vector<704x128xf32>
    %21 = arith.addf %18, %20 : vector<704x128xf32>
    %c0_10 = arith.constant 0 : index
    %c0_11 = arith.constant 0 : index
    %22 = vector.load %arg4[%c0_10, %c0_11] : memref<704x128xf32, #tpu.memory_space<vmem>>, vector<704x128xf32>
    tpu.vector_store %arg4[%c0_10, %c0_11], %21 {strides = array<i32>} : memref<704x128xf32, #tpu.memory_space<vmem>>, vector<704x128xf32>,
    return
  }
  func.func @transform_0(%arg0: i32) -> (i32, i32) {
    %c0_i32 = arith.constant 0 : i32
    %c0_i32_0 = arith.constant 0 : i32
    return %arg0, %c0_i32 : i32, i32
  }
  func.func @transform_1(%arg0: i32) -> (i32, i32) {
    %c0_i32 = arith.constant 0 : i32
    %c0_i32_0 = arith.constant 0 : i32
    %c0_i32_1 = arith.constant 0 : i32
    return %c0_i32, %c0_i32_0 : i32, i32
  }
  func.func @transform_2(%arg0: i32) -> (i32, i32) {
    %c0_i32 = arith.constant 0 : i32
    %c0_i32_0 = arith.constant 0 : i32
    %c0_i32_1 = arith.constant 0 : i32
    return %c0_i32, %c0_i32_0 : i32, i32
  }
  func.func @transform_3(%arg0: i32) -> (i32, i32) {
    %c0_i32 = arith.constant 0 : i32
    %c0_i32_0 = arith.constant 0 : i32
    return %arg0, %c0_i32 : i32, i32
  }
}

</mosaic_0001>

<bundles_post_ra>
// kernel: tpu_custom_call.1
= control target key start
LH: loop header
LB: loop body
LE: loop exit
PB: predicated region body
PF: predicated region fallthrough
CT: control target
= control target key end

     0   :  { %vm103_vm0 = vcmask 523264   ;;  %s10489_s0 = inlined_call_operand.vmem [shape: f32[704,64], index: 0, kind: input, shape index: {}]   ;;  %s10490_s1 = inlined_call_operand.vmem [shape: f32[64,128], index: 1, kind: input, shape index: {}]   ;;  %s10491_s2 = inlined_call_operand.vmem [shape: f32[1,128], index: 2, kind: input, shape index: {}]   ;;  %s10492_s3 = inlined_call_operand.hbm [shape: f32[704,128], index: 3, kind: output, shape index: {}]  }
   0x1   :  { %v5630_v0 = vld [vmem:[%s10489_s0 + $0x160] sm:$0xff]  ;;  %v5635_v1 = vld [vmem:[%s10489_s0 + $0x8] sm:$0xff]  ;;  %v5656_v7 = vld [vmem:[%s10489_s0 + $0x178] sm:$0xff] }
   0x2   :  { %v5640_v2 = vld [vmem:[%s10489_s0] sm:$0xff]  ;;  %v236_v3 = vsel %vm103_vm0, %v5630_v0, 0.0  ;;  %v107_v4 = vsel %vm103_vm0, %v5635_v1, 0.0  ;;  %v5651_v6 = vld [vmem:[%s10489_s0 + $0x168] sm:$0xff]  ;;  %v5661_v8 = vld [vmem:[%s10489_s0 + $0x170] sm:$0xff] }
   0x3   :  { %v104_v5 = vsel %vm103_vm0, %v5640_v2, 0.0  ;;  %237 = vadd.xlane.f32.xlu0 %v236_v3  ;;  %108 = vadd.xlane.f32.xlu2 %v107_v4 }
   0x4   :  { %105 = vadd.xlane.f32.xlu1 %v104_v5 }
   0x5   :  { %8 = vsyncpa [#allocation3], 0  ;;  %v239_v9 = vsel %vm103_vm0, %v5651_v6, 0.0  ;;  %v245_v10 = vsel %vm103_vm0, %v5656_v7, 0.0  ;;  %v242_v11 = vsel %vm103_vm0, %v5661_v8, 0.0  ;;  %v5672_v12 = vld [vmem:[%s10489_s0 + $0x10] sm:$0xff] }
   0x6   :  { %v5677_v13 = vld [vmem:[%s10489_s0 + $0x18] sm:$0xff]  ;;  %v5682_v14 = vld [vmem:[%s10489_s0 + $0x180] sm:$0xff]  ;;  %v110_v15 = vsel %vm103_vm0, %v5672_v12, 0.0  ;;  %v5693_v18 = vld [vmem:[%s10489_s0 + $0x188] sm:$0xff]  ;;  %v5603_v60 = vmov 64.0   ;;  %s5351_s17 = sshll.u32 %s10492_s3, 4  ;;  %s5352_s17 = int_to_ptr.hbm [resolvable:$true] %s5351_s17 }
   0x7   :  { %v113_v16 = vsel %vm103_vm0, %v5677_v13, 0.0  ;;  %v248_v17 = vsel %vm103_vm0, %v5682_v14, 0.0  ;;  %v5698_v19 = vld [vmem:[%s10489_s0 + $0x30] sm:$0xff]  ;;  %v5703_v20 = vld [vmem:[%s10489_s0 + $0x20] sm:$0xff]  ;;  %v251_v21 = vsel %vm103_vm0, %v5693_v18, 0.0  ;;  %v5719_v25 = vld [vmem:[%s10489_s0 + $0x1a8] sm:$0xff]  ;;  %5384 = vrcp.f32 %v5603_v60 }
   0x8   :  { %v122_v22 = vsel %vm103_vm0, %v5698_v19, 0.0  ;;  %v116_v23 = vsel %vm103_vm0, %v5703_v20, 0.0  ;;  %v5714_v24 = vld [vmem:[%s10489_s0 + $0x190] sm:$0xff]  ;;  %v5724_v26 = vld [vmem:[%s10489_s0 + $0x28] sm:$0xff]  ;;  %v263_v28 = vsel %vm103_vm0, %v5719_v25, 0.0  ;;  %v5735_v30 = vld [vmem:[%s10489_s0 + $0x198] sm:$0xff] }
   0x9   :  { %v254_v27 = vsel %vm103_vm0, %v5714_v24, 0.0  ;;  %v119_v29 = vsel %vm103_vm0, %v5724_v26, 0.0  ;;  %v5740_v31 = vld [vmem:[%s10489_s0 + $0x48] sm:$0xff]  ;;  %v5745_v32 = vld [vmem:[%s10489_s0 + $0x1a0] sm:$0xff]  ;;  %v257_v33 = vsel %vm103_vm0, %v5735_v30, 0.0  ;;  %v5756_v36 = vld [vmem:[%s10489_s0 + $0x38] sm:$0xff] }
   0xa   :  { %v131_v34 = vsel %vm103_vm0, %v5740_v31, 0.0  ;;  %v260_v35 = vsel %vm103_vm0, %v5745_v32, 0.0  ;;  %v5761_v37 = vld [vmem:[%s10489_s0 + $0x1c0] sm:$0xff]  ;;  %v125_v39 = vsel %vm103_vm0, %v5756_v36, 0.0  ;;  %v5777_v42 = vld [vmem:[%s10489_s0 + $0x1b0] sm:$0xff]  ;;  %v5787_v44 = vld [vmem:[%s10489_s0 + $0x1b8] sm:$0xff] }
   0xb   :  { %240 = vadd.xlane.f32.xlu0 %v239_v9  ;;  %246 = vadd.xlane.f32.xlu2 %v245_v10  ;;  %v5766_v38 = vld [vmem:[%s10489_s0 + $0x40] sm:$0xff]  ;;  %v272_v40 = vsel %vm103_vm0, %v5761_v37, 0.0  ;;  %v266_v45 = vsel %vm103_vm0, %v5777_v42, 0.0  ;;  %v269_v47 = vsel %vm103_vm0, %v5787_v44, 0.0  ;;  %v5798_v48 = vld [vmem:[%s10489_s0 + $0x50] sm:$0xff]  ;;  %v5803_v49 = vld [vmem:[%s10489_s0 + $0x1d8] sm:$0xff] }
   0xc   :  { %243 = vadd.xlane.f32.xlu1 %v242_v11  ;;  %v128_v41 = vsel %vm103_vm0, %v5766_v38, 0.0  ;;  %v5782_v43 = vld [vmem:[%s10489_s0 + $0x60] sm:$0xff]  ;;  %v5808_v50 = vld [vmem:[%s10489_s0 + $0x58] sm:$0xff]  ;;  %v134_v51 = vsel %vm103_vm0, %v5798_v48, 0.0  ;;  %v281_v52 = vsel %vm103_vm0, %v5803_v49, 0.0  ;;  %v5819_v54 = vld [vmem:[%s10489_s0 + $0x1c8] sm:$0xff] }
   0xd   :  { %v140_v46 = vsel %vm103_vm0, %v5782_v43, 0.0  ;;  %v137_v53 = vsel %vm103_vm0, %v5808_v50, 0.0  ;;  %v5824_v55 = vld [vmem:[%s10489_s0 + $0x1d0] sm:$0xff]  ;;  %v275_v56 = vsel %vm103_vm0, %v5819_v54, 0.0  ;;  %v5833_v58 = vld [vmem:[%s10489_s0 + $0x68] sm:$0xff]  ;;  %v5385_v61 = vpop.eup %5384  ;;  %s5605_s18 = smov 128  }
   0xe   :  { %v278_v57 = vsel %vm103_vm0, %v5824_v55, 0.0  ;;  %v143_v59 = vsel %vm103_vm0, %v5833_v58, 0.0  ;;  %v369_v62 = vmul.f32 64.0, %v5385_v61  ;;  %vm373_vm1 = vweird.f32 %v5385_v61  ;;  %s5606_s19 = smov 8  }
  0x10   :  { %v370_v63 = vsub.f32 1.0, %v369_v62 }
  0x12   :  { %v371_v3 = vmul.f32 %v5385_v61, %v370_v63 }
  0x13   :  { %111 = vadd.xlane.f32.xlu0 %v110_v15  ;;  %114 = vadd.xlane.f32.xlu2 %v113_v16 }
  0x14   :  { %249 = vadd.xlane.f32.xlu1 %v248_v17  ;;  %v372_v4 = vadd.f32 %v5385_v61, %v371_v3 }
  0x16   :  { %v5837_v5 = vsel %vm373_vm1, %v5385_v61, %v372_v4 }
  0x1b   :  { %252 = vadd.xlane.f32.xlu0 %v251_v21  ;;  %123 = vadd.xlane.f32.xlu2 %v122_v22 }
  0x1c   :  { %117 = vadd.xlane.f32.xlu1 %v116_v23 }
  0x23   :  { %255 = vadd.xlane.f32.xlu0 %v254_v27  ;;  %264 = vadd.xlane.f32.xlu2 %v263_v28 }
  0x24   :  { %120 = vadd.xlane.f32.xlu1 %v119_v29 }
  0x2b   :  { %258 = vadd.xlane.f32.xlu0 %v257_v33  ;;  %132 = vadd.xlane.f32.xlu2 %v131_v34 }
  0x2c   :  { %261 = vadd.xlane.f32.xlu1 %v260_v35 }
  0x33   :  { %126 = vadd.xlane.f32.xlu0 %v125_v39  ;;  %273 = vadd.xlane.f32.xlu2 %v272_v40 }
  0x34   :  { %129 = vadd.xlane.f32.xlu1 %v128_v41 }
  0x3b   :  { %267 = vadd.xlane.f32.xlu0 %v266_v45  ;;  %141 = vadd.xlane.f32.xlu2 %v140_v46 }
  0x3c   :  { %270 = vadd.xlane.f32.xlu1 %v269_v47 }
  0x43   :  { %135 = vadd.xlane.f32.xlu0 %v134_v51  ;;  %282 = vadd.xlane.f32.xlu2 %v281_v52 }
  0x44   :  { %138 = vadd.xlane.f32.xlu1 %v137_v53 }
  0x4b   :  { %276 = vadd.xlane.f32.xlu0 %v275_v56 }
  0x4c   :  { %279 = vadd.xlane.f32.xlu1 %v278_v57 }
  0x53   :  { %144 = vadd.xlane.f32.xlu0 %v143_v59 }
  0x76   :  { %v238_v9 = vpop.xlane.xlu0 %237  ;;  %v109_v10 = vpop.xlane.xlu2 %108 }
  0x77   :  { %v419_v11 = vmul.f32 %v5837_v5, %v238_v9  ;;  %v106_v15 = vpop.xlane.xlu1 %105  ;;  %v376_v39 = vmul.f32 %v5837_v5, %v109_v10 }
  0x78   :  { %v375_v16 = vmul.f32 %v5837_v5, %v106_v15 }
  0x79   :  { %v5842_v17 = vsub.f32 %v5630_v0, %v419_v11  ;;  %v5873_v52 = vsub.f32 %v5635_v1, %v376_v39 }
  0x7a   :  { %v5845_v21 = vsub.f32 %v5640_v2, %v375_v16 }
  0x7b   :  { %v595_v22 = vmul.f32 %v5842_v17, %v5842_v17  ;;  %v552_v63 = vmul.f32 %v5873_v52, %v5873_v52 }
  0x7c   :  { %v551_v23 = vmul.f32 %v5845_v21, %v5845_v21 }
  0x7d   :  { %v771_v27 = vsel %vm103_vm0, %v595_v22, 0.0 }
  0x7e   :  { %v241_v28 = vpop.xlane.xlu0 %240  ;;  %772 = vadd.xlane.f32.xlu2 %v771_v27  ;;  %v247_v29 = vpop.xlane.xlu2 %246  ;;  %v639_v33 = vsel %vm103_vm0, %v551_v23, 0.0 }
  0x7f   :  { %v420_v34 = vmul.f32 %v5837_v5, %v241_v28  ;;  %v422_v0 = vmul.f32 %v5837_v5, %v247_v29  ;;  %640 = vadd.xlane.f32.xlu1 %v639_v33  ;;  %v244_v2 = vpop.xlane.xlu1 %243 }
  0x80   :  { %v421_v35 = vmul.f32 %v5837_v5, %v244_v2 }
  0x81   :  { %v5858_v40 = vsub.f32 %v5651_v6, %v420_v34  ;;  %v5861_v41 = vsub.f32 %v5656_v7, %v422_v0 }
  0x82   :  { %v5864_v45 = vsub.f32 %v5661_v8, %v421_v35 }
  0x83   :  { %v596_v46 = vmul.f32 %v5858_v40, %v5858_v40  ;;  %v598_v47 = vmul.f32 %v5861_v41, %v5861_v41 }
  0x84   :  { %v597_v51 = vmul.f32 %v5864_v45, %v5864_v45 }
  0x85   :  { %v774_v6 = vsel %vm103_vm0, %v596_v46, 0.0  ;;  %v780_v7 = vsel %vm103_vm0, %v598_v47, 0.0 }
  0x86   :  { %v112_v53 = vpop.xlane.xlu0 %111  ;;  %775 = vadd.xlane.f32.xlu2 %v774_v6  ;;  %v115_v8 = vpop.xlane.xlu2 %114  ;;  %v777_v56 = vsel %vm103_vm0, %v597_v51, 0.0 }
  0x87   :  { %v377_v57 = vmul.f32 %v5837_v5, %v112_v53  ;;  %v378_v59 = vmul.f32 %v5837_v5, %v115_v8  ;;  %781 = vadd.xlane.f32.xlu1 %v780_v7  ;;  %778 = vadd.xlane.f32.xlu0 %v777_v56  ;;  %v250_v60 = vpop.xlane.xlu1 %249 }
  0x88   :  { %v423_v62 = vmul.f32 %v5837_v5, %v250_v60 }
  0x89   :  { %v5881_v61 = vsub.f32 %v5672_v12, %v377_v57  ;;  %v5884_v1 = vsub.f32 %v5677_v13, %v378_v59  ;;  %v642_v12 = vsel %vm103_vm0, %v552_v63, 0.0 }
  0x8a   :  { %v5894_v9 = vsub.f32 %v5682_v14, %v423_v62 }
  0x8b   :  { %v554_v3 = vmul.f32 %v5884_v1, %v5884_v1  ;;  %v553_v4 = vmul.f32 %v5881_v61, %v5881_v61 }
  0x8c   :  { %v599_v14 = vmul.f32 %v5894_v9, %v5894_v9 }
  0x8d   :  { %v648_v10 = vsel %vm103_vm0, %v554_v3, 0.0  ;;  %v645_v13 = vsel %vm103_vm0, %v553_v4, 0.0 }
  0x8e   :  { %v253_v11 = vpop.xlane.xlu0 %252  ;;  %643 = vadd.xlane.f32.xlu2 %v642_v12  ;;  %v124_v27 = vpop.xlane.xlu2 %123  ;;  %v783_v34 = vsel %vm103_vm0, %v599_v14, 0.0 }
  0x8f   :  { %v424_v15 = vmul.f32 %v5837_v5, %v253_v11  ;;  %649 = vadd.xlane.f32.xlu1 %v648_v10  ;;  %646 = vadd.xlane.f32.xlu0 %v645_v13  ;;  %v118_v16 = vpop.xlane.xlu1 %117  ;;  %v381_v35 = vmul.f32 %v5837_v5, %v124_v27 }
  0x90   :  { %v379_v23 = vmul.f32 %v5837_v5, %v118_v16 }
  0x91   :  { %v5901_v22 = vsub.f32 %v5693_v18, %v424_v15  ;;  %v5925_v51 = vsub.f32 %v5698_v19, %v381_v35 }
  0x92   :  { %v5909_v29 = vsub.f32 %v5703_v20, %v379_v23 }
  0x93   :  { %v600_v28 = vmul.f32 %v5901_v22, %v5901_v22  ;;  %v557_v60 = vmul.f32 %v5925_v51, %v5925_v51 }
  0x94   :  { %v555_v20 = vmul.f32 %v5909_v29, %v5909_v29 }
  0x95   :  { %v786_v33 = vsel %vm103_vm0, %v600_v28, 0.0  ;;  %v657_v12 = vsel %vm103_vm0, %v557_v60, 0.0  ;;  %v30_v60 = vld [vmem:[%s10489_s0 + $0x78] sm:$0xff] }
  0x96   :  { %v256_v0 = vpop.xlane.xlu0 %255  ;;  %784 = vadd.xlane.f32.xlu2 %v783_v34  ;;  %v265_v53 = vpop.xlane.xlu2 %264 }
  0x97   :  { %v425_v18 = vmul.f32 %v5837_v5, %v256_v0  ;;  %787 = vadd.xlane.f32.xlu0 %v786_v33  ;;  %v121_v2 = vpop.xlane.xlu1 %120  ;;  %v428_v59 = vmul.f32 %v5837_v5, %v265_v53  ;;  %v75_v53 = vld [vmem:[%s10489_s0 + $0x1e0] sm:$0xff] }
  0x98   :  { %v380_v39 = vmul.f32 %v5837_v5, %v121_v2 }
  0x99   :  { %v5917_v46 = vsub.f32 %v5714_v24, %v425_v18  ;;  %v651_v24 = vsel %vm103_vm0, %v555_v20, 0.0  ;;  %v5946_v4 = vsub.f32 %v5719_v25, %v428_v59  ;;  %v29_v20 = vld [vmem:[%s10489_s0 + $0x70] sm:$0xff] }
  0x9a   :  { %v5922_v47 = vsub.f32 %v5724_v26, %v380_v39 }
  0x9b   :  { %v601_v6 = vmul.f32 %v5917_v46, %v5917_v46  ;;  %v604_v16 = vmul.f32 %v5946_v4, %v5946_v4 }
  0x9c   :  { %v556_v7 = vmul.f32 %v5922_v47, %v5922_v47 }
  0x9d   :  { %v789_v8 = vsel %vm103_vm0, %v601_v6, 0.0  ;;  %v798_v28 = vsel %vm103_vm0, %v604_v16, 0.0  ;;  %v31_v16 = vld [vmem:[%s10489_s0 + $0x80] sm:$0xff] }
  0x9e   :  { %v259_v56 = vpop.xlane.xlu0 %258  ;;  %790 = vadd.xlane.f32.xlu1 %v789_v8  ;;  %652 = vadd.xlane.f32.xlu2 %v651_v24  ;;  %v654_v26 = vsel %vm103_vm0, %v556_v7, 0.0  ;;  %v133_v0 = vpop.xlane.xlu2 %132  ;;  %v146_v24 = vsel %vm103_vm0, %v29_v20, 0.0 }
  0x9f   :  { %v426_v57 = vmul.f32 %v5837_v5, %v259_v56  ;;  %655 = vadd.xlane.f32.xlu0 %v654_v26  ;;  %v262_v19 = vpop.xlane.xlu1 %261  ;;  %v284_v26 = vsel %vm103_vm0, %v75_v53, 0.0 }
  0xa0   :  { %v427_v62 = vmul.f32 %v5837_v5, %v262_v19 }
  0xa1   :  { %v5940_v63 = vsub.f32 %v5735_v30, %v426_v57 }
  0xa2   :  { %v5943_v3 = vsub.f32 %v5745_v32, %v427_v62 }
  0xa3   :  { %v602_v10 = vmul.f32 %v5940_v63, %v5940_v63 }
  0xa4   :  { %v603_v13 = vmul.f32 %v5943_v3, %v5943_v3 }
  0xa5   :  { %v792_v11 = vsel %vm103_vm0, %v602_v10, 0.0  ;;  %v149_v10 = vsel %vm103_vm0, %v30_v60, 0.0 }
  0xa6   :  { %v127_v15 = vpop.xlane.xlu0 %126  ;;  %658 = vadd.xlane.f32.xlu1 %v657_v12  ;;  %793 = vadd.xlane.f32.xlu2 %v792_v11  ;;  %v795_v30 = vsel %vm103_vm0, %v603_v13, 0.0  ;;  %v274_v11 = vpop.xlane.xlu2 %273 }
  0xa7   :  { %v382_v32 = vmul.f32 %v5837_v5, %v127_v15  ;;  %796 = vadd.xlane.f32.xlu0 %v795_v30  ;;  %v130_v25 = vpop.xlane.xlu1 %129  ;;  %v431_v30 = vmul.f32 %v5837_v5, %v274_v11 }
  0xa8   :  { %v383_v23 = vmul.f32 %v5837_v5, %v130_v25 }
  0xa9   :  { %v5960_v14 = vsub.f32 %v5756_v36, %v382_v32 }
  0xaa   :  { %v5963_v27 = vsub.f32 %v5766_v38, %v383_v23  ;;  %v384_v38 = vmul.f32 %v5837_v5, %v133_v0  ;;  %v6020_v23 = vsub.f32 %v5761_v37, %v431_v30  ;;  %v77_v37 = vld [vmem:[%s10489_s0 + $0x1f0] sm:$0xff] }
  0xab   :  { %v558_v33 = vmul.f32 %v5960_v14, %v5960_v14 }
  0xac   :  { %v559_v34 = vmul.f32 %v5963_v27, %v5963_v27  ;;  %v5985_v8 = vsub.f32 %v5740_v31, %v384_v38 }
  0xad   :  { %v660_v18 = vsel %vm103_vm0, %v558_v33, 0.0 }
  0xae   :  { %v268_v2 = vpop.xlane.xlu0 %267  ;;  %799 = vadd.xlane.f32.xlu1 %v798_v28  ;;  %661 = vadd.xlane.f32.xlu2 %v660_v18  ;;  %v663_v36 = vsel %vm103_vm0, %v559_v34, 0.0  ;;  %v560_v31 = vmul.f32 %v5985_v8, %v5985_v8  ;;  %v152_v34 = vsel %vm103_vm0, %v31_v16, 0.0 }
  0xaf   :  { %v429_v35 = vmul.f32 %v5837_v5, %v268_v2  ;;  %664 = vadd.xlane.f32.xlu0 %v663_v36  ;;  %v271_v39 = vpop.xlane.xlu1 %270  ;;  %v607_v36 = vmul.f32 %v6020_v23, %v6020_v23 }
  0xb0   :  { %v430_v6 = vmul.f32 %v5837_v5, %v271_v39  ;;  %v666_v12 = vsel %vm103_vm0, %v560_v31, 0.0  ;;  %v290_v39 = vsel %vm103_vm0, %v77_v37, 0.0 }
  0xb1   :  { %v5979_v7 = vsub.f32 %v5777_v42, %v429_v35 }
  0xb2   :  { %v5992_v57 = vsub.f32 %v5787_v44, %v430_v6  ;;  %v142_v6 = vpop.xlane.xlu2 %141 }
  0xb3   :  { %v605_v56 = vmul.f32 %v5979_v7, %v5979_v7 }
  0xb4   :  { %v606_v62 = vmul.f32 %v5992_v57, %v5992_v57 }
  0xb5   :  { %v801_v42 = vsel %vm103_vm0, %v605_v56, 0.0 }
  0xb6   :  { %147 = vadd.xlane.f32.xlu1 %v146_v24  ;;  %802 = vadd.xlane.f32.xlu2 %v801_v42  ;;  %v136_v19 = vpop.xlane.xlu0 %135  ;;  %v804_v13 = vsel %vm103_vm0, %v606_v62, 0.0  ;;  %v387_v24 = vmul.f32 %v5837_v5, %v142_v6  ;;  %v78_v42 = vld [vmem:[%s10489_s0 + $0x1f8] sm:$0xff] }
  0xb7   :  { %285 = vadd.xlane.f32.xlu0 %v284_v26  ;;  %v385_v59 = vmul.f32 %v5837_v5, %v136_v19  ;;  %v139_v15 = vpop.xlane.xlu1 %138  ;;  %v293_v60 = vsel %vm103_vm0, %v78_v42, 0.0 }
  0xb8   :  { %v386_v25 = vmul.f32 %v5837_v5, %v139_v15  ;;  %v6053_v19 = vsub.f32 %v5782_v43, %v387_v24  ;;  %v33_v15 = vld [vmem:[%s10489_s0 + $0x90] sm:$0xff]  ;;  %v79_v24 = vld [vmem:[%s10489_s0 + $0x200] sm:$0xff] }
  0xb9   :  { %v6004_v44 = vsub.f32 %v5798_v48, %v385_v59  ;;  %v76_v48 = vld [vmem:[%s10489_s0 + $0x1e8] sm:$0xff] }
  0xba   :  { %v287_v28 = vsel %vm103_vm0, %v76_v48, 0.0  ;;  %v6026_v0 = vsub.f32 %v5808_v50, %v386_v25  ;;  %v807_v50 = vsel %vm103_vm0, %v607_v36, 0.0  ;;  %v563_v11 = vmul.f32 %v6053_v19, %v6053_v19 }
  0xbb   :  { %v561_v32 = vmul.f32 %v6004_v44, %v6004_v44 }
  0xbc   :  { %v562_v35 = vmul.f32 %v6026_v0, %v6026_v0 }
  0xbd   :  { %v669_v33 = vsel %vm103_vm0, %v561_v32, 0.0 }
  0xbe   :  { %667 = vadd.xlane.f32.xlu1 %v666_v12  ;;  %150 = vadd.xlane.f32.xlu2 %v149_v10  ;;  %v277_v18 = vpop.xlane.xlu0 %276  ;;  %v672_v20 = vsel %vm103_vm0, %v562_v35, 0.0  ;;  %v2054_v10 = vld [vmem:[%s10490_s1 + $0x38] sm:$0xff]  ;;  %v2052_v35 = vld [vmem:[%s10490_s1 + $0x28] sm:$0xff] }
  0xbf   :  { %805 = vadd.xlane.f32.xlu0 %v804_v13  ;;  %v432_v2 = vmul.f32 %v5837_v5, %v277_v18  ;;  %v280_v53 = vpop.xlane.xlu1 %279  ;;  %v6064_v13 = vand.u32 4294901760, %v2054_v10 }
  0xc0   :  { %v433_v26 = vmul.f32 %v5837_v5, %v280_v53  ;;  %v2051_v53 = vld [vmem:[%s10490_s1 + $0x20] sm:$0xff] }
  0xc1   :  { %v6037_v38 = vsub.f32 %v5819_v54, %v432_v2  ;;  %v32_v54 = vld [vmem:[%s10489_s0 + $0x88] sm:$0xff]  ;;  %v6078_v32 = vsub.f32 %v2054_v10, %v6064_v13  ;;  %2332 = vmatpush.msra.mxu0 %v6064_v13  ;;  %5363 = vmatpush.msra.mxu2 %v6064_v13  ;;  %v283_v2 = vpop.xlane.xlu2 %282  ;;  %v6123_v42 = vand.u32 4294901760, %v2051_v53 }
  0xc2   :  { %v155_v59 = vsel %vm103_vm0, %v32_v54, 0.0  ;;  %v6059_v62 = vsub.f32 %v5824_v55, %v433_v26  ;;  %v2053_v55 = vld [vmem:[%s10490_s1 + $0x30] sm:$0xff] }
  0xc3   :  { %v608_v56 = vmul.f32 %v6037_v38, %v6037_v38  ;;  %v6080_v48 = vand.u32 4294901760, %v2053_v55  ;;  %v3062_v25 = vand.u32 4294901760, %v6078_v32 }
  0xc4   :  { %10892 = vst [vmem:[#allocation5_spill] sm:$0xff] %v6059_v62  ;;  %v609_v30 = vmul.f32 %v6059_v62, %v6059_v62 }
  0xc5   :  { %v810_v31 = vsel %vm103_vm0, %v608_v56, 0.0  ;;  %v6086_v16 = vsub.f32 %v2053_v55, %v6080_v48  ;;  %2334 = vmatpush.msra.mxu0 %v6080_v48  ;;  %5364 = vmatpush.msra.mxu2 %v6080_v48  ;;  %v3063_v36 = vsub.f32 %v6078_v32, %v3062_v25  ;;  %v34_v56 = vld [vmem:[%s10489_s0 + $0x98] sm:$0xff] }
  0xc6   :  { %288 = vadd.xlane.f32.xlu1 %v287_v28  ;;  %670 = vadd.xlane.f32.xlu2 %v669_v33  ;;  %v145_v12 = vpop.xlane.xlu0 %144  ;;  %v675_v33 = vsel %vm103_vm0, %v563_v11, 0.0  ;;  %v813_v18 = vsel %vm103_vm0, %v609_v30, 0.0  ;;  %v161_v55 = vsel %vm103_vm0, %v34_v56, 0.0 }
  0xc7   :  { %153 = vadd.xlane.f32.xlu0 %v152_v34  ;;  %v388_v43 = vmul.f32 %v5837_v5, %v145_v12  ;;  %v158_v34 = vsel %vm103_vm0, %v33_v15, 0.0  ;;  %v3068_v37 = vand.u32 4294901760, %v6086_v16  ;;  %v2049_v15 = vld [vmem:[%s10490_s1 + $0x10] sm:$0xff] }
  0xc9   :  { %v6091_v28 = vsub.f32 %v5833_v58, %v388_v43  ;;  %v3064_v58 = vand.u32 4294901760, %v3063_v36  ;;  %v296_v43 = vsel %vm103_vm0, %v79_v24, 0.0 }
  0xcb   :  { %v564_v6 = vmul.f32 %v6091_v28, %v6091_v28  ;;  %3065 = vmatpush.msra.mxu1 %v3064_v58  ;;  %5371 = vmatpush.msra.mxu3 %v3064_v58 }
  0xcd   :  { %v678_v11 = vsel %vm103_vm0, %v564_v6, 0.0  ;;  %v2047_v6 = vld [vmem:[%s10490_s1] sm:$0xff] }
  0xce   :  { %808 = vadd.xlane.f32.xlu1 %v807_v50  ;;  %291 = vadd.xlane.f32.xlu2 %v290_v39  ;;  %v3069_v50 = vsub.f32 %v6086_v16, %v3068_v37  ;;  %v6106_v39 = vand.u32 4294901760, %v2052_v35 }
  0xcf   :  { %673 = vadd.xlane.f32.xlu0 %v672_v20  ;;  %v434_v20 = vmul.f32 %v5837_v5, %v283_v2 }
  0xd0   :  { %v3070_v54 = vand.u32 4294901760, %v3069_v50  ;;  %v6121_v26 = vsub.f32 %v2052_v35, %v6106_v39  ;;  %2336 = vmatpush.msra.mxu0 %v6106_v39  ;;  %5365 = vmatpush.msra.mxu2 %v6106_v39 }
  0xd1   :  { %v6137_v10 = vsub.f32 %v5803_v49, %v434_v20 }
  0xd2   :  { %3071 = vmatpush.msra.mxu1 %v3070_v54  ;;  %5372 = vmatpush.msra.mxu3 %v3070_v54 }
  0xd3   :  { %10893 = vst [vmem:[#allocation6_spill] sm:$0xff] %v6137_v10  ;;  %2338 = vmatpush.msra.mxu0 %v6123_v42  ;;  %5366 = vmatpush.msra.mxu2 %v6123_v42  ;;  %v610_v50 = vmul.f32 %v6137_v10, %v6137_v10 }
  0xd6   :  { %156 = vadd.xlane.f32.xlu1 %v155_v59  ;;  %811 = vadd.xlane.f32.xlu2 %v810_v31  ;;  %v2050_v59 = vld [vmem:[%s10490_s1 + $0x18] sm:$0xff]  ;;  %v3074_v31 = vand.u32 4294901760, %v6121_v26 }
  0xd7   :  { %294 = vadd.xlane.f32.xlu0 %v293_v60  ;;  %v6132_v60 = vsub.f32 %v2051_v53, %v6123_v42  ;;  %v6134_v12 = vand.u32 4294901760, %v2050_v59  ;;  %v80_v53 = vld [vmem:[%s10489_s0 + $0x208] sm:$0xff] }
  0xd8   :  { %v3075_v30 = vsub.f32 %v6121_v26, %v3074_v31 }
  0xd9   :  { %v3080_v49 = vand.u32 4294901760, %v6132_v60  ;;  %2340 = vmatpush.msra.mxu0 %v6134_v12  ;;  %5367 = vmatpush.msra.mxu2 %v6134_v12 }
  0xda   :  { %v3076_v2 = vand.u32 4294901760, %v3075_v30  ;;  %v816_v30 = vsel %vm103_vm0, %v610_v50, 0.0 }
  0xdb   :  { %v3081_v36 = vsub.f32 %v6132_v60, %v3080_v49 }
  0xdc   :  { %3077 = vmatpush.msra.mxu1 %v3076_v2  ;;  %5373 = vmatpush.msra.mxu3 %v3076_v2  ;;  %v299_v2 = vsel %vm103_vm0, %v80_v53, 0.0  ;;  %v35_v53 = vld [vmem:[%s10489_s0 + $0xa0] sm:$0xff] }
  0xdd   :  { %v3082_v24 = vand.u32 4294901760, %v3081_v36 }
  0xde   :  { %676 = vadd.xlane.f32.xlu1 %v675_v33  ;;  %159 = vadd.xlane.f32.xlu2 %v158_v34  ;;  %v6152_v33 = vsub.f32 %v2050_v59, %v6134_v12  ;;  %v6154_v34 = vand.u32 4294901760, %v2049_v15  ;;  %v6183_v59 = vand.u32 4294901760, %v2047_v6 }
  0xdf   :  { %814 = vadd.xlane.f32.xlu0 %v813_v18  ;;  %v2048_v18 = vld [vmem:[%s10490_s1 + $0x8] sm:$0xff]  ;;  %3083 = vmatpush.msra.mxu1 %v3082_v24 }
  0xe0   :  { %v3086_v35 = vand.u32 4294901760, %v6152_v33  ;;  %v6166_v58 = vsub.f32 %v2049_v15, %v6154_v34  ;;  %v6170_v20 = vand.u32 4294901760, %v2048_v18  ;;  %2342 = vmatpush.msra.mxu0 %v6154_v34  ;;  %5368 = vmatpush.msra.mxu2 %v6154_v34  ;;  %v6194_v15 = vsub.f32 %v2047_v6, %v6183_v59 }
  0xe1   :  { %5374 = vmatpush.msra.mxu3 %v3082_v24 }
  0xe2   :  { %v3087_v56 = vsub.f32 %v6152_v33, %v3086_v35  ;;  %v3092_v54 = vand.u32 4294901760, %v6166_v58  ;;  %2344 = vmatpush.msra.mxu0 %v6170_v20  ;;  %5369 = vmatpush.msra.mxu2 %v6170_v20  ;;  %v3104_v24 = vand.u32 4294901760, %v6194_v15 }
  0xe4   :  { %2346 = vmatpush.msra.mxu0 %v6183_v59  ;;  %5370 = vmatpush.msra.mxu2 %v6183_v59  ;;  %v3105_v50 = vsub.f32 %v6194_v15, %v3104_v24 }
  0xe6   :  { %297 = vadd.xlane.f32.xlu1 %v296_v43  ;;  %679 = vadd.xlane.f32.xlu2 %v678_v11  ;;  %v6186_v43 = vsub.f32 %v2048_v18, %v6170_v20  ;;  %v3088_v11 = vand.u32 4294901760, %v3087_v56 }
  0xe7   :  { %162 = vadd.xlane.f32.xlu0 %v161_v55  ;;  %v3093_v55 = vsub.f32 %v6166_v58, %v3092_v54  ;;  %4498 = vmatpush.msrb.mxu0 %v3062_v25 }
  0xe8   :  { %v3098_v18 = vand.u32 4294901760, %v6186_v43  ;;  %3089 = vmatpush.msra.mxu1 %v3088_v11  ;;  %5375 = vmatpush.msra.mxu3 %v3088_v11  ;;  %v3106_v11 = vand.u32 4294901760, %v3105_v50 }
  0xe9   :  { %v3094_v36 = vand.u32 4294901760, %v3093_v55  ;;  %3471 = vmatpush.msrb.mxu2 %v6078_v32  ;;  %4502 = vmatpush.msrb.mxu0 %v3068_v37 }
  0xea   :  { %v3099_v56 = vsub.f32 %v6186_v43, %v3098_v18 }
  0xeb   :  { %3095 = vmatpush.msra.mxu1 %v3094_v36  ;;  %5376 = vmatpush.msra.mxu3 %v3094_v36  ;;  %v164_v36 = vsel %vm103_vm0, %v35_v53, 0.0 }
  0xec   :  { %v3100_v6 = vand.u32 4294901760, %v3099_v56  ;;  %3474 = vmatpush.msrb.mxu2 %v6086_v16  ;;  %4506 = vmatpush.msrb.mxu0 %v3074_v31 }
  0xee   :  { %817 = vadd.xlane.f32.xlu1 %v816_v30  ;;  %300 = vadd.xlane.f32.xlu2 %v299_v2 }
  0xef   :  { %3101 = vmatpush.msra.mxu1 %v3100_v6  ;;  %5377 = vmatpush.msra.mxu3 %v3100_v6 }
  0xf0   :  { %3477 = vmatpush.msrb.mxu2 %v6121_v26  ;;  %4510 = vmatpush.msrb.mxu0 %v3080_v49 }
  0xf1   :  { %v773_v25 = vpop.xlane.xlu2 %772  ;;  %3107 = vmatpush.msra.mxu1 %v3106_v11  ;;  %5378 = vmatpush.msra.mxu3 %v3106_v11 }
  0xf2   :  { %v947_v55 = vmul.f32 %v773_v25, %v5837_v5  ;;  %v641_v30 = vpop.xlane.xlu1 %640  ;;  %3480 = vmatpush.msrb.mxu2 %v6132_v60  ;;  %4514 = vmatpush.msrb.mxu0 %v3086_v35 }
  0xf3   :  { %v903_v2 = vmul.f32 %v641_v30, %v5837_v5  ;;  %3943 = vmatpush.msrb.mxu3 %v6064_v13  ;;  %4889 = vmatpush.msrb.mxu1 %v6064_v13 }
  0xf4   :  { %v6221_v32 = vadd.f32 1e-05, %v947_v55  ;;  %3483 = vmatpush.msrb.mxu2 %v6152_v33  ;;  %4518 = vmatpush.msrb.mxu0 %v3092_v54 }
  0xf5   :  { %v6225_v37 = vadd.f32 1e-05, %v903_v2  ;;  %3945 = vmatpush.msrb.mxu3 %v6080_v48  ;;  %4891 = vmatpush.msrb.mxu1 %v6080_v48 }
  0xf6   :  { %5386 = vrsqrt.f32 %v6221_v32  ;;  %165 = vadd.xlane.f32.xlu1 %v164_v36  ;;  %3486 = vmatpush.msrb.mxu2 %v6166_v58  ;;  %vm1525_vm6 = vweird.f32 %v6221_v32 }
  0xf7   :  { %5388 = vrsqrt.f32 %v6225_v37  ;;  %3947 = vmatpush.msrb.mxu3 %v6106_v39  ;;  %4893 = vmatpush.msrb.mxu1 %v6106_v39  ;;  %vm1085_vm3 = vweird.f32 %v6225_v37 }
  0xf8   :  { %4522 = vmatpush.msrb.mxu0 %v3098_v18  ;;  %3489 = vmatpush.msrb.mxu2 %v6186_v43 }
  0xf9   :  { %v776_v13 = vpop.xlane.xlu2 %775  ;;  %3949 = vmatpush.msrb.mxu3 %v6123_v42  ;;  %4895 = vmatpush.msrb.mxu1 %v6123_v42 }
  0xfa   :  { %v948_v16 = vmul.f32 %v776_v13, %v5837_v5  ;;  %v779_v26 = vpop.xlane.xlu0 %778  ;;  %v782_v31 = vpop.xlane.xlu1 %781  ;;  %4526 = vmatpush.msrb.mxu0 %v3104_v24  ;;  %3492 = vmatpush.msrb.mxu2 %v6194_v15 }
  0xfb   :  { %v949_v48 = vmul.f32 %v779_v26, %v5837_v5  ;;  %v950_v60 = vmul.f32 %v782_v31, %v5837_v5  ;;  %3951 = vmatpush.msrb.mxu3 %v6134_v12  ;;  %4897 = vmatpush.msrb.mxu1 %v6134_v12 }
  0xfc   :  { %v6248_v39 = vpop.eup %5386  ;;  %v6250_v49 = vadd.f32 1e-05, %v948_v16 }
  0xfd   :  { %v5389_v33 = vpop.eup %5388  ;;  %v1520_v35 = vmul.f32 %v6248_v39, %v6221_v32  ;;  %v6255_v54 = vadd.f32 1e-05, %v949_v48  ;;  %v6257_v56 = vadd.f32 1e-05, %v950_v60  ;;  %3953 = vmatpush.msrb.mxu3 %v6154_v34  ;;  %4899 = vmatpush.msrb.mxu1 %v6154_v34  ;;  %vm1526_vm4 = vweird.f32 %v6248_v39 }
  0xfe   :  { %v1080_v42 = vmul.f32 %v5389_v33, %v6225_v37  ;;  %5390 = vrsqrt.f32 %v6250_v49  ;;  %vm1086_vm2 = vweird.f32 %v5389_v33  ;;  %vm1527_vm7 = vmor %vm1525_vm6, %vm1526_vm4  ;;  %vm1535_vm8 = vweird.f32 %v6250_v49 }
  0xff   :  { %v1521_v58 = vmul.f32 %v6248_v39, %v1520_v35  ;;  %5392 = vrsqrt.f32 %v6255_v54  ;;  %3955 = vmatpush.msrb.mxu3 %v6170_v20  ;;  %4901 = vmatpush.msrb.mxu1 %v6170_v20  ;;  %vm1087_vm5 = vmor %vm1085_vm3, %vm1086_vm2  ;;  %vm1545_vm10 = vweird.f32 %v6255_v54  ;;  %vm1555_vm11 = vweird.f32 %v6257_v56 }
 0x100   :  { %v1081_v12 = vmul.f32 %v5389_v33, %v1080_v42  ;;  %5394 = vrsqrt.f32 %v6257_v56 }
 0x101   :  { %v1522_v43 = vmul.f32 0.5, %v1521_v58  ;;  %v644_v18 = vpop.xlane.xlu2 %643  ;;  %3957 = vmatpush.msrb.mxu3 %v6183_v59  ;;  %4903 = vmatpush.msrb.mxu1 %v6183_v59 }
 0x102   :  { %v1082_v50 = vmul.f32 0.5, %v1081_v12  ;;  %v904_v24 = vmul.f32 %v644_v18, %v5837_v5  ;;  %v647_v6 = vpop.xlane.xlu0 %646  ;;  %v650_v11 = vpop.xlane.xlu1 %649 }
 0x103   :  { %v1523_v53 = vsub.f32 1.5, %v1522_v43  ;;  %v905_v34 = vmul.f32 %v647_v6, %v5837_v5  ;;  %v906_v16 = vmul.f32 %v650_v11, %v5837_v5 }
 0x104   :  { %v6277_v15 = vpop.eup %5390  ;;  %v1083_v25 = vsub.f32 1.5, %v1082_v50  ;;  %v6279_v55 = vadd.f32 1e-05, %v904_v24 }
 0x105   :  { %v6281_v30 = vpop.eup %5392  ;;  %v1530_v20 = vmul.f32 %v6277_v15, %v6250_v49  ;;  %v6286_v2 = vadd.f32 1e-05, %v905_v34  ;;  %v1524_v26 = vmul.f32 %v6248_v39, %v1523_v53  ;;  %v6303_v12 = vadd.f32 1e-05, %v906_v16 }
 0x106   :  { %v6288_v36 = vpop.eup %5394  ;;  %v1084_v13 = vmul.f32 %v5389_v33, %v1083_v25  ;;  %v1540_v59 = vmul.f32 %v6281_v30, %v6255_v54  ;;  %5396 = vrsqrt.f32 %v6279_v55  ;;  %vm1536_vm9 = vweird.f32 %v6277_v15 }
 0x107   :  { %v1531_v37 = vmul.f32 %v6277_v15, %v1530_v20  ;;  %v1550_v31 = vmul.f32 %v6288_v36, %v6257_v56  ;;  %5398 = vrsqrt.f32 %v6286_v2  ;;  %v1528_v50 = vsel %vm1527_vm7, %v6248_v39, %v1524_v26  ;;  %vm6350_vm12 = vmor %vm1535_vm8, %vm1536_vm9 }
 0x108   :  { %v1088_v48 = vsel %vm1087_vm5, %v5389_v33, %v1084_v13  ;;  %v1541_v35 = vmul.f32 %v6281_v30, %v1540_v59  ;;  %5400 = vrsqrt.f32 %v6303_v12  ;;  %v2003_v11 = vmul.f32 %v1528_v50, %v5842_v17 }
 0x109   :  { %v1959_v60 = vmul.f32 %v1088_v48, %v5845_v21  ;;  %v785_v42 = vpop.xlane.xlu2 %784  ;;  %v1532_v58 = vmul.f32 0.5, %v1531_v37  ;;  %v1551_v33 = vmul.f32 %v6288_v36, %v1550_v31  ;;  %vm1546_vm13 = vweird.f32 %v6281_v30 }
 0x10a   :  { %v788_v43 = vpop.xlane.xlu0 %787  ;;  %v951_v18 = vmul.f32 %v785_v42, %v5837_v5  ;;  %v1542_v53 = vmul.f32 0.5, %v1541_v35  ;;  %v2192_v42 = vsel %vm103_vm0, %v2003_v11, 0  ;;  %vm1556_vm14 = vweird.f32 %v6288_v36  ;;  %vm6385_vm1 = vmor %vm1545_vm10, %vm1546_vm13 }
 0x10b   :  { %v952_v32 = vmul.f32 %v788_v43, %v5837_v5  ;;  %v2060_v6 = vsel %vm103_vm0, %v1959_v60, 0  ;;  %v1533_v25 = vsub.f32 1.5, %v1532_v58  ;;  %v1552_v13 = vmul.f32 0.5, %v1551_v33  ;;  %vm6402_vm4 = vmor %vm1555_vm11, %vm1556_vm14 }
 0x10c   :  { %v6309_v24 = vpop.eup %5396  ;;  %v6312_v21 = vadd.f32 1e-05, %v951_v18  ;;  %v6324_v16 = vand.u32 4294901760, %v2060_v6  ;;  %v1543_v37 = vsub.f32 1.5, %v1542_v53  ;;  %v6340_v50 = vand.u32 4294901760, %v2192_v42 }
 0x10d   :  { %v1090_v34 = vmul.f32 %v6309_v24, %v6279_v55  ;;  %v6318_v39 = vadd.f32 1e-05, %v952_v32  ;;  %v6321_v20 = vpop.eup %5398  ;;  %v1534_v35 = vmul.f32 %v6277_v15, %v1533_v25  ;;  %v1553_v43 = vsub.f32 1.5, %v1552_v13 }
 0x10e   :  { %5402 = vrsqrt.f32 %v6312_v21  ;;  %v1100_v26 = vmul.f32 %v6321_v20, %v6286_v2  ;;  %3109 = vmatmul.f32.vlgmr.msra.gmra.mxu1 %v6324_v16  ;;  %v6331_v60 = vpop.eup %5400  ;;  %10894 = vst [vmem:[#allocation7_spill] sm:$0xff] %v6340_v50  ;;  %v1544_v13 = vmul.f32 %v6281_v30, %v1543_v37  ;;  %3285 = vmatmul.f32.vlgmr.msra.gmra.mxu3 %v6340_v50  ;;  %vm1095_vm15 = vweird.f32 %v6279_v55 }
 0x10f   :  { %v1091_v59 = vmul.f32 %v6309_v24, %v1090_v34  ;;  %5404 = vrsqrt.f32 %v6318_v39  ;;  %v1110_v18 = vmul.f32 %v6331_v60, %v6303_v12  ;;  %v1554_v62 = vmul.f32 %v6288_v36, %v1553_v43 }
 0x110   :  { %v1101_v32 = vmul.f32 %v6321_v20, %v1100_v26  ;;  %vm1096_vm2 = vweird.f32 %v6309_v24  ;;  %vm1105_vm3 = vweird.f32 %v6286_v2  ;;  %vm1106_vm5 = vweird.f32 %v6321_v20 }
 0x111   :  { %v1092_v31 = vmul.f32 0.5, %v1091_v59  ;;  %v653_v17 = vpop.xlane.xlu2 %652  ;;  %v791_v48 = vpop.xlane.xlu1 %790  ;;  %v1111_v49 = vmul.f32 %v6331_v60, %v1110_v18  ;;  %vm1115_vm6 = vweird.f32 %v6303_v12  ;;  %vm6416_vm7 = vmor %vm1095_vm15, %vm1096_vm2  ;;  %vm1565_vm8 = vweird.f32 %v6312_v21 }
 0x112   :  { %v656_v58 = vpop.xlane.xlu0 %655  ;;  %v907_v53 = vmul.f32 %v653_v17, %v5837_v5  ;;  %v953_v25 = vmul.f32 %v791_v48, %v5837_v5  ;;  %v1538_v17 = vsel %vm6350_vm12, %v6277_v15, %v1534_v35  ;;  %v1102_v11 = vmul.f32 0.5, %v1101_v32  ;;  %vm6469_vm11 = vmor %vm1105_vm3, %vm1106_vm5 }
 0x113   :  { %v908_v34 = vmul.f32 %v656_v58, %v5837_v5  ;;  %v1093_v59 = vsub.f32 1.5, %v1092_v31  ;;  %v6378_v35 = vsub.f32 %v2060_v6, %v6324_v16  ;;  %v2004_v18 = vmul.f32 %v1538_v17, %v5858_v40 }
 0x114   :  { %v6342_v33 = vpop.eup %5402  ;;  %v6363_v48 = vadd.f32 1e-05, %v907_v53  ;;  %v6372_v31 = vadd.f32 1e-05, %v953_v25  ;;  %v1548_v6 = vsel %vm6385_vm1, %v6281_v30, %v1544_v13  ;;  %v1112_v40 = vmul.f32 0.5, %v1111_v49 }
 0x115   :  { %v1560_v26 = vmul.f32 %v6342_v33, %v6312_v21  ;;  %v6365_v58 = vadd.f32 1e-05, %v908_v34  ;;  %v6367_v10 = vpop.eup %5404  ;;  %v1094_v34 = vmul.f32 %v6309_v24, %v1093_v59  ;;  %v1558_v13 = vsel %vm6402_vm4, %v6288_v36, %v1554_v62 }
 0x116   :  { %v1570_v15 = vmul.f32 %v6367_v10, %v6318_v39  ;;  %5406 = vrsqrt.f32 %v6363_v48  ;;  %v1103_v59 = vsub.f32 1.5, %v1102_v11  ;;  %v6422_v17 = vsub.f32 %v2192_v42, %v6340_v50 }
 0x117   :  { %v1561_v37 = vmul.f32 %v6342_v33, %v1560_v26  ;;  %5408 = vrsqrt.f32 %v6365_v58  ;;  %v10495_v26 = vand.u32 4294901760, %v6378_v35  ;;  %v2005_v49 = vmul.f32 %v1548_v6, %v5864_v45 }
 0x118   :  { %v1571_v54 = vmul.f32 %v6367_v10, %v1570_v15  ;;  %5410 = vrsqrt.f32 %v6372_v31  ;;  %10903 = vst [vmem:[#allocation8_spill] sm:$0xff] %v6422_v17  ;;  %v1098_v62 = vsel %vm6416_vm7, %v6309_v24, %v1094_v34  ;;  %v2195_v55 = vsel %vm103_vm0, %v2004_v18, 0 }
 0x119   :  { %v794_v43 = vpop.xlane.xlu2 %793  ;;  %v1562_v30 = vmul.f32 0.5, %v1561_v37  ;;  %v659_v25 = vpop.xlane.xlu1 %658  ;;  %v1113_v15 = vsub.f32 1.5, %v1112_v40  ;;  %v2350_v42 = vsub.f32 %v6378_v35, %v10495_v26  ;;  %v10499_v53 = vand.u32 4294901760, %v6422_v17 }
 0x11a   :  { %v954_v36 = vmul.f32 %v794_v43, %v5837_v5  ;;  %v797_v37 = vpop.xlane.xlu0 %796  ;;  %v1572_v11 = vmul.f32 0.5, %v1571_v54  ;;  %v6438_v6 = vmul.f32 %v1558_v13, %v5861_v41  ;;  %v6440_v34 = vand.u32 4294901760, %v2195_v55 }
 0x11b   :  { %v1563_v24 = vsub.f32 1.5, %v1562_v30  ;;  %v1104_v40 = vmul.f32 %v6321_v20, %v1103_v59  ;;  %vm1116_vm9 = vweird.f32 %v6331_v60  ;;  %vm1575_vm10 = vweird.f32 %v6318_v39 }
 0x11c   :  { %v6435_v45 = vpop.eup %5406  ;;  %10904 = vst [vmem:[#allocation9_spill] sm:$0xff] %v6440_v34  ;;  %v6442_v18 = vadd.f32 1e-05, %v954_v36  ;;  %v955_v32 = vmul.f32 %v797_v37, %v5837_v5  ;;  %v1960_v30 = vmul.f32 %v1098_v62, %v5873_v52  ;;  %v2351_v56 = vand.u32 4294901760, %v2350_v42  ;;  %3289 = vmatmul.f32.gmra.mxu3 %v6440_v34  ;;  %vm6487_vm14 = vmor %vm1115_vm6, %vm1116_vm9 }
 0x11d   :  { %v6444_v43 = vpop.eup %5408  ;;  %v1120_v54 = vmul.f32 %v6435_v45, %v6363_v48  ;;  %v2702_v59 = vsub.f32 %v6422_v17, %v10499_v53  ;;  %v1114_v36 = vmul.f32 %v6331_v60, %v1113_v15  ;;  %v1573_v26 = vsub.f32 1.5, %v1572_v11 }
 0x11e   :  { %v6452_v41 = vpop.eup %5410  ;;  %v1130_v13 = vmul.f32 %v6444_v43, %v6365_v58  ;;  %v1564_v62 = vmul.f32 %v6342_v33, %v1563_v24  ;;  %vm1566_vm12 = vweird.f32 %v6342_v33  ;;  %2352 = vmatmul.f32.vlgmr.msra.gmra.mxu0 %v2351_v56  ;;  %5412 = vrsqrt.f32 %v6442_v18 }
 0x11f   :  { %v1121_v50 = vmul.f32 %v6435_v45, %v1120_v54  ;;  %v1580_v37 = vmul.f32 %v6452_v41, %v6372_v31  ;;  %v2703_v15 = vand.u32 4294901760, %v2702_v59  ;;  %v1108_v42 = vsel %vm6469_vm11, %v6321_v20, %v1104_v40  ;;  %vm6505_vm15 = vmor %vm1565_vm8, %vm1566_vm12 }
 0x120   :  { %vm1576_vm13 = vweird.f32 %v6367_v10  ;;  %v1131_v2 = vmul.f32 %v6444_v43, %v1130_v13  ;;  %v6481_v54 = vadd.f32 1e-05, %v955_v32  ;;  %v909_v59 = vmul.f32 %v659_v25, %v5837_v5 }
 0x121   :  { %v662_v11 = vpop.xlane.xlu2 %661  ;;  %v1581_v56 = vmul.f32 %v6452_v41, %v1580_v37  ;;  %2704 = vmatmul.f32.vlgmr.msra.gmra.mxu2 %v2703_v15  ;;  %v6494_v20 = vsub.f32 %v2195_v55, %v6440_v34  ;;  %v2063_v40 = vsel %vm103_vm0, %v1960_v30, 0  ;;  %v800_v32 = vpop.xlane.xlu1 %799  ;;  %v1118_v13 = vsel %vm6487_vm14, %v6331_v60, %v1114_v36  ;;  %vm6533_vm2 = vmor %vm1575_vm10, %vm1576_vm13 }
 0x122   :  { %v1574_v12 = vmul.f32 %v6367_v10, %v1573_v26  ;;  %v1122_v25 = vmul.f32 0.5, %v1121_v50  ;;  %5414 = vrsqrt.f32 %v6481_v54  ;;  %v1568_v55 = vsel %vm6505_vm15, %v6342_v33, %v1564_v62  ;;  %v665_v36 = vpop.xlane.xlu0 %664 }
 0x123   :  { %10909 = vst [vmem:[#allocation10_spill] sm:$0xff] %v6494_v20  ;;  %v6513_v30 = vadd.f32 1e-05, %v909_v59  ;;  %v10498_v60 = vand.u32 4294901760, %v6494_v20  ;;  %v6516_v26 = vand.u32 4294901760, %v2063_v40  ;;  %v6519_v21 = vmul.f32 %v1108_v42, %v5881_v61 }
 0x124   :  { %vm1125_vm1 = vweird.f32 %v6363_v48  ;;  %v1132_v52 = vmul.f32 0.5, %v1131_v2  ;;  %v2198_v50 = vsel %vm103_vm0, %v2005_v49, 0  ;;  %v910_v15 = vmul.f32 %v662_v11, %v5837_v5  ;;  %v6524_v24 = vpop.eup %5412 }
 0x125   :  { %v6527_v33 = vmul.f32 %v1118_v13, %v5884_v1  ;;  %v1582_v61 = vmul.f32 0.5, %v1581_v56  ;;  %5416 = vrsqrt.f32 %v6513_v30  ;;  %v2710_v49 = vsub.f32 %v6494_v20, %v10498_v60  ;;  %3113 = vmatmul.f32.gmra.mxu1 %v6516_v26 }
 0x126   :  { %v1578_v1 = vsel %vm6533_vm2, %v6367_v10, %v1574_v12  ;;  %v6546_v11 = vmul.f32 %v1568_v55, %v5894_v9  ;;  %v1123_v39 = vsub.f32 1.5, %v1122_v25  ;;  %vm1135_vm3 = vweird.f32 %v6365_v58 }
 0x127   :  { %v1590_v42 = vmul.f32 %v6524_v24, %v6442_v18  ;;  %vm1126_vm4 = vweird.f32 %v6435_v45  ;;  %vm1136_vm5 = vweird.f32 %v6444_v43  ;;  %vm1585_vm6 = vweird.f32 %v6372_v31 }
 0x128   :  { %v2711_v2 = vand.u32 4294901760, %v2710_v49  ;;  %v6554_v56 = vand.u32 4294901760, %v2198_v50  ;;  %v6556_v59 = vpop.eup %5414  ;;  %v1133_v10 = vsub.f32 1.5, %v1132_v52  ;;  %vm1586_vm7 = vweird.f32 %v6452_v41  ;;  %vm6596_vm10 = vmor %vm1125_vm1, %vm1126_vm4 }
 0x129   :  { %v1591_v9 = vmul.f32 %v6524_v24, %v1590_v42  ;;  %v6560_v13 = vadd.f32 1e-05, %v910_v15  ;;  %v6563_v12 = vmul.f32 %v1578_v1, %v5901_v22  ;;  %v1583_v37 = vsub.f32 1.5, %v1582_v61  ;;  %v803_v62 = vpop.xlane.xlu2 %802  ;;  %vm6613_vm12 = vmor %vm1135_vm3, %vm1136_vm5 }
 0x12a   :  { %10914 = vst [vmem:[#allocation11_spill] sm:$0xff] %v6554_v56  ;;  %v1600_v25 = vmul.f32 %v6556_v59, %v6481_v54  ;;  %2712 = vmatmul.f32.gmra.mxu2 %v2711_v2  ;;  %3293 = vmatmul.f32.gmra.mxu3 %v6554_v56  ;;  %v911_v55 = vmul.f32 %v665_v36, %v5837_v5  ;;  %vm1595_vm8 = vweird.f32 %v6442_v18  ;;  %vm1605_vm9 = vweird.f32 %v6481_v54  ;;  %vm6629_vm13 = vmor %vm1585_vm6, %vm1586_vm7 }
 0x12b   :  { %v1124_v52 = vmul.f32 %v6435_v45, %v1123_v39  ;;  %v1592_v49 = vmul.f32 0.5, %v1591_v9  ;;  %5418 = vrsqrt.f32 %v6560_v13  ;;  %v956_v22 = vmul.f32 %v800_v32, %v5837_v5  ;;  %v6573_v15 = vpop.eup %5416  ;;  %v6584_v39 = vpop.xlane.xlu1 %147 }
 0x12c   :  { %v1601_v61 = vmul.f32 %v6556_v59, %v1600_v25  ;;  %v6576_v1 = vadd.f32 1e-05, %v911_v55  ;;  %v6579_v42 = vsub.f32 %v2063_v40, %v6516_v26  ;;  %v6582_v36 = vsub.f32 %v2198_v50, %v6554_v56  ;;  %v286_v55 = vpop.xlane.xlu0 %285 }
 0x12d   :  { %v1134_v2 = vmul.f32 %v6444_v43, %v1133_v10  ;;  %v1593_v9 = vsub.f32 1.5, %v1592_v49  ;;  %v1140_v32 = vmul.f32 %v6573_v15, %v6513_v30  ;;  %v6590_v60 = vadd.f32 1e-05, %v956_v22 }
 0x12e   :  { %10915 = vst [vmem:[#allocation12_spill] sm:$0xff] %v6582_v36  ;;  %v1584_v50 = vmul.f32 %v6452_v41, %v1583_v37  ;;  %v1602_v25 = vmul.f32 0.5, %v1601_v61  ;;  %5420 = vrsqrt.f32 %v6576_v1  ;;  %v10500_v10 = vand.u32 4294901760, %v6579_v42 }
 0x12f   :  { %v1128_v49 = vsel %vm6596_vm10, %v6435_v45, %v1124_v52  ;;  %vm1596_vm11 = vweird.f32 %v6524_v24  ;;  %v1141_v48 = vmul.f32 %v6573_v15, %v1140_v32  ;;  %5422 = vrsqrt.f32 %v6590_v60 }
 0x130   :  { %v1603_v22 = vsub.f32 1.5, %v1602_v25  ;;  %v2358_v61 = vsub.f32 %v6579_v42, %v10500_v10  ;;  %v2066_v52 = vsel %vm103_vm0, %v6519_v21, 0  ;;  %v1594_v40 = vmul.f32 %v6524_v24, %v1593_v9  ;;  %vm6663_vm15 = vmor %vm1595_vm8, %vm1596_vm11 }
 0x131   :  { %v6623_v32 = vpop.eup %5418  ;;  %v1142_v25 = vmul.f32 0.5, %v1141_v48  ;;  %v6634_v53 = vand.u32 4294901760, %v2066_v52  ;;  %v2201_v10 = vsel %vm103_vm0, %v6438_v6, 0  ;;  %v1138_v21 = vsel %vm6613_vm12, %v6444_v43, %v1134_v2 }
 0x132   :  { %v1588_v31 = vsel %vm6629_vm13, %v6452_v41, %v1584_v50  ;;  %vm1606_vm14 = vweird.f32 %v6556_v59  ;;  %v1150_v45 = vmul.f32 %v6623_v32, %v6560_v13  ;;  %v1604_v9 = vmul.f32 %v6556_v59, %v1603_v22  ;;  %v151_v22 = vpop.xlane.xlu2 %150 }
 0x133   :  { %10922 = vst [vmem:[#allocation13_spill] sm:$0xff] %v6634_v53  ;;  %v2359_v48 = vand.u32 4294901760, %v2358_v61  ;;  %v10923_v56 = vand.u32 4294901760, %v6582_v36  ;;  %3117 = vmatmul.f32.gmra.mxu1 %v6634_v53  ;;  %v6652_v37 = vand.u32 4294901760, %v2201_v10  ;;  %v6657_v41 = vmul.f32 %v1128_v49, %v5909_v29  ;;  %vm6688_vm2 = vmor %vm1605_vm9, %vm1606_vm14 }
 0x134   :  { %v6654_v43 = vpop.eup %5420  ;;  %vm1145_vm1 = vweird.f32 %v6513_v30  ;;  %v957_v50 = vmul.f32 %v803_v62, %v5837_v5  ;;  %v6673_v29 = vmul.f32 %v1138_v21, %v5922_v47  ;;  %v1598_v18 = vsel %vm6663_vm15, %v6524_v24, %v1594_v40  ;;  %v806_v2 = vpop.xlane.xlu0 %805 }
 0x135   :  { %v2718_v6 = vsub.f32 %v6582_v36, %v10923_v56  ;;  %10924 = vst [vmem:[#allocation14_spill] sm:$0xff] %v6652_v37  ;;  %v1151_v56 = vmul.f32 %v6623_v32, %v1150_v45  ;;  %v6670_v61 = vpop.eup %5422  ;;  %v1143_v49 = vsub.f32 1.5, %v1142_v25  ;;  %v1160_v58 = vmul.f32 %v6654_v43, %v6576_v1  ;;  %2360 = vmatmul.f32.gmra.mxu0 %v2359_v48  ;;  %v6695_v25 = vpop.xlane.xlu1 %667 }
 0x136   :  { %3297 = vmatmul.f32.gmra.mxu3 %v6652_v37  ;;  %v6682_v45 = vmul.f32 %v1588_v31, %v5917_v46  ;;  %v1610_v24 = vmul.f32 %v6670_v61, %v6590_v60  ;;  %v435_v40 = vmul.f32 %v5837_v5, %v286_v55  ;;  %v1608_v46 = vsel %vm6688_vm2, %v6556_v59, %v1604_v9 }
 0x137   :  { %v2719_v62 = vand.u32 4294901760, %v2718_v6  ;;  %vm1146_vm3 = vweird.f32 %v6573_v15  ;;  %v1161_v54 = vmul.f32 %v6654_v43, %v1160_v58  ;;  %v6702_v21 = vadd.f32 1e-05, %v957_v50 }
 0x138   :  { %v6705_v31 = vmul.f32 %v1598_v18, %v5940_v63  ;;  %v1152_v48 = vmul.f32 0.5, %v1151_v56  ;;  %v1611_v6 = vmul.f32 %v6670_v61, %v1610_v24  ;;  %v389_v55 = vmul.f32 %v5837_v5, %v6584_v39  ;;  %v5562_v63 = vld [vmem:[%s10489_s0 + $0x1e0] sm:$0xff]  ;;  %vm6742_vm6 = vmor %vm1145_vm1, %vm1146_vm3 }
 0x139   :  { %2720 = vmatmul.f32.gmra.mxu2 %v2719_v62  ;;  %v1144_v47 = vmul.f32 %v6573_v15, %v1143_v49  ;;  %v1162_v59 = vmul.f32 0.5, %v1161_v54  ;;  %5424 = vrsqrt.f32 %v6702_v21  ;;  %v6713_v9 = vsub.f32 %v2066_v52, %v6634_v53  ;;  %v5563_v52 = vld [vmem:[%s10489_s0 + $0x70] sm:$0xff] }
 0x13a   :  { %v6716_v50 = vmul.f32 %v1608_v46, %v5943_v3  ;;  %vm1155_vm4 = vweird.f32 %v6560_v13  ;;  %vm1156_vm5 = vweird.f32 %v6623_v32  ;;  %v6723_v39 = vsub.f32 %v5562_v63, %v435_v40 }
 0x13b   :  { %v6726_v56 = vsub.f32 %v2201_v10, %v6652_v37  ;;  %v6731_v18 = vsub.f32 %v5563_v52, %v389_v55  ;;  %v10504_v3 = vand.u32 4294901760, %v6713_v9  ;;  %v2069_v49 = vsel %vm103_vm0, %v6527_v33, 0  ;;  %v671_v55 = vpop.xlane.xlu2 %670  ;;  %vm6797_vm11 = vmor %vm1155_vm4, %vm1156_vm5 }
 0x13c   :  { %v2204_v58 = vsel %vm103_vm0, %v6546_v11, 0  ;;  %v1153_v24 = vsub.f32 1.5, %v1152_v48  ;;  %vm1165_vm7 = vweird.f32 %v6576_v1  ;;  %v1612_v62 = vmul.f32 0.5, %v1611_v6 }
 0x13d   :  { %10929 = vst [vmem:[#allocation15_spill] sm:$0xff] %v6726_v56  ;;  %v10503_v40 = vand.u32 4294901760, %v6726_v56  ;;  %v6748_v46 = vand.u32 4294901760, %v2069_v49  ;;  %v1148_v33 = vsel %vm6742_vm6, %v6573_v15, %v1144_v47  ;;  %v1163_v11 = vsub.f32 1.5, %v1162_v59  ;;  %v289_v37 = vpop.xlane.xlu1 %288 }
 0x13e   :  { %v2366_v30 = vsub.f32 %v6713_v9, %v10504_v3  ;;  %v6756_v54 = vand.u32 4294901760, %v2204_v58  ;;  %vm1166_vm8 = vweird.f32 %v6654_v43  ;;  %v390_v6 = vmul.f32 %v5837_v5, %v151_v22 }
 0x13f   :  { %10932 = vst [vmem:[#allocation16_spill] sm:$0xff] %v6748_v46  ;;  %v2726_v48 = vsub.f32 %v6726_v56, %v10503_v40  ;;  %3121 = vmatmul.f32.gmra.mxu1 %v6748_v46  ;;  %v611_v15 = vmul.f32 %v6723_v39, %v6723_v39  ;;  %v6766_v47 = vpop.eup %5424  ;;  %vm1616_vm9 = vweird.f32 %v6670_v61  ;;  %v958_v63 = vmul.f32 %v806_v2, %v5837_v5  ;;  %v5564_v2 = vld [vmem:[%s10489_s0 + $0x78] sm:$0xff]  ;;  %vm6826_vm12 = vmor %vm1165_vm7, %vm1166_vm8 }
 0x140   :  { %10933 = vst [vmem:[#allocation17_spill] sm:$0xff] %v6756_v54  ;;  %v2367_v59 = vand.u32 4294901760, %v2366_v30  ;;  %3301 = vmatmul.f32.gmra.mxu3 %v6756_v54  ;;  %v565_v52 = vmul.f32 %v6731_v18, %v6731_v18  ;;  %v6774_v10 = vmul.f32 %v1148_v33, %v5925_v51  ;;  %v1154_v22 = vmul.f32 %v6623_v32, %v1153_v24 }
 0x141   :  { %v1613_v40 = vsub.f32 1.5, %v1612_v62  ;;  %v1620_v3 = vmul.f32 %v6766_v47, %v6702_v21  ;;  %v1164_v56 = vmul.f32 %v6654_v43, %v1163_v11  ;;  %vm1615_vm10 = vweird.f32 %v6590_v60 }
 0x142   :  { %2368 = vmatmul.f32.gmra.mxu0 %v2367_v59  ;;  %v2727_v30 = vand.u32 4294901760, %v2726_v48  ;;  %v6784_v34 = vsub.f32 %v5564_v2, %v390_v6  ;;  %v819_v51 = vsel %vm103_vm0, %v611_v15, 0.0  ;;  %v6788_v62 = vadd.f32 1e-05, %v958_v63  ;;  %v154_v59 = vpop.xlane.xlu0 %153  ;;  %vm6881_vm14 = vmor %vm1615_vm10, %vm1616_vm9 }
 0x143   :  { %v1621_v24 = vmul.f32 %v6766_v47, %v1620_v3  ;;  %820 = vadd.xlane.f32.xlu2 %v819_v51  ;;  %v681_v33 = vsel %vm103_vm0, %v565_v52, 0.0  ;;  %v912_v11 = vmul.f32 %v6695_v25, %v5837_v5  ;;  %v6802_v3 = vsub.f32 %v2069_v49, %v6748_v46  ;;  %v6820_v49 = vld [vmem:[%s10489_s0 + $0xa8] sm:$0xff] }
 0x144   :  { %2728 = vmatmul.f32.gmra.mxu2 %v2727_v30  ;;  %682 = vadd.xlane.f32.xlu0 %v681_v33  ;;  %v6805_v6 = vsub.f32 %v2204_v58, %v6756_v54  ;;  %v2072_v25 = vsel %vm103_vm0, %v6657_v41, 0  ;;  %v2207_v15 = vsel %vm103_vm0, %v6563_v12, 0  ;;  %v1158_v13 = vsel %vm6797_vm11, %v6623_v32, %v1154_v22  ;;  %v6839_v30 = vld [vmem:[%s10489_s0 + $0x210] sm:$0xff] }
 0x145   :  { %10936 = vst [vmem:[#allocation18_spill] sm:$0xff] %v6802_v3  ;;  %v1622_v63 = vmul.f32 0.5, %v1621_v24  ;;  %5426 = vrsqrt.f32 %v6788_v62  ;;  %v6815_v52 = vadd.f32 1e-05, %v912_v11  ;;  %v10512_v32 = vand.u32 4294901760, %v6802_v3 }
 0x146   :  { %10937 = vst [vmem:[#allocation19_spill] sm:$0xff] %v6805_v6  ;;  %v10511_v41 = vand.u32 4294901760, %v6805_v6  ;;  %v6832_v58 = vand.u32 4294901760, %v2072_v25  ;;  %v6834_v22 = vand.u32 4294901760, %v2207_v15  ;;  %v1168_v1 = vsel %vm6826_vm12, %v6654_v43, %v1164_v56 }
 0x147   :  { %v6845_v2 = vmul.f32 %v6670_v61, %v1613_v40  ;;  %5428 = vrsqrt.f32 %v6815_v52  ;;  %v566_v51 = vmul.f32 %v6784_v34, %v6784_v34  ;;  %v2374_v24 = vsub.f32 %v6802_v3, %v10512_v32 }
 0x148   :  { %10940 = vst [vmem:[#allocation20_spill] sm:$0xff] %v6832_v58  ;;  %v2734_v33 = vsub.f32 %v6805_v6, %v10511_v41  ;;  %3125 = vmatmul.f32.gmra.mxu1 %v6832_v58  ;;  %3305 = vmatmul.f32.gmra.mxu3 %v6834_v22  ;;  %v913_v43 = vmul.f32 %v671_v55, %v5837_v5  ;;  %v167_v56 = vsel %vm103_vm0, %v6820_v49, 0.0  ;;  %v1623_v40 = vsub.f32 1.5, %v1622_v63  ;;  %v292_v41 = vpop.xlane.xlu2 %291 }
 0x149   :  { %10941 = vst [vmem:[#allocation21_spill] sm:$0xff] %v6834_v22  ;;  %vm1625_vm13 = vweird.f32 %v6702_v21  ;;  %v684_v11 = vsel %vm103_vm0, %v566_v51, 0.0  ;;  %v391_v48 = vmul.f32 %v5837_v5, %v154_v59  ;;  %v302_v12 = vsel %vm103_vm0, %v6839_v30, 0.0 }
 0x14a   :  { %v2375_v32 = vand.u32 4294901760, %v2374_v24  ;;  %v2735_v54 = vand.u32 4294901760, %v2734_v33  ;;  %685 = vadd.xlane.f32.xlu1 %v684_v11  ;;  %v6866_v6 = vadd.f32 1e-05, %v913_v43  ;;  %v436_v55 = vmul.f32 %v5837_v5, %v289_v37 }
 0x14b   :  { %v6869_v36 = vpop.eup %5426  ;;  %v6872_v63 = vmul.f32 %v1158_v13, %v5960_v14  ;;  %v6875_v51 = vmul.f32 %v1168_v1, %v5963_v27  ;;  %168 = vadd.xlane.f32.xlu2 %v167_v56  ;;  %v6886_v24 = vsub.f32 %v2072_v25, %v6832_v58  ;;  %v6889_v37 = vsub.f32 %v2207_v15, %v6834_v22  ;;  %v809_v14 = vpop.xlane.xlu1 %808  ;;  %v5565_v13 = vld [vmem:[%s10489_s0 + $0x80] sm:$0xff]  ;;  %v5566_v56 = vld [vmem:[%s10489_s0 + $0x1e8] sm:$0xff] }
 0x14c   :  { %v1618_v27 = vsel %vm6881_vm14, %v6670_v61, %v6845_v2  ;;  %vm1626_vm15 = vweird.f32 %v6766_v47  ;;  %v1630_v60 = vmul.f32 %v6869_v36, %v6788_v62  ;;  %2376 = vmatmul.f32.gmra.mxu0 %v2375_v32  ;;  %2736 = vmatmul.f32.gmra.mxu2 %v2735_v54  ;;  %5430 = vrsqrt.f32 %v6866_v6  ;;  %v6914_v54 = vld [vmem:[%s10489_s0 + $0x218] sm:$0xff]  ;;  %v674_v32 = vpop.xlane.xlu0 %673 }
 0x14d   :  { %10944 = vst [vmem:[#allocation22_spill] sm:$0xff] %v6886_v24  ;;  %v6899_v25 = vpop.eup %5428  ;;  %v6902_v15 = vmul.f32 %v6766_v47, %v1623_v40  ;;  %v6907_v1 = vsub.f32 %v5565_v13, %v391_v48  ;;  %303 = vadd.xlane.f32.xlu0 %v302_v12  ;;  %v10523_v61 = vand.u32 4294901760, %v6886_v24  ;;  %v10524_v2 = vand.u32 4294901760, %v6889_v37  ;;  %vm6951_vm1 = vmor %vm1625_vm13, %vm1626_vm15 }
 0x14e   :  { %10945 = vst [vmem:[#allocation23_spill] sm:$0xff] %v6889_v37  ;;  %v1631_v33 = vmul.f32 %v6869_v36, %v1630_v60  ;;  %v1170_v43 = vmul.f32 %v6899_v25, %v6815_v52  ;;  %v6922_v40 = vsub.f32 %v5566_v56, %v436_v55  ;;  %v2075_v11 = vsel %vm103_vm0, %v6673_v29, 0 }
 0x14f   :  { %v2382_v48 = vsub.f32 %v6886_v24, %v10523_v61  ;;  %v2742_v12 = vsub.f32 %v6889_v37, %v10524_v2  ;;  %v6932_v59 = vand.u32 4294901760, %v2075_v11  ;;  %v2210_v60 = vsel %vm103_vm0, %v6682_v45, 0 }
 0x150   :  { %v1632_v13 = vmul.f32 0.5, %v1631_v33  ;;  %v1171_v55 = vmul.f32 %v6899_v25, %v1170_v43  ;;  %v6937_v56 = vand.u32 4294901760, %v2210_v60  ;;  %v305_v29 = vsel %vm103_vm0, %v6914_v54, 0.0 }
 0x151   :  { %10946 = vst [vmem:[#allocation24_spill] sm:$0xff] %v6932_v59  ;;  %v2383_v22 = vand.u32 4294901760, %v2382_v48  ;;  %v2743_v20 = vand.u32 4294901760, %v2742_v12  ;;  %3129 = vmatmul.f32.gmra.mxu1 %v6932_v59  ;;  %v437_v61 = vmul.f32 %v5837_v5, %v292_v41  ;;  %v567_v2 = vmul.f32 %v6907_v1, %v6907_v1 }
 0x152   :  { %10947 = vst [vmem:[#allocation25_spill] sm:$0xff] %v6937_v56  ;;  %v6945_v37 = vpop.eup %5430  ;;  %v1633_v33 = vsub.f32 1.5, %v1632_v13  ;;  %v1172_v43 = vmul.f32 0.5, %v1171_v55  ;;  %3309 = vmatmul.f32.gmra.mxu3 %v6937_v56  ;;  %306 = vadd.xlane.f32.xlu1 %v305_v29  ;;  %v914_v41 = vmul.f32 %v674_v32, %v5837_v5  ;;  %v612_v48 = vmul.f32 %v6922_v40, %v6922_v40  ;;  %v812_v55 = vpop.xlane.xlu2 %811 }
 0x153   :  { %v1628_v12 = vsel %vm6951_vm1, %v6766_v47, %v6902_v15  ;;  %vm1636_vm2 = vweird.f32 %v6869_v36  ;;  %v1180_v21 = vmul.f32 %v6945_v37, %v6866_v6  ;;  %v687_v13 = vsel %vm103_vm0, %v567_v2, 0.0 }
 0x154   :  { %v1634_v29 = vmul.f32 %v6869_v36, %v1633_v33  ;;  %v1173_v17 = vsub.f32 1.5, %v1172_v43  ;;  %2384 = vmatmul.f32.gmra.mxu0 %v2383_v22  ;;  %2744 = vmatmul.f32.gmra.mxu2 %v2743_v20  ;;  %v6968_v32 = vadd.f32 1e-05, %v914_v41  ;;  %v822_v58 = vsel %vm103_vm0, %v612_v48, 0.0  ;;  %v157_v33 = vpop.xlane.xlu1 %156  ;;  %v5567_v20 = vld [vmem:[%s10489_s0 + $0x1f0] sm:$0xff]  ;;  %v7011_v48 = vld [vmem:[%s10489_s0 + $0x220] sm:$0xff] }
 0x155   :  { %v1181_v45 = vmul.f32 %v6945_v37, %v1180_v21  ;;  %688 = vadd.xlane.f32.xlu2 %v687_v13  ;;  %823 = vadd.xlane.f32.xlu0 %v822_v58  ;;  %v959_v47 = vmul.f32 %v809_v14, %v5837_v5  ;;  %v6974_v15 = vsub.f32 %v2075_v11, %v6932_v59  ;;  %v2078_v2 = vsel %vm103_vm0, %v6774_v10, 0  ;;  %v295_v11 = vpop.xlane.xlu0 %294 }
 0x156   :  { %v6979_v22 = vmul.f32 %v1618_v27, %v5946_v4  ;;  %vm1635_vm3 = vweird.f32 %v6788_v62  ;;  %v6985_v43 = vsub.f32 %v5567_v20, %v437_v61  ;;  %5432 = vrsqrt.f32 %v6968_v32 }
 0x157   :  { %10950 = vst [vmem:[#allocation26_spill] sm:$0xff] %v6974_v15  ;;  %vm1175_vm4 = vweird.f32 %v6815_v52  ;;  %v1182_v58 = vmul.f32 0.5, %v1181_v45  ;;  %v6989_v14 = vadd.f32 1e-05, %v959_v47  ;;  %v10531_v10 = vand.u32 4294901760, %v6974_v15  ;;  %vm6997_vm5 = vmor %vm1635_vm3, %vm1636_vm2 }
 0x158   :  { %v6993_v4 = vmul.f32 %v1628_v12, %v5979_v7  ;;  %v7002_v27 = vsub.f32 %v2210_v60, %v6937_v56  ;;  %v7004_v61 = vand.u32 4294901760, %v2078_v2  ;;  %v2213_v41 = vsel %vm103_vm0, %v6705_v31, 0  ;;  %v7024_v31 = vld [vmem:[%s10489_s0 + $0xb0] sm:$0xff] }
 0x159   :  { %v1638_v7 = vsel %vm6997_vm5, %v6869_v36, %v1634_v29  ;;  %v7017_v12 = vmul.f32 %v6899_v25, %v1173_v17  ;;  %vm1176_vm6 = vweird.f32 %v6899_v25  ;;  %5434 = vrsqrt.f32 %v6989_v14 }
 0x15a   :  { %10953 = vst [vmem:[#allocation27_spill] sm:$0xff] %v7002_v27  ;;  %v2390_v60 = vsub.f32 %v6974_v15, %v10531_v10  ;;  %v10534_v21 = vand.u32 4294901760, %v7002_v27  ;;  %3133 = vmatmul.f32.gmra.mxu1 %v7004_v61  ;;  %v7031_v36 = vand.u32 4294901760, %v2213_v41  ;;  %v613_v17 = vmul.f32 %v6985_v43, %v6985_v43  ;;  %vm7052_vm7 = vmor %vm1175_vm4, %vm1176_vm6 }
 0x15b   :  { %10954 = vst [vmem:[#allocation28_spill] sm:$0xff] %v7004_v61  ;;  %v1183_v13 = vsub.f32 1.5, %v1182_v58  ;;  %v960_v29 = vmul.f32 %v812_v55, %v5837_v5  ;;  %v308_v45 = vsel %vm103_vm0, %v7011_v48, 0.0  ;;  %v438_v47 = vmul.f32 %v5837_v5, %v295_v11 }
 0x15c   :  { %10955 = vst [vmem:[#allocation29_spill] sm:$0xff] %v7031_v36  ;;  %v7039_v20 = vpop.eup %5432  ;;  %v2391_v62 = vand.u32 4294901760, %v2390_v60  ;;  %v2750_v10 = vsub.f32 %v7002_v27, %v10534_v21  ;;  %3313 = vmatmul.f32.gmra.mxu3 %v7031_v36  ;;  %v825_v56 = vsel %vm103_vm0, %v613_v17, 0.0  ;;  %v170_v58 = vsel %vm103_vm0, %v7024_v31, 0.0  ;;  %v160_v17 = vpop.xlane.xlu2 %159 }
 0x15d   :  { %vm1185_vm8 = vweird.f32 %v6866_v6  ;;  %vm1186_vm9 = vweird.f32 %v6945_v37  ;;  %v1190_v11 = vmul.f32 %v7039_v20, %v6968_v32  ;;  %826 = vadd.xlane.f32.xlu1 %v825_v56  ;;  %v7060_v60 = vadd.f32 1e-05, %v960_v29  ;;  %309 = vadd.xlane.f32.xlu2 %v308_v45  ;;  %v677_v45 = vpop.xlane.xlu1 %676 }
 0x15e   :  { %v7063_v21 = vmul.f32 %v1638_v7, %v5992_v57  ;;  %vm1195_vm10 = vweird.f32 %v6968_v32  ;;  %2392 = vmatmul.f32.gmra.mxu0 %v2391_v62  ;;  %v2751_v27 = vand.u32 4294901760, %v2750_v10  ;;  %171 = vadd.xlane.f32.xlu0 %v170_v58  ;;  %v392_v59 = vmul.f32 %v5837_v5, %v157_v33  ;;  %v5568_v33 = vld [vmem:[%s10489_s0 + $0x1f8] sm:$0xff]  ;;  %vm7110_vm11 = vmor %vm1185_vm8, %vm1186_vm9 }
 0x15f   :  { %v7071_v56 = vpop.eup %5434  ;;  %v7074_v29 = vmul.f32 %v6945_v37, %v1183_v13  ;;  %v1191_v57 = vmul.f32 %v7039_v20, %v1190_v11  ;;  %5436 = vrsqrt.f32 %v7060_v60  ;;  %v7079_v7 = vsub.f32 %v2078_v2, %v7004_v61  ;;  %v5569_v13 = vld [vmem:[%s10489_s0 + $0x88] sm:$0xff]  ;;  %v7099_v11 = vld [vmem:[%s10489_s0 + $0xb8] sm:$0xff]  ;;  %v815_v61 = vpop.xlane.xlu0 %814 }
 0x160   :  { %v1640_v62 = vmul.f32 %v7071_v56, %v6989_v14  ;;  %2752 = vmatmul.f32.gmra.mxu2 %v2751_v27  ;;  %v7086_v10 = vsub.f32 %v5568_v33, %v438_v47  ;;  %v7091_v58 = vsub.f32 %v5569_v13, %v392_v59  ;;  %v7094_v2 = vsub.f32 %v2213_v41, %v7031_v36 }
 0x161   :  { %10958 = vst [vmem:[#allocation30_spill] sm:$0xff] %v7079_v7  ;;  %v1192_v27 = vmul.f32 0.5, %v1191_v57  ;;  %v2081_v47 = vsel %vm103_vm0, %v6872_v63, 0  ;;  %v2216_v33 = vsel %vm103_vm0, %v6716_v50, 0  ;;  %v10964_v50 = vand.u32 4294901760, %v7079_v7 }
 0x162   :  { %10959 = vst [vmem:[#allocation31_spill] sm:$0xff] %v7094_v2  ;;  %v1641_v41 = vmul.f32 %v7071_v56, %v1640_v62  ;;  %v10549_v57 = vand.u32 4294901760, %v7094_v2  ;;  %v7116_v13 = vand.u32 4294901760, %v2081_v47  ;;  %v7118_v52 = vand.u32 4294901760, %v2216_v33 }
 0x163   :  { %v1193_v63 = vsub.f32 1.5, %v1192_v27  ;;  %v2398_v36 = vsub.f32 %v7079_v7, %v10964_v50  ;;  %v173_v6 = vsel %vm103_vm0, %v7099_v11, 0.0  ;;  %v393_v15 = vmul.f32 %v5837_v5, %v160_v17 }
 0x164   :  { %10962 = vst [vmem:[#allocation32_spill] sm:$0xff] %v7116_v13  ;;  %v1642_v46 = vmul.f32 0.5, %v1641_v41  ;;  %v2758_v62 = vsub.f32 %v7094_v2, %v10549_v57  ;;  %3137 = vmatmul.f32.gmra.mxu1 %v7116_v13  ;;  %3317 = vmatmul.f32.gmra.mxu3 %v7118_v52  ;;  %v614_v27 = vmul.f32 %v7086_v10, %v7086_v10  ;;  %vm1645_vm12 = vweird.f32 %v6989_v14 }
 0x165   :  { %10963 = vst [vmem:[#allocation33_spill] sm:$0xff] %v7118_v52  ;;  %v961_v24 = vmul.f32 %v815_v61, %v5837_v5  ;;  %v7134_v50 = vpop.eup %5436  ;;  %v1188_v17 = vsel %vm7110_vm11, %v6945_v37, %v7074_v29  ;;  %v2399_v41 = vand.u32 4294901760, %v2398_v36  ;;  %174 = vadd.xlane.f32.xlu1 %v173_v6  ;;  %v568_v57 = vmul.f32 %v7091_v58, %v7091_v58  ;;  %v680_v29 = vpop.xlane.xlu2 %679 }
 0x166   :  { %vm1196_vm13 = vweird.f32 %v7039_v20  ;;  %v1643_v2 = vsub.f32 1.5, %v1642_v46  ;;  %v1650_v61 = vmul.f32 %v7134_v50, %v7060_v60  ;;  %v2759_v7 = vand.u32 4294901760, %v2758_v62  ;;  %v5570_v46 = vld [vmem:[%s10489_s0 + $0x90] sm:$0xff]  ;;  %v298_v55 = vpop.xlane.xlu1 %297 }
 0x167   :  { %vm1646_vm14 = vweird.f32 %v7071_v56  ;;  %2400 = vmatmul.f32.gmra.mxu0 %v2399_v41  ;;  %v828_v59 = vsel %vm103_vm0, %v614_v27, 0.0  ;;  %v7148_v37 = vadd.f32 1e-05, %v961_v24  ;;  %v690_v36 = vsel %vm103_vm0, %v568_v57, 0.0  ;;  %vm7170_vm15 = vmor %vm1195_vm10, %vm1196_vm13 }
 0x168   :  { %v1194_v6 = vmul.f32 %v7039_v20, %v1193_v63  ;;  %v1651_v53 = vmul.f32 %v7134_v50, %v1650_v61  ;;  %2760 = vmatmul.f32.gmra.mxu2 %v2759_v7  ;;  %v7156_v62 = vsub.f32 %v5570_v46, %v393_v15  ;;  %829 = vadd.xlane.f32.xlu2 %v828_v59  ;;  %v2084_v27 = vsel %vm103_vm0, %v6875_v51, 0  ;;  %vm7192_vm1 = vmor %vm1645_vm12, %vm1646_vm14  ;;  %v163_v61 = vpop.xlane.xlu0 %162 }
 0x169   :  { %v10965_v24 = vsel %vm7052_vm7, %v6899_v25, %v7017_v12  ;;  %5438 = vrsqrt.f32 %v7148_v37  ;;  %691 = vadd.xlane.f32.xlu0 %v690_v36  ;;  %v915_v51 = vmul.f32 %v677_v45, %v5837_v5  ;;  %v7177_v15 = vsub.f32 %v2081_v47, %v7116_v13 }
 0x16a   :  { %v1968_v57 = vmul.f32 %v10965_v24, %v5985_v8  ;;  %v1644_v25 = vmul.f32 %v7071_v56, %v1643_v2  ;;  %v1652_v8 = vmul.f32 0.5, %v1651_v53  ;;  %v7181_v12 = vsub.f32 %v2216_v33, %v7118_v52 }
 0x16b   :  { %10968 = vst [vmem:[#allocation34_spill] sm:$0xff] %v7177_v15  ;;  %v7183_v32 = vand.u32 4294901760, %v2084_v27  ;;  %v7186_v63 = vmul.f32 %v1188_v17, %v6004_v44  ;;  %v7196_v47 = vadd.f32 1e-05, %v915_v51  ;;  %v10557_v53 = vand.u32 4294901760, %v7177_v15  ;;  %v7204_v44 = vld [vmem:[%s10489_s0 + $0xc0] sm:$0xff] }
 0x16c   :  { %10969 = vst [vmem:[#allocation35_spill] sm:$0xff] %v7181_v12  ;;  %v2219_v2 = vsel %vm103_vm0, %v6979_v22, 0  ;;  %v1198_v14 = vsel %vm7170_vm15, %v7039_v20, %v1194_v6  ;;  %v10556_v33 = vand.u32 4294901760, %v7181_v12  ;;  %v569_v41 = vmul.f32 %v7156_v62, %v7156_v62  ;;  %v7218_v22 = vld [vmem:[%s10489_s0 + $0x228] sm:$0xff] }
 0x16d   :  { %10970 = vst [vmem:[#allocation36_spill] sm:$0xff] %v7183_v32  ;;  %3141 = vmatmul.f32.gmra.mxu1 %v7183_v32  ;;  %v7211_v17 = vand.u32 4294901760, %v2219_v2  ;;  %v1653_v59 = vsub.f32 1.5, %v1652_v8  ;;  %5440 = vrsqrt.f32 %v7196_v47  ;;  %v2406_v20 = vsub.f32 %v7177_v15, %v10557_v53 }
 0x16e   :  { %v916_v36 = vmul.f32 %v680_v29, %v5837_v5  ;;  %v1648_v6 = vsel %vm7192_vm1, %v7071_v56, %v1644_v25  ;;  %v2766_v46 = vsub.f32 %v7181_v12, %v10556_v33  ;;  %v693_v24 = vsel %vm103_vm0, %v569_v41, 0.0 }
 0x16f   :  { %10973 = vst [vmem:[#allocation37_spill] sm:$0xff] %v7211_v17  ;;  %3321 = vmatmul.f32.gmra.mxu3 %v7211_v17  ;;  %v176_v7 = vsel %vm103_vm0, %v7204_v44, 0.0  ;;  %v7235_v51 = vpop.eup %5438  ;;  %v2407_v8 = vand.u32 4294901760, %v2406_v20  ;;  %694 = vadd.xlane.f32.xlu1 %v693_v24  ;;  %v394_v45 = vmul.f32 %v5837_v5, %v163_v61  ;;  %v311_v56 = vsel %vm103_vm0, %v7218_v22, 0.0 }
 0x170   :  { %v7237_v29 = vadd.f32 1e-05, %v916_v36  ;;  %vm1655_vm2 = vweird.f32 %v7060_v60  ;;  %vm1656_vm3 = vweird.f32 %v7134_v50  ;;  %v1660_v25 = vmul.f32 %v7235_v51, %v7148_v37  ;;  %177 = vadd.xlane.f32.xlu2 %v176_v7  ;;  %v7259_v36 = vld [vmem:[%s10489_s0 + $0x230] sm:$0xff]  ;;  %v5572_v60 = vld [vmem:[%s10489_s0 + $0x200] sm:$0xff] }
 0x171   :  { %v2767_v41 = vand.u32 4294901760, %v2766_v46  ;;  %v7247_v33 = vmul.f32 %v1198_v14, %v6026_v0  ;;  %v7250_v20 = vmul.f32 %v1648_v6, %v6020_v23  ;;  %v7253_v61 = vmul.f32 %v7134_v50, %v1653_v59  ;;  %2408 = vmatmul.f32.gmra.mxu0 %v2407_v8  ;;  %312 = vadd.xlane.f32.xlu0 %v311_v56  ;;  %v301_v46 = vpop.xlane.xlu2 %300  ;;  %v5571_v0 = vld [vmem:[%s10489_s0 + $0x98] sm:$0xff]  ;;  %vm7279_vm4 = vmor %vm1655_vm2, %vm1656_vm3 }
 0x172   :  { %5442 = vrsqrt.f32 %v7237_v29  ;;  %v7264_v23 = vsub.f32 %v5571_v0, %v394_v45  ;;  %v439_v14 = vmul.f32 %v5837_v5, %v298_v55  ;;  %v7268_v59 = vsub.f32 %v2084_v27, %v7183_v32 }
 0x173   :  { %2768 = vmatmul.f32.gmra.mxu2 %v2767_v41  ;;  %v7271_v6 = vsub.f32 %v2219_v2, %v7211_v17  ;;  %v7273_v24 = vpop.eup %5440  ;;  %v1661_v8 = vmul.f32 %v7235_v51, %v1660_v25  ;;  %vm1205_vm5 = vweird.f32 %v7196_v47  ;;  %v2087_v27 = vsel %vm103_vm0, %v1968_v57, 0  ;;  %v818_v2 = vpop.xlane.xlu1 %817 }
 0x174   :  { %10974 = vst [vmem:[#allocation38_spill] sm:$0xff] %v7268_v59  ;;  %v2222_v55 = vsel %vm103_vm0, %v6993_v4, 0  ;;  %v1200_v45 = vmul.f32 %v7273_v24, %v7196_v47  ;;  %v7293_v56 = vsub.f32 %v5572_v60, %v439_v14  ;;  %v314_v25 = vsel %vm103_vm0, %v7259_v36, 0.0 }
 0x175   :  { %10975 = vst [vmem:[#allocation39_spill] sm:$0xff] %v7271_v6  ;;  %v440_v41 = vmul.f32 %v5837_v5, %v301_v46  ;;  %v7300_v4 = vand.u32 4294901760, %v2087_v27  ;;  %v7302_v53 = vand.u32 4294901760, %v2222_v55  ;;  %vm1215_vm6 = vweird.f32 %v7237_v29 }
 0x176   :  { %v1201_v14 = vmul.f32 %v7273_v24, %v1200_v45  ;;  %v570_v46 = vmul.f32 %v7264_v23, %v7264_v23  ;;  %v7314_v57 = vmul.f32 0.5, %v1661_v8  ;;  %v10979_v0 = vand.u32 4294901760, %v7268_v59 }
 0x177   :  { %10978 = vst [vmem:[#allocation40_spill] sm:$0xff] %v7302_v53  ;;  %v10980_v12 = vand.u32 4294901760, %v7271_v6  ;;  %3145 = vmatmul.f32.gmra.mxu1 %v7300_v4  ;;  %3325 = vmatmul.f32.gmra.mxu3 %v7302_v53  ;;  %v615_v45 = vmul.f32 %v7293_v56, %v7293_v56  ;;  %vm1665_vm7 = vweird.f32 %v7148_v37  ;;  %vm1666_vm8 = vweird.f32 %v7235_v51 }
 0x178   :  { %v7312_v60 = vpop.eup %5442  ;;  %v2414_v52 = vsub.f32 %v7268_v59, %v10979_v0  ;;  %v1202_v17 = vmul.f32 0.5, %v1201_v14  ;;  %315 = vadd.xlane.f32.xlu1 %v314_v25  ;;  %v5573_v0 = vld [vmem:[%s10489_s0 + $0x208] sm:$0xff]  ;;  %v696_v14 = vsel %vm103_vm0, %v570_v46, 0.0  ;;  %vm1206_vm9 = vweird.f32 %v7273_v24  ;;  %vm7436_vm13 = vmor %vm1665_vm7, %vm1666_vm8 }
 0x179   :  { %v2774_v32 = vsub.f32 %v7271_v6, %v10980_v12  ;;  %v1210_v8 = vmul.f32 %v7312_v60, %v7237_v29  ;;  %v7331_v13 = vsub.f32 %v5573_v0, %v440_v41  ;;  %v2090_v12 = vsel %vm103_vm0, %v7186_v63, 0  ;;  %697 = vadd.xlane.f32.xlu2 %v696_v14  ;;  %vm1207_vm10 = vmor %vm1205_vm5, %vm1206_vm9 }
 0x17a   :  { %v2415_v6 = vand.u32 4294901760, %v2414_v52  ;;  %v831_v15 = vsel %vm103_vm0, %v615_v45, 0.0  ;;  %v1203_v25 = vsub.f32 1.5, %v1202_v17  ;;  %v962_v41 = vmul.f32 %v818_v2, %v5837_v5 }
 0x17b   :  { %v2775_v59 = vand.u32 4294901760, %v2774_v32  ;;  %v1211_v3 = vmul.f32 %v7312_v60, %v1210_v8  ;;  %832 = vadd.xlane.f32.xlu0 %v831_v15  ;;  %v1663_v63 = vsub.f32 1.5, %v7314_v57  ;;  %v7344_v52 = vsub.f32 %v2087_v27, %v7300_v4  ;;  %v166_v47 = vpop.xlane.xlu1 %165 }
 0x17c   :  { %2416 = vmatmul.f32.gmra.mxu0 %v2415_v6  ;;  %v7347_v32 = vsub.f32 %v2222_v55, %v7302_v53  ;;  %v7349_v46 = vand.u32 4294901760, %v2090_v12  ;;  %v1204_v17 = vmul.f32 %v7273_v24, %v1203_v25  ;;  %v7352_v8 = vadd.f32 1e-05, %v962_v41 }
 0x17d   :  { %2776 = vmatmul.f32.gmra.mxu2 %v2775_v59  ;;  %v1212_v45 = vmul.f32 0.5, %v1211_v3  ;;  %v2225_v15 = vsel %vm103_vm0, %v7063_v21, 0  ;;  %v10577_v59 = vand.u32 4294901760, %v7344_v52  ;;  %v616_v55 = vmul.f32 %v7331_v13, %v7331_v13  ;;  %v7369_v3 = vld [vmem:[%s10489_s0 + $0x238] sm:$0xff]  ;;  %v7374_v21 = vld [vmem:[%s10489_s0 + $0xc8] sm:$0xff] }
 0x17e   :  { %10981 = vst [vmem:[#allocation41_spill] sm:$0xff] %v7347_v32  ;;  %v10576_v6 = vand.u32 4294901760, %v7347_v32  ;;  %v7362_v27 = vand.u32 4294901760, %v2225_v15  ;;  %v1208_v2 = vsel %vm1207_vm10, %v7273_v24, %v1204_v17  ;;  %vm1216_vm11 = vweird.f32 %v7312_v60 }
 0x17f   :  { %10982 = vst [vmem:[#allocation42_spill] sm:$0xff] %v7349_v46  ;;  %v1213_v57 = vsub.f32 1.5, %v1212_v45  ;;  %5444 = vrsqrt.f32 %v7352_v8  ;;  %v1971_v0 = vmul.f32 %v1208_v2, %v6053_v19  ;;  %v2422_v14 = vsub.f32 %v7344_v52, %v10577_v59  ;;  %3149 = vmatmul.f32.gmra.mxu1 %v7349_v46  ;;  %vm7397_vm12 = vmor %vm1215_vm6, %vm1216_vm11 }
 0x180   :  { %10983 = vst [vmem:[#allocation43_spill] sm:$0xff] %v7362_v27  ;;  %v2782_v25 = vsub.f32 %v7347_v32, %v10576_v6  ;;  %3329 = vmatmul.f32.gmra.mxu3 %v7362_v27  ;;  %v834_v24 = vsel %vm103_vm0, %v616_v55, 0.0  ;;  %v317_v19 = vsel %vm103_vm0, %v7369_v3, 0.0  ;;  %v179_v17 = vsel %vm103_vm0, %v7374_v21, 0.0 }
 0x181   :  { %v1214_v41 = vmul.f32 %v7312_v60, %v1213_v57  ;;  %835 = vadd.xlane.f32.xlu1 %v834_v24  ;;  %v395_v45 = vmul.f32 %v5837_v5, %v166_v47  ;;  %v2423_v6 = vand.u32 4294901760, %v2422_v14  ;;  %v7402_v55 = vsub.f32 %v2090_v12, %v7349_v46  ;;  %v7410_v24 = vld [vmem:[%s10489_s0 + $0xd0] sm:$0xff]  ;;  %318 = vadd.xlane.f32.xlu2 %v317_v19  ;;  %v5574_v12 = vld [vmem:[%s10489_s0 + $0xa0] sm:$0xff] }
 0x182   :  { %v2783_v59 = vand.u32 4294901760, %v2782_v25  ;;  %v7405_v57 = vsub.f32 %v2225_v15, %v7362_v27  ;;  %v10987_v29 = vsel %vm7279_vm4, %v7134_v50, %v7253_v61  ;;  %v2093_v14 = vsel %vm103_vm0, %v7247_v33, 0 }
 0x183   :  { %v2016_v47 = vmul.f32 %v10987_v29, %v6037_v38  ;;  %180 = vadd.xlane.f32.xlu0 %v179_v17  ;;  %v7421_v15 = vsub.f32 %v5574_v12, %v395_v45  ;;  %v2228_v25 = vsel %vm103_vm0, %v7250_v20, 0  ;;  %v1664_v7 = vmul.f32 %v7235_v51, %v1663_v63 }
 0x184   :  { %10986 = vst [vmem:[#allocation44_spill] sm:$0xff] %v7405_v57  ;;  %2424 = vmatmul.f32.gmra.mxu0 %v2423_v6  ;;  %v10578_v38 = vand.u32 4294901760, %v7402_v55  ;;  %v10579_v50 = vand.u32 4294901760, %v7405_v57  ;;  %v7430_v61 = vand.u32 4294901760, %v2093_v14  ;;  %v1218_v20 = vsel %vm7397_vm12, %v7312_v60, %v1214_v41 }
 0x185   :  { %2784 = vmatmul.f32.gmra.mxu2 %v2783_v59  ;;  %v5445_v19 = vpop.eup %5444  ;;  %v7443_v63 = vand.u32 4294901760, %v2228_v25  ;;  %v182_v59 = vsel %vm103_vm0, %v7410_v24, 0.0  ;;  %v571_v6 = vmul.f32 %v7421_v15, %v7421_v15  ;;  %v2096_v60 = vsel %vm103_vm0, %v1971_v0, 0 }
 0x186   :  { %10988 = vst [vmem:[#allocation45_spill] sm:$0xff] %v7430_v61  ;;  %v1670_v17 = vmul.f32 %v5445_v19, %v7352_v8  ;;  %v2430_v37 = vsub.f32 %v7402_v55, %v10578_v38  ;;  %v2790_v45 = vsub.f32 %v7405_v57, %v10579_v50  ;;  %v7458_v41 = vsub.f32 %v2093_v14, %v7430_v61 }
 0x187   :  { %10991 = vst [vmem:[#allocation46_spill] sm:$0xff] %v7443_v63  ;;  %v7461_v2 = vsub.f32 %v2228_v25, %v7443_v63  ;;  %v1668_v29 = vsel %vm7436_vm13, %v7235_v51, %v1664_v7  ;;  %3153 = vmatmul.f32.gmra.mxu1 %v7430_v61  ;;  %v699_v38 = vsel %vm103_vm0, %v571_v6, 0.0  ;;  %v2231_v50 = vsel %vm103_vm0, %v2016_v47, 0 }
 0x188   :  { %v1671_v12 = vmul.f32 %v5445_v19, %v1670_v17  ;;  %3333 = vmatmul.f32.gmra.mxu3 %v7443_v63  ;;  %v1972_v0 = vmul.f32 %v1218_v20, %v6091_v28  ;;  %v2431_v14 = vand.u32 4294901760, %v2430_v37  ;;  %v2791_v27 = vand.u32 4294901760, %v2790_v45  ;;  %v10995_v17 = vld [vmem:[#allocation5_spill] sm:$0xff] }
 0x189   :  { %10992 = vst [vmem:[#allocation47_spill] sm:$0xff] %v7461_v2  ;;  %183 = vadd.xlane.f32.xlu1 %v182_v59  ;;  %v7471_v25 = vand.u32 4294901760, %v2096_v60  ;;  %v10591_v33 = vand.u32 4294901760, %v7458_v41  ;;  %v10587_v51 = vand.u32 4294901760, %v7461_v2  ;;  %v7475_v7 = vand.u32 4294901760, %v2231_v50  ;;  %v7482_v28 = vld [vmem:[%s10489_s0 + $0x240] sm:$0xff] }
 0x18a   :  { %v1672_v53 = vmul.f32 0.5, %v1671_v12  ;;  %v2017_v63 = vmul.f32 %v1668_v29, %v10995_v17  ;;  %vm1676_vm14 = vweird.f32 %v5445_v19  ;;  %vm1675_vm15 = vweird.f32 %v7352_v8  ;;  %v11000_v17 = vld [vmem:[#allocation6_spill] sm:$0xff] }
 0x18b   :  { %10993 = vst [vmem:[#allocation48_spill] sm:$0xff] %v7471_v25  ;;  %700 = vadd.xlane.f32.xlu0 %v699_v38  ;;  %v7485_v47 = vsub.f32 %v2096_v60, %v7471_v25  ;;  %v2099_v20 = vsel %vm103_vm0, %v1972_v0, 0  ;;  %v7495_v8 = vsub.f32 %v2231_v50, %v7475_v7  ;;  %vm1677_vm1 = vmor %vm1675_vm15, %vm1676_vm14  ;;  %v320_v45 = vsel %vm103_vm0, %v7482_v28, 0.0 }
 0x18c   :  { %10994 = vst [vmem:[#allocation49_spill] sm:$0xff] %v7475_v7  ;;  %v1673_v6 = vsub.f32 1.5, %v1672_v53  ;;  %2432 = vmatmul.f32.gmra.mxu0 %v2431_v14  ;;  %v2438_v53 = vsub.f32 %v7458_v41, %v10591_v33  ;;  %v2234_v38 = vsel %vm103_vm0, %v2017_v63, 0  ;;  %v7503_v29 = vand.u32 4294901760, %v2099_v20 }
 0x18d   :  { %2792 = vmatmul.f32.gmra.mxu2 %v2791_v27  ;;  %10996 = vst [vmem:[#allocation5_spill] sm:$0xff] %v7485_v47  ;;  %v2798_v27 = vsub.f32 %v7461_v2, %v10587_v51  ;;  %v10590_v60 = vand.u32 4294901760, %v7485_v47  ;;  %v10586_v50 = vand.u32 4294901760, %v7495_v8  ;;  %v7506_v14 = vand.u32 4294901760, %v2234_v38 }
 0x18e   :  { %v1674_v59 = vmul.f32 %v5445_v19, %v1673_v6  ;;  %10997 = vst [vmem:[#allocation50_spill] sm:$0xff] %v7495_v8  ;;  %v2439_v12 = vand.u32 4294901760, %v2438_v53 }
 0x18f   :  { %3157 = vmatmul.f32.gmra.mxu1 %v7471_v25  ;;  %10998 = vst [vmem:[#allocation51_spill] sm:$0xff] %v7503_v29  ;;  %v2799_v0 = vand.u32 4294901760, %v2798_v27  ;;  %v2446_v6 = vsub.f32 %v7485_v47, %v10590_v60  ;;  %v7519_v53 = vsub.f32 %v2234_v38, %v7506_v14 }
 0x190   :  { %v1678_v37 = vsel %vm1677_vm1, %v5445_v19, %v1674_v59  ;;  %3337 = vmatmul.f32.gmra.mxu3 %v7475_v7  ;;  %10999 = vst [vmem:[#allocation52_spill] sm:$0xff] %v7506_v14  ;;  %v7510_v19 = vsub.f32 %v2099_v20, %v7503_v29  ;;  %v2806_v59 = vsub.f32 %v7495_v8, %v10586_v50 }
 0x191   :  { %v2018_v63 = vmul.f32 %v1678_v37, %v11000_v17  ;;  %11002 = vst [vmem:[#allocation53_spill] sm:$0xff] %v7519_v53  ;;  %v2447_v37 = vand.u32 4294901760, %v2446_v6 }
 0x192   :  { %11001 = vst [vmem:[#allocation6_spill] sm:$0xff] %v7510_v19  ;;  %v10589_v20 = vand.u32 4294901760, %v7510_v19 }
 0x193   :  { %321 = vadd.xlane.f32.xlu0 %v320_v45  ;;  %v2237_v27 = vsel %vm103_vm0, %v2018_v63, 0  ;;  %v2807_v45 = vand.u32 4294901760, %v2806_v59 }
 0x194   :  { %2440 = vmatmul.f32.gmra.mxu0 %v2439_v12  ;;  %v10588_v12 = vand.u32 4294901760, %v7519_v53  ;;  %v2454_v38 = vsub.f32 %v7510_v19, %v10589_v20 }
 0x195   :  { %2800 = vmatmul.f32.gmra.mxu2 %v2799_v0  ;;  %v7526_v0 = vand.u32 4294901760, %v2237_v27 }
 0x196   :  { %v2814_v17 = vsub.f32 %v7519_v53, %v10588_v12  ;;  %v2455_v6 = vand.u32 4294901760, %v2454_v38 }
 0x197   :  { %3161 = vmatmul.f32.gmra.mxu1 %v7503_v29  ;;  %11003 = vst [vmem:[#allocation54_spill] sm:$0xff] %v7526_v0  ;;  %v7535_v63 = vsub.f32 %v2237_v27, %v7526_v0 }
 0x198   :  { %3341 = vmatmul.f32.gmra.mxu3 %v7506_v14  ;;  %v2815_v59 = vand.u32 4294901760, %v2814_v17 }
 0x199   :  { %11004 = vst [vmem:[#allocation55_spill] sm:$0xff] %v7535_v63  ;;  %v10594_v50 = vand.u32 4294901760, %v7535_v63 }
 0x19c   :  { %2448 = vmatmul.f32.gmra.mxu0 %v2447_v37  ;;  %v2822_v37 = vsub.f32 %v7535_v63, %v10594_v50 }
 0x19d   :  { %2808 = vmatmul.f32.gmra.mxu2 %v2807_v45 }
 0x19e   :  { %v2823_v45 = vand.u32 4294901760, %v2822_v37 }
 0x1a0   :  { %3345 = vmatmul.f32.gmra.mxu3 %v7526_v0 }
 0x1a4   :  { %2456 = vmatmul.f32.gmra.mxu0 %v2455_v6 }
 0x1a5   :  { %2816 = vmatmul.f32.gmra.mxu2 %v2815_v59 }
 0x1ad   :  { %2824 = vmatmul.f32.gmra.mxu2 %v2823_v45 }
 0x1b6   :  { %v821_v51 = vpop.xlane.xlu2 %820 }
 0x1b7   :  { %v963_v12 = vmul.f32 %v821_v51, %v5837_v5  ;;  %v683_v20 = vpop.xlane.xlu0 %682 }
 0x1b8   :  { %v917_v27 = vmul.f32 %v683_v20, %v5837_v5 }
 0x1b9   :  { %v1051_v60 = vadd.f32 1e-05, %v963_v12 }
 0x1ba   :  { %v1005_v33 = vadd.f32 1e-05, %v917_v27 }
 0x1bb   :  { %5446 = vrsqrt.f32 %v1051_v60  ;;  %vm1685_vm2 = vweird.f32 %v1051_v60 }
 0x1bc   :  { %5448 = vrsqrt.f32 %v1005_v33  ;;  %vm1225_vm5 = vweird.f32 %v1005_v33 }
 0x1bd   :  { %v686_v38 = vpop.xlane.xlu1 %685 }
 0x1be   :  { %v169_v17 = vpop.xlane.xlu2 %168  ;;  %v918_v6 = vmul.f32 %v686_v38, %v5837_v5 }
 0x1bf   :  { %v396_v59 = vmul.f32 %v5837_v5, %v169_v17 }
 0x1c0   :  { %v304_v0 = vpop.xlane.xlu0 %303  ;;  %v7546_v50 = vadd.f32 1e-05, %v918_v6 }
 0x1c1   :  { %v5447_v37 = vpop.eup %5446  ;;  %v7549_v45 = vsub.f32 %v6820_v49, %v396_v59  ;;  %v441_v51 = vmul.f32 %v5837_v5, %v304_v0 }
 0x1c2   :  { %v5449_v20 = vpop.eup %5448  ;;  %v1680_v12 = vmul.f32 %v5447_v37, %v1051_v60  ;;  %5450 = vrsqrt.f32 %v7546_v50  ;;  %vm1686_vm3 = vweird.f32 %v5447_v37  ;;  %vm1235_vm9 = vweird.f32 %v7546_v50 }
 0x1c3   :  { %v1220_v27 = vmul.f32 %v5449_v20, %v1005_v33  ;;  %v7554_v14 = vsub.f32 %v6839_v30, %v441_v51  ;;  %v572_v38 = vmul.f32 %v7549_v45, %v7549_v45  ;;  %vm1226_vm4 = vweird.f32 %v5449_v20  ;;  %vm1687_vm6 = vmor %vm1685_vm2, %vm1686_vm3 }
 0x1c4   :  { %v1681_v17 = vmul.f32 %v5447_v37, %v1680_v12  ;;  %vm1227_vm7 = vmor %vm1225_vm5, %vm1226_vm4 }
 0x1c5   :  { %v1221_v6 = vmul.f32 %v5449_v20, %v1220_v27  ;;  %v702_v63 = vsel %vm103_vm0, %v572_v38, 0.0  ;;  %v617_v49 = vmul.f32 %v7554_v14, %v7554_v14  ;;  %v307_v59 = vpop.xlane.xlu1 %306  ;;  %v7569_v38 = vld [vmem:[%s10489_s0 + $0x248] sm:$0xff] }
 0x1c6   :  { %v1682_v0 = vmul.f32 0.5, %v1681_v17  ;;  %703 = vadd.xlane.f32.xlu1 %v702_v63  ;;  %v442_v7 = vmul.f32 %v5837_v5, %v307_v59 }
 0x1c7   :  { %v1222_v53 = vmul.f32 0.5, %v1221_v6  ;;  %v837_v8 = vsel %vm103_vm0, %v617_v49, 0.0  ;;  %v7576_v49 = vld [vmem:[%s10489_s0 + $0xd8] sm:$0xff] }
 0x1c8   :  { %v5451_v30 = vpop.eup %5450  ;;  %v1683_v51 = vsub.f32 1.5, %v1682_v0  ;;  %v689_v2 = vpop.xlane.xlu2 %688  ;;  %838 = vadd.xlane.f32.xlu2 %v837_v8  ;;  %v7564_v27 = vsub.f32 %v6914_v54, %v442_v7  ;;  %v185_v33 = vsel %vm103_vm0, %v7576_v49, 0.0 }
 0x1c9   :  { %v824_v12 = vpop.xlane.xlu0 %823  ;;  %v1223_v63 = vsub.f32 1.5, %v1222_v53  ;;  %v1230_v17 = vmul.f32 %v5451_v30, %v7546_v50  ;;  %v919_v6 = vmul.f32 %v689_v2, %v5837_v5  ;;  %v323_v2 = vsel %vm103_vm0, %v7569_v38, 0.0 }
 0x1ca   :  { %v1684_v8 = vmul.f32 %v5447_v37, %v1683_v51  ;;  %v964_v54 = vmul.f32 %v824_v12, %v5837_v5  ;;  %v618_v7 = vmul.f32 %v7564_v27, %v7564_v27  ;;  %vm1236_vm8 = vweird.f32 %v5451_v30 }
 0x1cb   :  { %v1224_v53 = vmul.f32 %v5449_v20, %v1223_v63  ;;  %v1231_v59 = vmul.f32 %v5451_v30, %v1230_v17  ;;  %v7583_v0 = vadd.f32 1e-05, %v919_v6  ;;  %vm1237_vm10 = vmor %vm1235_vm9, %vm1236_vm8 }
 0x1cc   :  { %v1688_v57 = vsel %vm1687_vm6, %v5447_v37, %v1684_v8  ;;  %v7587_v32 = vadd.f32 1e-05, %v964_v54  ;;  %v840_v51 = vsel %vm103_vm0, %v618_v7, 0.0 }
 0x1cd   :  { %v2019_v12 = vmul.f32 %v1688_v57, %v6723_v39  ;;  %v1228_v60 = vsel %vm1227_vm7, %v5449_v20, %v1224_v53  ;;  %v1232_v29 = vmul.f32 0.5, %v1231_v59  ;;  %5452 = vrsqrt.f32 %v7583_v0  ;;  %841 = vadd.xlane.f32.xlu0 %v840_v51 }
 0x1ce   :  { %v1973_v63 = vmul.f32 %v1228_v60, %v6731_v18  ;;  %5454 = vrsqrt.f32 %v7587_v32  ;;  %324 = vadd.xlane.f32.xlu1 %v323_v2  ;;  %vm1245_vm11 = vweird.f32 %v7583_v0  ;;  %vm1695_vm13 = vweird.f32 %v7587_v32 }
 0x1cf   :  { %v1233_v37 = vsub.f32 1.5, %v1232_v29  ;;  %v2240_v17 = vsel %vm103_vm0, %v2019_v12, 0 }
 0x1d0   :  { %v310_v6 = vpop.xlane.xlu2 %309  ;;  %186 = vadd.xlane.f32.xlu2 %v185_v33  ;;  %v827_v8 = vpop.xlane.xlu1 %826  ;;  %v2102_v39 = vsel %vm103_vm0, %v1973_v63, 0  ;;  %v7599_v57 = vand.u32 4294901760, %v2240_v17 }
 0x1d1   :  { %v1234_v20 = vmul.f32 %v5451_v30, %v1233_v37  ;;  %v443_v54 = vmul.f32 %v5837_v5, %v310_v6  ;;  %v172_v18 = vpop.xlane.xlu0 %171  ;;  %v965_v7 = vmul.f32 %v827_v8, %v5837_v5  ;;  %v7603_v53 = vand.u32 4294901760, %v2102_v39 }
 0x1d2   :  { %11005 = vst [vmem:[#allocation56_spill] sm:$0xff] %v7599_v57  ;;  %v397_v29 = vmul.f32 %v5837_v5, %v172_v18  ;;  %3349 = vmatmul.f32.gmra.mxu3 %v7599_v57 }
 0x1d3   :  { %11006 = vst [vmem:[#allocation57_spill] sm:$0xff] %v7603_v53  ;;  %v7607_v50 = vpop.eup %5452  ;;  %v1238_v59 = vsel %vm1237_vm10, %v5451_v30, %v1234_v20  ;;  %v7610_v2 = vsub.f32 %v7011_v48, %v443_v54  ;;  %v7612_v33 = vadd.f32 1e-05, %v965_v7  ;;  %3165 = vmatmul.f32.gmra.mxu1 %v7603_v53  ;;  %v7627_v48 = vld [vmem:[%s10489_s0 + $0xe0] sm:$0xff]  ;;  %v7643_v20 = vsub.f32 %v2102_v39, %v7603_v53  ;;  %v7652_v7 = vld [vmem:[%s10489_s0 + $0xe8] sm:$0xff] }
 0x1d4   :  { %v7615_v51 = vpop.eup %5454  ;;  %v1974_v12 = vmul.f32 %v1238_v59, %v6784_v34  ;;  %v1240_v60 = vmul.f32 %v7607_v50, %v7583_v0  ;;  %v7622_v63 = vsub.f32 %v7024_v31, %v397_v29  ;;  %vm1246_vm12 = vweird.f32 %v7607_v50 }
 0x1d5   :  { %v1690_v30 = vmul.f32 %v7615_v51, %v7587_v32  ;;  %5456 = vrsqrt.f32 %v7612_v33  ;;  %v619_v31 = vmul.f32 %v7610_v2, %v7610_v2  ;;  %v188_v6 = vsel %vm103_vm0, %v7627_v48, 0.0  ;;  %11007 = vst [vmem:[#allocation58_spill] sm:$0xff] %v7643_v20  ;;  %vm1247_vm2 = vmor %vm1245_vm11, %vm1246_vm12 }
 0x1d6   :  { %v1241_v34 = vmul.f32 %v7607_v50, %v1240_v60  ;;  %v573_v37 = vmul.f32 %v7622_v63, %v7622_v63  ;;  %189 = vadd.xlane.f32.xlu0 %v188_v6  ;;  %v7646_v54 = vsub.f32 %v2240_v17, %v7599_v57  ;;  %v2105_v18 = vsel %vm103_vm0, %v1974_v12, 0 }
 0x1d7   :  { %v1691_v8 = vmul.f32 %v7615_v51, %v1690_v30  ;;  %vm1696_vm14 = vweird.f32 %v7615_v51  ;;  %v843_v59 = vsel %vm103_vm0, %v619_v31, 0.0  ;;  %v10623_v12 = vand.u32 4294901760, %v7643_v20 }
 0x1d8   :  { %11008 = vst [vmem:[#allocation59_spill] sm:$0xff] %v7646_v54  ;;  %v1242_v29 = vmul.f32 0.5, %v1241_v34  ;;  %v705_v60 = vsel %vm103_vm0, %v573_v37, 0.0  ;;  %v175_v30 = vpop.xlane.xlu1 %174  ;;  %844 = vadd.xlane.f32.xlu1 %v843_v59  ;;  %v7663_v34 = vld [vmem:[%s10489_s0 + $0x250] sm:$0xff]  ;;  %vm1705_vm15 = vweird.f32 %v7612_v33  ;;  %v7666_v31 = vand.u32 4294901760, %v2105_v18  ;;  %vm1697_vm3 = vmor %vm1695_vm13, %vm1696_vm14 }
 0x1d9   :  { %v1692_v39 = vmul.f32 0.5, %v1691_v8  ;;  %706 = vadd.xlane.f32.xlu2 %v705_v60  ;;  %v398_v17 = vmul.f32 %v5837_v5, %v175_v30  ;;  %v191_v37 = vsel %vm103_vm0, %v7652_v7, 0.0  ;;  %v2462_v6 = vsub.f32 %v7643_v20, %v10623_v12 }
 0x1da   :  { %v1243_v57 = vsub.f32 1.5, %v1242_v29  ;;  %11009 = vst [vmem:[#allocation60_spill] sm:$0xff] %v7666_v31  ;;  %v11010_v53 = vand.u32 4294901760, %v7646_v54 }
 0x1db   :  { %v5457_v8 = vpop.eup %5456  ;;  %v1693_v59 = vsub.f32 1.5, %v1692_v39  ;;  %v830_v60 = vpop.xlane.xlu2 %829  ;;  %v7671_v30 = vsub.f32 %v7099_v11, %v398_v17  ;;  %3169 = vmatmul.f32.gmra.mxu1 %v7666_v31  ;;  %v326_v11 = vsel %vm103_vm0, %v7663_v34, 0.0  ;;  %v2463_v17 = vand.u32 4294901760, %v2462_v6 }
 0x1dc   :  { %v2830_v29 = vsub.f32 %v7646_v54, %v11010_v53  ;;  %v1244_v25 = vmul.f32 %v7607_v50, %v1243_v57  ;;  %v1700_v19 = vmul.f32 %v5457_v8, %v7612_v33  ;;  %vm1706_vm1 = vweird.f32 %v5457_v8  ;;  %v692_v61 = vpop.xlane.xlu0 %691 }
 0x1dd   :  { %v1694_v39 = vmul.f32 %v7615_v51, %v1693_v59  ;;  %v966_v53 = vmul.f32 %v830_v60, %v5837_v5  ;;  %v920_v57 = vmul.f32 %v692_v61, %v5837_v5  ;;  %v574_v0 = vmul.f32 %v7671_v30, %v7671_v30  ;;  %2464 = vmatmul.f32.gmra.mxu0 %v2463_v17  ;;  %vm7718_vm4 = vmor %vm1705_vm15, %vm1706_vm1  ;;  %v7737_v17 = vld [vmem:[%s10489_s0 + $0x258] sm:$0xff] }
 0x1de   :  { %v1248_v12 = vsel %vm1247_vm2, %v7607_v50, %v1244_v25  ;;  %v1701_v54 = vmul.f32 %v5457_v8, %v1700_v19  ;;  %v2831_v20 = vand.u32 4294901760, %v2830_v29  ;;  %v7707_v19 = vsub.f32 %v2105_v18, %v7666_v31 }
 0x1df   :  { %v1975_v47 = vmul.f32 %v1248_v12, %v6907_v1  ;;  %v1698_v59 = vsel %vm1697_vm3, %v7615_v51, %v1694_v39  ;;  %v7700_v60 = vadd.f32 1e-05, %v966_v53  ;;  %v7702_v61 = vadd.f32 1e-05, %v920_v57 }
 0x1e0   :  { %v2020_v25 = vmul.f32 %v1698_v59, %v6922_v40  ;;  %v1702_v50 = vmul.f32 0.5, %v1701_v54  ;;  %2832 = vmatmul.f32.gmra.mxu2 %v2831_v20  ;;  %v708_v32 = vsel %vm103_vm0, %v574_v0, 0.0  ;;  %11011 = vst [vmem:[#allocation61_spill] sm:$0xff] %v7707_v19  ;;  %192 = vadd.xlane.f32.xlu1 %v191_v37  ;;  %v10630_v40 = vand.u32 4294901760, %v7707_v19 }
 0x1e1   :  { %5458 = vrsqrt.f32 %v7700_v60  ;;  %327 = vadd.xlane.f32.xlu2 %v326_v11  ;;  %v2108_v1 = vsel %vm103_vm0, %v1975_v47, 0  ;;  %709 = vadd.xlane.f32.xlu0 %v708_v32  ;;  %vm1715_vm5 = vweird.f32 %v7700_v60  ;;  %vm1255_vm6 = vweird.f32 %v7702_v61 }
 0x1e2   :  { %v1703_v51 = vsub.f32 1.5, %v1702_v50  ;;  %5460 = vrsqrt.f32 %v7702_v61  ;;  %v695_v12 = vpop.xlane.xlu1 %694  ;;  %v7713_v54 = vand.u32 4294901760, %v2108_v1  ;;  %v2243_v47 = vsel %vm103_vm0, %v2020_v25, 0 }
 0x1e3   :  { %v178_v18 = vpop.xlane.xlu2 %177  ;;  %v921_v6 = vmul.f32 %v695_v12, %v5837_v5  ;;  %v2470_v39 = vsub.f32 %v7707_v19, %v10630_v40  ;;  %v7732_v57 = vand.u32 4294901760, %v2243_v47  ;;  %v329_v12 = vsel %vm103_vm0, %v7737_v17, 0.0 }
 0x1e4   :  { %11012 = vst [vmem:[#allocation62_spill] sm:$0xff] %v7713_v54  ;;  %v1704_v37 = vmul.f32 %v5457_v8, %v1703_v51  ;;  %v399_v29 = vmul.f32 %v5837_v5, %v178_v18  ;;  %v313_v11 = vpop.xlane.xlu0 %312  ;;  %3173 = vmatmul.f32.gmra.mxu1 %v7713_v54 }
 0x1e5   :  { %v444_v33 = vmul.f32 %v5837_v5, %v313_v11  ;;  %v7730_v53 = vadd.f32 1e-05, %v921_v6  ;;  %11015 = vst [vmem:[#allocation63_spill] sm:$0xff] %v7732_v57  ;;  %v2471_v25 = vand.u32 4294901760, %v2470_v39  ;;  %3353 = vmatmul.f32.gmra.mxu3 %v7732_v57  ;;  %v7770_v6 = vsub.f32 %v2243_v47, %v7732_v57  ;;  %v7784_v47 = vld [vmem:[%s10489_s0 + $0x260] sm:$0xff] }
 0x1e6   :  { %v1708_v0 = vsel %vm7718_vm4, %v5457_v8, %v1704_v37  ;;  %v7742_v59 = vsub.f32 %v7204_v44, %v399_v29 }
 0x1e7   :  { %v7744_v50 = vpop.eup %5458  ;;  %v2021_v32 = vmul.f32 %v1708_v0, %v6985_v43  ;;  %v7748_v51 = vsub.f32 %v7218_v22, %v444_v33  ;;  %5462 = vrsqrt.f32 %v7730_v53  ;;  %2472 = vmatmul.f32.gmra.mxu0 %v2471_v25  ;;  %v7762_v22 = vsub.f32 %v2108_v1, %v7713_v54  ;;  %11017 = vst [vmem:[#allocation65_spill] sm:$0xff] %v7770_v6 }
 0x1e8   :  { %v7754_v20 = vpop.eup %5460  ;;  %v1710_v44 = vmul.f32 %v7744_v50, %v7700_v60  ;;  %v575_v43 = vmul.f32 %v7742_v59, %v7742_v59  ;;  %v10640_v25 = vand.u32 4294901760, %v7770_v6  ;;  %vm1716_vm7 = vweird.f32 %v7744_v50 }
 0x1e9   :  { %11016 = vst [vmem:[#allocation64_spill] sm:$0xff] %v7762_v22  ;;  %v1250_v8 = vmul.f32 %v7754_v20, %v7702_v61  ;;  %v620_v18 = vmul.f32 %v7748_v51, %v7748_v51  ;;  %330 = vadd.xlane.f32.xlu0 %v329_v12  ;;  %v10631_v11 = vand.u32 4294901760, %v7762_v22  ;;  %v2246_v1 = vsel %vm103_vm0, %v2021_v32, 0  ;;  %vm7809_vm10 = vmor %vm1715_vm5, %vm1716_vm7 }
 0x1ea   :  { %v1711_v37 = vmul.f32 %v7744_v50, %v1710_v44  ;;  %v711_v29 = vsel %vm103_vm0, %v575_v43, 0.0  ;;  %v7779_v40 = vand.u32 4294901760, %v2246_v1  ;;  %v7794_v43 = vld [vmem:[%s10489_s0 + $0xf0] sm:$0xff]  ;;  %vm1256_vm8 = vweird.f32 %v7754_v20 }
 0x1eb   :  { %v1251_v39 = vmul.f32 %v7754_v20, %v1250_v8  ;;  %712 = vadd.xlane.f32.xlu1 %v711_v29  ;;  %v846_v33 = vsel %vm103_vm0, %v620_v18, 0.0  ;;  %v316_v0 = vpop.xlane.xlu1 %315  ;;  %v2478_v44 = vsub.f32 %v7762_v22, %v10631_v11  ;;  %vm1265_vm9 = vweird.f32 %v7730_v53  ;;  %vm7825_vm11 = vmor %vm1255_vm6, %vm1256_vm8 }
 0x1ec   :  { %11018 = vst [vmem:[#allocation66_spill] sm:$0xff] %v7779_v40  ;;  %v1712_v12 = vmul.f32 0.5, %v1711_v37  ;;  %847 = vadd.xlane.f32.xlu2 %v846_v33  ;;  %v445_v32 = vmul.f32 %v5837_v5, %v316_v0  ;;  %v698_v37 = vpop.xlane.xlu2 %697  ;;  %v2838_v33 = vsub.f32 %v7770_v6, %v10640_v25  ;;  %v332_v54 = vsel %vm103_vm0, %v7784_v47, 0.0 }
 0x1ed   :  { %v5463_v8 = vpop.eup %5462  ;;  %v1252_v18 = vmul.f32 0.5, %v1251_v39  ;;  %v922_v57 = vmul.f32 %v698_v37, %v5837_v5  ;;  %3357 = vmatmul.f32.gmra.mxu3 %v7779_v40  ;;  %v194_v37 = vsel %vm103_vm0, %v7794_v43, 0.0 }
 0x1ee   :  { %v833_v29 = vpop.xlane.xlu0 %832  ;;  %v1713_v0 = vsub.f32 1.5, %v1712_v12  ;;  %v1260_v11 = vmul.f32 %v5463_v8, %v7730_v53  ;;  %v7815_v12 = vsub.f32 %v7259_v36, %v445_v32  ;;  %v2479_v36 = vand.u32 4294901760, %v2478_v44 }
 0x1ef   :  { %v1253_v31 = vsub.f32 1.5, %v1252_v18  ;;  %v967_v22 = vmul.f32 %v833_v29, %v5837_v5  ;;  %v7829_v29 = vadd.f32 1e-05, %v922_v57  ;;  %v2839_v19 = vand.u32 4294901760, %v2838_v33 }
 0x1f0   :  { %v1714_v25 = vmul.f32 %v7744_v50, %v1713_v0  ;;  %v1261_v18 = vmul.f32 %v5463_v8, %v1260_v11  ;;  %v621_v0 = vmul.f32 %v7815_v12, %v7815_v12  ;;  %vm1266_vm12 = vweird.f32 %v5463_v8  ;;  %2480 = vmatmul.f32.gmra.mxu0 %v2479_v36 }
 0x1f1   :  { %v1254_v32 = vmul.f32 %v7754_v20, %v1253_v31  ;;  %v7832_v6 = vadd.f32 1e-05, %v967_v22  ;;  %5464 = vrsqrt.f32 %v7829_v29  ;;  %2840 = vmatmul.f32.gmra.mxu2 %v2839_v19  ;;  %vm7850_vm13 = vmor %vm1265_vm9, %vm1266_vm12  ;;  %v7855_v19 = vsub.f32 %v2246_v1, %v7779_v40 }
 0x1f2   :  { %v1718_v61 = vsel %vm7809_vm10, %v7744_v50, %v1714_v25  ;;  %v1262_v46 = vmul.f32 0.5, %v1261_v18  ;;  %v849_v50 = vsel %vm103_vm0, %v621_v0, 0.0  ;;  %v7877_v0 = vld [vmem:[%s10489_s0 + $0xf8] sm:$0xff]  ;;  %vm1275_vm14 = vweird.f32 %v7829_v29 }
 0x1f3   :  { %v2022_v57 = vmul.f32 %v1718_v61, %v7086_v10  ;;  %v1258_v31 = vsel %vm7825_vm11, %v7754_v20, %v1254_v32  ;;  %5466 = vrsqrt.f32 %v7832_v6  ;;  %333 = vadd.xlane.f32.xlu1 %v332_v54  ;;  %850 = vadd.xlane.f32.xlu0 %v849_v50  ;;  %11025 = vst [vmem:[#allocation67_spill] sm:$0xff] %v7855_v19  ;;  %v10647_v53 = vand.u32 4294901760, %v7855_v19 }
 0x1f4   :  { %v836_v22 = vpop.xlane.xlu1 %835  ;;  %v1976_v11 = vmul.f32 %v1258_v31, %v7091_v58  ;;  %v1263_v44 = vsub.f32 1.5, %v1262_v46  ;;  %195 = vadd.xlane.f32.xlu2 %v194_v37  ;;  %v319_v20 = vpop.xlane.xlu2 %318  ;;  %vm1725_vm15 = vweird.f32 %v7832_v6  ;;  %v197_v50 = vsel %vm103_vm0, %v7877_v0, 0.0 }
 0x1f5   :  { %v968_v25 = vmul.f32 %v836_v22, %v5837_v5  ;;  %v2249_v54 = vsel %vm103_vm0, %v2022_v57, 0  ;;  %v446_v46 = vmul.f32 %v5837_v5, %v319_v20 }
 0x1f6   :  { %v1264_v58 = vmul.f32 %v5463_v8, %v1263_v44  ;;  %v181_v33 = vpop.xlane.xlu0 %180  ;;  %v7863_v60 = vand.u32 4294901760, %v2249_v54  ;;  %v2111_v32 = vsel %vm103_vm0, %v1976_v11, 0 }
 0x1f7   :  { %v7859_v39 = vadd.f32 1e-05, %v968_v25  ;;  %v400_v37 = vmul.f32 %v5837_v5, %v181_v33  ;;  %v7865_v18 = vpop.eup %5464  ;;  %v7870_v36 = vsub.f32 %v7369_v3, %v446_v46  ;;  %v7894_v11 = vand.u32 4294901760, %v2111_v32 }
 0x1f8   :  { %11026 = vst [vmem:[#allocation68_spill] sm:$0xff] %v7863_v60  ;;  %v1268_v1 = vsel %vm7850_vm13, %v5463_v8, %v1264_v58  ;;  %v1270_v31 = vmul.f32 %v7865_v18, %v7829_v29  ;;  %3361 = vmatmul.f32.gmra.mxu3 %v7863_v60  ;;  %vm1276_vm1 = vweird.f32 %v7865_v18 }
 0x1f9   :  { %5468 = vrsqrt.f32 %v7859_v39  ;;  %v5467_v61 = vpop.eup %5466  ;;  %v1977_v57 = vmul.f32 %v1268_v1, %v7156_v62  ;;  %v7888_v8 = vsub.f32 %v7374_v21, %v400_v37  ;;  %v2846_v62 = vsub.f32 %v7855_v19, %v10647_v53  ;;  %11027 = vst [vmem:[#allocation69_spill] sm:$0xff] %v7894_v11  ;;  %3177 = vmatmul.f32.gmra.mxu1 %v7894_v11  ;;  %vm7919_vm4 = vmor %vm1275_vm14, %vm1276_vm1 }
 0x1fa   :  { %v1720_v3 = vmul.f32 %v5467_v61, %v7832_v6  ;;  %v1271_v22 = vmul.f32 %v7865_v18, %v1270_v31  ;;  %v622_v44 = vmul.f32 %v7870_v36, %v7870_v36  ;;  %v7906_v37 = vsub.f32 %v2111_v32, %v7894_v11 }
 0x1fb   :  { %v2847_v20 = vand.u32 4294901760, %v2846_v62  ;;  %v576_v21 = vmul.f32 %v7888_v8, %v7888_v8  ;;  %198 = vadd.xlane.f32.xlu0 %v197_v50  ;;  %v7909_v1 = vsub.f32 %v2249_v54, %v7863_v60  ;;  %vm1726_vm2 = vweird.f32 %v5467_v61 }
 0x1fc   :  { %v184_v25 = vpop.xlane.xlu1 %183  ;;  %v1721_v10 = vmul.f32 %v5467_v61, %v1720_v3  ;;  %v1272_v46 = vmul.f32 0.5, %v1271_v22  ;;  %v852_v33 = vsel %vm103_vm0, %v622_v44, 0.0  ;;  %v2114_v22 = vsel %vm103_vm0, %v1977_v57, 0  ;;  %vm7935_vm5 = vmor %vm1725_vm15, %vm1726_vm2 }
 0x1fd   :  { %v401_v58 = vmul.f32 %v5837_v5, %v184_v25  ;;  %11028 = vst [vmem:[#allocation70_spill] sm:$0xff] %v7909_v1  ;;  %2848 = vmatmul.f32.gmra.mxu2 %v2847_v20  ;;  %853 = vadd.xlane.f32.xlu1 %v852_v33  ;;  %v714_v62 = vsel %vm103_vm0, %v576_v21, 0.0  ;;  %vm1735_vm3 = vweird.f32 %v7859_v39  ;;  %v10651_v57 = vand.u32 4294901760, %v7909_v1  ;;  %v7929_v20 = vld [vmem:[%s10489_s0 + $0x100] sm:$0xff] }
 0x1fe   :  { %v1722_v3 = vmul.f32 0.5, %v1721_v10  ;;  %v701_v25 = vpop.xlane.xlu0 %700  ;;  %v1273_v53 = vsub.f32 1.5, %v1272_v46  ;;  %715 = vadd.xlane.f32.xlu2 %v714_v62  ;;  %v10650_v10 = vand.u32 4294901760, %v7906_v37  ;;  %v7947_v62 = vld [vmem:[%s10489_s0 + $0x268] sm:$0xff]  ;;  %v200_v60 = vsel %vm103_vm0, %v7929_v20, 0.0 }
 0x1ff   :  { %v5469_v31 = vpop.eup %5468  ;;  %v923_v50 = vmul.f32 %v701_v25, %v5837_v5  ;;  %v7940_v33 = vsub.f32 %v7410_v24, %v401_v58 }
 0x200   :  { %v1730_v44 = vmul.f32 %v5469_v31, %v7859_v39  ;;  %v1723_v32 = vsub.f32 1.5, %v1722_v3  ;;  %v1274_v21 = vmul.f32 %v7865_v18, %v1273_v53  ;;  %v7942_v3 = vand.u32 4294901760, %v2114_v22 }
 0x201   :  { %v7949_v53 = vadd.f32 1e-05, %v923_v50  ;;  %v2486_v6 = vsub.f32 %v7906_v37, %v10650_v10  ;;  %vm1736_vm6 = vweird.f32 %v5469_v31  ;;  %v335_v10 = vsel %vm103_vm0, %v7947_v62, 0.0 }
 0x202   :  { %v1731_v46 = vmul.f32 %v5469_v31, %v1730_v44  ;;  %11033 = vst [vmem:[#allocation71_spill] sm:$0xff] %v7942_v3  ;;  %v1724_v25 = vmul.f32 %v5467_v61, %v1723_v32  ;;  %v2854_v44 = vsub.f32 %v7909_v1, %v10651_v57  ;;  %v1278_v24 = vsel %vm7919_vm4, %v7865_v18, %v1274_v21  ;;  %vm7972_vm7 = vmor %vm1735_vm3, %vm1736_vm6 }
 0x203   :  { %v1978_v32 = vmul.f32 %v1278_v24, %v7264_v23  ;;  %5470 = vrsqrt.f32 %v7949_v53  ;;  %v2487_v54 = vand.u32 4294901760, %v2486_v6  ;;  %3181 = vmatmul.f32.gmra.mxu1 %v7942_v3  ;;  %v7979_v29 = vsub.f32 %v2114_v22, %v7942_v3 }
 0x204   :  { %v1732_v58 = vmul.f32 0.5, %v1731_v46  ;;  %v1728_v50 = vsel %vm7935_vm5, %v5467_v61, %v1724_v25  ;;  %v2855_v18 = vand.u32 4294901760, %v2854_v44  ;;  %v577_v61 = vmul.f32 %v7940_v33, %v7940_v33 }
 0x205   :  { %v2023_v57 = vmul.f32 %v1728_v50, %v7293_v56  ;;  %201 = vadd.xlane.f32.xlu1 %v200_v60  ;;  %11036 = vst [vmem:[#allocation72_spill] sm:$0xff] %v7979_v29  ;;  %v2117_v56 = vsel %vm103_vm0, %v1978_v32, 0  ;;  %2488 = vmatmul.f32.gmra.mxu0 %v2487_v54  ;;  %v10657_v60 = vand.u32 4294901760, %v7979_v29  ;;  %vm1285_vm8 = vweird.f32 %v7949_v53 }
 0x206   :  { %v1733_v40 = vsub.f32 1.5, %v1732_v58  ;;  %v322_v23 = vpop.xlane.xlu0 %321  ;;  %2856 = vmatmul.f32.gmra.mxu2 %v2855_v18  ;;  %v7983_v39 = vand.u32 4294901760, %v2117_v56  ;;  %336 = vadd.xlane.f32.xlu2 %v335_v10  ;;  %v717_v6 = vsel %vm103_vm0, %v577_v61, 0.0 }
 0x207   :  { %v447_v25 = vmul.f32 %v5837_v5, %v322_v23  ;;  %v2252_v44 = vsel %vm103_vm0, %v2023_v57, 0  ;;  %718 = vadd.xlane.f32.xlu0 %v717_v6  ;;  %v2494_v10 = vsub.f32 %v7979_v29, %v10657_v60 }
 0x208   :  { %v1734_v46 = vmul.f32 %v5469_v31, %v1733_v40  ;;  %11037 = vst [vmem:[#allocation73_spill] sm:$0xff] %v7983_v39  ;;  %v7993_v40 = vand.u32 4294901760, %v2252_v44  ;;  %v8000_v50 = vsub.f32 %v2117_v56, %v7983_v39 }
 0x209   :  { %v7991_v24 = vsub.f32 %v7482_v28, %v447_v25  ;;  %v5471_v58 = vpop.eup %5470  ;;  %v2495_v54 = vand.u32 4294901760, %v2494_v10 }
 0x20a   :  { %v1738_v22 = vsel %vm7972_vm7, %v5469_v31, %v1734_v46  ;;  %11038 = vst [vmem:[#allocation74_spill] sm:$0xff] %v7993_v40  ;;  %v1280_v57 = vmul.f32 %v5471_v58, %v7949_v53  ;;  %3365 = vmatmul.f32.gmra.mxu3 %v7993_v40  ;;  %v8009_v31 = vld [vmem:[%s10489_s0 + $0x270] sm:$0xff]  ;;  %v10656_v18 = vand.u32 4294901760, %v8000_v50  ;;  %vm1286_vm9 = vweird.f32 %v5471_v58 }
 0x20b   :  { %v2024_v32 = vmul.f32 %v1738_v22, %v7331_v13  ;;  %11039 = vst [vmem:[#allocation75_spill] sm:$0xff] %v8000_v50  ;;  %v623_v28 = vmul.f32 %v7991_v24, %v7991_v24  ;;  %v8012_v13 = vsub.f32 %v2252_v44, %v7993_v40  ;;  %3185 = vmatmul.f32.gmra.mxu1 %v7983_v39  ;;  %v338_v25 = vsel %vm103_vm0, %v8009_v31, 0.0  ;;  %vm1287_vm10 = vmor %vm1285_vm8, %vm1286_vm9 }
 0x20c   :  { %v1281_v23 = vmul.f32 %v5471_v58, %v1280_v57  ;;  %v2502_v44 = vsub.f32 %v8000_v50, %v10656_v18 }
 0x20d   :  { %11040 = vst [vmem:[#allocation76_spill] sm:$0xff] %v8012_v13  ;;  %v2255_v21 = vsel %vm103_vm0, %v2024_v32, 0  ;;  %v855_v61 = vsel %vm103_vm0, %v623_v28, 0.0  ;;  %v10654_v56 = vand.u32 4294901760, %v8012_v13  ;;  %2496 = vmatmul.f32.gmra.mxu0 %v2495_v54  ;;  %v8037_v28 = vld [vmem:[%s10489_s0 + $0x108] sm:$0xff] }
 0x20e   :  { %v8019_v46 = vand.u32 4294901760, %v2255_v21  ;;  %v1282_v6 = vmul.f32 0.5, %v1281_v23  ;;  %856 = vadd.xlane.f32.xlu2 %v855_v61  ;;  %v2503_v23 = vand.u32 4294901760, %v2502_v44 }
 0x20f   :  { %v2862_v22 = vsub.f32 %v8012_v13, %v10654_v56  ;;  %339 = vadd.xlane.f32.xlu0 %v338_v25  ;;  %v203_v25 = vsel %vm103_vm0, %v8037_v28, 0.0 }
 0x210   :  { %11041 = vst [vmem:[#allocation77_spill] sm:$0xff] %v8019_v46  ;;  %v8031_v32 = vsub.f32 %v2255_v21, %v8019_v46  ;;  %v1283_v10 = vsub.f32 1.5, %v1282_v6 }
 0x211   :  { %v2863_v53 = vand.u32 4294901760, %v2862_v22 }
 0x212   :  { %11042 = vst [vmem:[#allocation78_spill] sm:$0xff] %v8031_v32  ;;  %v10655_v57 = vand.u32 4294901760, %v8031_v32  ;;  %v1284_v54 = vmul.f32 %v5471_v58, %v1283_v10  ;;  %3369 = vmatmul.f32.gmra.mxu3 %v8019_v46 }
 0x213   :  { %2864 = vmatmul.f32.gmra.mxu2 %v2863_v53 }
 0x214   :  { %v2870_v21 = vsub.f32 %v8031_v32, %v10655_v57  ;;  %v1288_v61 = vsel %vm1287_vm10, %v5471_v58, %v1284_v54 }
 0x215   :  { %v1979_v6 = vmul.f32 %v1288_v61, %v7421_v15  ;;  %2504 = vmatmul.f32.gmra.mxu0 %v2503_v23 }
 0x216   :  { %v2871_v22 = vand.u32 4294901760, %v2870_v21  ;;  %204 = vadd.xlane.f32.xlu2 %v203_v25 }
 0x217   :  { %v2120_v56 = vsel %vm103_vm0, %v1979_v6, 0 }
 0x218   :  { %v8047_v10 = vand.u32 4294901760, %v2120_v56 }
 0x21a   :  { %11043 = vst [vmem:[#allocation79_spill] sm:$0xff] %v8047_v10  ;;  %3189 = vmatmul.f32.gmra.mxu1 %v8047_v10  ;;  %v8051_v44 = vsub.f32 %v2120_v56, %v8047_v10 }
 0x21b   :  { %2872 = vmatmul.f32.gmra.mxu2 %v2871_v22 }
 0x21c   :  { %11044 = vst [vmem:[#allocation80_spill] sm:$0xff] %v8051_v44  ;;  %v10658_v58 = vand.u32 4294901760, %v8051_v44 }
 0x21e   :  { %v2510_v53 = vsub.f32 %v8051_v44, %v10658_v58 }
 0x220   :  { %v2511_v15 = vand.u32 4294901760, %v2510_v53 }
 0x222   :  { %2512 = vmatmul.f32.gmra.mxu0 %v2511_v15 }
 0x239   :  { %v704_v54 = vpop.xlane.xlu1 %703 }
 0x23a   :  { %v924_v23 = vmul.f32 %v704_v54, %v5837_v5 }
 0x23b   :  { %v839_v21 = vpop.xlane.xlu2 %838 }
 0x23c   :  { %v969_v61 = vmul.f32 %v839_v21, %v5837_v5  ;;  %v1012_v25 = vadd.f32 1e-05, %v924_v23 }
 0x23e   :  { %v1057_v6 = vadd.f32 1e-05, %v969_v61  ;;  %5472 = vrsqrt.f32 %v1012_v25  ;;  %vm1295_vm13 = vweird.f32 %v1012_v25 }
 0x240   :  { %5474 = vrsqrt.f32 %v1057_v6  ;;  %v842_v56 = vpop.xlane.xlu0 %841  ;;  %vm1745_vm14 = vweird.f32 %v1057_v6 }
 0x241   :  { %v970_v22 = vmul.f32 %v842_v56, %v5837_v5  ;;  %v325_v57 = vpop.xlane.xlu1 %324 }
 0x242   :  { %v448_v18 = vmul.f32 %v5837_v5, %v325_v57 }
 0x243   :  { %v187_v60 = vpop.xlane.xlu2 %186  ;;  %v8061_v58 = vadd.f32 1e-05, %v970_v22 }
 0x244   :  { %v5473_v53 = vpop.eup %5472  ;;  %v402_v15 = vmul.f32 %v5837_v5, %v187_v60  ;;  %v8065_v54 = vsub.f32 %v7569_v38, %v448_v18 }
 0x245   :  { %v1290_v21 = vmul.f32 %v5473_v53, %v1012_v25  ;;  %5476 = vrsqrt.f32 %v8061_v58  ;;  %vm1296_vm11 = vweird.f32 %v5473_v53  ;;  %vm1755_vm3 = vweird.f32 %v8061_v58 }
 0x246   :  { %v5475_v23 = vpop.eup %5474  ;;  %v8069_v61 = vsub.f32 %v7576_v49, %v402_v15  ;;  %v624_v56 = vmul.f32 %v8065_v54, %v8065_v54  ;;  %vm1297_vm15 = vmor %vm1295_vm13, %vm1296_vm11 }
 0x247   :  { %v1740_v57 = vmul.f32 %v5475_v23, %v1057_v6  ;;  %v1291_v46 = vmul.f32 %v5473_v53, %v1290_v21  ;;  %vm1746_vm12 = vweird.f32 %v5475_v23 }
 0x248   :  { %v578_v22 = vmul.f32 %v8069_v61, %v8069_v61  ;;  %v858_v60 = vsel %vm103_vm0, %v624_v56, 0.0  ;;  %vm1747_vm1 = vmor %vm1745_vm14, %vm1746_vm12 }
 0x249   :  { %v1741_v40 = vmul.f32 %v5475_v23, %v1740_v57  ;;  %v1292_v38 = vmul.f32 0.5, %v1291_v46  ;;  %859 = vadd.xlane.f32.xlu0 %v858_v60  ;;  %v190_v32 = vpop.xlane.xlu0 %189  ;;  %v8085_v46 = vld [vmem:[%s10489_s0 + $0x110] sm:$0xff] }
 0x24a   :  { %v720_v18 = vsel %vm103_vm0, %v578_v22, 0.0  ;;  %v403_v1 = vmul.f32 %v5837_v5, %v190_v32  ;;  %v8094_v32 = vld [vmem:[%s10489_s0 + $0x278] sm:$0xff] }
 0x24b   :  { %v8077_v13 = vpop.eup %5476  ;;  %v1742_v49 = vmul.f32 0.5, %v1741_v40  ;;  %v1293_v15 = vsub.f32 1.5, %v1292_v38  ;;  %721 = vadd.xlane.f32.xlu1 %v720_v18  ;;  %v845_v57 = vpop.xlane.xlu1 %844 }
 0x24c   :  { %v1750_v21 = vmul.f32 %v8077_v13, %v8061_v58  ;;  %v707_v56 = vpop.xlane.xlu2 %706  ;;  %v8089_v38 = vsub.f32 %v7627_v48, %v403_v1  ;;  %v971_v18 = vmul.f32 %v845_v57, %v5837_v5  ;;  %vm1756_vm2 = vweird.f32 %v8077_v13 }
 0x24d   :  { %v1743_v22 = vsub.f32 1.5, %v1742_v49  ;;  %v1294_v60 = vmul.f32 %v5473_v53, %v1293_v15  ;;  %v925_v40 = vmul.f32 %v707_v56, %v5837_v5  ;;  %v206_v49 = vsel %vm103_vm0, %v8085_v46, 0.0  ;;  %vm8122_vm4 = vmor %vm1755_vm3, %vm1756_vm2 }
 0x24e   :  { %v1751_v25 = vmul.f32 %v8077_v13, %v1750_v21  ;;  %v579_v48 = vmul.f32 %v8089_v38, %v8089_v38  ;;  %v8107_v10 = vadd.f32 1e-05, %v971_v18  ;;  %v341_v21 = vsel %vm103_vm0, %v8094_v32, 0.0 }
 0x24f   :  { %v1744_v15 = vmul.f32 %v5475_v23, %v1743_v22  ;;  %v1298_v56 = vsel %vm1297_vm15, %v5473_v53, %v1294_v60  ;;  %v8101_v19 = vadd.f32 1e-05, %v925_v40 }
 0x250   :  { %v1980_v1 = vmul.f32 %v1298_v56, %v7549_v45  ;;  %v1752_v6 = vmul.f32 0.5, %v1751_v25  ;;  %v723_v53 = vsel %vm103_vm0, %v579_v48, 0.0  ;;  %vm1765_vm6 = vweird.f32 %v8107_v10 }
 0x251   :  { %v1748_v57 = vsel %vm1747_vm1, %v5475_v23, %v1744_v15  ;;  %5478 = vrsqrt.f32 %v8101_v19  ;;  %207 = vadd.xlane.f32.xlu0 %v206_v49  ;;  %724 = vadd.xlane.f32.xlu2 %v723_v53  ;;  %vm1305_vm5 = vweird.f32 %v8101_v19 }
 0x252   :  { %v2025_v22 = vmul.f32 %v1748_v57, %v7554_v14  ;;  %v1753_v60 = vsub.f32 1.5, %v1752_v6  ;;  %5480 = vrsqrt.f32 %v8107_v10  ;;  %v2123_v45 = vsel %vm103_vm0, %v1980_v1, 0 }
 0x253   :  { %342 = vadd.xlane.f32.xlu1 %v341_v21  ;;  %v193_v25 = vpop.xlane.xlu1 %192  ;;  %v8119_v18 = vand.u32 4294901760, %v2123_v45  ;;  %v8138_v21 = vld [vmem:[%s10489_s0 + $0x280] sm:$0xff] }
 0x254   :  { %v1754_v40 = vmul.f32 %v8077_v13, %v1753_v60  ;;  %v328_v23 = vpop.xlane.xlu2 %327  ;;  %v2258_v49 = vsel %vm103_vm0, %v2025_v22, 0  ;;  %v710_v56 = vpop.xlane.xlu0 %709  ;;  %v404_v48 = vmul.f32 %v5837_v5, %v193_v25 }
 0x255   :  { %11045 = vst [vmem:[#allocation81_spill] sm:$0xff] %v8119_v18  ;;  %v449_v15 = vmul.f32 %v5837_v5, %v328_v23  ;;  %v8128_v1 = vand.u32 4294901760, %v2258_v49  ;;  %v926_v6 = vmul.f32 %v710_v56, %v5837_v5  ;;  %3193 = vmatmul.f32.gmra.mxu1 %v8119_v18  ;;  %v8141_v57 = vsub.f32 %v2123_v45, %v8119_v18 }
 0x256   :  { %v1758_v58 = vsel %vm8122_vm4, %v8077_v13, %v1754_v40  ;;  %v8147_v60 = vsub.f32 %v7652_v7, %v404_v48  ;;  %v344_v13 = vsel %vm103_vm0, %v8138_v21, 0.0 }
 0x257   :  { %11048 = vst [vmem:[#allocation82_spill] sm:$0xff] %v8128_v1  ;;  %v5479_v53 = vpop.eup %5478  ;;  %v8144_v22 = vsub.f32 %v7663_v34, %v449_v15  ;;  %3373 = vmatmul.f32.gmra.mxu3 %v8128_v1  ;;  %v2026_v23 = vmul.f32 %v1758_v58, %v7564_v27  ;;  %v8154_v14 = vadd.f32 1e-05, %v926_v6  ;;  %v10677_v45 = vand.u32 4294901760, %v8141_v57 }
 0x258   :  { %11049 = vst [vmem:[#allocation83_spill] sm:$0xff] %v8141_v57  ;;  %v5481_v40 = vpop.eup %5480  ;;  %v1300_v25 = vmul.f32 %v5479_v53, %v8101_v19  ;;  %v580_v15 = vmul.f32 %v8147_v60, %v8147_v60  ;;  %v8169_v18 = vsub.f32 %v2258_v49, %v8128_v1  ;;  %vm1306_vm7 = vweird.f32 %v5479_v53 }
 0x259   :  { %v1760_v34 = vmul.f32 %v5481_v40, %v8107_v10  ;;  %v625_v7 = vmul.f32 %v8144_v22, %v8144_v22  ;;  %5482 = vrsqrt.f32 %v8154_v14  ;;  %345 = vadd.xlane.f32.xlu2 %v344_v13  ;;  %v2518_v27 = vsub.f32 %v8141_v57, %v10677_v45  ;;  %v8176_v45 = vld [vmem:[%s10489_s0 + $0x118] sm:$0xff]  ;;  %vm1307_vm9 = vmor %vm1305_vm5, %vm1306_vm7 }
 0x25a   :  { %v1301_v56 = vmul.f32 %v5479_v53, %v1300_v25  ;;  %v726_v6 = vsel %vm103_vm0, %v580_v15, 0.0  ;;  %11050 = vst [vmem:[#allocation84_spill] sm:$0xff] %v8169_v18  ;;  %v2261_v13 = vsel %vm103_vm0, %v2026_v23, 0  ;;  %v10684_v49 = vand.u32 4294901760, %v8169_v18 }
 0x25b   :  { %v1761_v48 = vmul.f32 %v5481_v40, %v1760_v34  ;;  %v861_v58 = vsel %vm103_vm0, %v625_v7, 0.0  ;;  %727 = vadd.xlane.f32.xlu0 %v726_v6  ;;  %v2519_v25 = vand.u32 4294901760, %v2518_v27  ;;  %v8180_v15 = vand.u32 4294901760, %v2261_v13 }
 0x25c   :  { %v1302_v39 = vmul.f32 0.5, %v1301_v56  ;;  %862 = vadd.xlane.f32.xlu1 %v861_v58  ;;  %v331_v7 = vpop.xlane.xlu0 %330  ;;  %vm1766_vm8 = vweird.f32 %v5481_v40  ;;  %v209_v57 = vsel %vm103_vm0, %v8176_v45, 0.0  ;;  %vm1315_vm11 = vweird.f32 %v8154_v14 }
 0x25d   :  { %v1762_v34 = vmul.f32 0.5, %v1761_v48  ;;  %11051 = vst [vmem:[#allocation85_spill] sm:$0xff] %v8180_v15  ;;  %v450_v27 = vmul.f32 %v5837_v5, %v331_v7  ;;  %2520 = vmatmul.f32.gmra.mxu0 %v2519_v25  ;;  %v2878_v48 = vsub.f32 %v8169_v18, %v10684_v49  ;;  %v8200_v44 = vsub.f32 %v2261_v13, %v8180_v15  ;;  %vm1767_vm10 = vmor %vm1765_vm6, %vm1766_vm8 }
 0x25e   :  { %v1303_v56 = vsub.f32 1.5, %v1302_v39  ;;  %v713_v58 = vpop.xlane.xlu1 %712  ;;  %v8193_v39 = vld [vmem:[%s10489_s0 + $0x288] sm:$0xff] }
 0x25f   :  { %v1763_v23 = vsub.f32 1.5, %v1762_v34  ;;  %v848_v6 = vpop.xlane.xlu2 %847  ;;  %v927_v1 = vmul.f32 %v713_v58, %v5837_v5  ;;  %3377 = vmatmul.f32.gmra.mxu3 %v8180_v15  ;;  %v5483_v7 = vpop.eup %5482  ;;  %v8197_v58 = vsub.f32 %v7737_v17, %v450_v27  ;;  %11052 = vst [vmem:[#allocation86_spill] sm:$0xff] %v8200_v44  ;;  %v2879_v13 = vand.u32 4294901760, %v2878_v48 }
 0x260   :  { %v1304_v25 = vmul.f32 %v5479_v53, %v1303_v56  ;;  %v972_v34 = vmul.f32 %v848_v6, %v5837_v5  ;;  %v1310_v18 = vmul.f32 %v5483_v7, %v8154_v14  ;;  %v347_v56 = vsel %vm103_vm0, %v8193_v39, 0.0  ;;  %v8251_v14 = vld [vmem:[%s10489_s0 + $0x120] sm:$0xff] }
 0x261   :  { %v1764_v49 = vmul.f32 %v5481_v40, %v1763_v23  ;;  %v8206_v3 = vadd.f32 1e-05, %v927_v1  ;;  %v626_v19 = vmul.f32 %v8197_v58, %v8197_v58  ;;  %2880 = vmatmul.f32.gmra.mxu2 %v2879_v13  ;;  %vm1316_vm12 = vweird.f32 %v5483_v7 }
 0x262   :  { %v1308_v50 = vsel %vm1307_vm9, %v5479_v53, %v1304_v25  ;;  %v8213_v17 = vadd.f32 1e-05, %v972_v34  ;;  %v1311_v6 = vmul.f32 %v5483_v7, %v1310_v18  ;;  %v10691_v48 = vand.u32 4294901760, %v8200_v44  ;;  %vm8234_vm13 = vmor %vm1315_vm11, %vm1316_vm12 }
 0x263   :  { %v1981_v27 = vmul.f32 %v1308_v50, %v7622_v63  ;;  %v1768_v23 = vsel %vm1767_vm10, %v5481_v40, %v1764_v49  ;;  %5484 = vrsqrt.f32 %v8206_v3  ;;  %v864_v53 = vsel %vm103_vm0, %v626_v19, 0.0  ;;  %348 = vadd.xlane.f32.xlu0 %v347_v56 }
 0x264   :  { %v2027_v1 = vmul.f32 %v1768_v23, %v7610_v2  ;;  %5486 = vrsqrt.f32 %v8213_v17  ;;  %210 = vadd.xlane.f32.xlu1 %v209_v57  ;;  %v1312_v10 = vmul.f32 0.5, %v1311_v6  ;;  %865 = vadd.xlane.f32.xlu2 %v864_v53  ;;  %v2886_v57 = vsub.f32 %v8200_v44, %v10691_v48 }
 0x265   :  { %v2126_v50 = vsel %vm103_vm0, %v1981_v27, 0  ;;  %vm1775_vm14 = vweird.f32 %v8213_v17  ;;  %vm1325_vm15 = vweird.f32 %v8206_v3 }
 0x266   :  { %v334_v63 = vpop.xlane.xlu1 %333  ;;  %v2264_v18 = vsel %vm103_vm0, %v2027_v1, 0  ;;  %v1313_v2 = vsub.f32 1.5, %v1312_v10  ;;  %v8230_v25 = vand.u32 4294901760, %v2126_v50  ;;  %v851_v13 = vpop.xlane.xlu0 %850  ;;  %v2887_v10 = vand.u32 4294901760, %v2886_v57 }
 0x267   :  { %v196_v40 = vpop.xlane.xlu2 %195  ;;  %v451_v49 = vmul.f32 %v5837_v5, %v334_v63  ;;  %v8239_v19 = vand.u32 4294901760, %v2264_v18  ;;  %v973_v6 = vmul.f32 %v851_v13, %v5837_v5  ;;  %v8255_v63 = vpop.f32.mrf.mxu3  ;;  %v212_v13 = vsel %vm103_vm0, %v8251_v14, 0.0 }
 0x268   :  { %11053 = vst [vmem:[#allocation87_spill] sm:$0xff] %v8230_v25  ;;  %v405_v56 = vmul.f32 %v5837_v5, %v196_v40  ;;  %v1314_v23 = vmul.f32 %v5483_v7, %v1313_v2  ;;  %3197 = vmatmul.f32.gmra.mxu1 %v8230_v25 }
 0x269   :  { %11056 = vst [vmem:[#allocation88_spill] sm:$0xff] %v8239_v19  ;;  %v8241_v27 = vpop.eup %5484  ;;  %v8245_v1 = vsub.f32 %v7784_v47, %v451_v49  ;;  %3381 = vmatmul.f32.gmra.mxu3 %v8239_v19  ;;  %v8269_v57 = vadd.f32 1e-05, %v973_v6  ;;  %2888 = vmatmul.f32.gmra.mxu2 %v2887_v10  ;;  %v8288_v10 = vsub.f32 %v2264_v18, %v8239_v19 }
 0x26a   :  { %v8253_v53 = vpop.eup %5486  ;;  %11057 = vst [vmem:[#allocation89_spill] sm:$0xff] %v8255_v63  ;;  %v1320_v2 = vmul.f32 %v8241_v27, %v8206_v3  ;;  %v8262_v47 = vsub.f32 %v7794_v43, %v405_v56  ;;  %v1318_v40 = vsel %vm8234_vm13, %v5483_v7, %v1314_v23  ;;  %vm1326_vm1 = vweird.f32 %v8241_v27 }
 0x26b   :  { %v1770_v49 = vmul.f32 %v8253_v53, %v8213_v17  ;;  %v1982_v48 = vmul.f32 %v1318_v40, %v7671_v30  ;;  %v627_v34 = vmul.f32 %v8245_v1, %v8245_v1  ;;  %5488 = vrsqrt.f32 %v8269_v57  ;;  %11059 = vst [vmem:[#allocation91_spill] sm:$0xff] %v8288_v10  ;;  %vm8305_vm3 = vmor %vm1325_vm15, %vm1326_vm1 }
 0x26c   :  { %v1321_v15 = vmul.f32 %v8241_v27, %v1320_v2  ;;  %v581_v43 = vmul.f32 %v8262_v47, %v8262_v47  ;;  %v8283_v56 = vsub.f32 %v2126_v50, %v8230_v25  ;;  %213 = vadd.xlane.f32.xlu2 %v212_v13  ;;  %vm1776_vm2 = vweird.f32 %v8253_v53 }
 0x26d   :  { %v1771_v7 = vmul.f32 %v8253_v53, %v1770_v49  ;;  %v867_v6 = vsel %vm103_vm0, %v627_v34, 0.0  ;;  %v2129_v49 = vsel %vm103_vm0, %v1982_v48, 0  ;;  %vm8317_vm4 = vmor %vm1775_vm14, %vm1776_vm2  ;;  %vm1785_vm5 = vweird.f32 %v8269_v57 }
 0x26e   :  { %11058 = vst [vmem:[#allocation90_spill] sm:$0xff] %v8283_v56  ;;  %v1322_v23 = vmul.f32 0.5, %v1321_v15  ;;  %v729_v30 = vsel %vm103_vm0, %v581_v43, 0.0  ;;  %868 = vadd.xlane.f32.xlu0 %v867_v6  ;;  %v10696_v40 = vand.u32 4294901760, %v8283_v56  ;;  %v8296_v15 = vld [vmem:[%s10489_s0 + $0x290] sm:$0xff]  ;;  %v199_v13 = vpop.xlane.xlu0 %198  ;;  %v8299_v18 = vand.u32 4294901760, %v2129_v49 }
 0x26f   :  { %v1772_v2 = vmul.f32 0.5, %v1771_v7  ;;  %730 = vadd.xlane.f32.xlu1 %v729_v30  ;;  %v406_v48 = vmul.f32 %v5837_v5, %v199_v13  ;;  %v11065_v13 = vand.u32 4294901760, %v8288_v10  ;;  %v8360_v7 = vpop.f32.mrf.mxu2 }
 0x270   :  { %v1323_v50 = vsub.f32 1.5, %v1322_v23  ;;  %11060 = vst [vmem:[#allocation92_spill] sm:$0xff] %v8299_v18  ;;  %v854_v30 = vpop.xlane.xlu1 %853  ;;  %v2526_v23 = vsub.f32 %v8283_v56, %v10696_v40  ;;  %3201 = vmatmul.f32.gmra.mxu1 %v8299_v18  ;;  %v350_v40 = vsel %vm103_vm0, %v8296_v15, 0.0  ;;  %v8344_v56 = vsub.f32 %v2129_v49, %v8299_v18 }
 0x271   :  { %v1773_v34 = vsub.f32 1.5, %v1772_v2  ;;  %v716_v2 = vpop.xlane.xlu2 %715  ;;  %v974_v43 = vmul.f32 %v854_v30, %v5837_v5  ;;  %v2894_v19 = vsub.f32 %v8288_v10, %v11065_v13  ;;  %v8329_v44 = vpop.eup %5488  ;;  %11067 = vst [vmem:[#allocation94_spill] sm:$0xff] %v8360_v7 }
 0x272   :  { %v1324_v3 = vmul.f32 %v8241_v27, %v1323_v50  ;;  %v928_v63 = vmul.f32 %v716_v2, %v5837_v5  ;;  %v8334_v50 = vsub.f32 %v7877_v0, %v406_v48  ;;  %v2527_v25 = vand.u32 4294901760, %v2526_v23  ;;  %11066 = vst [vmem:[#allocation93_spill] sm:$0xff] %v8344_v56 }
 0x273   :  { %v1774_v17 = vmul.f32 %v8253_v53, %v1773_v34  ;;  %v1780_v13 = vmul.f32 %v8329_v44, %v8269_v57  ;;  %v8341_v10 = vadd.f32 1e-05, %v974_v43  ;;  %v2895_v23 = vand.u32 4294901760, %v2894_v19 }
 0x274   :  { %v1328_v30 = vsel %vm8305_vm3, %v8241_v27, %v1324_v3  ;;  %v8350_v48 = vadd.f32 1e-05, %v928_v63  ;;  %2528 = vmatmul.f32.gmra.mxu0 %v2527_v25  ;;  %v8355_v27 = vld [vmem:[%s10489_s0 + $0x128] sm:$0xff]  ;;  %vm1786_vm6 = vweird.f32 %v8329_v44  ;;  %v10705_v19 = vand.u32 4294901760, %v8344_v56 }
 0x275   :  { %v1778_v34 = vsel %vm8317_vm4, %v8253_v53, %v1774_v17  ;;  %v1983_v0 = vmul.f32 %v1328_v30, %v7742_v59  ;;  %v1781_v49 = vmul.f32 %v8329_v44, %v1780_v13  ;;  %5490 = vrsqrt.f32 %v8341_v10  ;;  %2896 = vmatmul.f32.gmra.mxu2 %v2895_v23  ;;  %vm8389_vm7 = vmor %vm1785_vm5, %vm1786_vm6 }
 0x276   :  { %v2028_v43 = vmul.f32 %v1778_v34, %v7748_v51  ;;  %5492 = vrsqrt.f32 %v8350_v48  ;;  %v582_v59 = vmul.f32 %v8334_v50, %v8334_v50  ;;  %v215_v51 = vsel %vm103_vm0, %v8355_v27, 0.0 }
 0x277   :  { %351 = vadd.xlane.f32.xlu1 %v350_v40  ;;  %v1782_v25 = vmul.f32 0.5, %v1781_v49  ;;  %v2132_v53 = vsel %vm103_vm0, %v1983_v0, 0  ;;  %216 = vadd.xlane.f32.xlu0 %v215_v51  ;;  %v8375_v40 = vpop.f32.mrf.mxu3  ;;  %v2534_v13 = vsub.f32 %v8344_v56, %v10705_v19  ;;  %v8383_v0 = vpop.f32.mrf.mxu1  ;;  %v8397_v49 = vld [vmem:[%s10489_s0 + $0x298] sm:$0xff]  ;;  %vm1335_vm8 = vweird.f32 %v8350_v48 }
 0x278   :  { %v732_v63 = vsel %vm103_vm0, %v582_v59, 0.0  ;;  %v202_v6 = vpop.xlane.xlu1 %201  ;;  %v8372_v3 = vand.u32 4294901760, %v2132_v53  ;;  %v2267_v2 = vsel %vm103_vm0, %v2028_v43, 0  ;;  %11069 = vst [vmem:[#allocation96_spill] sm:$0xff] %v8375_v40  ;;  %vm1795_vm9 = vweird.f32 %v8341_v10 }
 0x279   :  { %v1783_v17 = vsub.f32 1.5, %v1782_v25  ;;  %733 = vadd.xlane.f32.xlu2 %v732_v63  ;;  %v407_v30 = vmul.f32 %v5837_v5, %v202_v6  ;;  %v8381_v34 = vand.u32 4294901760, %v2267_v2  ;;  %v337_v43 = vpop.xlane.xlu2 %336  ;;  %v2535_v19 = vand.u32 4294901760, %v2534_v13 }
 0x27a   :  { %11068 = vst [vmem:[#allocation95_spill] sm:$0xff] %v8372_v3  ;;  %3205 = vmatmul.f32.gmra.mxu1 %v8372_v3  ;;  %v8400_v59 = vsub.f32 %v2132_v53, %v8372_v3  ;;  %v452_v57 = vmul.f32 %v5837_v5, %v337_v43  ;;  %v719_v63 = vpop.xlane.xlu0 %718  ;;  %v353_v13 = vsel %vm103_vm0, %v8397_v49, 0.0 }
 0x27b   :  { %11070 = vst [vmem:[#allocation97_spill] sm:$0xff] %v8381_v34  ;;  %v8402_v25 = vpop.eup %5490  ;;  %v1784_v51 = vmul.f32 %v8329_v44, %v1783_v17  ;;  %v8407_v6 = vsub.f32 %v7929_v20, %v407_v30  ;;  %3385 = vmatmul.f32.gmra.mxu3 %v8381_v34  ;;  %v929_v17 = vmul.f32 %v719_v63, %v5837_v5 }
 0x27c   :  { %11073 = vst [vmem:[#allocation98_spill] sm:$0xff] %v8400_v59  ;;  %v8410_v40 = vpop.eup %5492  ;;  %v1790_v53 = vmul.f32 %v8402_v25, %v8341_v10  ;;  %v8423_v30 = vsub.f32 %v7947_v62, %v452_v57  ;;  %2536 = vmatmul.f32.gmra.mxu0 %v2535_v19  ;;  %v10712_v62 = vand.u32 4294901760, %v8400_v59  ;;  %v8438_v19 = vsub.f32 %v2267_v2, %v8381_v34 }
 0x27d   :  { %v1788_v43 = vsel %vm8389_vm7, %v8329_v44, %v1784_v51  ;;  %v1330_v20 = vmul.f32 %v8410_v40, %v8350_v48  ;;  %v8429_v18 = vadd.f32 1e-05, %v929_v17  ;;  %v583_v23 = vmul.f32 %v8407_v6, %v8407_v6 }
 0x27e   :  { %v2029_v7 = vmul.f32 %v1788_v43, %v7815_v12  ;;  %v1791_v3 = vmul.f32 %v8402_v25, %v1790_v53  ;;  %v628_v51 = vmul.f32 %v8423_v30, %v8423_v30  ;;  %11074 = vst [vmem:[#allocation99_spill] sm:$0xff] %v8438_v19  ;;  %vm1796_vm10 = vweird.f32 %v8402_v25 }
 0x27f   :  { %v1331_v44 = vmul.f32 %v8410_v40, %v1330_v20  ;;  %5494 = vrsqrt.f32 %v8429_v18  ;;  %v735_v12 = vsel %vm103_vm0, %v583_v23, 0.0  ;;  %vm1336_vm11 = vweird.f32 %v8410_v40  ;;  %v8450_v34 = vpop.f32.mrf.mxu3  ;;  %vm8456_vm12 = vmor %vm1795_vm9, %vm1796_vm10 }
 0x280   :  { %v1792_v57 = vmul.f32 0.5, %v1791_v3  ;;  %v870_v53 = vsel %vm103_vm0, %v628_v51, 0.0  ;;  %736 = vadd.xlane.f32.xlu0 %v735_v12  ;;  %v2542_v17 = vsub.f32 %v8400_v59, %v10712_v62  ;;  %v10713_v43 = vand.u32 4294901760, %v8438_v19  ;;  %11075 = vst [vmem:[#allocation100_spill] sm:$0xff] %v8450_v34  ;;  %vm8474_vm13 = vmor %vm1335_vm8, %vm1336_vm11  ;;  %v8486_v62 = vld [vmem:[%s10489_s0 + $0x130] sm:$0xff]  ;;  %v8488_v34 = vpop.f32.mrf.mxu0 }
 0x281   :  { %v1332_v63 = vmul.f32 0.5, %v1331_v44  ;;  %354 = vadd.xlane.f32.xlu2 %v353_v13  ;;  %871 = vadd.xlane.f32.xlu1 %v870_v53  ;;  %v857_v3 = vpop.xlane.xlu2 %856  ;;  %v2270_v20 = vsel %vm103_vm0, %v2029_v7, 0  ;;  %v8466_v7 = vld [vmem:[%s10489_s0 + $0x2a0] sm:$0xff]  ;;  %vm1345_vm14 = vweird.f32 %v8429_v18 }
 0x282   :  { %v1793_v2 = vsub.f32 1.5, %v1792_v57  ;;  %v975_v44 = vmul.f32 %v857_v3, %v5837_v5  ;;  %v340_v51 = vpop.xlane.xlu0 %339  ;;  %v2543_v57 = vand.u32 4294901760, %v2542_v17  ;;  %v8461_v12 = vand.u32 4294901760, %v2270_v20 }
 0x283   :  { %v1333_v23 = vsub.f32 1.5, %v1332_v63  ;;  %v8468_v63 = vpop.f32.mrf.mxu2  ;;  %v453_v17 = vmul.f32 %v5837_v5, %v340_v51  ;;  %v2902_v3 = vsub.f32 %v8438_v19, %v10713_v43 }
 0x284   :  { %11078 = vst [vmem:[#allocation101_spill] sm:$0xff] %v8461_v12  ;;  %v1794_v53 = vmul.f32 %v8402_v25, %v1793_v2  ;;  %2544 = vmatmul.f32.gmra.mxu0 %v2543_v57  ;;  %3389 = vmatmul.f32.gmra.mxu3 %v8461_v12  ;;  %v8495_v2 = vsub.f32 %v2270_v20, %v8461_v12  ;;  %v218_v12 = vsel %vm103_vm0, %v8486_v62, 0.0 }
 0x285   :  { %11079 = vst [vmem:[#allocation102_spill] sm:$0xff] %v8468_v63  ;;  %v1334_v48 = vmul.f32 %v8410_v40, %v1333_v23  ;;  %v8491_v63 = vadd.f32 1e-05, %v975_v44  ;;  %v5495_v51 = vpop.eup %5494  ;;  %v8501_v19 = vsub.f32 %v8009_v31, %v453_v17  ;;  %v2903_v59 = vand.u32 4294901760, %v2902_v3 }
 0x286   :  { %11082 = vst [vmem:[#allocation103_spill] sm:$0xff] %v8495_v2  ;;  %v1798_v43 = vsel %vm8456_vm12, %v8402_v25, %v1794_v53  ;;  %v356_v23 = vsel %vm103_vm0, %v8466_v7, 0.0  ;;  %v1340_v20 = vmul.f32 %v5495_v51, %v8429_v18  ;;  %vm1346_vm15 = vweird.f32 %v5495_v51 }
 0x287   :  { %v1338_v44 = vsel %vm8474_vm13, %v8410_v40, %v1334_v48  ;;  %v2030_v57 = vmul.f32 %v1798_v43, %v7870_v36  ;;  %5496 = vrsqrt.f32 %v8491_v63  ;;  %2904 = vmatmul.f32.gmra.mxu2 %v2903_v59  ;;  %v629_v31 = vmul.f32 %v8501_v19, %v8501_v19  ;;  %vm1347_vm1 = vmor %vm1345_vm14, %vm1346_vm15 }
 0x288   :  { %v1984_v25 = vmul.f32 %v1338_v44, %v7888_v8  ;;  %v1341_v13 = vmul.f32 %v5495_v51, %v1340_v20  ;;  %357 = vadd.xlane.f32.xlu0 %v356_v23  ;;  %v10720_v40 = vand.u32 4294901760, %v8495_v2  ;;  %v8534_v44 = vpop.f32.mrf.mxu3  ;;  %vm1805_vm2 = vweird.f32 %v8491_v63 }
 0x289   :  { %v2273_v36 = vsel %vm103_vm0, %v2030_v57, 0  ;;  %219 = vadd.xlane.f32.xlu1 %v218_v12  ;;  %v205_v43 = vpop.xlane.xlu2 %204  ;;  %v873_v10 = vsel %vm103_vm0, %v629_v31, 0.0  ;;  %v8532_v12 = vpop.f32.mrf.mxu1  ;;  %11087 = vst [vmem:[#allocation108_spill] sm:$0xff] %v8534_v44  ;;  %v8544_v31 = vld [vmem:[%s10489_s0 + $0x138] sm:$0xff] }
 0x28a   :  { %v2135_v8 = vsel %vm103_vm0, %v1984_v25, 0  ;;  %v8521_v53 = vand.u32 4294901760, %v2273_v36  ;;  %v1342_v59 = vmul.f32 0.5, %v1341_v13  ;;  %v408_v17 = vmul.f32 %v5837_v5, %v205_v43  ;;  %874 = vadd.xlane.f32.xlu2 %v873_v10  ;;  %11086 = vst [vmem:[#allocation107_spill] sm:$0xff] %v8532_v12 }
 0x28b   :  { %v2910_v3 = vsub.f32 %v8495_v2, %v10720_v40  ;;  %v8527_v48 = vand.u32 4294901760, %v2135_v8  ;;  %v8549_v43 = vpop.f32.mrf.mxu2 }
 0x28c   :  { %11083 = vst [vmem:[#allocation104_spill] sm:$0xff] %v8521_v53  ;;  %v8530_v23 = vsub.f32 %v2273_v36, %v8521_v53  ;;  %v1343_v57 = vsub.f32 1.5, %v1342_v59  ;;  %v8537_v20 = vsub.f32 %v8037_v28, %v408_v17  ;;  %3393 = vmatmul.f32.gmra.mxu3 %v8521_v53 }
 0x28d   :  { %11084 = vst [vmem:[#allocation105_spill] sm:$0xff] %v8527_v48  ;;  %v2911_v25 = vand.u32 4294901760, %v2910_v3  ;;  %3209 = vmatmul.f32.gmra.mxu1 %v8527_v48  ;;  %v8547_v13 = vsub.f32 %v2135_v8, %v8527_v48  ;;  %v5497_v36 = vpop.eup %5496  ;;  %v221_v8 = vsel %vm103_vm0, %v8544_v31, 0.0 }
 0x28e   :  { %11085 = vst [vmem:[#allocation106_spill] sm:$0xff] %v8530_v23  ;;  %v10727_v28 = vand.u32 4294901760, %v8530_v23  ;;  %v1344_v10 = vmul.f32 %v5495_v51, %v1343_v57  ;;  %v1800_v59 = vmul.f32 %v5497_v36, %v8491_v63  ;;  %v584_v17 = vmul.f32 %v8537_v20, %v8537_v20 }
 0x28f   :  { %11088 = vst [vmem:[#allocation109_spill] sm:$0xff] %v8547_v13  ;;  %2912 = vmatmul.f32.gmra.mxu2 %v2911_v25  ;;  %v10728_v3 = vand.u32 4294901760, %v8547_v13  ;;  %vm1806_vm3 = vweird.f32 %v5497_v36 }
 0x290   :  { %11089 = vst [vmem:[#allocation110_spill] sm:$0xff] %v8549_v43  ;;  %v2918_v40 = vsub.f32 %v8530_v23, %v10727_v28  ;;  %v1348_v18 = vsel %vm1347_vm1, %v5495_v51, %v1344_v10  ;;  %v1801_v53 = vmul.f32 %v5497_v36, %v1800_v59  ;;  %v738_v2 = vsel %vm103_vm0, %v584_v17, 0.0  ;;  %v8574_v51 = vld [vmem:[%s10489_s0 + $0x2a8] sm:$0xff]  ;;  %vm1807_vm4 = vmor %vm1805_vm2, %vm1806_vm3 }
 0x291   :  { %v1985_v57 = vmul.f32 %v1348_v18, %v7940_v33  ;;  %739 = vadd.xlane.f32.xlu1 %v738_v2  ;;  %v2550_v25 = vsub.f32 %v8547_v13, %v10728_v3  ;;  %v8576_v33 = vpop.f32.mrf.mxu0  ;;  %v8600_v3 = vpop.f32.mrf.mxu3 }
 0x292   :  { %v1802_v44 = vmul.f32 0.5, %v1801_v53  ;;  %222 = vadd.xlane.f32.xlu2 %v221_v8  ;;  %v2919_v48 = vand.u32 4294901760, %v2918_v40  ;;  %v8580_v53 = vpop.f32.mrf.mxu1  ;;  %v359_v40 = vsel %vm103_vm0, %v8574_v51, 0.0  ;;  %11096 = vst [vmem:[#allocation117_spill] sm:$0xff] %v8600_v3 }
 0x293   :  { %v2551_v43 = vand.u32 4294901760, %v2550_v25  ;;  %v2138_v28 = vsel %vm103_vm0, %v1985_v57, 0  ;;  %11091 = vst [vmem:[#allocation112_spill] sm:$0xff] %v8580_v53  ;;  %v8588_v17 = vpop.f32.mrf.mxu2 }
 0x294   :  { %v1803_v2 = vsub.f32 1.5, %v1802_v44  ;;  %v8578_v10 = vand.u32 4294901760, %v2138_v28  ;;  %11093 = vst [vmem:[#allocation114_spill] sm:$0xff] %v8588_v17 }
 0x295   :  { %2552 = vmatmul.f32.gmra.mxu0 %v2551_v43 }
 0x296   :  { %11090 = vst [vmem:[#allocation111_spill] sm:$0xff] %v8578_v10  ;;  %v1804_v63 = vmul.f32 %v5497_v36, %v1803_v2  ;;  %3213 = vmatmul.f32.gmra.mxu1 %v8578_v10  ;;  %v8586_v59 = vsub.f32 %v2138_v28, %v8578_v10 }
 0x297   :  { %2920 = vmatmul.f32.gmra.mxu2 %v2919_v48 }
 0x298   :  { %11092 = vst [vmem:[#allocation113_spill] sm:$0xff] %v8586_v59  ;;  %v1808_v8 = vsel %vm1807_vm4, %v5497_v36, %v1804_v63  ;;  %v10729_v44 = vand.u32 4294901760, %v8586_v59 }
 0x299   :  { %v2031_v18 = vmul.f32 %v1808_v8, %v7991_v24  ;;  %360 = vadd.xlane.f32.xlu1 %v359_v40  ;;  %v8598_v28 = vpop.f32.mrf.mxu0 }
 0x29a   :  { %v2558_v43 = vsub.f32 %v8586_v59, %v10729_v44  ;;  %11095 = vst [vmem:[#allocation116_spill] sm:$0xff] %v8598_v28 }
 0x29b   :  { %v2276_v57 = vsel %vm103_vm0, %v2031_v18, 0  ;;  %v8610_v40 = vpop.f32.mrf.mxu2 }
 0x29c   :  { %v2559_v25 = vand.u32 4294901760, %v2558_v43  ;;  %v8596_v2 = vand.u32 4294901760, %v2276_v57  ;;  %11098 = vst [vmem:[#allocation119_spill] sm:$0xff] %v8610_v40 }
 0x29e   :  { %11094 = vst [vmem:[#allocation115_spill] sm:$0xff] %v8596_v2  ;;  %2560 = vmatmul.f32.gmra.mxu0 %v2559_v25  ;;  %3397 = vmatmul.f32.gmra.mxu3 %v8596_v2  ;;  %v8604_v48 = vsub.f32 %v2276_v57, %v8596_v2 }
 0x2a0   :  { %11097 = vst [vmem:[#allocation118_spill] sm:$0xff] %v8604_v48  ;;  %v10734_v24 = vand.u32 4294901760, %v8604_v48 }
 0x2a2   :  { %v2926_v36 = vsub.f32 %v8604_v48, %v10734_v24 }
 0x2a4   :  { %v2927_v63 = vand.u32 4294901760, %v2926_v36 }
 0x2a6   :  { %2928 = vmatmul.f32.gmra.mxu2 %v2927_v63 }
 0x2bc   :  { %v860_v8 = vpop.xlane.xlu0 %859 }
 0x2bd   :  { %v976_v18 = vmul.f32 %v860_v8, %v5837_v5 }
 0x2be   :  { %v722_v43 = vpop.xlane.xlu1 %721 }
 0x2bf   :  { %v1064_v25 = vadd.f32 1e-05, %v976_v18  ;;  %v930_v44 = vmul.f32 %v722_v43, %v5837_v5 }
 0x2c1   :  { %5498 = vrsqrt.f32 %v1064_v25  ;;  %v1018_v57 = vadd.f32 1e-05, %v930_v44  ;;  %vm1815_vm6 = vweird.f32 %v1064_v25 }
 0x2c3   :  { %5500 = vrsqrt.f32 %v1018_v57  ;;  %vm1355_vm9 = vweird.f32 %v1018_v57 }
 0x2c4   :  { %v208_v2 = vpop.xlane.xlu0 %207  ;;  %v725_v23 = vpop.xlane.xlu2 %724 }
 0x2c5   :  { %v409_v3 = vmul.f32 %v5837_v5, %v208_v2  ;;  %v931_v24 = vmul.f32 %v725_v23, %v5837_v5 }
 0x2c6   :  { %v343_v36 = vpop.xlane.xlu1 %342 }
 0x2c7   :  { %v5499_v48 = vpop.eup %5498  ;;  %v8617_v63 = vsub.f32 %v8085_v46, %v409_v3  ;;  %v454_v8 = vmul.f32 %v5837_v5, %v343_v36  ;;  %v8620_v18 = vadd.f32 1e-05, %v931_v24 }
 0x2c8   :  { %v1810_v40 = vmul.f32 %v5499_v48, %v1064_v25  ;;  %vm1816_vm5 = vweird.f32 %v5499_v48 }
 0x2c9   :  { %v5501_v43 = vpop.eup %5500  ;;  %v8623_v44 = vsub.f32 %v8094_v32, %v454_v8  ;;  %v585_v17 = vmul.f32 %v8617_v63, %v8617_v63  ;;  %5502 = vrsqrt.f32 %v8620_v18  ;;  %vm1817_vm8 = vmor %vm1815_vm6, %vm1816_vm5  ;;  %vm1365_vm12 = vweird.f32 %v8620_v18 }
 0x2ca   :  { %v1811_v2 = vmul.f32 %v5499_v48, %v1810_v40  ;;  %v1350_v10 = vmul.f32 %v5501_v43, %v1018_v57  ;;  %vm1356_vm7 = vweird.f32 %v5501_v43 }
 0x2cb   :  { %v741_v23 = vsel %vm103_vm0, %v585_v17, 0.0  ;;  %v630_v46 = vmul.f32 %v8623_v44, %v8623_v44  ;;  %vm1357_vm10 = vmor %vm1355_vm9, %vm1356_vm7 }
 0x2cc   :  { %v1812_v3 = vmul.f32 0.5, %v1811_v2  ;;  %v1351_v36 = vmul.f32 %v5501_v43, %v1350_v10  ;;  %742 = vadd.xlane.f32.xlu2 %v741_v23  ;;  %v346_v24 = vpop.xlane.xlu2 %345  ;;  %v8640_v23 = vld [vmem:[%s10489_s0 + $0x2b0] sm:$0xff] }
 0x2cd   :  { %v876_v59 = vsel %vm103_vm0, %v630_v46, 0.0  ;;  %v455_v13 = vmul.f32 %v5837_v5, %v346_v24 }
 0x2ce   :  { %v1813_v32 = vsub.f32 1.5, %v1812_v3  ;;  %v1352_v8 = vmul.f32 0.5, %v1351_v36  ;;  %877 = vadd.xlane.f32.xlu0 %v876_v59  ;;  %v728_v40 = vpop.xlane.xlu0 %727  ;;  %v8645_v59 = vld [vmem:[%s10489_s0 + $0x140] sm:$0xff] }
 0x2cf   :  { %v863_v56 = vpop.xlane.xlu1 %862  ;;  %v5503_v17 = vpop.eup %5502  ;;  %v8634_v2 = vsub.f32 %v8138_v21, %v455_v13  ;;  %v932_v10 = vmul.f32 %v728_v40, %v5837_v5  ;;  %v362_v13 = vsel %vm103_vm0, %v8640_v23, 0.0 }
 0x2d0   :  { %v1814_v53 = vmul.f32 %v5499_v48, %v1813_v32  ;;  %v1353_v28 = vsub.f32 1.5, %v1352_v8  ;;  %v1360_v25 = vmul.f32 %v5503_v17, %v8620_v18  ;;  %v977_v21 = vmul.f32 %v863_v56, %v5837_v5 }
 0x2d1   :  { %v8652_v36 = vadd.f32 1e-05, %v932_v10  ;;  %v631_v24 = vmul.f32 %v8634_v2, %v8634_v2  ;;  %v224_v56 = vsel %vm103_vm0, %v8645_v59, 0.0  ;;  %vm1366_vm11 = vweird.f32 %v5503_v17 }
 0x2d2   :  { %v1818_v46 = vsel %vm1817_vm8, %v5499_v48, %v1814_v53  ;;  %v1354_v3 = vmul.f32 %v5501_v43, %v1353_v28  ;;  %v1361_v8 = vmul.f32 %v5503_v17, %v1360_v25  ;;  %v8658_v57 = vadd.f32 1e-05, %v977_v21  ;;  %vm1367_vm13 = vmor %vm1365_vm12, %vm1366_vm11 }
 0x2d3   :  { %v2032_v32 = vmul.f32 %v1818_v46, %v8065_v54  ;;  %5504 = vrsqrt.f32 %v8652_v36  ;;  %v879_v53 = vsel %vm103_vm0, %v631_v24, 0.0  ;;  %vm1375_vm14 = vweird.f32 %v8652_v36 }
 0x2d4   :  { %v1358_v40 = vsel %vm1357_vm10, %v5501_v43, %v1354_v3  ;;  %363 = vadd.xlane.f32.xlu2 %v362_v13  ;;  %v1362_v48 = vmul.f32 0.5, %v1361_v8  ;;  %5506 = vrsqrt.f32 %v8658_v57  ;;  %880 = vadd.xlane.f32.xlu1 %v879_v53  ;;  %v8673_v13 = vld [vmem:[%s10489_s0 + $0x148] sm:$0xff]  ;;  %vm1825_vm3 = vweird.f32 %v8658_v57 }
 0x2d5   :  { %v1986_v28 = vmul.f32 %v1358_v40, %v8069_v61  ;;  %v2279_v54 = vsel %vm103_vm0, %v2032_v32, 0  ;;  %v8675_v61 = vpop.f32.mrf.mxu1  ;;  %v8680_v32 = vpop.f32.mrf.mxu3 }
 0x2d6   :  { %225 = vadd.xlane.f32.xlu0 %v224_v56  ;;  %v1363_v10 = vsub.f32 1.5, %v1362_v48  ;;  %v8668_v43 = vand.u32 4294901760, %v2279_v54  ;;  %11100 = vst [vmem:[#allocation121_spill] sm:$0xff] %v8675_v61  ;;  %v349_v46 = vpop.xlane.xlu0 %348 }
 0x2d7   :  { %v211_v25 = vpop.xlane.xlu1 %210  ;;  %v2141_v21 = vsel %vm103_vm0, %v1986_v28, 0  ;;  %11102 = vst [vmem:[#allocation123_spill] sm:$0xff] %v8680_v32  ;;  %v866_v56 = vpop.xlane.xlu2 %865  ;;  %v456_v40 = vmul.f32 %v5837_v5, %v349_v46 }
 0x2d8   :  { %11099 = vst [vmem:[#allocation120_spill] sm:$0xff] %v8668_v43  ;;  %v410_v3 = vmul.f32 %v5837_v5, %v211_v25  ;;  %v8678_v24 = vand.u32 4294901760, %v2141_v21  ;;  %v1364_v8 = vmul.f32 %v5503_v17, %v1363_v10  ;;  %3401 = vmatmul.f32.gmra.mxu3 %v8668_v43  ;;  %v978_v28 = vmul.f32 %v866_v56, %v5837_v5 }
 0x2d9   :  { %v8685_v53 = vpop.eup %5504  ;;  %v227_v10 = vsel %vm103_vm0, %v8673_v13, 0.0  ;;  %v8703_v61 = vsub.f32 %v8193_v39, %v456_v40 }
 0x2da   :  { %11101 = vst [vmem:[#allocation122_spill] sm:$0xff] %v8678_v24  ;;  %v8690_v48 = vsub.f32 %v8176_v45, %v410_v3  ;;  %3217 = vmatmul.f32.gmra.mxu1 %v8678_v24  ;;  %v8696_v18 = vsub.f32 %v2141_v21, %v8678_v24  ;;  %v8698_v25 = vpop.eup %5506  ;;  %v1368_v46 = vsel %vm1367_vm13, %v5503_v17, %v1364_v8  ;;  %v8711_v12 = vadd.f32 1e-05, %v978_v28 }
 0x2db   :  { %v1370_v32 = vmul.f32 %v8685_v53, %v8652_v36  ;;  %v8706_v45 = vsub.f32 %v2279_v54, %v8668_v43  ;;  %v1987_v3 = vmul.f32 %v1368_v46, %v8089_v38  ;;  %v1820_v56 = vmul.f32 %v8698_v25, %v8658_v57 }
 0x2dc   :  { %11103 = vst [vmem:[#allocation124_spill] sm:$0xff] %v8696_v18  ;;  %228 = vadd.xlane.f32.xlu1 %v227_v10  ;;  %v632_v17 = vmul.f32 %v8703_v61, %v8703_v61  ;;  %v586_v39 = vmul.f32 %v8690_v48, %v8690_v48  ;;  %5508 = vrsqrt.f32 %v8711_v12  ;;  %v10749_v38 = vand.u32 4294901760, %v8696_v18 }
 0x2dd   :  { %11104 = vst [vmem:[#allocation125_spill] sm:$0xff] %v8706_v45  ;;  %v1371_v21 = vmul.f32 %v8685_v53, %v1370_v32  ;;  %v1821_v8 = vmul.f32 %v8698_v25, %v1820_v56  ;;  %v10756_v32 = vand.u32 4294901760, %v8706_v45  ;;  %v2144_v56 = vsel %vm103_vm0, %v1987_v3, 0 }
 0x2de   :  { %v882_v40 = vsel %vm103_vm0, %v632_v17, 0.0  ;;  %v744_v28 = vsel %vm103_vm0, %v586_v39, 0.0  ;;  %v2566_v46 = vsub.f32 %v8696_v18, %v10749_v38  ;;  %vm1376_vm15 = vweird.f32 %v8685_v53  ;;  %v8737_v18 = vpop.f32.mrf.mxu1 }
 0x2df   :  { %v1372_v54 = vmul.f32 0.5, %v1371_v21  ;;  %v1822_v10 = vmul.f32 0.5, %v1821_v8  ;;  %883 = vadd.xlane.f32.xlu2 %v882_v40  ;;  %745 = vadd.xlane.f32.xlu0 %v744_v28  ;;  %v214_v21 = vpop.xlane.xlu2 %213  ;;  %v2934_v17 = vsub.f32 %v8706_v45, %v10756_v32  ;;  %v8733_v39 = vand.u32 4294901760, %v2144_v56  ;;  %11106 = vst [vmem:[#allocation127_spill] sm:$0xff] %v8737_v18  ;;  %vm1377_vm2 = vmor %vm1375_vm14, %vm1376_vm15 }
 0x2e0   :  { %vm1826_vm1 = vweird.f32 %v8698_v25  ;;  %v411_v8 = vmul.f32 %v5837_v5, %v214_v21  ;;  %v2567_v38 = vand.u32 4294901760, %v2566_v46  ;;  %v8756_v21 = vpop.f32.mrf.mxu2  ;;  %vm1835_vm5 = vweird.f32 %v8711_v12 }
 0x2e1   :  { %v1373_v43 = vsub.f32 1.5, %v1372_v54  ;;  %11105 = vst [vmem:[#allocation126_spill] sm:$0xff] %v8733_v39  ;;  %v1823_v24 = vsub.f32 1.5, %v1822_v10  ;;  %v869_v40 = vpop.xlane.xlu0 %868  ;;  %v2935_v29 = vand.u32 4294901760, %v2934_v17  ;;  %v8745_v10 = vpop.f32.mrf.mxu0  ;;  %vm1827_vm4 = vmor %vm1825_vm3, %vm1826_vm1 }
 0x2e2   :  { %v731_v28 = vpop.xlane.xlu1 %730  ;;  %v979_v54 = vmul.f32 %v869_v40, %v5837_v5  ;;  %3221 = vmatmul.f32.gmra.mxu1 %v8733_v39  ;;  %v8743_v32 = vpop.eup %5508  ;;  %2568 = vmatmul.f32.gmra.mxu0 %v2567_v38  ;;  %11107 = vst [vmem:[#allocation128_spill] sm:$0xff] %v8756_v21 }
 0x2e3   :  { %v1374_v3 = vmul.f32 %v8685_v53, %v1373_v43  ;;  %v933_v11 = vmul.f32 %v731_v28, %v5837_v5  ;;  %v1824_v46 = vmul.f32 %v8698_v25, %v1823_v24  ;;  %v8754_v43 = vsub.f32 %v8251_v14, %v411_v8  ;;  %2936 = vmatmul.f32.gmra.mxu2 %v2935_v29  ;;  %v8777_v8 = vld [vmem:[%s10489_s0 + $0x150] sm:$0xff]  ;;  %v8782_v29 = vld [vmem:[%s10489_s0 + $0x2b8] sm:$0xff] }
 0x2e4   :  { %v1830_v40 = vmul.f32 %v8743_v32, %v8711_v12  ;;  %v8763_v36 = vadd.f32 1e-05, %v979_v54  ;;  %v8766_v24 = vsub.f32 %v2144_v56, %v8733_v39  ;;  %vm1836_vm6 = vweird.f32 %v8743_v32 }
 0x2e5   :  { %v1378_v17 = vsel %vm1377_vm2, %v8685_v53, %v1374_v3  ;;  %v1828_v57 = vsel %vm1827_vm4, %v8698_v25, %v1824_v46  ;;  %v8770_v38 = vadd.f32 1e-05, %v933_v11  ;;  %v587_v53 = vmul.f32 %v8754_v43, %v8754_v43  ;;  %vm8810_vm7 = vmor %vm1835_vm5, %vm1836_vm6 }
 0x2e6   :  { %11108 = vst [vmem:[#allocation129_spill] sm:$0xff] %v8766_v24  ;;  %v1988_v14 = vmul.f32 %v1378_v17, %v8147_v60  ;;  %v2033_v56 = vmul.f32 %v1828_v57, %v8144_v22  ;;  %v1831_v60 = vmul.f32 %v8743_v32, %v1830_v40  ;;  %5510 = vrsqrt.f32 %v8763_v36 }
 0x2e7   :  { %5512 = vrsqrt.f32 %v8770_v38  ;;  %v747_v11 = vsel %vm103_vm0, %v587_v53, 0.0  ;;  %v230_v28 = vsel %vm103_vm0, %v8777_v8, 0.0  ;;  %v365_v22 = vsel %vm103_vm0, %v8782_v29, 0.0 }
 0x2e8   :  { %v1832_v25 = vmul.f32 0.5, %v1831_v60  ;;  %748 = vadd.xlane.f32.xlu1 %v747_v11  ;;  %v10757_v3 = vand.u32 4294901760, %v8766_v24  ;;  %231 = vadd.xlane.f32.xlu2 %v230_v28  ;;  %v2147_v46 = vsel %vm103_vm0, %v1988_v14, 0  ;;  %v2282_v17 = vsel %vm103_vm0, %v2033_v56, 0  ;;  %v8804_v11 = vpop.f32.mrf.mxu3 }
 0x2e9   :  { %366 = vadd.xlane.f32.xlu0 %v365_v22  ;;  %v8802_v60 = vand.u32 4294901760, %v2147_v46  ;;  %11110 = vst [vmem:[#allocation131_spill] sm:$0xff] %v8804_v11  ;;  %v8814_v56 = vand.u32 4294901760, %v2282_v17  ;;  %vm1845_vm8 = vweird.f32 %v8763_v36  ;;  %vm1385_vm9 = vweird.f32 %v8770_v38 }
 0x2ea   :  { %v352_v54 = vpop.xlane.xlu1 %351  ;;  %v1833_v40 = vsub.f32 1.5, %v1832_v25  ;;  %v2574_v53 = vsub.f32 %v8766_v24, %v10757_v3  ;;  %v217_v14 = vpop.xlane.xlu0 %216  ;;  %v8819_v25 = vld [vmem:[%s10489_s0 + $0x158] sm:$0xff] }
 0x2eb   :  { %v457_v57 = vmul.f32 %v5837_v5, %v352_v54  ;;  %11109 = vst [vmem:[#allocation130_spill] sm:$0xff] %v8802_v60  ;;  %v8823_v54 = vpop.f32.mrf.mxu1  ;;  %v412_v12 = vmul.f32 %v5837_v5, %v217_v14  ;;  %3225 = vmatmul.f32.gmra.mxu1 %v8802_v60  ;;  %v8833_v24 = vpop.f32.mrf.mxu0  ;;  %3405 = vmatmul.f32.gmra.mxu3 %v8814_v56 }
 0x2ec   :  { %11113 = vst [vmem:[#allocation132_spill] sm:$0xff] %v8814_v56  ;;  %v8821_v22 = vpop.eup %5510  ;;  %v1834_v3 = vmul.f32 %v8743_v32, %v1833_v40  ;;  %v734_v45 = vpop.xlane.xlu2 %733  ;;  %v2575_v21 = vand.u32 4294901760, %v2574_v53  ;;  %v8841_v14 = vsub.f32 %v2147_v46, %v8802_v60 }
 0x2ed   :  { %11114 = vst [vmem:[#allocation133_spill] sm:$0xff] %v8823_v54  ;;  %v8828_v11 = vsub.f32 %v8296_v15, %v457_v57  ;;  %v8831_v39 = vpop.eup %5512  ;;  %v1840_v18 = vmul.f32 %v8821_v22, %v8763_v36  ;;  %v934_v40 = vmul.f32 %v734_v45, %v5837_v5  ;;  %v8849_v53 = vsub.f32 %v8355_v27, %v412_v12 }
 0x2ee   :  { %11115 = vst [vmem:[#allocation134_spill] sm:$0xff] %v8833_v24  ;;  %v1838_v15 = vsel %vm8810_vm7, %v8743_v32, %v1834_v3  ;;  %v1380_v57 = vmul.f32 %v8831_v39, %v8770_v38  ;;  %2576 = vmatmul.f32.gmra.mxu0 %v2575_v21  ;;  %v233_v54 = vsel %vm103_vm0, %v8819_v25, 0.0  ;;  %v10764_v21 = vand.u32 4294901760, %v8841_v14 }
 0x2ef   :  { %11116 = vst [vmem:[#allocation135_spill] sm:$0xff] %v8841_v14  ;;  %v2034_v45 = vmul.f32 %v1838_v15, %v8197_v58  ;;  %v1841_v24 = vmul.f32 %v8821_v22, %v1840_v18  ;;  %v8856_v46 = vadd.f32 1e-05, %v934_v40  ;;  %v588_v3 = vmul.f32 %v8849_v53, %v8849_v53 }
 0x2f0   :  { %v1381_v32 = vmul.f32 %v8831_v39, %v1380_v57  ;;  %v633_v27 = vmul.f32 %v8828_v11, %v8828_v11  ;;  %vm1846_vm10 = vweird.f32 %v8821_v22  ;;  %234 = vadd.xlane.f32.xlu2 %v233_v54  ;;  %v8867_v58 = vsub.f32 %v2282_v17, %v8814_v56 }
 0x2f1   :  { %v1842_v28 = vmul.f32 0.5, %v1841_v24  ;;  %5514 = vrsqrt.f32 %v8856_v46  ;;  %vm1386_vm11 = vweird.f32 %v8831_v39  ;;  %v750_v12 = vsel %vm103_vm0, %v588_v3, 0.0  ;;  %vm8879_vm12 = vmor %vm1845_vm8, %vm1846_vm10 }
 0x2f2   :  { %11117 = vst [vmem:[#allocation136_spill] sm:$0xff] %v8867_v58  ;;  %v1382_v18 = vmul.f32 0.5, %v1381_v32  ;;  %v885_v40 = vsel %vm103_vm0, %v633_v27, 0.0  ;;  %751 = vadd.xlane.f32.xlu1 %v750_v12  ;;  %v2582_v24 = vsub.f32 %v8841_v14, %v10764_v21  ;;  %v2285_v54 = vsel %vm103_vm0, %v2034_v45, 0  ;;  %v8885_v12 = vpop.f32.mrf.mxu3  ;;  %vm8892_vm13 = vmor %vm1385_vm9, %vm1386_vm11 }
 0x2f3   :  { %v1843_v15 = vsub.f32 1.5, %v1842_v28  ;;  %886 = vadd.xlane.f32.xlu0 %v885_v40  ;;  %v737_v27 = vpop.xlane.xlu0 %736  ;;  %v8883_v28 = vand.u32 4294901760, %v2285_v54  ;;  %11121 = vst [vmem:[#allocation138_spill] sm:$0xff] %v8885_v12  ;;  %v8904_v14 = vpop.f32.mrf.mxu0  ;;  %vm1395_vm14 = vweird.f32 %v8856_v46 }
 0x2f4   :  { %v1383_v32 = vsub.f32 1.5, %v1382_v18  ;;  %v355_v3 = vpop.xlane.xlu2 %354  ;;  %v935_v18 = vmul.f32 %v737_v27, %v5837_v5  ;;  %v872_v21 = vpop.xlane.xlu1 %871  ;;  %v2583_v57 = vand.u32 4294901760, %v2582_v24 }
 0x2f5   :  { %11120 = vst [vmem:[#allocation137_spill] sm:$0xff] %v8883_v28  ;;  %v1844_v40 = vmul.f32 %v8821_v22, %v1843_v15  ;;  %v458_v36 = vmul.f32 %v5837_v5, %v355_v3  ;;  %v980_v12 = vmul.f32 %v872_v21, %v5837_v5  ;;  %v11124_v15 = vand.u32 4294901760, %v8867_v58  ;;  %3409 = vmatmul.f32.gmra.mxu3 %v8883_v28 }
 0x2f6   :  { %v1384_v56 = vmul.f32 %v8831_v39, %v1383_v32  ;;  %v8912_v24 = vadd.f32 1e-05, %v935_v18  ;;  %2584 = vmatmul.f32.gmra.mxu0 %v2583_v57  ;;  %v8915_v21 = vsub.f32 %v2285_v54, %v8883_v28  ;;  %v8917_v32 = vpop.f32.mrf.mxu2 }
 0x2f7   :  { %v2942_v60 = vsub.f32 %v8867_v58, %v11124_v15  ;;  %v5515_v38 = vpop.eup %5514  ;;  %v1848_v3 = vsel %vm8879_vm12, %v8821_v22, %v1844_v40  ;;  %v8910_v27 = vsub.f32 %v8397_v49, %v458_v36  ;;  %11126 = vst [vmem:[#allocation140_spill] sm:$0xff] %v8917_v32  ;;  %v8926_v49 = vadd.f32 1e-05, %v980_v12 }
 0x2f8   :  { %11125 = vst [vmem:[#allocation139_spill] sm:$0xff] %v8915_v21  ;;  %v2035_v15 = vmul.f32 %v1848_v3, %v8245_v1  ;;  %v1388_v58 = vsel %vm8892_vm13, %v8831_v39, %v1384_v56  ;;  %v1390_v17 = vmul.f32 %v5515_v38, %v8856_v46  ;;  %5516 = vrsqrt.f32 %v8912_v24 }
 0x2f9   :  { %v1989_v22 = vmul.f32 %v1388_v58, %v8262_v47  ;;  %v2943_v40 = vand.u32 4294901760, %v2942_v60  ;;  %v634_v54 = vmul.f32 %v8910_v27, %v8910_v27  ;;  %vm1396_vm15 = vweird.f32 %v5515_v38  ;;  %v8936_v60 = vpop.f32.mrf.mxu1 }
 0x2fa   :  { %v1391_v57 = vmul.f32 %v5515_v38, %v1390_v17  ;;  %5518 = vrsqrt.f32 %v8926_v49  ;;  %v10773_v1 = vand.u32 4294901760, %v8915_v21  ;;  %v2288_v12 = vsel %vm103_vm0, %v2035_v15, 0  ;;  %v8949_v15 = vpop.f32.mrf.mxu3  ;;  %vm8954_vm1 = vmor %vm1395_vm14, %vm1396_vm15 }
 0x2fb   :  { %2944 = vmatmul.f32.gmra.mxu2 %v2943_v40  ;;  %v358_v56 = vpop.xlane.xlu0 %357  ;;  %v888_v47 = vsel %vm103_vm0, %v634_v54, 0.0  ;;  %v2150_v58 = vsel %vm103_vm0, %v1989_v22, 0  ;;  %v8944_v17 = vand.u32 4294901760, %v2288_v12  ;;  %11129 = vst [vmem:[#allocation143_spill] sm:$0xff] %v8949_v15  ;;  %vm1405_vm2 = vweird.f32 %v8912_v24 }
 0x2fc   :  { %v1392_v39 = vmul.f32 0.5, %v1391_v57  ;;  %v459_v45 = vmul.f32 %v5837_v5, %v358_v56  ;;  %889 = vadd.xlane.f32.xlu0 %v888_v47  ;;  %v220_v36 = vpop.xlane.xlu1 %219  ;;  %v2950_v18 = vsub.f32 %v8915_v21, %v10773_v1  ;;  %v8942_v3 = vand.u32 4294901760, %v2150_v58 }
 0x2fd   :  { %11128 = vst [vmem:[#allocation142_spill] sm:$0xff] %v8944_v17  ;;  %v875_v40 = vpop.xlane.xlu2 %874  ;;  %v413_v22 = vmul.f32 %v5837_v5, %v220_v36  ;;  %3413 = vmatmul.f32.gmra.mxu3 %v8944_v17  ;;  %v8978_v32 = vsub.f32 %v2288_v12, %v8944_v17  ;;  %vm1855_vm4 = vweird.f32 %v8926_v49  ;;  %v8999_v17 = vpop.f32.mrf.mxu0 }
 0x2fe   :  { %11127 = vst [vmem:[#allocation141_spill] sm:$0xff] %v8942_v3  ;;  %v1393_v57 = vsub.f32 1.5, %v1392_v39  ;;  %v8947_v54 = vpop.eup %5516  ;;  %v981_v47 = vmul.f32 %v875_v40, %v5837_v5  ;;  %v8960_v1 = vsub.f32 %v8466_v7, %v459_v45  ;;  %3229 = vmatmul.f32.gmra.mxu1 %v8942_v3  ;;  %v8965_v39 = vsub.f32 %v2150_v58, %v8942_v3  ;;  %v8980_v58 = vpop.f32.mrf.mxu2 }
 0x2ff   :  { %v1400_v46 = vmul.f32 %v8947_v54, %v8912_v24  ;;  %v8970_v28 = vsub.f32 %v8486_v62, %v413_v22  ;;  %v2951_v21 = vand.u32 4294901760, %v2950_v18  ;;  %11133 = vst [vmem:[#allocation145_spill] sm:$0xff] %v8978_v32  ;;  %vm1406_vm3 = vweird.f32 %v8947_v54 }
 0x300   :  { %11132 = vst [vmem:[#allocation144_spill] sm:$0xff] %v8965_v39  ;;  %v1394_v36 = vmul.f32 %v5515_v38, %v1393_v57  ;;  %v5519_v15 = vpop.eup %5518  ;;  %v8972_v40 = vadd.f32 1e-05, %v981_v47  ;;  %v635_v7 = vmul.f32 %v8960_v1, %v8960_v1  ;;  %v10782_v45 = vand.u32 4294901760, %v8965_v39  ;;  %vm9009_vm6 = vmor %vm1405_vm2, %vm1406_vm3 }
 0x301   :  { %11134 = vst [vmem:[#allocation146_spill] sm:$0xff] %v8980_v58  ;;  %v1401_v62 = vmul.f32 %v8947_v54, %v1400_v46  ;;  %v1850_v18 = vmul.f32 %v5519_v15, %v8926_v49  ;;  %vm1856_vm5 = vweird.f32 %v5519_v15  ;;  %v10785_v46 = vand.u32 4294901760, %v8978_v32  ;;  %v9003_v3 = vpop.f32.mrf.mxu1 }
 0x302   :  { %v1398_v57 = vsel %vm8954_vm1, %v5515_v38, %v1394_v36  ;;  %5520 = vrsqrt.f32 %v8972_v40  ;;  %v891_v56 = vsel %vm103_vm0, %v635_v7, 0.0  ;;  %v589_v38 = vmul.f32 %v8970_v28, %v8970_v28  ;;  %11135 = vst [vmem:[#allocation147_spill] sm:$0xff] %v9003_v3  ;;  %vm9025_vm7 = vmor %vm1855_vm4, %vm1856_vm5 }
 0x303   :  { %v1990_v22 = vmul.f32 %v1398_v57, %v8334_v50  ;;  %v1402_v12 = vmul.f32 0.5, %v1401_v62  ;;  %v1851_v47 = vmul.f32 %v5519_v15, %v1850_v18  ;;  %2952 = vmatmul.f32.gmra.mxu2 %v2951_v21  ;;  %892 = vadd.xlane.f32.xlu2 %v891_v56  ;;  %v2590_v50 = vsub.f32 %v8965_v39, %v10782_v45 }
 0x304   :  { %v740_v36 = vpop.xlane.xlu1 %739  ;;  %v753_v7 = vsel %vm103_vm0, %v589_v38, 0.0  ;;  %vm1865_vm8 = vweird.f32 %v8972_v40 }
 0x305   :  { %v2153_v57 = vsel %vm103_vm0, %v1990_v22, 0  ;;  %v1403_v62 = vsub.f32 1.5, %v1402_v12  ;;  %v1852_v21 = vmul.f32 0.5, %v1851_v47  ;;  %v223_v18 = vpop.xlane.xlu2 %222  ;;  %v936_v58 = vmul.f32 %v740_v36, %v5837_v5  ;;  %754 = vadd.xlane.f32.xlu1 %v753_v7 }
 0x306   :  { %v414_v22 = vmul.f32 %v5837_v5, %v223_v18  ;;  %v2591_v12 = vand.u32 4294901760, %v2590_v50  ;;  %v2958_v47 = vsub.f32 %v8978_v32, %v10785_v46  ;;  %v9017_v38 = vand.u32 4294901760, %v2153_v57 }
 0x307   :  { %v1404_v36 = vmul.f32 %v8947_v54, %v1403_v62  ;;  %v1853_v45 = vsub.f32 1.5, %v1852_v21  ;;  %v9020_v39 = vadd.f32 1e-05, %v936_v58 }
 0x308   :  { %11138 = vst [vmem:[#allocation148_spill] sm:$0xff] %v9017_v38  ;;  %v5521_v24 = vpop.eup %5520  ;;  %v9030_v50 = vsub.f32 %v8544_v31, %v414_v22  ;;  %2592 = vmatmul.f32.gmra.mxu0 %v2591_v12  ;;  %v2959_v18 = vand.u32 4294901760, %v2958_v47  ;;  %3233 = vmatmul.f32.gmra.mxu1 %v9017_v38  ;;  %v9034_v62 = vsub.f32 %v2153_v57, %v9017_v38  ;;  %v9044_v22 = vpop.f32.mrf.mxu2 }
 0x309   :  { %v1408_v58 = vsel %vm9009_vm6, %v8947_v54, %v1404_v36  ;;  %v1854_v21 = vmul.f32 %v5519_v15, %v1853_v45  ;;  %v1860_v49 = vmul.f32 %v5521_v24, %v8972_v40  ;;  %5522 = vrsqrt.f32 %v9020_v39  ;;  %11142 = vst [vmem:[#allocation150_spill] sm:$0xff] %v9044_v22 }
 0x30a   :  { %11141 = vst [vmem:[#allocation149_spill] sm:$0xff] %v9034_v62  ;;  %v1991_v7 = vmul.f32 %v1408_v58, %v8407_v6  ;;  %v590_v31 = vmul.f32 %v9030_v50, %v9030_v50  ;;  %v10786_v54 = vand.u32 4294901760, %v9034_v62  ;;  %vm1866_vm9 = vweird.f32 %v5521_v24 }
 0x30b   :  { %v1858_v57 = vsel %vm9025_vm7, %v5519_v15, %v1854_v21  ;;  %v1861_v12 = vmul.f32 %v5521_v24, %v1860_v49  ;;  %2960 = vmatmul.f32.gmra.mxu2 %v2959_v18  ;;  %v9060_v21 = vpop.f32.mrf.mxu0  ;;  %vm1867_vm10 = vmor %vm1865_vm8, %vm1866_vm9  ;;  %vm1415_vm11 = vweird.f32 %v9020_v39 }
 0x30c   :  { %v2036_v45 = vmul.f32 %v1858_v57, %v8423_v30  ;;  %v756_v6 = vsel %vm103_vm0, %v590_v31, 0.0  ;;  %v361_v56 = vpop.xlane.xlu1 %360  ;;  %v2156_v47 = vsel %vm103_vm0, %v1991_v7, 0  ;;  %v2598_v3 = vsub.f32 %v9034_v62, %v10786_v54  ;;  %v9062_v30 = vpop.f32.mrf.mxu3 }
 0x30d   :  { %v1862_v36 = vmul.f32 0.5, %v1861_v12  ;;  %757 = vadd.xlane.f32.xlu0 %v756_v6  ;;  %v460_v58 = vmul.f32 %v5837_v5, %v361_v56  ;;  %v9057_v15 = vand.u32 4294901760, %v2156_v47  ;;  %11144 = vst [vmem:[#allocation152_spill] sm:$0xff] %v9062_v30  ;;  %v9069_v6 = vpop.f32.mrf.mxu1 }
 0x30e   :  { %v2291_v18 = vsel %vm103_vm0, %v2036_v45, 0  ;;  %v2599_v7 = vand.u32 4294901760, %v2598_v3 }
 0x30f   :  { %11143 = vst [vmem:[#allocation151_spill] sm:$0xff] %v9057_v15  ;;  %v1863_v49 = vsub.f32 1.5, %v1862_v36  ;;  %v9065_v31 = vsub.f32 %v8574_v51, %v460_v58  ;;  %v9067_v57 = vand.u32 4294901760, %v2291_v18  ;;  %v5523_v12 = vpop.eup %5522  ;;  %v9076_v45 = vsub.f32 %v2156_v47, %v9057_v15 }
 0x310   :  { %3237 = vmatmul.f32.gmra.mxu1 %v9057_v15  ;;  %v1410_v36 = vmul.f32 %v5523_v12, %v9020_v39  ;;  %2600 = vmatmul.f32.gmra.mxu0 %v2599_v7  ;;  %vm1416_vm12 = vweird.f32 %v5523_v12 }
 0x311   :  { %11145 = vst [vmem:[#allocation153_spill] sm:$0xff] %v9067_v57  ;;  %v1864_v56 = vmul.f32 %v5521_v24, %v1863_v49  ;;  %3417 = vmatmul.f32.gmra.mxu3 %v9067_v57  ;;  %v636_v51 = vmul.f32 %v9065_v31, %v9065_v31  ;;  %v10790_v58 = vand.u32 4294901760, %v9076_v45  ;;  %v9084_v3 = vsub.f32 %v2291_v18, %v9067_v57  ;;  %vm1417_vm13 = vmor %vm1415_vm11, %vm1416_vm12 }
 0x312   :  { %11146 = vst [vmem:[#allocation154_spill] sm:$0xff] %v9076_v45  ;;  %v1411_v46 = vmul.f32 %v5523_v12, %v1410_v36  ;;  %v9099_v36 = vpop.f32.mrf.mxu2 }
 0x313   :  { %11147 = vst [vmem:[#allocation155_spill] sm:$0xff] %v9084_v3  ;;  %v1868_v40 = vsel %vm1867_vm10, %v5521_v24, %v1864_v56  ;;  %v894_v47 = vsel %vm103_vm0, %v636_v51, 0.0  ;;  %v2606_v49 = vsub.f32 %v9076_v45, %v10790_v58  ;;  %v10789_v7 = vand.u32 4294901760, %v9084_v3 }
 0x314   :  { %v2037_v54 = vmul.f32 %v1868_v40, %v8501_v19  ;;  %v1412_v32 = vmul.f32 0.5, %v1411_v46  ;;  %895 = vadd.xlane.f32.xlu1 %v894_v47  ;;  %11149 = vst [vmem:[#allocation157_spill] sm:$0xff] %v9099_v36  ;;  %v9101_v40 = vpop.f32.mrf.mxu0  ;;  %v9103_v46 = vpop.f32.mrf.mxu3 }
 0x315   :  { %v2607_v30 = vand.u32 4294901760, %v2606_v49  ;;  %v2966_v24 = vsub.f32 %v9084_v3, %v10789_v7  ;;  %11150 = vst [vmem:[#allocation158_spill] sm:$0xff] %v9103_v46 }
 0x316   :  { %v2294_v19 = vsel %vm103_vm0, %v2037_v54, 0  ;;  %v1413_v18 = vsub.f32 1.5, %v1412_v32 }
 0x317   :  { %v9097_v56 = vand.u32 4294901760, %v2294_v19  ;;  %v2967_v51 = vand.u32 4294901760, %v2966_v24 }
 0x318   :  { %v1414_v39 = vmul.f32 %v5523_v12, %v1413_v18  ;;  %2608 = vmatmul.f32.gmra.mxu0 %v2607_v30  ;;  %v9117_v30 = vpop.f32.mrf.mxu1 }
 0x319   :  { %11148 = vst [vmem:[#allocation156_spill] sm:$0xff] %v9097_v56  ;;  %3421 = vmatmul.f32.gmra.mxu3 %v9097_v56  ;;  %v9107_v47 = vsub.f32 %v2294_v19, %v9097_v56  ;;  %2968 = vmatmul.f32.gmra.mxu2 %v2967_v51 }
 0x31a   :  { %v1418_v54 = vsel %vm1417_vm13, %v5523_v12, %v1414_v39  ;;  %v9123_v12 = vpop.f32.mrf.mxu2 }
 0x31b   :  { %11151 = vst [vmem:[#allocation159_spill] sm:$0xff] %v9107_v47  ;;  %v10791_v32 = vand.u32 4294901760, %v9107_v47  ;;  %v1992_v49 = vmul.f32 %v1418_v54, %v8537_v20 }
 0x31c   :  { %11154 = vst [vmem:[#allocation162_spill] sm:$0xff] %v9123_v12  ;;  %v9129_v54 = vpop.f32.mrf.mxu0 }
 0x31d   :  { %v2974_v24 = vsub.f32 %v9107_v47, %v10791_v32  ;;  %v2159_v7 = vsel %vm103_vm0, %v1992_v49, 0 }
 0x31e   :  { %v9115_v18 = vand.u32 4294901760, %v2159_v7 }
 0x31f   :  { %v2975_v58 = vand.u32 4294901760, %v2974_v24 }
 0x320   :  { %11152 = vst [vmem:[#allocation160_spill] sm:$0xff] %v9115_v18  ;;  %3241 = vmatmul.f32.gmra.mxu1 %v9115_v18  ;;  %v9121_v19 = vsub.f32 %v2159_v7, %v9115_v18  ;;  %v9141_v36 = vpop.f32.mrf.mxu1 }
 0x321   :  { %2976 = vmatmul.f32.gmra.mxu2 %v2975_v58  ;;  %11155 = vst [vmem:[#allocation163_spill] sm:$0xff] %v9141_v36 }
 0x322   :  { %11153 = vst [vmem:[#allocation161_spill] sm:$0xff] %v9121_v19  ;;  %v10800_v20 = vand.u32 4294901760, %v9121_v19 }
 0x324   :  { %v2614_v51 = vsub.f32 %v9121_v19, %v10800_v20  ;;  %v9154_v19 = vpop.f32.mrf.mxu3 }
 0x325   :  { %11156 = vst [vmem:[#allocation164_spill] sm:$0xff] %v9154_v19 }
 0x326   :  { %v2615_v39 = vand.u32 4294901760, %v2614_v51 }
 0x328   :  { %2616 = vmatmul.f32.gmra.mxu0 %v2615_v39 }
 0x33f   :  { %v743_v49 = vpop.xlane.xlu2 %742 }
 0x340   :  { %v937_v24 = vmul.f32 %v743_v49, %v5837_v5 }
 0x341   :  { %v878_v32 = vpop.xlane.xlu0 %877 }
 0x342   :  { %v1025_v56 = vadd.f32 1e-05, %v937_v24  ;;  %v982_v7 = vmul.f32 %v878_v32, %v5837_v5 }
 0x344   :  { %5524 = vrsqrt.f32 %v1025_v56  ;;  %v1070_v57 = vadd.f32 1e-05, %v982_v7  ;;  %vm1425_vm15 = vweird.f32 %v1025_v56 }
 0x346   :  { %5526 = vrsqrt.f32 %v1070_v57  ;;  %vm1875_vm3 = vweird.f32 %v1070_v57 }
 0x347   :  { %v364_v58 = vpop.xlane.xlu2 %363  ;;  %v881_v3 = vpop.xlane.xlu1 %880 }
 0x348   :  { %v461_v47 = vmul.f32 %v5837_v5, %v364_v58  ;;  %v983_v51 = vmul.f32 %v881_v3, %v5837_v5 }
 0x349   :  { %v226_v46 = vpop.xlane.xlu0 %225 }
 0x34a   :  { %v5525_v20 = vpop.eup %5524  ;;  %v9136_v39 = vsub.f32 %v8640_v23, %v461_v47  ;;  %v415_v49 = vmul.f32 %v5837_v5, %v226_v46  ;;  %v9139_v24 = vadd.f32 1e-05, %v983_v51 }
 0x34b   :  { %v1420_v12 = vmul.f32 %v5525_v20, %v1025_v56  ;;  %vm1426_vm14 = vweird.f32 %v5525_v20 }
 0x34c   :  { %v5527_v32 = vpop.eup %5526  ;;  %v9144_v7 = vsub.f32 %v8645_v59, %v415_v49  ;;  %v637_v58 = vmul.f32 %v9136_v39, %v9136_v39  ;;  %5528 = vrsqrt.f32 %v9139_v24  ;;  %vm1427_vm2 = vmor %vm1425_vm15, %vm1426_vm14  ;;  %vm1885_vm6 = vweird.f32 %v9139_v24 }
 0x34d   :  { %v1421_v22 = vmul.f32 %v5525_v20, %v1420_v12  ;;  %v1870_v3 = vmul.f32 %v5527_v32, %v1070_v57  ;;  %vm1876_vm1 = vweird.f32 %v5527_v32 }
 0x34e   :  { %v591_v23 = vmul.f32 %v9144_v7, %v9144_v7  ;;  %v897_v46 = vsel %vm103_vm0, %v637_v58, 0.0  ;;  %vm1877_vm4 = vmor %vm1875_vm3, %vm1876_vm1 }
 0x34f   :  { %v1422_v47 = vmul.f32 0.5, %v1421_v22  ;;  %v1871_v51 = vmul.f32 %v5527_v32, %v1870_v3  ;;  %898 = vadd.xlane.f32.xlu0 %v897_v46  ;;  %v229_v15 = vpop.xlane.xlu1 %228 }
 0x350   :  { %v759_v18 = vsel %vm103_vm0, %v591_v23, 0.0  ;;  %v416_v12 = vmul.f32 %v5837_v5, %v229_v15  ;;  %v9162_v15 = vpop.f32.mrf.mxu0 }
 0x351   :  { %v1423_v59 = vsub.f32 1.5, %v1422_v47  ;;  %v1872_v49 = vmul.f32 0.5, %v1871_v51  ;;  %760 = vadd.xlane.f32.xlu2 %v759_v18 }
 0x352   :  { %v5529_v38 = vpop.eup %5528  ;;  %v884_v58 = vpop.xlane.xlu2 %883  ;;  %v9157_v3 = vsub.f32 %v8673_v13, %v416_v12 }
 0x353   :  { %v1424_v45 = vmul.f32 %v5525_v20, %v1423_v59  ;;  %v1873_v62 = vsub.f32 1.5, %v1872_v49  ;;  %v746_v22 = vpop.xlane.xlu0 %745  ;;  %v1880_v23 = vmul.f32 %v5529_v38, %v9139_v24  ;;  %v984_v46 = vmul.f32 %v884_v58, %v5837_v5  ;;  %v9166_v59 = vpop.f32.mrf.mxu1 }
 0x354   :  { %v938_v18 = vmul.f32 %v746_v22, %v5837_v5  ;;  %v592_v51 = vmul.f32 %v9157_v3, %v9157_v3  ;;  %11157 = vst [vmem:[#allocation165_spill] sm:$0xff] %v9166_v59  ;;  %vm1886_vm5 = vweird.f32 %v5529_v38 }
 0x355   :  { %v1428_v47 = vsel %vm1427_vm2, %v5525_v20, %v1424_v45  ;;  %v1874_v56 = vmul.f32 %v5527_v32, %v1873_v62  ;;  %v1881_v49 = vmul.f32 %v5529_v38, %v1880_v23  ;;  %v9170_v12 = vadd.f32 1e-05, %v984_v46  ;;  %v9179_v45 = vpop.f32.mrf.mxu2  ;;  %vm1887_vm7 = vmor %vm1885_vm6, %vm1886_vm5 }
 0x356   :  { %v1993_v13 = vmul.f32 %v1428_v47, %v8617_v63  ;;  %v9172_v58 = vadd.f32 1e-05, %v938_v18  ;;  %v762_v19 = vsel %vm103_vm0, %v592_v51, 0.0  ;;  %11158 = vst [vmem:[#allocation166_spill] sm:$0xff] %v9179_v45  ;;  %v9186_v18 = vpop.f32.mrf.mxu3 }
 0x357   :  { %v1878_v22 = vsel %vm1877_vm4, %v5527_v32, %v1874_v56  ;;  %v1882_v57 = vmul.f32 0.5, %v1881_v49  ;;  %5530 = vrsqrt.f32 %v9170_v12  ;;  %763 = vadd.xlane.f32.xlu1 %v762_v19  ;;  %11161 = vst [vmem:[#allocation169_spill] sm:$0xff] %v9186_v18  ;;  %vm1895_vm9 = vweird.f32 %v9170_v12 }
 0x358   :  { %v2038_v62 = vmul.f32 %v1878_v22, %v8623_v44  ;;  %5532 = vrsqrt.f32 %v9172_v58  ;;  %v2162_v63 = vsel %vm103_vm0, %v1993_v13, 0  ;;  %vm1435_vm11 = vweird.f32 %v9172_v58 }
 0x359   :  { %v1883_v20 = vsub.f32 1.5, %v1882_v57  ;;  %v9181_v23 = vand.u32 4294901760, %v2162_v63 }
 0x35a   :  { %v2297_v32 = vsel %vm103_vm0, %v2038_v62, 0 }
 0x35b   :  { %11159 = vst [vmem:[#allocation167_spill] sm:$0xff] %v9181_v23  ;;  %v9184_v46 = vand.u32 4294901760, %v2297_v32  ;;  %v1884_v44 = vmul.f32 %v5529_v38, %v1883_v20  ;;  %v749_v19 = vpop.xlane.xlu1 %748  ;;  %3245 = vmatmul.f32.gmra.mxu1 %v9181_v23  ;;  %v232_v47 = vpop.xlane.xlu2 %231 }
 0x35c   :  { %v367_v56 = vpop.xlane.xlu0 %366  ;;  %v939_v51 = vmul.f32 %v749_v19, %v5837_v5  ;;  %v417_v22 = vmul.f32 %v5837_v5, %v232_v47  ;;  %v9194_v20 = vpop.f32.mrf.mxu0  ;;  %v9211_v47 = vsub.f32 %v2162_v63, %v9181_v23 }
 0x35d   :  { %11160 = vst [vmem:[#allocation168_spill] sm:$0xff] %v9184_v46  ;;  %3425 = vmatmul.f32.gmra.mxu3 %v9184_v46  ;;  %v5531_v13 = vpop.eup %5530  ;;  %v1888_v49 = vsel %vm1887_vm7, %v5529_v38, %v1884_v44  ;;  %v462_v62 = vmul.f32 %v5837_v5, %v367_v56  ;;  %v9200_v59 = vpop.f32.mrf.mxu1 }
 0x35e   :  { %v5533_v57 = vpop.eup %5532  ;;  %11162 = vst [vmem:[#allocation170_spill] sm:$0xff] %v9194_v20  ;;  %v2039_v24 = vmul.f32 %v1888_v49, %v8634_v2  ;;  %v1890_v18 = vmul.f32 %v5531_v13, %v9170_v12  ;;  %v9198_v45 = vadd.f32 1e-05, %v939_v51  ;;  %v9204_v36 = vsub.f32 %v8777_v8, %v417_v22 }
 0x35f   :  { %11163 = vst [vmem:[#allocation171_spill] sm:$0xff] %v9200_v59  ;;  %v1430_v19 = vmul.f32 %v5533_v57, %v9172_v58  ;;  %v9207_v38 = vsub.f32 %v8782_v29, %v462_v62  ;;  %v10817_v8 = vand.u32 4294901760, %v9211_v47  ;;  %v9219_v22 = vsub.f32 %v2297_v32, %v9184_v46 }
 0x360   :  { %v1891_v44 = vmul.f32 %v5531_v13, %v1890_v18  ;;  %5534 = vrsqrt.f32 %v9198_v45  ;;  %11164 = vst [vmem:[#allocation172_spill] sm:$0xff] %v9211_v47  ;;  %v593_v51 = vmul.f32 %v9204_v36, %v9204_v36  ;;  %v2300_v29 = vsel %vm103_vm0, %v2039_v24, 0  ;;  %v9222_v18 = vpop.f32.mrf.mxu2 }
 0x361   :  { %v1431_v2 = vmul.f32 %v5533_v57, %v1430_v19  ;;  %v638_v56 = vmul.f32 %v9207_v38, %v9207_v38  ;;  %11165 = vst [vmem:[#allocation173_spill] sm:$0xff] %v9219_v22  ;;  %v9226_v23 = vand.u32 4294901760, %v2300_v29  ;;  %vm1896_vm8 = vweird.f32 %v5531_v13 }
 0x362   :  { %v1892_v49 = vmul.f32 0.5, %v1891_v44  ;;  %11166 = vst [vmem:[#allocation174_spill] sm:$0xff] %v9222_v18  ;;  %v765_v19 = vsel %vm103_vm0, %v593_v51, 0.0  ;;  %v2622_v32 = vsub.f32 %v9211_v47, %v10817_v8  ;;  %v10818_v24 = vand.u32 4294901760, %v9219_v22  ;;  %v9232_v44 = vpop.f32.mrf.mxu3  ;;  %vm1897_vm12 = vmor %vm1895_vm9, %vm1896_vm8 }
 0x363   :  { %v1432_v62 = vmul.f32 0.5, %v1431_v2  ;;  %v900_v63 = vsel %vm103_vm0, %v638_v56, 0.0  ;;  %11167 = vst [vmem:[#allocation175_spill] sm:$0xff] %v9226_v23  ;;  %v235_v20 = vpop.xlane.xlu2 %234  ;;  %766 = vadd.xlane.f32.xlu0 %v765_v19  ;;  %vm1436_vm10 = vweird.f32 %v5533_v57  ;;  %vm1445_vm14 = vweird.f32 %v9198_v45 }
 0x364   :  { %v1893_v59 = vsub.f32 1.5, %v1892_v49  ;;  %901 = vadd.xlane.f32.xlu2 %v900_v63  ;;  %11168 = vst [vmem:[#allocation176_spill] sm:$0xff] %v9232_v44  ;;  %v418_v56 = vmul.f32 %v5837_v5, %v235_v20  ;;  %v2623_v46 = vand.u32 4294901760, %v2622_v32  ;;  %v2982_v8 = vsub.f32 %v9219_v22, %v10818_v24  ;;  %vm1437_vm13 = vmor %vm1435_vm11, %vm1436_vm10 }
 0x365   :  { %v1433_v2 = vsub.f32 1.5, %v1432_v62  ;;  %3429 = vmatmul.f32.gmra.mxu3 %v9226_v23  ;;  %v752_v19 = vpop.xlane.xlu1 %751  ;;  %v9247_v44 = vsub.f32 %v2300_v29, %v9226_v23 }
 0x366   :  { %v5535_v51 = vpop.eup %5534  ;;  %v1894_v49 = vmul.f32 %v5531_v13, %v1893_v59  ;;  %v887_v63 = vpop.xlane.xlu0 %886  ;;  %v9244_v20 = vsub.f32 %v8819_v25, %v418_v56  ;;  %v940_v24 = vmul.f32 %v752_v19, %v5837_v5  ;;  %2624 = vmatmul.f32.gmra.mxu0 %v2623_v46  ;;  %v2983_v29 = vand.u32 4294901760, %v2982_v8 }
 0x367   :  { %v1434_v12 = vmul.f32 %v5533_v57, %v1433_v2  ;;  %v1440_v62 = vmul.f32 %v5535_v51, %v9198_v45  ;;  %11169 = vst [vmem:[#allocation177_spill] sm:$0xff] %v9247_v44  ;;  %v9249_v59 = vpop.f32.mrf.mxu0  ;;  %v985_v32 = vmul.f32 %v887_v63, %v5837_v5  ;;  %v9255_v2 = vpop.f32.mrf.mxu1  ;;  %vm1446_vm15 = vweird.f32 %v5535_v51 }
 0x368   :  { %v1898_v58 = vsel %vm1897_vm12, %v5531_v13, %v1894_v49  ;;  %v9261_v13 = vadd.f32 1e-05, %v940_v24  ;;  %v594_v49 = vmul.f32 %v9244_v20, %v9244_v20  ;;  %2984 = vmatmul.f32.gmra.mxu2 %v2983_v29  ;;  %v10823_v46 = vand.u32 4294901760, %v9247_v44  ;;  %vm9277_vm1 = vmor %vm1445_vm14, %vm1446_vm15 }
 0x369   :  { %v2040_v25 = vmul.f32 %v1898_v58, %v8703_v61  ;;  %v1438_v56 = vsel %vm1437_vm13, %v5533_v57, %v1434_v12  ;;  %v1441_v22 = vmul.f32 %v5535_v51, %v1440_v62  ;;  %v9259_v18 = vadd.f32 1e-05, %v985_v32  ;;  %v9268_v61 = vpop.f32.mrf.mxu2 }
 0x36a   :  { %v1994_v23 = vmul.f32 %v1438_v56, %v8690_v48  ;;  %11170 = vst [vmem:[#allocation178_spill] sm:$0xff] %v9268_v61  ;;  %v768_v48 = vsel %vm103_vm0, %v594_v49, 0.0  ;;  %v2990_v8 = vsub.f32 %v9247_v44, %v10823_v46  ;;  %v9284_v62 = vpop.f32.mrf.mxu3  ;;  %vm1455_vm4 = vweird.f32 %v9261_v13 }
 0x36b   :  { %v1442_v63 = vmul.f32 0.5, %v1441_v22  ;;  %v2303_v19 = vsel %vm103_vm0, %v2040_v25, 0  ;;  %5536 = vrsqrt.f32 %v9259_v18  ;;  %769 = vadd.xlane.f32.xlu1 %v768_v48  ;;  %11174 = vst [vmem:[#allocation180_spill] sm:$0xff] %v9284_v62  ;;  %vm1905_vm2 = vweird.f32 %v9259_v18 }
 0x36c   :  { %5538 = vrsqrt.f32 %v9261_v13  ;;  %v2165_v24 = vsel %vm103_vm0, %v1994_v23, 0  ;;  %v9282_v12 = vand.u32 4294901760, %v2303_v19  ;;  %v2991_v32 = vand.u32 4294901760, %v2990_v8 }
 0x36d   :  { %v1443_v57 = vsub.f32 1.5, %v1442_v63  ;;  %v9286_v25 = vand.u32 4294901760, %v2165_v24 }
 0x36e   :  { %11173 = vst [vmem:[#allocation179_spill] sm:$0xff] %v9282_v12  ;;  %3433 = vmatmul.f32.gmra.mxu3 %v9282_v12  ;;  %v9290_v45 = vsub.f32 %v2303_v19, %v9282_v12 }
 0x36f   :  { %v1444_v58 = vmul.f32 %v5535_v51, %v1443_v57  ;;  %11175 = vst [vmem:[#allocation181_spill] sm:$0xff] %v9286_v25  ;;  %v890_v56 = vpop.xlane.xlu0 %889  ;;  %v9292_v29 = vpop.f32.mrf.mxu1  ;;  %3249 = vmatmul.f32.gmra.mxu1 %v9286_v25  ;;  %v9299_v63 = vsub.f32 %v2165_v24, %v9286_v25 }
 0x370   :  { %11176 = vst [vmem:[#allocation182_spill] sm:$0xff] %v9290_v45  ;;  %v986_v23 = vmul.f32 %v890_v56, %v5837_v5  ;;  %v9301_v48 = vpop.f32.mrf.mxu0  ;;  %v10828_v19 = vand.u32 4294901760, %v9290_v45  ;;  %2992 = vmatmul.f32.gmra.mxu2 %v2991_v32 }
 0x371   :  { %v1448_v49 = vsel %vm9277_vm1, %v5535_v51, %v1444_v58  ;;  %11177 = vst [vmem:[#allocation183_spill] sm:$0xff] %v9299_v63  ;;  %v5537_v57 = vpop.eup %5536  ;;  %v10833_v51 = vand.u32 4294901760, %v9299_v63 }
 0x372   :  { %v1995_v8 = vmul.f32 %v1448_v49, %v8754_v43  ;;  %v5539_v46 = vpop.eup %5538  ;;  %v1900_v12 = vmul.f32 %v5537_v57, %v9259_v18  ;;  %v9306_v44 = vadd.f32 1e-05, %v986_v23  ;;  %v2998_v24 = vsub.f32 %v9290_v45, %v10828_v19  ;;  %v9321_v23 = vpop.f32.mrf.mxu2 }
 0x373   :  { %v1450_v22 = vmul.f32 %v5539_v46, %v9261_v13  ;;  %v2630_v32 = vsub.f32 %v9299_v63, %v10833_v51  ;;  %11179 = vst [vmem:[#allocation185_spill] sm:$0xff] %v9321_v23  ;;  %vm1906_vm3 = vweird.f32 %v5537_v57  ;;  %vm1456_vm5 = vweird.f32 %v5539_v46 }
 0x374   :  { %v2168_v58 = vsel %vm103_vm0, %v1995_v8, 0  ;;  %v1901_v56 = vmul.f32 %v5537_v57, %v1900_v12  ;;  %5540 = vrsqrt.f32 %v9306_v44  ;;  %v2999_v19 = vand.u32 4294901760, %v2998_v24  ;;  %vm9335_vm6 = vmor %vm1905_vm2, %vm1906_vm3 }
 0x375   :  { %v1451_v43 = vmul.f32 %v5539_v46, %v1450_v22  ;;  %v9319_v49 = vand.u32 4294901760, %v2168_v58  ;;  %v2631_v45 = vand.u32 4294901760, %v2630_v32  ;;  %v9327_v22 = vpop.f32.mrf.mxu3  ;;  %vm1457_vm7 = vmor %vm1455_vm4, %vm1456_vm5  ;;  %vm1915_vm8 = vweird.f32 %v9306_v44 }
 0x376   :  { %v1902_v62 = vmul.f32 0.5, %v1901_v56  ;;  %v893_v12 = vpop.xlane.xlu2 %892  ;;  %11181 = vst [vmem:[#allocation187_spill] sm:$0xff] %v9327_v22 }
 0x377   :  { %11178 = vst [vmem:[#allocation184_spill] sm:$0xff] %v9319_v49  ;;  %v1452_v8 = vmul.f32 0.5, %v1451_v43  ;;  %v9325_v61 = vsub.f32 %v2168_v58, %v9319_v49  ;;  %v987_v51 = vmul.f32 %v893_v12, %v5837_v5  ;;  %3253 = vmatmul.f32.gmra.mxu1 %v9319_v49  ;;  %2632 = vmatmul.f32.gmra.mxu0 %v2631_v45  ;;  %v9340_v22 = vpop.f32.mrf.mxu1 }
 0x378   :  { %v1903_v25 = vsub.f32 1.5, %v1902_v62  ;;  %v9331_v23 = vpop.f32.mrf.mxu0  ;;  %v755_v43 = vpop.xlane.xlu1 %754  ;;  %11184 = vst [vmem:[#allocation188_spill] sm:$0xff] %v9340_v22  ;;  %3000 = vmatmul.f32.gmra.mxu2 %v2999_v19 }
 0x379   :  { %11180 = vst [vmem:[#allocation186_spill] sm:$0xff] %v9325_v61  ;;  %v1453_v56 = vsub.f32 1.5, %v1452_v8  ;;  %v10840_v58 = vand.u32 4294901760, %v9325_v61  ;;  %v1075_v12 = vadd.f32 1e-05, %v987_v51  ;;  %v941_v18 = vmul.f32 %v755_v43, %v5837_v5 }
 0x37a   :  { %v5541_v32 = vpop.eup %5540  ;;  %v1904_v62 = vmul.f32 %v5537_v57, %v1903_v25  ;;  %v9359_v24 = vpop.f32.mrf.mxu2 }
 0x37b   :  { %v1454_v49 = vmul.f32 %v5539_v46, %v1453_v56  ;;  %v1910_v63 = vmul.f32 %v5541_v32, %v9306_v44  ;;  %v2638_v45 = vsub.f32 %v9325_v61, %v10840_v58  ;;  %5542 = vrsqrt.f32 %v1075_v12  ;;  %11185 = vst [vmem:[#allocation189_spill] sm:$0xff] %v9359_v24 }
 0x37c   :  { %v1908_v8 = vsel %vm9335_vm6, %v5537_v57, %v1904_v62  ;;  %v9352_v25 = vadd.f32 1e-05, %v941_v18  ;;  %vm1916_vm9 = vweird.f32 %v5541_v32  ;;  %vm1925_vm11 = vweird.f32 %v1075_v12 }
 0x37d   :  { %v2041_v13 = vmul.f32 %v1908_v8, %v8828_v11  ;;  %v1458_v47 = vsel %vm1457_vm7, %v5539_v46, %v1454_v49  ;;  %v1911_v51 = vmul.f32 %v5541_v32, %v1910_v63  ;;  %v2639_v22 = vand.u32 4294901760, %v2638_v45  ;;  %v9364_v11 = vpop.f32.mrf.mxu3  ;;  %vm1917_vm10 = vmor %vm1915_vm8, %vm1916_vm9 }
 0x37e   :  { %v1996_v19 = vmul.f32 %v1458_v47, %v8849_v53  ;;  %5544 = vrsqrt.f32 %v9352_v25  ;;  %11187 = vst [vmem:[#allocation191_spill] sm:$0xff] %v9364_v11  ;;  %vm1465_vm13 = vweird.f32 %v9352_v25 }
 0x37f   :  { %v1912_v56 = vmul.f32 0.5, %v1911_v51  ;;  %v2306_v43 = vsel %vm103_vm0, %v2041_v13, 0  ;;  %2640 = vmatmul.f32.gmra.mxu0 %v2639_v22 }
 0x380   :  { %v758_v57 = vpop.xlane.xlu0 %757  ;;  %v2171_v62 = vsel %vm103_vm0, %v1996_v19, 0  ;;  %v9362_v18 = vand.u32 4294901760, %v2306_v43  ;;  %v9373_v49 = vpop.f32.mrf.mxu0 }
 0x381   :  { %v1913_v46 = vsub.f32 1.5, %v1912_v56  ;;  %v942_v53 = vmul.f32 %v758_v57, %v5837_v5  ;;  %v9367_v47 = vand.u32 4294901760, %v2171_v62  ;;  %v5543_v63 = vpop.eup %5542  ;;  %v9378_v19 = vpop.f32.mrf.mxu1 }
 0x382   :  { %11186 = vst [vmem:[#allocation190_spill] sm:$0xff] %v9362_v18  ;;  %3437 = vmatmul.f32.gmra.mxu3 %v9362_v18  ;;  %v9371_v44 = vsub.f32 %v2306_v43, %v9362_v18  ;;  %v1920_v8 = vmul.f32 %v5543_v63, %v1075_v12  ;;  %vm1926_vm12 = vweird.f32 %v5543_v63  ;;  %v9388_v24 = vpop.f32.mrf.mxu2 }
 0x383   :  { %11188 = vst [vmem:[#allocation192_spill] sm:$0xff] %v9367_v47  ;;  %v1914_v45 = vmul.f32 %v5541_v32, %v1913_v46  ;;  %v9375_v13 = vadd.f32 1e-05, %v942_v53  ;;  %3257 = vmatmul.f32.gmra.mxu1 %v9367_v47  ;;  %v9381_v22 = vsub.f32 %v2171_v62, %v9367_v47  ;;  %vm9402_vm15 = vmor %vm1925_vm11, %vm1926_vm12 }
 0x384   :  { %11189 = vst [vmem:[#allocation193_spill] sm:$0xff] %v9371_v44  ;;  %v5545_v51 = vpop.eup %5544  ;;  %v10847_v56 = vand.u32 4294901760, %v9371_v44  ;;  %v1921_v58 = vmul.f32 %v5543_v63, %v1920_v8 }
 0x385   :  { %11190 = vst [vmem:[#allocation194_spill] sm:$0xff] %v9381_v22  ;;  %v1918_v57 = vsel %vm1917_vm10, %v5541_v32, %v1914_v45  ;;  %v1460_v43 = vmul.f32 %v5545_v51, %v9352_v25  ;;  %5546 = vrsqrt.f32 %v9375_v13  ;;  %v10850_v11 = vand.u32 4294901760, %v9381_v22  ;;  %v9395_v45 = vpop.f32.mrf.mxu3 }
 0x386   :  { %v2042_v18 = vmul.f32 %v1918_v57, %v8910_v27  ;;  %v1922_v46 = vmul.f32 0.5, %v1921_v58  ;;  %11191 = vst [vmem:[#allocation195_spill] sm:$0xff] %v9388_v24  ;;  %vm1466_vm14 = vweird.f32 %v5545_v51  ;;  %v3006_v32 = vsub.f32 %v9371_v44, %v10847_v56 }
 0x387   :  { %v1461_v53 = vmul.f32 %v5545_v51, %v1460_v43  ;;  %v896_v62 = vpop.xlane.xlu1 %895  ;;  %11192 = vst [vmem:[#allocation196_spill] sm:$0xff] %v9395_v45  ;;  %v2646_v43 = vsub.f32 %v9381_v22, %v10850_v11  ;;  %vm1467_vm1 = vmor %vm1465_vm13, %vm1466_vm14  ;;  %vm1475_vm2 = vweird.f32 %v9375_v13 }
 0x388   :  { %v2309_v27 = vsel %vm103_vm0, %v2042_v18, 0  ;;  %v1923_v8 = vsub.f32 1.5, %v1922_v46  ;;  %v988_v57 = vmul.f32 %v896_v62, %v5837_v5  ;;  %v3007_v47 = vand.u32 4294901760, %v3006_v32  ;;  %v9417_v62 = vpop.f32.mrf.mxu0 }
 0x389   :  { %v1462_v58 = vmul.f32 0.5, %v1461_v53  ;;  %v9406_v61 = vand.u32 4294901760, %v2309_v27  ;;  %v2647_v45 = vand.u32 4294901760, %v2646_v43  ;;  %v9408_v53 = vpop.f32.mrf.mxu1 }
 0x38a   :  { %v1924_v56 = vmul.f32 %v5543_v63, %v1923_v8  ;;  %v1076_v44 = vadd.f32 1e-05, %v988_v57  ;;  %3008 = vmatmul.f32.gmra.mxu2 %v3007_v47  ;;  %v9424_v11 = vpop.f32.mrf.mxu2 }
 0x38b   :  { %11195 = vst [vmem:[#allocation197_spill] sm:$0xff] %v9406_v61  ;;  %v1463_v18 = vsub.f32 1.5, %v1462_v58  ;;  %v5547_v46 = vpop.eup %5546  ;;  %3441 = vmatmul.f32.gmra.mxu3 %v9406_v61  ;;  %v9415_v12 = vsub.f32 %v2309_v27, %v9406_v61  ;;  %2648 = vmatmul.f32.gmra.mxu0 %v2647_v45 }
 0x38c   :  { %v1928_v32 = vsel %vm9402_vm15, %v5543_v63, %v1924_v56  ;;  %v1470_v58 = vmul.f32 %v5547_v46, %v9375_v13  ;;  %5548 = vrsqrt.f32 %v1076_v44  ;;  %11197 = vst [vmem:[#allocation199_spill] sm:$0xff] %v9424_v11  ;;  %vm1476_vm3 = vweird.f32 %v5547_v46 }
 0x38d   :  { %11196 = vst [vmem:[#allocation198_spill] sm:$0xff] %v9415_v12  ;;  %v1464_v8 = vmul.f32 %v5545_v51, %v1463_v18  ;;  %v2043_v57 = vmul.f32 %v1928_v32, %v8960_v1  ;;  %v10851_v25 = vand.u32 4294901760, %v9415_v12  ;;  %v9435_v18 = vpop.f32.mrf.mxu3  ;;  %vm1477_vm4 = vmor %vm1475_vm2, %vm1476_vm3  ;;  %vm1935_vm5 = vweird.f32 %v1076_v44 }
 0x38e   :  { %v1471_v43 = vmul.f32 %v5547_v46, %v1470_v58  ;;  %11199 = vst [vmem:[#allocation201_spill] sm:$0xff] %v9435_v18 }
 0x38f   :  { %v1468_v47 = vsel %vm1467_vm1, %v5545_v51, %v1464_v8  ;;  %v3014_v24 = vsub.f32 %v9415_v12, %v10851_v25  ;;  %v2312_v63 = vsel %vm103_vm0, %v2043_v57, 0 }
 0x390   :  { %v1997_v27 = vmul.f32 %v1468_v47, %v8970_v28  ;;  %v1472_v56 = vmul.f32 0.5, %v1471_v43  ;;  %v9432_v1 = vand.u32 4294901760, %v2312_v63  ;;  %v9443_v13 = vpop.f32.mrf.mxu0 }
 0x391   :  { %v3015_v45 = vand.u32 4294901760, %v3014_v24 }
 0x392   :  { %11198 = vst [vmem:[#allocation200_spill] sm:$0xff] %v9432_v1  ;;  %v2174_v51 = vsel %vm103_vm0, %v1997_v27, 0  ;;  %v1473_v32 = vsub.f32 1.5, %v1472_v56  ;;  %v9440_v28 = vsub.f32 %v2312_v63, %v9432_v1  ;;  %v5549_v58 = vpop.eup %5548  ;;  %v9449_v27 = vpop.f32.mrf.mxu1 }
 0x393   :  { %v9437_v8 = vand.u32 4294901760, %v2174_v51  ;;  %3016 = vmatmul.f32.gmra.mxu2 %v3015_v45  ;;  %3445 = vmatmul.f32.gmra.mxu3 %v9432_v1  ;;  %v1930_v47 = vmul.f32 %v5549_v58, %v1076_v44  ;;  %vm1936_vm6 = vweird.f32 %v5549_v58  ;;  %v9460_v61 = vpop.f32.mrf.mxu2 }
 0x394   :  { %11201 = vst [vmem:[#allocation203_spill] sm:$0xff] %v9440_v28  ;;  %v1474_v57 = vmul.f32 %v5547_v46, %v1473_v32  ;;  %v10858_v24 = vand.u32 4294901760, %v9440_v28  ;;  %vm1937_vm7 = vmor %vm1935_vm5, %vm1936_vm6 }
 0x395   :  { %11200 = vst [vmem:[#allocation202_spill] sm:$0xff] %v9437_v8  ;;  %3261 = vmatmul.f32.gmra.mxu1 %v9437_v8  ;;  %v9447_v43 = vsub.f32 %v2174_v51, %v9437_v8  ;;  %v1931_v56 = vmul.f32 %v5549_v58, %v1930_v47 }
 0x396   :  { %v1478_v63 = vsel %vm1477_vm4, %v5547_v46, %v1474_v57  ;;  %v3022_v32 = vsub.f32 %v9440_v28, %v10858_v24  ;;  %11203 = vst [vmem:[#allocation205_spill] sm:$0xff] %v9460_v61 }
 0x397   :  { %11202 = vst [vmem:[#allocation204_spill] sm:$0xff] %v9447_v43  ;;  %v10859_v25 = vand.u32 4294901760, %v9447_v43  ;;  %v1998_v45 = vmul.f32 %v1478_v63, %v9030_v50  ;;  %v1932_v1 = vmul.f32 0.5, %v1931_v56  ;;  %v9465_v50 = vpop.f32.mrf.mxu3 }
 0x398   :  { %v3023_v12 = vand.u32 4294901760, %v3022_v32  ;;  %11205 = vst [vmem:[#allocation207_spill] sm:$0xff] %v9465_v50  ;;  %v9471_v56 = vpop.f32.mrf.mxu0 }
 0x399   :  { %v2654_v51 = vsub.f32 %v9447_v43, %v10859_v25  ;;  %v2177_v46 = vsel %vm103_vm0, %v1998_v45, 0  ;;  %v1933_v57 = vsub.f32 1.5, %v1932_v1 }
 0x39a   :  { %v9463_v18 = vand.u32 4294901760, %v2177_v46  ;;  %v9474_v1 = vpop.f32.mrf.mxu1 }
 0x39b   :  { %v2655_v47 = vand.u32 4294901760, %v2654_v51  ;;  %3024 = vmatmul.f32.gmra.mxu2 %v3023_v12  ;;  %v1934_v63 = vmul.f32 %v5549_v58, %v1933_v57  ;;  %11207 = vst [vmem:[#allocation209_spill] sm:$0xff] %v9474_v1 }
 0x39c   :  { %11204 = vst [vmem:[#allocation206_spill] sm:$0xff] %v9463_v18  ;;  %v9469_v44 = vsub.f32 %v2177_v46, %v9463_v18  ;;  %v9483_v46 = vpop.f32.mrf.mxu2 }
 0x39d   :  { %2656 = vmatmul.f32.gmra.mxu0 %v2655_v47  ;;  %3265 = vmatmul.f32.gmra.mxu1 %v9463_v18  ;;  %v1938_v32 = vsel %vm1937_vm7, %v5549_v58, %v1934_v63  ;;  %11209 = vst [vmem:[#allocation211_spill] sm:$0xff] %v9483_v46 }
 0x39e   :  { %11206 = vst [vmem:[#allocation208_spill] sm:$0xff] %v9469_v44  ;;  %v10860_v45 = vand.u32 4294901760, %v9469_v44  ;;  %v2044_v51 = vmul.f32 %v1938_v32, %v9065_v31 }
 0x39f   :  { %v9485_v25 = vpop.f32.mrf.mxu3 }
 0x3a0   :  { %v2662_v12 = vsub.f32 %v9469_v44, %v10860_v45  ;;  %v2315_v57 = vsel %vm103_vm0, %v2044_v51, 0  ;;  %11210 = vst [vmem:[#allocation212_spill] sm:$0xff] %v9485_v25  ;;  %v9494_v32 = vpop.f32.mrf.mxu0 }
 0x3a1   :  { %v9481_v24 = vand.u32 4294901760, %v2315_v57 }
 0x3a2   :  { %v2663_v47 = vand.u32 4294901760, %v2662_v12  ;;  %v9492_v63 = vpop.f32.mrf.mxu1 }
 0x3a3   :  { %11208 = vst [vmem:[#allocation210_spill] sm:$0xff] %v9481_v24  ;;  %3449 = vmatmul.f32.gmra.mxu3 %v9481_v24  ;;  %v9489_v58 = vsub.f32 %v2315_v57, %v9481_v24 }
 0x3a4   :  { %11212 = vst [vmem:[#allocation214_spill] sm:$0xff] %v9492_v63  ;;  %v9499_v45 = vpop.f32.mrf.mxu2 }
 0x3a5   :  { %2664 = vmatmul.f32.gmra.mxu0 %v2663_v47  ;;  %11211 = vst [vmem:[#allocation213_spill] sm:$0xff] %v9489_v58  ;;  %v10865_v31 = vand.u32 4294901760, %v9489_v58 }
 0x3a6   :  { %11213 = vst [vmem:[#allocation215_spill] sm:$0xff] %v9499_v45 }
 0x3a7   :  { %v3030_v51 = vsub.f32 %v9489_v58, %v10865_v31  ;;  %v9501_v47 = vpop.f32.mrf.mxu3 }
 0x3a8   :  { %11214 = vst [vmem:[#allocation216_spill] sm:$0xff] %v9501_v47  ;;  %v9505_v57 = vpop.f32.mrf.mxu0 }
 0x3a9   :  { %v3031_v12 = vand.u32 4294901760, %v3030_v51  ;;  %11216 = vst [vmem:[#allocation218_spill] sm:$0xff] %v9505_v57 }
 0x3aa   :  { %v9503_v28 = vpop.f32.mrf.mxu1 }
 0x3ab   :  { %3032 = vmatmul.f32.gmra.mxu2 %v3031_v12  ;;  %11215 = vst [vmem:[#allocation217_spill] sm:$0xff] %v9503_v28 }
 0x3ac   :  { %v9507_v24 = vpop.f32.mrf.mxu2 }
 0x3ad   :  { %11217 = vst [vmem:[#allocation219_spill] sm:$0xff] %v9507_v24 }
 0x3af   :  { %v9509_v25 = vpop.f32.mrf.mxu3 }
 0x3b0   :  { %11218 = vst [vmem:[#allocation220_spill] sm:$0xff] %v9509_v25  ;;  %v9513_v46 = vpop.f32.mrf.mxu0 }
 0x3b1   :  { %11220 = vst [vmem:[#allocation222_spill] sm:$0xff] %v9513_v46 }
 0x3b2   :  { %v9511_v50 = vpop.f32.mrf.mxu1 }
 0x3b3   :  { %11219 = vst [vmem:[#allocation221_spill] sm:$0xff] %v9511_v50 }
 0x3b4   :  { %v9515_v61 = vpop.f32.mrf.mxu2 }
 0x3b5   :  { %11221 = vst [vmem:[#allocation223_spill] sm:$0xff] %v9515_v61 }
 0x3b7   :  { %v9517_v31 = vpop.f32.mrf.mxu3 }
 0x3b8   :  { %11222 = vst [vmem:[#allocation224_spill] sm:$0xff] %v9517_v31  ;;  %v9519_v12 = vpop.f32.mrf.mxu0 }
 0x3b9   :  { %11223 = vst [vmem:[#allocation225_spill] sm:$0xff] %v9519_v12 }
 0x3ba   :  { %v9522_v47 = vpop.f32.mrf.mxu1 }
 0x3bb   :  { %11224 = vst [vmem:[#allocation226_spill] sm:$0xff] %v9522_v47 }
 0x3bc   :  { %v9525_v18 = vpop.f32.mrf.mxu2 }
 0x3bd   :  { %11225 = vst [vmem:[#allocation227_spill] sm:$0xff] %v9525_v18 }
 0x3bf   :  { %v9528_v31 = vpop.f32.mrf.mxu3 }
 0x3c0   :  { %11226 = vst [vmem:[#allocation228_spill] sm:$0xff] %v9528_v31  ;;  %v9530_v44 = vpop.f32.mrf.mxu0 }
 0x3c1   :  { %11227 = vst [vmem:[#allocation229_spill] sm:$0xff] %v9530_v44 }
 0x3c2   :  { %v899_v51 = vpop.xlane.xlu0 %898 }
 0x3c3   :  { %v989_v58 = vmul.f32 %v899_v51, %v5837_v5  ;;  %v9532_v51 = vpop.f32.mrf.mxu1 }
 0x3c4   :  { %v761_v45 = vpop.xlane.xlu2 %760  ;;  %11228 = vst [vmem:[#allocation230_spill] sm:$0xff] %v9532_v51  ;;  %v9534_v46 = vpop.f32.mrf.mxu2 }
 0x3c5   :  { %v943_v24 = vmul.f32 %v761_v45, %v5837_v5  ;;  %v1077_v11 = vadd.f32 1e-05, %v989_v58  ;;  %11229 = vst [vmem:[#allocation231_spill] sm:$0xff] %v9534_v46 }
 0x3c7   :  { %v1031_v25 = vadd.f32 1e-05, %v943_v24  ;;  %5550 = vrsqrt.f32 %v1077_v11  ;;  %vm1945_vm10 = vweird.f32 %v1077_v11 }
 0x3c9   :  { %5552 = vrsqrt.f32 %v1031_v25  ;;  %vm1485_vm12 = vweird.f32 %v1031_v25 }
 0x3ca   :  { %v764_v50 = vpop.xlane.xlu1 %763 }
 0x3cb   :  { %v944_v61 = vmul.f32 %v764_v50, %v5837_v5  ;;  %v9536_v50 = vpop.f32.mrf.mxu3  ;;  %v9538_v22 = vpop.f32.mrf.mxu1 }
 0x3cc   :  { %11230 = vst [vmem:[#allocation232_spill] sm:$0xff] %v9536_v50 }
 0x3cd   :  { %v5551_v8 = vpop.eup %5550  ;;  %v1032_v12 = vadd.f32 1e-05, %v944_v61  ;;  %11231 = vst [vmem:[#allocation233_spill] sm:$0xff] %v9538_v22  ;;  %v9540_v61 = vpop.f32.mrf.mxu0 }
 0x3ce   :  { %v1940_v47 = vmul.f32 %v5551_v8, %v1077_v11  ;;  %vm1946_vm8 = vweird.f32 %v5551_v8  ;;  %11232 = vst [vmem:[#allocation234_spill] sm:$0xff] %v9540_v61 }
 0x3cf   :  { %v5553_v28 = vpop.eup %5552  ;;  %5554 = vrsqrt.f32 %v1032_v12  ;;  %vm1947_vm11 = vmor %vm1945_vm10, %vm1946_vm8  ;;  %vm1495_vm15 = vweird.f32 %v1032_v12 }
 0x3d0   :  { %v1480_v45 = vmul.f32 %v5553_v28, %v1031_v25  ;;  %v1941_v58 = vmul.f32 %v5551_v8, %v1940_v47  ;;  %vm1486_vm9 = vweird.f32 %v5553_v28 }
 0x3d1   :  { %vm1487_vm13 = vmor %vm1485_vm12, %vm1486_vm9 }
 0x3d2   :  { %v1481_v24 = vmul.f32 %v5553_v28, %v1480_v45  ;;  %v1942_v43 = vmul.f32 0.5, %v1941_v58 }
 0x3d4   :  { %v1482_v18 = vmul.f32 0.5, %v1481_v24  ;;  %v1943_v63 = vsub.f32 1.5, %v1942_v43 }
 0x3d5   :  { %v5555_v31 = vpop.eup %5554 }
 0x3d6   :  { %v1483_v44 = vsub.f32 1.5, %v1482_v18  ;;  %v1944_v51 = vmul.f32 %v5551_v8, %v1943_v63  ;;  %v1490_v47 = vmul.f32 %v5555_v31, %v1032_v12  ;;  %v767_v24 = vpop.xlane.xlu0 %766  ;;  %vm1496_vm14 = vweird.f32 %v5555_v31 }
 0x3d7   :  { %v902_v46 = vpop.xlane.xlu2 %901  ;;  %v945_v18 = vmul.f32 %v767_v24, %v5837_v5  ;;  %vm1497_vm1 = vmor %vm1495_vm15, %vm1496_vm14 }
 0x3d8   :  { %v1484_v45 = vmul.f32 %v5553_v28, %v1483_v44  ;;  %v1948_v58 = vsel %vm1947_vm11, %v5551_v8, %v1944_v51  ;;  %v1491_v50 = vmul.f32 %v5555_v31, %v1490_v47  ;;  %v990_v57 = vmul.f32 %v902_v46, %v5837_v5  ;;  %v9548_v44 = vpop.f32.mrf.mxu2  ;;  %v9561_v51 = vpop.f32.mrf.mxu1 }
 0x3d9   :  { %v2045_v43 = vmul.f32 %v1948_v58, %v9136_v39  ;;  %v9546_v1 = vadd.f32 1e-05, %v945_v18  ;;  %11233 = vst [vmem:[#allocation235_spill] sm:$0xff] %v9548_v44 }
 0x3da   :  { %v1488_v22 = vsel %vm1487_vm13, %v5553_v28, %v1484_v45  ;;  %v1492_v63 = vmul.f32 0.5, %v1491_v50  ;;  %v1078_v61 = vadd.f32 1e-05, %v990_v57  ;;  %v9555_v28 = vpop.f32.mrf.mxu3  ;;  %11236 = vst [vmem:[#allocation238_spill] sm:$0xff] %v9561_v51 }
 0x3db   :  { %v1999_v11 = vmul.f32 %v1488_v22, %v9144_v7  ;;  %v2318_v25 = vsel %vm103_vm0, %v2045_v43, 0  ;;  %11235 = vst [vmem:[#allocation237_spill] sm:$0xff] %v9555_v28  ;;  %v9557_v7 = vpop.f32.mrf.mxu0  ;;  %vm1505_vm6 = vweird.f32 %v9546_v1 }
 0x3dc   :  { %v1493_v8 = vsub.f32 1.5, %v1492_v63  ;;  %5556 = vrsqrt.f32 %v1078_v61  ;;  %v9553_v46 = vand.u32 4294901760, %v2318_v25  ;;  %vm1955_vm4 = vweird.f32 %v1078_v61 }
 0x3dd   :  { %5558 = vrsqrt.f32 %v9546_v1  ;;  %v2180_v39 = vsel %vm103_vm0, %v1999_v11, 0 }
 0x3de   :  { %11234 = vst [vmem:[#allocation236_spill] sm:$0xff] %v9553_v46  ;;  %v1494_v22 = vmul.f32 %v5555_v31, %v1493_v8  ;;  %v9559_v57 = vand.u32 4294901760, %v2180_v39  ;;  %3453 = vmatmul.f32.gmra.mxu3 %v9553_v46  ;;  %v9565_v50 = vsub.f32 %v2318_v25, %v9553_v46  ;;  %v770_v24 = vpop.xlane.xlu1 %769 }
 0x3df   :  { %v946_v18 = vmul.f32 %v770_v24, %v5837_v5 }
 0x3e0   :  { %11237 = vst [vmem:[#allocation239_spill] sm:$0xff] %v9565_v50  ;;  %v1498_v47 = vsel %vm1497_vm1, %v5555_v31, %v1494_v22  ;;  %3269 = vmatmul.f32.gmra.mxu1 %v9559_v57  ;;  %v9569_v45 = vsub.f32 %v2180_v39, %v9559_v57  ;;  %v10880_v12 = vand.u32 4294901760, %v9565_v50  ;;  %v9587_v44 = vpop.f32.mrf.mxu1 }
 0x3e1   :  { %v2000_v58 = vmul.f32 %v1498_v47, %v9157_v3  ;;  %v1034_v22 = vadd.f32 1e-05, %v946_v18  ;;  %v9583_v47 = vpop.f32.mrf.mxu2  ;;  %11239 = vst [vmem:[#allocation241_spill] sm:$0xff] %v9587_v44 }
 0x3e2   :  { %v5557_v43 = vpop.eup %5556  ;;  %v10883_v11 = vand.u32 4294901760, %v9569_v45  ;;  %v3038_v31 = vsub.f32 %v9565_v50, %v10880_v12  ;;  %11238 = vst [vmem:[#allocation240_spill] sm:$0xff] %v9583_v47  ;;  %v9592_v18 = vpop.f32.mrf.mxu3 }
 0x3e3   :  { %v5559_v63 = vpop.eup %5558  ;;  %v1950_v8 = vmul.f32 %v5557_v43, %v1078_v61  ;;  %v2183_v25 = vsel %vm103_vm0, %v2000_v58, 0  ;;  %5560 = vrsqrt.f32 %v1034_v22  ;;  %11240 = vst [vmem:[#allocation242_spill] sm:$0xff] %v9592_v18  ;;  %v9594_v51 = vpop.f32.mrf.mxu0  ;;  %vm1956_vm2 = vweird.f32 %v5557_v43 }
 0x3e4   :  { %v1500_v39 = vmul.f32 %v5559_v63, %v9546_v1  ;;  %v2670_v3 = vsub.f32 %v9569_v45, %v10883_v11  ;;  %v3039_v24 = vand.u32 4294901760, %v3038_v31  ;;  %v9585_v28 = vand.u32 4294901760, %v2183_v25  ;;  %11241 = vst [vmem:[#allocation243_spill] sm:$0xff] %v9594_v51  ;;  %vm1957_vm5 = vmor %vm1955_vm4, %vm1956_vm2 }
 0x3e5   :  { %v1951_v5 = vmul.f32 %v5557_v43, %v1950_v8  ;;  %vm1506_vm3 = vweird.f32 %v5559_v63  ;;  %vm1515_vm9 = vweird.f32 %v1034_v22 }
 0x3e6   :  { %v1501_v46 = vmul.f32 %v5559_v63, %v1500_v39  ;;  %v2671_v50 = vand.u32 4294901760, %v2670_v3  ;;  %3040 = vmatmul.f32.gmra.mxu2 %v3039_v24  ;;  %v9590_v58 = vsub.f32 %v2183_v25, %v9585_v28  ;;  %vm1507_vm7 = vmor %vm1505_vm6, %vm1506_vm3 }
 0x3e7   :  { %v1952_v12 = vmul.f32 0.5, %v1951_v5 }
 0x3e8   :  { %v1502_v11 = vmul.f32 0.5, %v1501_v46  ;;  %3273 = vmatmul.f32.gmra.mxu1 %v9585_v28  ;;  %2672 = vmatmul.f32.gmra.mxu0 %v2671_v50  ;;  %v10884_v31 = vand.u32 4294901760, %v9590_v58  ;;  %v9611_v51 = vpop.f32.mrf.mxu1 }
 0x3e9   :  { %v1953_v8 = vsub.f32 1.5, %v1952_v12  ;;  %v5561_v3 = vpop.eup %5560 }
 0x3ea   :  { %v1503_v39 = vsub.f32 1.5, %v1502_v11  ;;  %v2678_v25 = vsub.f32 %v9590_v58, %v10884_v31  ;;  %v1510_v12 = vmul.f32 %v5561_v3, %v1034_v22  ;;  %v9603_v11 = vpop.f32.mrf.mxu2  ;;  %v9606_v44 = vpop.f32.mrf.mxu3  ;;  %vm1516_vm8 = vweird.f32 %v5561_v3 }
 0x3eb   :  { %v1954_v5 = vmul.f32 %v5557_v43, %v1953_v8  ;;  %11242 = vst [vmem:[#allocation244_spill] sm:$0xff] %v9603_v11  ;;  %v9608_v31 = vpop.f32.mrf.mxu0  ;;  %vm1517_vm10 = vmor %vm1515_vm9, %vm1516_vm8 }
 0x3ec   :  { %v1504_v24 = vmul.f32 %v5559_v63, %v1503_v39  ;;  %v2679_v18 = vand.u32 4294901760, %v2678_v25  ;;  %v1511_v8 = vmul.f32 %v5561_v3, %v1510_v12  ;;  %11243 = vst [vmem:[#allocation245_spill] sm:$0xff] %v9606_v44 }
 0x3ed   :  { %v1958_v46 = vsel %vm1957_vm5, %v5557_v43, %v1954_v5 }
 0x3ee   :  { %v2046_v50 = vmul.f32 %v1958_v46, %v9207_v38  ;;  %v1508_v47 = vsel %vm1507_vm7, %v5559_v63, %v1504_v24  ;;  %v1512_v1 = vmul.f32 0.5, %v1511_v8 }
 0x3ef   :  { %v2001_v61 = vmul.f32 %v1508_v47, %v9204_v36 }
 0x3f0   :  { %v2321_v39 = vsel %vm103_vm0, %v2046_v50, 0  ;;  %2680 = vmatmul.f32.gmra.mxu0 %v2679_v18  ;;  %v1513_v63 = vsub.f32 1.5, %v1512_v1  ;;  %v9642_v44 = vpop.f32.mrf.mxu1 }
 0x3f1   :  { %v2186_v43 = vsel %vm103_vm0, %v2001_v61, 0  ;;  %v9614_v5 = vand.u32 4294901760, %v2321_v39 }
 0x3f2   :  { %v9616_v38 = vand.u32 4294901760, %v2186_v43  ;;  %v1514_v25 = vmul.f32 %v5561_v3, %v1513_v63  ;;  %v9628_v46 = vpop.f32.mrf.mxu2  ;;  %v9633_v61 = vpop.f32.mrf.mxu3 }
 0x3f3   :  { %11244 = vst [vmem:[#allocation246_spill] sm:$0xff] %v9614_v5  ;;  %3457 = vmatmul.f32.gmra.mxu3 %v9614_v5  ;;  %v9620_v36 = vsub.f32 %v2321_v39, %v9614_v5  ;;  %v9639_v1 = vpop.f32.mrf.mxu0  ;;  %v11276_v5 = vld [vmem:[#allocation30_spill] sm:$0xff] }
 0x3f4   :  { %3277 = vmatmul.f32.gmra.mxu1 %v9616_v38  ;;  %v9624_v47 = vsub.f32 %v2186_v43, %v9616_v38  ;;  %11246 = vst [vmem:[#allocation248_spill] sm:$0xff] %v9628_v46  ;;  %v1518_v12 = vsel %vm1517_vm10, %v5561_v3, %v1514_v25  ;;  %v11248_v25 = vand.u32 4294901760, %v6378_v35  ;;  %v11277_v11 = vand.u32 4294901760, %v11276_v5 }
 0x3f5   :  { %11245 = vst [vmem:[#allocation247_spill] sm:$0xff] %v9620_v36  ;;  %v10885_v18 = vand.u32 4294901760, %v9620_v36  ;;  %v2002_v8 = vmul.f32 %v1518_v12, %v9244_v20 }
 0x3f6   :  { %v10886_v24 = vand.u32 4294901760, %v9624_v47  ;;  %11247 = vst [vmem:[#allocation249_spill] sm:$0xff] %v9633_v61 }
 0x3f7   :  { %v3046_v50 = vsub.f32 %v9620_v36, %v10885_v18  ;;  %v2189_v63 = vsel %vm103_vm0, %v2002_v8, 0  ;;  %v11283_v36 = vld [vmem:[#allocation34_spill] sm:$0xff] }
 0x3f8   :  { %v2686_v22 = vsub.f32 %v9624_v47, %v10886_v24  ;;  %v9644_v3 = vand.u32 4294901760, %v2189_v63 }
 0x3f9   :  { %v3047_v39 = vand.u32 4294901760, %v3046_v50 }
 0x3fa   :  { %v2687_v43 = vand.u32 4294901760, %v2686_v22  ;;  %v9650_v20 = vsub.f32 %v2189_v63, %v9644_v3  ;;  %v9652_v12 = vpop.f32.mrf.mxu2  ;;  %v9655_v22 = vpop.f32.mrf.mxu3 }
 0x3fb   :  { %3048 = vmatmul.f32.gmra.mxu2 %v3047_v39  ;;  %3961 = vmatmul.f32.vlgmr.msrb.gmra.mxu3 %v11248_v25  ;;  %11249 = vst [vmem:[#allocation250_spill] sm:$0xff] %v9652_v12  ;;  %v9660_v39 = vpop.f32.mrf.mxu1  ;;  %v9665_v63 = vpop.f32.mrf.mxu0 }
 0x3fc   :  { %2688 = vmatmul.f32.gmra.mxu0 %v2687_v43  ;;  %3281 = vmatmul.f32.gmra.mxu1 %v9644_v3  ;;  %v10887_v50 = vand.u32 4294901760, %v9650_v20  ;;  %11250 = vst [vmem:[#allocation251_spill] sm:$0xff] %v9655_v22  ;;  %v11251_v43 = vand.u32 4294901760, %v6579_v42 }
 0x3fe   :  { %v2694_v8 = vsub.f32 %v9650_v20, %v10887_v50  ;;  %v11254_v50 = vand.u32 4294901760, %v6713_v9 }
 0x400   :  { %v2695_v18 = vand.u32 4294901760, %v2694_v8 }
 0x402   :  { %v9668_v25 = vpop.f32.mrf.mxu2  ;;  %v9670_v24 = vpop.f32.mrf.mxu3 }
 0x403   :  { %3495 = vmatmul.f32.vlgmr.msrb.gmra.mxu2 %v6378_v35  ;;  %3967 = vmatmul.f32.gmra.mxu3 %v11251_v43  ;;  %11252 = vst [vmem:[#allocation252_spill] sm:$0xff] %v9668_v25  ;;  %v9675_v8 = vpop.f32.mrf.mxu0  ;;  %v9677_v35 = vpop.f32.mrf.mxu1  ;;  %v11257_v43 = vld [vmem:[#allocation18_spill] sm:$0xff] }
 0x404   :  { %2696 = vmatmul.f32.gmra.mxu0 %v2695_v18  ;;  %4905 = vmatmul.f32.vlgmr.msrb.gmra.mxu1 %v6324_v16  ;;  %11253 = vst [vmem:[#allocation253_spill] sm:$0xff] %v9670_v24  ;;  %v11258_v22 = vand.u32 4294901760, %v11257_v43 }
 0x405   :  { %11255 = vst [vmem:[#allocation254_spill] sm:$0xff] %v9677_v35 }
 0x40a   :  { %v9681_v18 = vpop.f32.mrf.mxu2  ;;  %v9686_v24 = vpop.f32.mrf.mxu3 }
 0x40b   :  { %3500 = vmatmul.f32.gmra.mxu2 %v6579_v42  ;;  %3973 = vmatmul.f32.gmra.mxu3 %v11254_v50  ;;  %11256 = vst [vmem:[#allocation255_spill] sm:$0xff] %v9681_v18  ;;  %v11260_v42 = vld [vmem:[#allocation13_spill] sm:$0xff]  ;;  %v9690_v50 = vpop.f32.mrf.mxu0  ;;  %v9692_v25 = vpop.f32.mrf.mxu1  ;;  %v11263_v18 = vld [vmem:[#allocation22_spill] sm:$0xff] }
 0x40c   :  { %4528 = vmatmul.f32.vlgmr.msrb.gmra.mxu0 %v6324_v16  ;;  %4909 = vmatmul.f32.gmra.mxu1 %v6516_v26  ;;  %11259 = vst [vmem:[#allocation18_spill] sm:$0xff] %v9686_v24  ;;  %v11264_v61 = vand.u32 4294901760, %v11263_v18 }
 0x40d   :  { %11261 = vst [vmem:[#allocation13_spill] sm:$0xff] %v9692_v25 }
 0x412   :  { %v9694_v16 = vpop.f32.mrf.mxu2 }
 0x413   :  { %3505 = vmatmul.f32.gmra.mxu2 %v6713_v9  ;;  %3979 = vmatmul.f32.gmra.mxu3 %v11258_v22  ;;  %11262 = vst [vmem:[#allocation256_spill] sm:$0xff] %v9694_v16  ;;  %v9699_v9 = vpop.f32.mrf.mxu3  ;;  %v11266_v22 = vld [vmem:[#allocation16_spill] sm:$0xff]  ;;  %v9705_v24 = vpop.f32.mrf.mxu0  ;;  %v11270_v16 = vld [vmem:[#allocation26_spill] sm:$0xff] }
 0x414   :  { %4532 = vmatmul.f32.gmra.mxu0 %v6516_v26  ;;  %4913 = vmatmul.f32.gmra.mxu1 %v11260_v42  ;;  %11265 = vst [vmem:[#allocation22_spill] sm:$0xff] %v9699_v9  ;;  %v9703_v26 = vpop.f32.mrf.mxu1  ;;  %v11271_v46 = vand.u32 4294901760, %v11270_v16 }
 0x415   :  { %11267 = vst [vmem:[#allocation16_spill] sm:$0xff] %v9703_v26 }
 0x416   :  { %11268 = vst [vmem:[#allocation257_spill] sm:$0xff] %v9705_v24  ;;  %v11345_v24 = vld [vmem:[#allocation69_spill] sm:$0xff] }
 0x41a   :  { %v9707_v12 = vpop.f32.mrf.mxu2 }
 0x41b   :  { %3510 = vmatmul.f32.gmra.mxu2 %v11257_v43  ;;  %3985 = vmatmul.f32.gmra.mxu3 %v11264_v61  ;;  %11269 = vst [vmem:[#allocation258_spill] sm:$0xff] %v9707_v12  ;;  %v11272_v61 = vld [vmem:[#allocation20_spill] sm:$0xff]  ;;  %v9714_v43 = vpop.f32.mrf.mxu3  ;;  %v9718_v9 = vpop.f32.mrf.mxu0 }
 0x41c   :  { %4536 = vmatmul.f32.gmra.mxu0 %v11260_v42  ;;  %4917 = vmatmul.f32.gmra.mxu1 %v11266_v22  ;;  %11273 = vst [vmem:[#allocation26_spill] sm:$0xff] %v9714_v43  ;;  %v9716_v42 = vpop.f32.mrf.mxu1 }
 0x41d   :  { %11274 = vst [vmem:[#allocation20_spill] sm:$0xff] %v9716_v42  ;;  %v11284_v42 = vand.u32 4294901760, %v11283_v36 }
 0x41e   :  { %11275 = vst [vmem:[#allocation259_spill] sm:$0xff] %v9718_v9 }
 0x422   :  { %v9723_v12 = vpop.f32.mrf.mxu2 }
 0x423   :  { %3515 = vmatmul.f32.gmra.mxu2 %v11263_v18  ;;  %3991 = vmatmul.f32.gmra.mxu3 %v11271_v46  ;;  %11278 = vst [vmem:[#allocation30_spill] sm:$0xff] %v9723_v12  ;;  %v11279_v46 = vld [vmem:[#allocation24_spill] sm:$0xff]  ;;  %v9727_v18 = vpop.f32.mrf.mxu3  ;;  %v9731_v43 = vpop.f32.mrf.mxu0 }
 0x424   :  { %4540 = vmatmul.f32.gmra.mxu0 %v11266_v22  ;;  %4921 = vmatmul.f32.gmra.mxu1 %v11272_v61  ;;  %11280 = vst [vmem:[#allocation24_spill] sm:$0xff] %v9727_v18  ;;  %v9729_v22 = vpop.f32.mrf.mxu1 }
 0x425   :  { %11281 = vst [vmem:[#allocation260_spill] sm:$0xff] %v9729_v22  ;;  %v11290_v22 = vld [vmem:[#allocation38_spill] sm:$0xff] }
 0x426   :  { %11282 = vst [vmem:[#allocation261_spill] sm:$0xff] %v9731_v43  ;;  %v11291_v43 = vand.u32 4294901760, %v11290_v22 }
 0x42b   :  { %3520 = vmatmul.f32.gmra.mxu2 %v11270_v16  ;;  %3997 = vmatmul.f32.gmra.mxu3 %v11277_v11  ;;  %v9736_v16 = vpop.f32.mrf.mxu2  ;;  %v11286_v11 = vld [vmem:[#allocation28_spill] sm:$0xff]  ;;  %v9742_v12 = vpop.f32.mrf.mxu0 }
 0x42c   :  { %4544 = vmatmul.f32.gmra.mxu0 %v11272_v61  ;;  %4925 = vmatmul.f32.gmra.mxu1 %v11279_v46  ;;  %11285 = vst [vmem:[#allocation34_spill] sm:$0xff] %v9736_v16  ;;  %v9740_v61 = vpop.f32.mrf.mxu3  ;;  %v9744_v18 = vpop.f32.mrf.mxu1 }
 0x42d   :  { %11287 = vst [vmem:[#allocation28_spill] sm:$0xff] %v9740_v61 }
 0x42e   :  { %11288 = vst [vmem:[#allocation262_spill] sm:$0xff] %v9742_v12 }
 0x42f   :  { %11289 = vst [vmem:[#allocation263_spill] sm:$0xff] %v9744_v18  ;;  %v11297_v18 = vand.u32 4294901760, %v7344_v52 }
 0x433   :  { %3525 = vmatmul.f32.gmra.mxu2 %v11276_v5  ;;  %4003 = vmatmul.f32.gmra.mxu3 %v11284_v42  ;;  %v11292_v5 = vld [vmem:[#allocation32_spill] sm:$0xff]  ;;  %v9751_v42 = vpop.f32.mrf.mxu2  ;;  %v9755_v16 = vpop.f32.mrf.mxu0 }
 0x434   :  { %4548 = vmatmul.f32.gmra.mxu0 %v11279_v46  ;;  %4929 = vmatmul.f32.gmra.mxu1 %v11286_v11  ;;  %11293 = vst [vmem:[#allocation38_spill] sm:$0xff] %v9751_v42  ;;  %v9753_v46 = vpop.f32.mrf.mxu3  ;;  %v9757_v61 = vpop.f32.mrf.mxu1 }
 0x435   :  { %11294 = vst [vmem:[#allocation32_spill] sm:$0xff] %v9753_v46  ;;  %v11302_v46 = vand.u32 4294901760, %v7402_v55 }
 0x436   :  { %11295 = vst [vmem:[#allocation264_spill] sm:$0xff] %v9755_v16 }
 0x437   :  { %11296 = vst [vmem:[#allocation265_spill] sm:$0xff] %v9757_v61 }
 0x43b   :  { %3530 = vmatmul.f32.gmra.mxu2 %v11283_v36  ;;  %4009 = vmatmul.f32.gmra.mxu3 %v11291_v43  ;;  %v11298_v36 = vld [vmem:[#allocation36_spill] sm:$0xff]  ;;  %v9764_v43 = vpop.f32.mrf.mxu2  ;;  %v9773_v61 = vpop.f32.mrf.mxu0 }
 0x43c   :  { %4552 = vmatmul.f32.gmra.mxu0 %v11286_v11  ;;  %4933 = vmatmul.f32.gmra.mxu1 %v11292_v5  ;;  %11299 = vst [vmem:[#allocation36_spill] sm:$0xff] %v9764_v43  ;;  %v9766_v11 = vpop.f32.mrf.mxu3  ;;  %v9768_v42 = vpop.f32.mrf.mxu1 }
 0x43d   :  { %11300 = vst [vmem:[#allocation266_spill] sm:$0xff] %v9766_v11 }
 0x43e   :  { %11301 = vst [vmem:[#allocation267_spill] sm:$0xff] %v9768_v42 }
 0x43f   :  { %11303 = vst [vmem:[#allocation268_spill] sm:$0xff] %v9773_v61 }
 0x443   :  { %3535 = vmatmul.f32.gmra.mxu2 %v11290_v22  ;;  %4015 = vmatmul.f32.gmra.mxu3 %v11297_v18  ;;  %v9777_v18 = vpop.f32.mrf.mxu2  ;;  %v11305_v22 = vand.u32 4294901760, %v7458_v41  ;;  %v9784_v11 = vpop.f32.mrf.mxu0 }
 0x444   :  { %4556 = vmatmul.f32.gmra.mxu0 %v11292_v5  ;;  %4937 = vmatmul.f32.gmra.mxu1 %v11298_v36  ;;  %11304 = vst [vmem:[#allocation269_spill] sm:$0xff] %v9777_v18  ;;  %v9782_v5 = vpop.f32.mrf.mxu3  ;;  %v11311_v18 = vld [vmem:[#allocation5_spill] sm:$0xff] }
 0x445   :  { %11306 = vst [vmem:[#allocation270_spill] sm:$0xff] %v9782_v5  ;;  %v11312_v43 = vand.u32 4294901760, %v11311_v18 }
 0x446   :  { %11307 = vst [vmem:[#allocation271_spill] sm:$0xff] %v9784_v11 }
 0x44b   :  { %3540 = vmatmul.f32.gmra.mxu2 %v7344_v52  ;;  %4021 = vmatmul.f32.gmra.mxu3 %v11302_v46  ;;  %v9786_v52 = vpop.f32.mrf.mxu1  ;;  %v11309_v46 = vld [vmem:[#allocation42_spill] sm:$0xff] }
 0x44c   :  { %4560 = vmatmul.f32.gmra.mxu0 %v11298_v36  ;;  %4941 = vmatmul.f32.gmra.mxu1 %v7300_v4  ;;  %11308 = vst [vmem:[#allocation272_spill] sm:$0xff] %v9786_v52  ;;  %v9790_v36 = vpop.f32.mrf.mxu2  ;;  %v9799_v5 = vpop.f32.mrf.mxu3 }
 0x44d   :  { %11310 = vst [vmem:[#allocation42_spill] sm:$0xff] %v9790_v36  ;;  %v9801_v52 = vpop.f32.mrf.mxu0 }
 0x44e   :  { %11316 = vst [vmem:[#allocation273_spill] sm:$0xff] %v9801_v52 }
 0x453   :  { %3545 = vmatmul.f32.gmra.mxu2 %v7402_v55  ;;  %4027 = vmatmul.f32.gmra.mxu3 %v11305_v22  ;;  %v11313_v55 = vld [vmem:[#allocation45_spill] sm:$0xff] }
 0x454   :  { %4564 = vmatmul.f32.gmra.mxu0 %v7300_v4  ;;  %4945 = vmatmul.f32.gmra.mxu1 %v11309_v46  ;;  %11315 = vst [vmem:[#allocation45_spill] sm:$0xff] %v9799_v5  ;;  %v11317_v4 = vld [vmem:[#allocation6_spill] sm:$0xff]  ;;  %v9806_v36 = vpop.f32.mrf.mxu2 }
 0x455   :  { %v11318_v42 = vand.u32 4294901760, %v11317_v4  ;;  %11319 = vst [vmem:[#allocation6_spill] sm:$0xff] %v9806_v36  ;;  %v11324_v5 = vld [vmem:[#allocation58_spill] sm:$0xff] }
 0x456   :  { %v11325_v52 = vand.u32 4294901760, %v11324_v5 }
 0x45b   :  { %3550 = vmatmul.f32.gmra.mxu2 %v7458_v41  ;;  %4033 = vmatmul.f32.gmra.mxu3 %v11312_v43  ;;  %v11320_v41 = vld [vmem:[#allocation48_spill] sm:$0xff]  ;;  %v9810_v43 = vpop.f32.mrf.mxu3 }
 0x45c   :  { %4568 = vmatmul.f32.gmra.mxu0 %v11309_v46  ;;  %4949 = vmatmul.f32.gmra.mxu1 %v11313_v55  ;;  %11321 = vst [vmem:[#allocation48_spill] sm:$0xff] %v9810_v43 }
 0x45d   :  { %v9797_v22 = vpop.f32.mrf.mxu1 }
 0x45e   :  { %11314 = vst [vmem:[#allocation5_spill] sm:$0xff] %v9797_v22 }
 0x463   :  { %3555 = vmatmul.f32.gmra.mxu2 %v11311_v18  ;;  %4039 = vmatmul.f32.gmra.mxu3 %v11318_v42  ;;  %v11326_v42 = vld [vmem:[#allocation51_spill] sm:$0xff]  ;;  %v9821_v18 = vpop.f32.mrf.mxu2 }
 0x464   :  { %4572 = vmatmul.f32.gmra.mxu0 %v11313_v55  ;;  %4953 = vmatmul.f32.gmra.mxu1 %v11320_v41  ;;  %11327 = vst [vmem:[#allocation58_spill] sm:$0xff] %v9821_v18  ;;  %v9823_v55 = vpop.f32.mrf.mxu3 }
 0x465   :  { %v9812_v46 = vpop.f32.mrf.mxu0  ;;  %v9814_v22 = vpop.f32.mrf.mxu1  ;;  %11328 = vst [vmem:[#allocation51_spill] sm:$0xff] %v9823_v55  ;;  %v11337_v55 = vld [vmem:[#allocation64_spill] sm:$0xff] }
 0x466   :  { %11322 = vst [vmem:[#allocation274_spill] sm:$0xff] %v9812_v46 }
 0x467   :  { %11323 = vst [vmem:[#allocation275_spill] sm:$0xff] %v9814_v22  ;;  %v11331_v22 = vld [vmem:[#allocation61_spill] sm:$0xff] }
 0x468   :  { %v11332_v46 = vand.u32 4294901760, %v11331_v22 }
 0x46b   :  { %3560 = vmatmul.f32.gmra.mxu2 %v11317_v4  ;;  %4045 = vmatmul.f32.gmra.mxu3 %v11325_v52  ;;  %v11333_v52 = vld [vmem:[#allocation57_spill] sm:$0xff]  ;;  %v9834_v4 = vpop.f32.mrf.mxu2 }
 0x46c   :  { %4576 = vmatmul.f32.gmra.mxu0 %v11320_v41  ;;  %4957 = vmatmul.f32.gmra.mxu1 %v11326_v42  ;;  %11334 = vst [vmem:[#allocation61_spill] sm:$0xff] %v9834_v4 }
 0x46d   :  { %v9825_v36 = vpop.f32.mrf.mxu0 }
 0x46e   :  { %11329 = vst [vmem:[#allocation276_spill] sm:$0xff] %v9825_v36  ;;  %v11342_v36 = vld [vmem:[#allocation62_spill] sm:$0xff] }
 0x471   :  { %v9827_v43 = vpop.f32.mrf.mxu1 }
 0x472   :  { %11330 = vst [vmem:[#allocation277_spill] sm:$0xff] %v9827_v43  ;;  %v11338_v43 = vand.u32 4294901760, %v11337_v55 }
 0x473   :  { %3565 = vmatmul.f32.gmra.mxu2 %v11324_v5  ;;  %4051 = vmatmul.f32.gmra.mxu3 %v11332_v46  ;;  %v9846_v5 = vld [vmem:[%s10491_s2] ss:$0 sm:$0xff]  ;;  %v11339_v46 = vld [vmem:[#allocation60_spill] sm:$0xff] }
 0x474   :  { %4580 = vmatmul.f32.gmra.mxu0 %v11326_v42  ;;  %4961 = vmatmul.f32.gmra.mxu1 %v11333_v52 }
 0x476   :  { %v3458_v41 = vpop.f32.mrf.mxu3 }
 0x479   :  { %v9836_v11 = vpop.f32.mrf.mxu0  ;;  %v9838_v18 = vpop.f32.mrf.mxu1 }
 0x47a   :  { %11335 = vst [vmem:[#allocation57_spill] sm:$0xff] %v9836_v11  ;;  %v2354_v11 = vadd.f32 %v9846_v5, %v8488_v34  ;;  %v2362_v34 = vadd.f32 %v9846_v5, %v8576_v33 }
 0x47b   :  { %11336 = vst [vmem:[#allocation278_spill] sm:$0xff] %v9838_v18  ;;  %3570 = vmatmul.f32.gmra.mxu2 %v11331_v22  ;;  %4057 = vmatmul.f32.gmra.mxu3 %v11338_v43  ;;  %v11341_v43 = vand.u32 4294901760, %v7906_v37 }
 0x47c   :  { %4584 = vmatmul.f32.gmra.mxu0 %v11333_v52  ;;  %4965 = vmatmul.f32.gmra.mxu1 %v11339_v46  ;;  %v3111_v52 = vadd.f32 %v8383_v0, %v2354_v11  ;;  %v11346_v0 = vld [vmem:[#allocation107_spill] sm:$0xff] }
 0x47d   :  { %v3115_v11 = vadd.f32 %v11346_v0, %v2362_v34 }
 0x47e   :  { %v3049_v42 = vpop.f32.mrf.mxu2  ;;  %v3962_v4 = vpop.f32.mrf.mxu3 }
 0x481   :  { %v9852_v18 = vpop.f32.mrf.mxu0  ;;  %v4906_v22 = vpop.f32.mrf.mxu1 }
 0x482   :  { %11340 = vst [vmem:[#allocation64_spill] sm:$0xff] %v9852_v18 }
 0x483   :  { %3575 = vmatmul.f32.gmra.mxu2 %v11337_v55  ;;  %4063 = vmatmul.f32.gmra.mxu3 %v11341_v43  ;;  %v11343_v55 = vld [vmem:[#allocation72_spill] sm:$0xff] }
 0x484   :  { %4588 = vmatmul.f32.gmra.mxu0 %v11339_v46  ;;  %4969 = vmatmul.f32.gmra.mxu1 %v11342_v36  ;;  %v11344_v43 = vand.u32 4294901760, %v11343_v55 }
 0x486   :  { %v3496_v61 = vpop.f32.mrf.mxu2  ;;  %v3968_v16 = vpop.f32.mrf.mxu3 }
 0x487   :  { %v3497_v12 = vadd.f32 %v3496_v61, %v3111_v52 }
 0x489   :  { %v3963_v26 = vadd.f32 %v3962_v4, %v3497_v12  ;;  %v4529_v18 = vpop.f32.mrf.mxu0  ;;  %v4910_v9 = vpop.f32.mrf.mxu1  ;;  %v3050_v12 = vadd.f32 %v9846_v5, %v3049_v42  ;;  %v11347_v4 = vld [vmem:[#allocation116_spill] sm:$0xff] }
 0x48a   :  { %v11351_v42 = vld [vmem:[#allocation112_spill] sm:$0xff] }
 0x48b   :  { %v4530_v25 = vadd.f32 %v4529_v18, %v3963_v26  ;;  %3580 = vmatmul.f32.gmra.mxu2 %v7906_v37  ;;  %4069 = vmatmul.f32.gmra.mxu3 %v11344_v43  ;;  %v2370_v26 = vadd.f32 %v9846_v5, %v11347_v4 }
 0x48c   :  { %4592 = vmatmul.f32.gmra.mxu0 %v11342_v36  ;;  %4973 = vmatmul.f32.gmra.mxu1 %v11345_v24 }
 0x48d   :  { %v4907_v46 = vadd.f32 %v4906_v22, %v4530_v25  ;;  %v11348_v25 = vld [vmem:[#allocation75_spill] sm:$0xff]  ;;  %v9874_v22 = vadd.f32 %v3458_v41, %v3050_v12  ;;  %v3119_v0 = vadd.f32 %v11351_v42, %v2370_v26  ;;  %v11354_v12 = vld [vmem:[#allocation73_spill] sm:$0xff] }
 0x48e   :  { %v3501_v61 = vpop.f32.mrf.mxu2  ;;  %v3974_v52 = vpop.f32.mrf.mxu3  ;;  %v11349_v36 = vand.u32 4294901760, %v11348_v25  ;;  %v11355_v26 = vld [vmem:[#allocation121_spill] sm:$0xff] }
 0x48f   :  { %5257 = vst [vmem:[#allocation2] sm:$0xff] %v4907_v46  ;;  %v3502_v33 = vadd.f32 %v3501_v61, %v3115_v11  ;;  %v11350_v46 = vld [vmem:[#allocation71_spill] sm:$0xff] }
 0x491   :  { %v3969_v37 = vadd.f32 %v3968_v16, %v3502_v33  ;;  %v4533_v18 = vpop.f32.mrf.mxu0  ;;  %v4914_v35 = vpop.f32.mrf.mxu1  ;;  %v2378_v33 = vadd.f32 %v9846_v5, %v8745_v10 }
 0x493   :  { %v4534_v43 = vadd.f32 %v4533_v18, %v3969_v37  ;;  %3585 = vmatmul.f32.gmra.mxu2 %v11343_v55  ;;  %4075 = vmatmul.f32.gmra.mxu3 %v11349_v36 }
 0x494   :  { %4596 = vmatmul.f32.gmra.mxu0 %v11345_v24  ;;  %4977 = vmatmul.f32.gmra.mxu1 %v11350_v46 }
 0x495   :  { %v4911_v34 = vadd.f32 %v4910_v9, %v4534_v43  ;;  %v11352_v9 = vld [vmem:[#allocation80_spill] sm:$0xff]  ;;  %v3123_v43 = vadd.f32 %v11355_v26, %v2378_v33  ;;  %v11359_v33 = vld [vmem:[#allocation79_spill] sm:$0xff] }
 0x496   :  { %v3506_v11 = vpop.f32.mrf.mxu2  ;;  %v3980_v61 = vpop.f32.mrf.mxu3  ;;  %v11353_v41 = vand.u32 4294901760, %v11352_v9 }
 0x497   :  { %5258 = vst [vmem:[#allocation2 + $0x8] sm:$0xff] %v4911_v34  ;;  %v3507_v16 = vadd.f32 %v3506_v11, %v3119_v0 }
 0x499   :  { %v3975_v55 = vadd.f32 %v3974_v52, %v3507_v16  ;;  %v4537_v4 = vpop.f32.mrf.mxu0  ;;  %v4918_v37 = vpop.f32.mrf.mxu1  ;;  %v11356_v52 = vld [vmem:[#allocation134_spill] sm:$0xff] }
 0x49a   :  { %v2386_v42 = vadd.f32 %v9846_v5, %v11356_v52 }
 0x49b   :  { %v4538_v18 = vadd.f32 %v4537_v4, %v3975_v55  ;;  %3590 = vmatmul.f32.gmra.mxu2 %v11348_v25  ;;  %4081 = vmatmul.f32.gmra.mxu3 %v11353_v41  ;;  %v11360_v4 = vld [vmem:[#allocation127_spill] sm:$0xff] }
 0x49c   :  { %4600 = vmatmul.f32.gmra.mxu0 %v11350_v46  ;;  %4981 = vmatmul.f32.gmra.mxu1 %v11354_v12 }
 0x49d   :  { %v4915_v24 = vadd.f32 %v4914_v35, %v4538_v18  ;;  %v11357_v35 = vld [vmem:[#allocation83_spill] sm:$0xff]  ;;  %v3127_v18 = vadd.f32 %v11360_v4, %v2386_v42  ;;  %v11363_v42 = vld [vmem:[#allocation81_spill] sm:$0xff] }
 0x49e   :  { %v3511_v36 = vpop.f32.mrf.mxu2  ;;  %v3986_v34 = vpop.f32.mrf.mxu3  ;;  %v11358_v55 = vand.u32 4294901760, %v11357_v35 }
 0x49f   :  { %5259 = vst [vmem:[#allocation2 + $0x10] sm:$0xff] %v4915_v24  ;;  %v3512_v10 = vadd.f32 %v3511_v36, %v3123_v43 }
 0x4a1   :  { %v3981_v0 = vadd.f32 %v3980_v61, %v3512_v10  ;;  %v4541_v11 = vpop.f32.mrf.mxu0  ;;  %v4922_v25 = vpop.f32.mrf.mxu1  ;;  %v2394_v61 = vadd.f32 %v9846_v5, %v8904_v14 }
 0x4a3   :  { %v4542_v16 = vadd.f32 %v4541_v11, %v3981_v0  ;;  %3595 = vmatmul.f32.gmra.mxu2 %v11352_v9  ;;  %4087 = vmatmul.f32.gmra.mxu3 %v11358_v55  ;;  %v11364_v0 = vld [vmem:[#allocation133_spill] sm:$0xff] }
 0x4a4   :  { %4604 = vmatmul.f32.gmra.mxu0 %v11354_v12  ;;  %4985 = vmatmul.f32.gmra.mxu1 %v11359_v33  ;;  %v3131_v11 = vadd.f32 %v11364_v0, %v2394_v61 }
 0x4a5   :  { %v4919_v46 = vadd.f32 %v4918_v37, %v4542_v16  ;;  %v11361_v37 = vld [vmem:[#allocation90_spill] sm:$0xff] }
 0x4a6   :  { %v3516_v41 = vpop.f32.mrf.mxu2  ;;  %v3992_v24 = vpop.f32.mrf.mxu3  ;;  %v11362_v52 = vand.u32 4294901760, %v11361_v37 }
 0x4a7   :  { %5260 = vst [vmem:[#allocation2 + $0x18] sm:$0xff] %v4919_v46  ;;  %v3517_v26 = vadd.f32 %v3516_v41, %v3127_v18 }
 0x4a9   :  { %v3987_v43 = vadd.f32 %v3986_v34, %v3517_v26  ;;  %v4545_v36 = vpop.f32.mrf.mxu0  ;;  %v4926_v9 = vpop.f32.mrf.mxu1  ;;  %v2402_v34 = vadd.f32 %v9846_v5, %v8999_v17  ;;  %v11367_v26 = vld [vmem:[#allocation87_spill] sm:$0xff] }
 0x4ab   :  { %v4546_v10 = vadd.f32 %v4545_v36, %v3987_v43  ;;  %3600 = vmatmul.f32.gmra.mxu2 %v11357_v35  ;;  %4093 = vmatmul.f32.gmra.mxu3 %v11362_v52  ;;  %v3135_v61 = vadd.f32 %v8936_v60, %v2402_v34  ;;  %v11370_v60 = vld [vmem:[#allocation92_spill] sm:$0xff] }
 0x4ac   :  { %4608 = vmatmul.f32.gmra.mxu0 %v11359_v33  ;;  %4989 = vmatmul.f32.gmra.mxu1 %v11363_v42 }
 0x4ad   :  { %v4923_v12 = vadd.f32 %v4922_v25, %v4546_v10  ;;  %v11365_v25 = vld [vmem:[#allocation93_spill] sm:$0xff] }
 0x4ae   :  { %v3521_v16 = vpop.f32.mrf.mxu2  ;;  %v3998_v55 = vpop.f32.mrf.mxu3  ;;  %v11366_v41 = vand.u32 4294901760, %v11365_v25 }
 0x4af   :  { %5261 = vst [vmem:[#allocation2 + $0x20] sm:$0xff] %v4923_v12  ;;  %v3522_v14 = vadd.f32 %v3521_v16, %v3131_v11  ;;  %v11371_v11 = vld [vmem:[#allocation147_spill] sm:$0xff] }
 0x4b1   :  { %v3993_v46 = vadd.f32 %v3992_v24, %v3522_v14  ;;  %v4549_v4 = vpop.f32.mrf.mxu0  ;;  %v4930_v35 = vpop.f32.mrf.mxu1  ;;  %v2410_v24 = vadd.f32 %v9846_v5, %v9060_v21 }
 0x4b3   :  { %v4550_v18 = vadd.f32 %v4549_v4, %v3993_v46  ;;  %3605 = vmatmul.f32.gmra.mxu2 %v11361_v37  ;;  %4099 = vmatmul.f32.gmra.mxu3 %v11366_v41  ;;  %v3139_v16 = vadd.f32 %v11371_v11, %v2410_v24 }
 0x4b4   :  { %4612 = vmatmul.f32.gmra.mxu0 %v11363_v42  ;;  %4993 = vmatmul.f32.gmra.mxu1 %v11367_v26 }
 0x4b5   :  { %v4927_v33 = vadd.f32 %v4926_v9, %v4550_v18  ;;  %v11368_v9 = vld [vmem:[#allocation98_spill] sm:$0xff] }
 0x4b6   :  { %v3526_v43 = vpop.f32.mrf.mxu2  ;;  %v4004_v36 = vpop.f32.mrf.mxu3  ;;  %v11369_v0 = vand.u32 4294901760, %v11368_v9 }
 0x4b7   :  { %5262 = vst [vmem:[#allocation2 + $0x28] sm:$0xff] %v4927_v33  ;;  %v3527_v17 = vadd.f32 %v3526_v43, %v3135_v61 }
 0x4b9   :  { %v3999_v10 = vadd.f32 %v3998_v55, %v3527_v17  ;;  %v4553_v52 = vpop.f32.mrf.mxu0  ;;  %v4934_v37 = vpop.f32.mrf.mxu1  ;;  %v2418_v55 = vadd.f32 %v9846_v5, %v9101_v40 }
 0x4bb   :  { %v4554_v12 = vadd.f32 %v4553_v52, %v3999_v10  ;;  %3610 = vmatmul.f32.gmra.mxu2 %v11365_v25  ;;  %4105 = vmatmul.f32.gmra.mxu3 %v11369_v0  ;;  %v3143_v61 = vadd.f32 %v9069_v6, %v2418_v55  ;;  %v11377_v6 = vld [vmem:[#allocation105_spill] sm:$0xff] }
 0x4bc   :  { %4616 = vmatmul.f32.gmra.mxu0 %v11367_v26  ;;  %4997 = vmatmul.f32.gmra.mxu1 %v11370_v60  ;;  %v11374_v26 = vld [vmem:[#allocation95_spill] sm:$0xff] }
 0x4bd   :  { %v4931_v42 = vadd.f32 %v4930_v35, %v4554_v12  ;;  %v11372_v35 = vld [vmem:[#allocation109_spill] sm:$0xff] }
 0x4be   :  { %v3531_v14 = vpop.f32.mrf.mxu2  ;;  %v4010_v34 = vpop.f32.mrf.mxu3  ;;  %v11373_v41 = vand.u32 4294901760, %v11372_v35 }
 0x4bf   :  { %5263 = vst [vmem:[#allocation2 + $0x30] sm:$0xff] %v4931_v42  ;;  %v3532_v21 = vadd.f32 %v3531_v14, %v3139_v16  ;;  %v2434_v16 = vadd.f32 %v9846_v5, %v9162_v15 }
 0x4c1   :  { %v4005_v46 = vadd.f32 %v4004_v36, %v3532_v21  ;;  %v4557_v4 = vpop.f32.mrf.mxu0  ;;  %v4938_v18 = vpop.f32.mrf.mxu1  ;;  %v2426_v36 = vadd.f32 %v9846_v5, %v9129_v54 }
 0x4c3   :  { %v4558_v25 = vadd.f32 %v4557_v4, %v4005_v46  ;;  %3615 = vmatmul.f32.gmra.mxu2 %v11368_v9  ;;  %4111 = vmatmul.f32.gmra.mxu3 %v11373_v41  ;;  %v3147_v42 = vadd.f32 %v9117_v30, %v2426_v36  ;;  %v11378_v46 = vld [vmem:[#allocation124_spill] sm:$0xff]  ;;  %v11380_v30 = vld [vmem:[#allocation111_spill] sm:$0xff] }
 0x4c4   :  { %4620 = vmatmul.f32.gmra.mxu0 %v11370_v60  ;;  %5001 = vmatmul.f32.gmra.mxu1 %v11374_v26  ;;  %v11379_v4 = vand.u32 4294901760, %v11378_v46 }
 0x4c5   :  { %v4935_v33 = vadd.f32 %v4934_v37, %v4558_v25  ;;  %v11375_v37 = vld [vmem:[#allocation113_spill] sm:$0xff]  ;;  %v11381_v25 = vld [vmem:[#allocation163_spill] sm:$0xff] }
 0x4c6   :  { %v3536_v43 = vpop.f32.mrf.mxu2  ;;  %v4016_v17 = vpop.f32.mrf.mxu3  ;;  %v11376_v9 = vand.u32 4294901760, %v11375_v37 }
 0x4c7   :  { %5264 = vst [vmem:[#allocation2 + $0x38] sm:$0xff] %v4935_v33  ;;  %v3537_v40 = vadd.f32 %v3536_v43, %v3143_v61 }
 0x4c9   :  { %v4011_v24 = vadd.f32 %v4010_v34, %v3537_v40  ;;  %v4561_v10 = vpop.f32.mrf.mxu0  ;;  %v4942_v52 = vpop.f32.mrf.mxu1 }
 0x4cb   :  { %v4562_v12 = vadd.f32 %v4561_v10, %v4011_v24  ;;  %3620 = vmatmul.f32.gmra.mxu2 %v11372_v35  ;;  %4117 = vmatmul.f32.gmra.mxu3 %v11376_v9  ;;  %v3151_v35 = vadd.f32 %v11381_v25, %v2434_v16  ;;  %v11383_v24 = vld [vmem:[#allocation129_spill] sm:$0xff] }
 0x4cc   :  { %4624 = vmatmul.f32.gmra.mxu0 %v11374_v26  ;;  %5005 = vmatmul.f32.gmra.mxu1 %v11377_v6  ;;  %v11382_v26 = vld [vmem:[#allocation170_spill] sm:$0xff]  ;;  %v11384_v10 = vand.u32 4294901760, %v11383_v24 }
 0x4cd   :  { %v4939_v0 = vadd.f32 %v4938_v18, %v4562_v12  ;;  %v2442_v61 = vadd.f32 %v9846_v5, %v11382_v26  ;;  %v11385_v12 = vld [vmem:[#allocation122_spill] sm:$0xff] }
 0x4ce   :  { %v3541_v60 = vpop.f32.mrf.mxu2  ;;  %v4022_v11 = vpop.f32.mrf.mxu3 }
 0x4cf   :  { %5265 = vst [vmem:[#allocation2 + $0x40] sm:$0xff] %v4939_v0  ;;  %v3542_v54 = vadd.f32 %v3541_v60, %v3147_v42  ;;  %v2450_v60 = vadd.f32 %v9846_v5, %v9249_v59 }
 0x4d1   :  { %v4017_v14 = vadd.f32 %v4016_v17, %v3542_v54  ;;  %v4565_v34 = vpop.f32.mrf.mxu0  ;;  %v4946_v21 = vpop.f32.mrf.mxu1 }
 0x4d3   :  { %v4566_v55 = vadd.f32 %v4565_v34, %v4017_v14  ;;  %3625 = vmatmul.f32.gmra.mxu2 %v11375_v37  ;;  %4123 = vmatmul.f32.gmra.mxu3 %v11379_v4  ;;  %v11386_v37 = vld [vmem:[#allocation165_spill] sm:$0xff]  ;;  %v11387_v34 = vld [vmem:[#allocation135_spill] sm:$0xff] }
 0x4d4   :  { %4628 = vmatmul.f32.gmra.mxu0 %v11377_v6  ;;  %5009 = vmatmul.f32.gmra.mxu1 %v11380_v30  ;;  %v3155_v9 = vadd.f32 %v11386_v37, %v2442_v61  ;;  %v11390_v4 = vld [vmem:[#allocation171_spill] sm:$0xff]  ;;  %v11391_v61 = vld [vmem:[#allocation144_spill] sm:$0xff] }
 0x4d5   :  { %v4943_v18 = vadd.f32 %v4942_v52, %v4566_v55 }
 0x4d6   :  { %v3546_v41 = vpop.f32.mrf.mxu2  ;;  %v4028_v33 = vpop.f32.mrf.mxu3 }
 0x4d7   :  { %5266 = vst [vmem:[#allocation2 + $0x48] sm:$0xff] %v4943_v18  ;;  %v3547_v15 = vadd.f32 %v3546_v41, %v3151_v35  ;;  %v3159_v18 = vadd.f32 %v11390_v4, %v2450_v60  ;;  %v2458_v35 = vadd.f32 %v9846_v5, %v9301_v48  ;;  %v11397_v4 = vld [vmem:[#allocation154_spill] sm:$0xff] }
 0x4d9   :  { %v4023_v43 = vadd.f32 %v4022_v11, %v3547_v15  ;;  %v4569_v17 = vpop.f32.mrf.mxu0  ;;  %v4950_v40 = vpop.f32.mrf.mxu1 }
 0x4db   :  { %v4570_v36 = vadd.f32 %v4569_v17, %v4023_v43  ;;  %3630 = vmatmul.f32.gmra.mxu2 %v11378_v46  ;;  %4129 = vmatmul.f32.gmra.mxu3 %v11384_v10  ;;  %v11389_v46 = vld [vmem:[#allocation126_spill] sm:$0xff]  ;;  %v11392_v43 = vand.u32 4294901760, %v11391_v61 }
 0x4dc   :  { %4632 = vmatmul.f32.gmra.mxu0 %v11380_v30  ;;  %5013 = vmatmul.f32.gmra.mxu1 %v11385_v12 }
 0x4dd   :  { %v4947_v52 = vadd.f32 %v4946_v21, %v4570_v36  ;;  %v11388_v21 = vand.u32 4294901760, %v11387_v34  ;;  %v3163_v36 = vadd.f32 %v9255_v2, %v2458_v35  ;;  %v11396_v2 = vld [vmem:[#allocation141_spill] sm:$0xff] }
 0x4de   :  { %v3551_v0 = vpop.f32.mrf.mxu2  ;;  %v4034_v6 = vpop.f32.mrf.mxu3 }
 0x4df   :  { %5267 = vst [vmem:[#allocation2 + $0x50] sm:$0xff] %v4947_v52  ;;  %v3552_v42 = vadd.f32 %v3551_v0, %v3155_v9  ;;  %v2466_v52 = vadd.f32 %v9846_v5, %v9331_v23 }
 0x4e1   :  { %v4029_v11 = vadd.f32 %v4028_v33, %v3552_v42  ;;  %v4573_v54 = vpop.f32.mrf.mxu0  ;;  %v4954_v16 = vpop.f32.mrf.mxu1 }
 0x4e3   :  { %v4574_v14 = vadd.f32 %v4573_v54, %v4029_v11  ;;  %3635 = vmatmul.f32.gmra.mxu2 %v11383_v24  ;;  %4135 = vmatmul.f32.gmra.mxu3 %v11388_v21  ;;  %v3167_v11 = vadd.f32 %v9292_v29, %v2466_v52  ;;  %v11399_v29 = vld [vmem:[#allocation148_spill] sm:$0xff] }
 0x4e4   :  { %4636 = vmatmul.f32.gmra.mxu0 %v11385_v12  ;;  %5017 = vmatmul.f32.gmra.mxu1 %v11389_v46 }
 0x4e5   :  { %v4951_v55 = vadd.f32 %v4950_v40, %v4574_v14  ;;  %v11393_v40 = vld [vmem:[#allocation130_spill] sm:$0xff]  ;;  %v2474_v14 = vadd.f32 %v9846_v5, %v9373_v49 }
 0x4e6   :  { %v3556_v30 = vpop.f32.mrf.mxu2  ;;  %v4040_v25 = vpop.f32.mrf.mxu3 }
 0x4e7   :  { %5268 = vst [vmem:[#allocation2 + $0x58] sm:$0xff] %v4951_v55  ;;  %v3557_v59 = vadd.f32 %v3556_v30, %v3159_v18  ;;  %v11398_v18 = vand.u32 4294901760, %v11397_v4 }
 0x4e9   :  { %v4035_v41 = vadd.f32 %v4034_v6, %v3557_v59  ;;  %v4577_v33 = vpop.f32.mrf.mxu0  ;;  %v4958_v15 = vpop.f32.mrf.mxu1  ;;  %v11394_v6 = vld [vmem:[#allocation149_spill] sm:$0xff] }
 0x4ea   :  { %v11395_v42 = vand.u32 4294901760, %v11394_v6 }
 0x4eb   :  { %v4578_v26 = vadd.f32 %v4577_v33, %v4035_v41  ;;  %3640 = vmatmul.f32.gmra.mxu2 %v11387_v34  ;;  %4141 = vmatmul.f32.gmra.mxu3 %v11392_v43  ;;  %v2482_v33 = vadd.f32 %v9846_v5, %v9417_v62 }
 0x4ec   :  { %4640 = vmatmul.f32.gmra.mxu0 %v11389_v46  ;;  %5021 = vmatmul.f32.gmra.mxu1 %v11393_v40 }
 0x4ed   :  { %v4955_v17 = vadd.f32 %v4954_v16, %v4578_v26 }
 0x4ee   :  { %v3561_v24 = vpop.f32.mrf.mxu2  ;;  %v4046_v10 = vpop.f32.mrf.mxu3 }
 0x4ef   :  { %5269 = vst [vmem:[#allocation2 + $0x60] sm:$0xff] %v4955_v17  ;;  %v3562_v48 = vadd.f32 %v3561_v24, %v3163_v36  ;;  %v11401_v17 = vld [vmem:[#allocation161_spill] sm:$0xff]  ;;  %v11403_v24 = vld [vmem:[#allocation151_spill] sm:$0xff] }
 0x4f1   :  { %v4041_v12 = vadd.f32 %v4040_v25, %v3562_v48  ;;  %v4581_v37 = vpop.f32.mrf.mxu0  ;;  %v4962_v9 = vpop.f32.mrf.mxu1  ;;  %v11400_v25 = vld [vmem:[#allocation188_spill] sm:$0xff] }
 0x4f2   :  { %v3171_v59 = vadd.f32 %v11400_v25, %v2474_v14 }
 0x4f3   :  { %v4582_v0 = vadd.f32 %v4581_v37, %v4041_v12  ;;  %3645 = vmatmul.f32.gmra.mxu2 %v11391_v61  ;;  %4147 = vmatmul.f32.gmra.mxu3 %v11395_v42  ;;  %v2490_v12 = vadd.f32 %v9846_v5, %v9443_v13  ;;  %v11404_v42 = vld [vmem:[#allocation172_spill] sm:$0xff] }
 0x4f4   :  { %4644 = vmatmul.f32.gmra.mxu0 %v11393_v40  ;;  %5025 = vmatmul.f32.gmra.mxu1 %v11396_v2  ;;  %v11402_v40 = vand.u32 4294901760, %v11401_v17 }
 0x4f5   :  { %v4959_v60 = vadd.f32 %v4958_v15, %v4582_v0 }
 0x4f6   :  { %v3566_v54 = vpop.f32.mrf.mxu2  ;;  %v4052_v16 = vpop.f32.mrf.mxu3 }
 0x4f7   :  { %5270 = vst [vmem:[#allocation2 + $0x68] sm:$0xff] %v4959_v60  ;;  %v3567_v23 = vadd.f32 %v3566_v54, %v3167_v11  ;;  %v11405_v60 = vand.u32 4294901760, %v11404_v42  ;;  %v3179_v11 = vadd.f32 %v9408_v53, %v2490_v12  ;;  %v11409_v53 = vld [vmem:[#allocation167_spill] sm:$0xff] }
 0x4f9   :  { %v4047_v34 = vadd.f32 %v4046_v10, %v3567_v23  ;;  %v4585_v21 = vpop.f32.mrf.mxu0  ;;  %v4966_v55 = vpop.f32.mrf.mxu1  ;;  %v3175_v10 = vadd.f32 %v9378_v19, %v2482_v33  ;;  %v11406_v19 = vld [vmem:[#allocation160_spill] sm:$0xff]  ;;  %v2498_v23 = vadd.f32 %v9846_v5, %v9471_v56 }
 0x4fb   :  { %v4586_v46 = vadd.f32 %v4585_v21, %v4047_v34  ;;  %3650 = vmatmul.f32.gmra.mxu2 %v11394_v6  ;;  %4153 = vmatmul.f32.gmra.mxu3 %v11398_v18 }
 0x4fc   :  { %4648 = vmatmul.f32.gmra.mxu0 %v11396_v2  ;;  %5029 = vmatmul.f32.gmra.mxu1 %v11399_v29 }
 0x4fd   :  { %v4963_v30 = vadd.f32 %v4962_v9, %v4586_v46  ;;  %v11407_v46 = vld [vmem:[#allocation183_spill] sm:$0xff] }
 0x4fe   :  { %v3571_v35 = vpop.f32.mrf.mxu2  ;;  %v4058_v41 = vpop.f32.mrf.mxu3 }
 0x4ff   :  { %5271 = vst [vmem:[#allocation2 + $0x70] sm:$0xff] %v4963_v30  ;;  %v3572_v49 = vadd.f32 %v3571_v35, %v3171_v59  ;;  %v3183_v30 = vadd.f32 %v9449_v27, %v2498_v23  ;;  %v2506_v59 = vadd.f32 %v9846_v5, %v9494_v32  ;;  %v11412_v27 = vld [vmem:[#allocation181_spill] sm:$0xff] }
 0x501   :  { %v4053_v15 = vadd.f32 %v4052_v16, %v3572_v49  ;;  %v4589_v26 = vpop.f32.mrf.mxu0  ;;  %v4970_v61 = vpop.f32.mrf.mxu1 }
 0x503   :  { %v4590_v43 = vadd.f32 %v4589_v26, %v4053_v15  ;;  %3655 = vmatmul.f32.gmra.mxu2 %v11397_v4  ;;  %4159 = vmatmul.f32.gmra.mxu3 %v11402_v40  ;;  %v11408_v4 = vand.u32 4294901760, %v11407_v46  ;;  %v11410_v15 = vld [vmem:[#allocation186_spill] sm:$0xff] }
 0x504   :  { %4652 = vmatmul.f32.gmra.mxu0 %v11399_v29  ;;  %5033 = vmatmul.f32.gmra.mxu1 %v11403_v24  ;;  %v11411_v26 = vand.u32 4294901760, %v11410_v15 }
 0x505   :  { %v4967_v36 = vadd.f32 %v4966_v55, %v4590_v43  ;;  %v11413_v43 = vld [vmem:[#allocation209_spill] sm:$0xff] }
 0x506   :  { %v3576_v48 = vpop.f32.mrf.mxu2  ;;  %v4064_v52 = vpop.f32.mrf.mxu3 }
 0x507   :  { %5272 = vst [vmem:[#allocation2 + $0x78] sm:$0xff] %v4967_v36  ;;  %v3577_v62 = vadd.f32 %v3576_v48, %v3175_v10 }
 0x509   :  { %v4059_v37 = vadd.f32 %v4058_v41, %v3577_v62  ;;  %v4593_v9 = vpop.f32.mrf.mxu0  ;;  %v4974_v0 = vpop.f32.mrf.mxu1 }
 0x50b   :  { %v4594_v6 = vadd.f32 %v4593_v9, %v4059_v37  ;;  %3660 = vmatmul.f32.gmra.mxu2 %v11401_v17  ;;  %4165 = vmatmul.f32.gmra.mxu3 %v11405_v60  ;;  %v3187_v17 = vadd.f32 %v11413_v43, %v2506_v59  ;;  %v11415_v37 = vld [vmem:[#allocation194_spill] sm:$0xff]  ;;  %v11428_v43 = vld [vmem:[#allocation221_spill] sm:$0xff] }
 0x50c   :  { %4656 = vmatmul.f32.gmra.mxu0 %v11403_v24  ;;  %5037 = vmatmul.f32.gmra.mxu1 %v11406_v19  ;;  %v11414_v24 = vld [vmem:[#allocation218_spill] sm:$0xff]  ;;  %v11416_v9 = vand.u32 4294901760, %v11415_v37 }
 0x50d   :  { %v4971_v2 = vadd.f32 %v4970_v61, %v4594_v6  ;;  %v2514_v10 = vadd.f32 %v9846_v5, %v11414_v24  ;;  %v11417_v6 = vld [vmem:[#allocation184_spill] sm:$0xff]  ;;  %v11429_v24 = vld [vmem:[#allocation229_spill] sm:$0xff] }
 0x50e   :  { %v3581_v54 = vpop.f32.mrf.mxu2  ;;  %v4070_v16 = vpop.f32.mrf.mxu3 }
 0x50f   :  { %5273 = vst [vmem:[#allocation2 + $0x80] sm:$0xff] %v4971_v2  ;;  %v3582_v13 = vadd.f32 %v3581_v54, %v3179_v11  ;;  %v11419_v54 = vld [vmem:[#allocation222_spill] sm:$0xff] }
 0x511   :  { %v4065_v14 = vadd.f32 %v4064_v52, %v3582_v13  ;;  %v4597_v34 = vpop.f32.mrf.mxu0  ;;  %v4978_v21 = vpop.f32.mrf.mxu1 }
 0x513   :  { %v4598_v55 = vadd.f32 %v4597_v34, %v4065_v14  ;;  %3665 = vmatmul.f32.gmra.mxu2 %v11404_v42  ;;  %4171 = vmatmul.f32.gmra.mxu3 %v11408_v4  ;;  %v11418_v42 = vld [vmem:[#allocation214_spill] sm:$0xff]  ;;  %v11422_v4 = vld [vmem:[#allocation192_spill] sm:$0xff] }
 0x514   :  { %4660 = vmatmul.f32.gmra.mxu0 %v11406_v19  ;;  %5041 = vmatmul.f32.gmra.mxu1 %v11409_v53  ;;  %v3191_v60 = vadd.f32 %v11418_v42, %v2514_v10  ;;  %v2538_v10 = vadd.f32 %v9846_v5, %v11429_v24 }
 0x515   :  { %v4975_v18 = vadd.f32 %v4974_v0, %v4598_v55 }
 0x516   :  { %v3586_v29 = vpop.f32.mrf.mxu2  ;;  %v4076_v25 = vpop.f32.mrf.mxu3 }
 0x517   :  { %5274 = vst [vmem:[#allocation2 + $0x88] sm:$0xff] %v4975_v18  ;;  %v3587_v56 = vadd.f32 %v3586_v29, %v3183_v30  ;;  %v11423_v18 = vld [vmem:[#allocation217_spill] sm:$0xff] }
 0x519   :  { %v4071_v35 = vadd.f32 %v4070_v16, %v3587_v56  ;;  %v4601_v41 = vpop.f32.mrf.mxu0  ;;  %v4982_v49 = vpop.f32.mrf.mxu1  ;;  %v2522_v16 = vadd.f32 %v9846_v5, %v11419_v54  ;;  %v11424_v56 = vld [vmem:[#allocation225_spill] sm:$0xff] }
 0x51a   :  { %v2530_v59 = vadd.f32 %v9846_v5, %v11424_v56 }
 0x51b   :  { %v4602_v33 = vadd.f32 %v4601_v41, %v4071_v35  ;;  %3670 = vmatmul.f32.gmra.mxu2 %v11407_v46  ;;  %4177 = vmatmul.f32.gmra.mxu3 %v11411_v26 }
 0x51c   :  { %4664 = vmatmul.f32.gmra.mxu0 %v11409_v53  ;;  %5045 = vmatmul.f32.gmra.mxu1 %v11412_v27  ;;  %v3195_v53 = vadd.f32 %v11423_v18, %v2522_v16 }
 0x51d   :  { %v4979_v61 = vadd.f32 %v4978_v21, %v4602_v33  ;;  %v11420_v21 = vld [vmem:[#allocation204_spill] sm:$0xff] }
 0x51e   :  { %v3591_v40 = vpop.f32.mrf.mxu2  ;;  %v4082_v36 = vpop.f32.mrf.mxu3  ;;  %v11421_v55 = vand.u32 4294901760, %v11420_v21 }
 0x51f   :  { %5275 = vst [vmem:[#allocation2 + $0x90] sm:$0xff] %v4979_v61  ;;  %v3592_v32 = vadd.f32 %v3591_v40, %v3187_v17  ;;  %v3199_v17 = vadd.f32 %v11428_v43, %v2530_v59  ;;  %v11436_v59 = vand.u32 4294901760, %v9624_v47 }
 0x521   :  { %v4077_v48 = vadd.f32 %v4076_v25, %v3592_v32  ;;  %v4605_v52 = vpop.f32.mrf.mxu0  ;;  %v4986_v62 = vpop.f32.mrf.mxu1 }
 0x523   :  { %v4606_v12 = vadd.f32 %v4605_v52, %v4077_v48  ;;  %3675 = vmatmul.f32.gmra.mxu2 %v11410_v15  ;;  %4183 = vmatmul.f32.gmra.mxu3 %v11416_v9  ;;  %v11425_v15 = vld [vmem:[#allocation208_spill] sm:$0xff] }
 0x524   :  { %4668 = vmatmul.f32.gmra.mxu0 %v11412_v27  ;;  %5049 = vmatmul.f32.gmra.mxu1 %v11417_v6  ;;  %v11426_v26 = vand.u32 4294901760, %v11425_v15  ;;  %v11427_v27 = vld [vmem:[#allocation202_spill] sm:$0xff] }
 0x525   :  { %v4983_v0 = vadd.f32 %v4982_v49, %v4606_v12 }
 0x526   :  { %v3596_v2 = vpop.f32.mrf.mxu2  ;;  %v4088_v19 = vpop.f32.mrf.mxu3 }
 0x527   :  { %5276 = vst [vmem:[#allocation2 + $0x98] sm:$0xff] %v4983_v0  ;;  %v3597_v11 = vadd.f32 %v3596_v2, %v3191_v60  ;;  %v11431_v0 = vld [vmem:[#allocation206_spill] sm:$0xff] }
 0x529   :  { %v4083_v13 = vadd.f32 %v4082_v36, %v3597_v11  ;;  %v4609_v23 = vpop.f32.mrf.mxu0  ;;  %v4990_v14 = vpop.f32.mrf.mxu1  ;;  %v11433_v11 = vld [vmem:[#allocation234_spill] sm:$0xff] }
 0x52a   :  { %v2546_v54 = vadd.f32 %v9846_v5, %v11433_v11 }
 0x52b   :  { %v4610_v34 = vadd.f32 %v4609_v23, %v4083_v13  ;;  %3680 = vmatmul.f32.gmra.mxu2 %v11415_v37  ;;  %4189 = vmatmul.f32.gmra.mxu3 %v11421_v55  ;;  %v11430_v37 = vand.u32 4294901760, %v9569_v45  ;;  %v11435_v55 = vld [vmem:[#allocation230_spill] sm:$0xff] }
 0x52c   :  { %4672 = vmatmul.f32.gmra.mxu0 %v11417_v6  ;;  %5053 = vmatmul.f32.gmra.mxu1 %v11422_v4  ;;  %v11432_v6 = vld [vmem:[#allocation226_spill] sm:$0xff] }
 0x52d   :  { %v4987_v46 = vadd.f32 %v4986_v62, %v4610_v34  ;;  %v3203_v42 = vadd.f32 %v11432_v6, %v2538_v10  ;;  %v11434_v34 = vand.u32 4294901760, %v9590_v58  ;;  %v11443_v6 = vld [vmem:[#allocation241_spill] sm:$0xff] }
 0x52e   :  { %v3601_v30 = vpop.f32.mrf.mxu2  ;;  %v4094_v29 = vpop.f32.mrf.mxu3 }
 0x52f   :  { %5277 = vst [vmem:[#allocation2 + $0xa0] sm:$0xff] %v4987_v46  ;;  %v3602_v25 = vadd.f32 %v3601_v30, %v3195_v53  ;;  %v3207_v46 = vadd.f32 %v11435_v55, %v2546_v54  ;;  %v2554_v30 = vadd.f32 %v9846_v5, %v9557_v7 }
 0x531   :  { %v4089_v35 = vadd.f32 %v4088_v19, %v3602_v25  ;;  %v4613_v41 = vpop.f32.mrf.mxu0  ;;  %v4994_v49 = vpop.f32.mrf.mxu1 }
 0x533   :  { %v4614_v33 = vadd.f32 %v4613_v41, %v4089_v35  ;;  %3685 = vmatmul.f32.gmra.mxu2 %v11420_v21  ;;  %4195 = vmatmul.f32.gmra.mxu3 %v11426_v26  ;;  %v11437_v41 = vld [vmem:[#allocation233_spill] sm:$0xff]  ;;  %v11438_v26 = vld [vmem:[#allocation243_spill] sm:$0xff] }
 0x534   :  { %4676 = vmatmul.f32.gmra.mxu0 %v11422_v4  ;;  %5057 = vmatmul.f32.gmra.mxu1 %v11427_v27 }
 0x535   :  { %v4991_v61 = vadd.f32 %v4990_v14, %v4614_v33 }
 0x536   :  { %v3606_v40 = vpop.f32.mrf.mxu2  ;;  %v4100_v36 = vpop.f32.mrf.mxu3 }
 0x537   :  { %5278 = vst [vmem:[#allocation2 + $0xa8] sm:$0xff] %v4991_v61  ;;  %v3607_v32 = vadd.f32 %v3606_v40, %v3199_v17  ;;  %v2562_v61 = vadd.f32 %v9846_v5, %v11438_v26  ;;  %v11439_v40 = vand.u32 4294901760, %v9650_v20 }
 0x539   :  { %v4095_v48 = vadd.f32 %v4094_v29, %v3607_v32  ;;  %v4617_v52 = vpop.f32.mrf.mxu0  ;;  %v4998_v62 = vpop.f32.mrf.mxu1 }
 0x53b   :  { %v4618_v12 = vadd.f32 %v4617_v52, %v4095_v48  ;;  %3690 = vmatmul.f32.gmra.mxu2 %v11425_v15  ;;  %4201 = vmatmul.f32.gmra.mxu3 %v11430_v37  ;;  %v2570_v52 = vadd.f32 %v9846_v5, %v9608_v31 }
 0x53c   :  { %4680 = vmatmul.f32.gmra.mxu0 %v11427_v27  ;;  %5061 = vmatmul.f32.gmra.mxu1 %v11431_v0 }
 0x53d   :  { %v4995_v9 = vadd.f32 %v4994_v49, %v4618_v12  ;;  %v3211_v49 = vadd.f32 %v11437_v41, %v2554_v30 }
 0x53e   :  { %v3611_v60 = vpop.f32.mrf.mxu2  ;;  %v4106_v2 = vpop.f32.mrf.mxu3 }
 0x53f   :  { %5279 = vst [vmem:[#allocation2 + $0xb0] sm:$0xff] %v4995_v9  ;;  %v3612_v19 = vadd.f32 %v3611_v60, %v3203_v42  ;;  %v11441_v9 = vld [vmem:[#allocation8_spill] sm:$0xff]  ;;  %v3219_v42 = vadd.f32 %v11443_v6, %v2570_v52  ;;  %v11456_v52 = vld [vmem:[#allocation254_spill] sm:$0xff] }
 0x541   :  { %v4101_v16 = vadd.f32 %v4100_v36, %v3612_v19  ;;  %v4621_v13 = vpop.f32.mrf.mxu0  ;;  %v5002_v23 = vpop.f32.mrf.mxu1  ;;  %v11440_v36 = vld [vmem:[#allocation238_spill] sm:$0xff]  ;;  %v2578_v19 = vadd.f32 %v9846_v5, %v9639_v1 }
 0x542   :  { %v3215_v32 = vadd.f32 %v11440_v36, %v2562_v61 }
 0x543   :  { %v4622_v14 = vadd.f32 %v4621_v13, %v4101_v16  ;;  %3695 = vmatmul.f32.gmra.mxu2 %v9569_v45  ;;  %4207 = vmatmul.f32.gmra.mxu3 %v11434_v34  ;;  %v11444_v13 = vld [vmem:[#allocation10_spill] sm:$0xff]  ;;  %v3223_v34 = vadd.f32 %v9611_v51, %v2578_v19  ;;  %v11449_v51 = vld [vmem:[#allocation9_spill] sm:$0xff] }
 0x544   :  { %4684 = vmatmul.f32.gmra.mxu0 %v11431_v0  ;;  %5065 = vmatmul.f32.gmra.mxu1 %v9559_v57  ;;  %v11442_v0 = vand.u32 4294901760, %v11441_v9  ;;  %v11460_v19 = vld [vmem:[#allocation17_spill] sm:$0xff] }
 0x545   :  { %v4999_v21 = vadd.f32 %v4998_v62, %v4622_v14  ;;  %v11446_v14 = vld [vmem:[#allocation7_spill] sm:$0xff] }
 0x546   :  { %v3616_v4 = vpop.f32.mrf.mxu2  ;;  %v4112_v18 = vpop.f32.mrf.mxu3 }
 0x547   :  { %5280 = vst [vmem:[#allocation2 + $0xb8] sm:$0xff] %v4999_v21  ;;  %v3617_v53 = vadd.f32 %v3616_v4, %v3207_v46  ;;  %v2586_v46 = vadd.f32 %v9846_v5, %v9665_v63 }
 0x549   :  { %v4107_v29 = vadd.f32 %v4106_v2, %v3617_v53  ;;  %v4625_v25 = vpop.f32.mrf.mxu0  ;;  %v5006_v45 = vpop.f32.mrf.mxu1 }
 0x54b   :  { %v4626_v56 = vadd.f32 %v4625_v25, %v4107_v29  ;;  %3700 = vmatmul.f32.gmra.mxu2 %v9590_v58  ;;  %4213 = vmatmul.f32.gmra.mxu3 %v11436_v59  ;;  %v11447_v29 = vld [vmem:[#allocation12_spill] sm:$0xff] }
 0x54c   :  { %4688 = vmatmul.f32.gmra.mxu0 %v9559_v57  ;;  %5069 = vmatmul.f32.gmra.mxu1 %v9585_v28  ;;  %v11448_v25 = vand.u32 4294901760, %v11447_v29 }
 0x54d   :  { %v5003_v35 = vadd.f32 %v5002_v23, %v4626_v56  ;;  %v11445_v23 = vand.u32 4294901760, %v11444_v13 }
 0x54e   :  { %v3621_v33 = vpop.f32.mrf.mxu2  ;;  %v4118_v15 = vpop.f32.mrf.mxu3 }
 0x54f   :  { %5281 = vst [vmem:[#allocation2 + $0xc0] sm:$0xff] %v5003_v35  ;;  %v3622_v7 = vadd.f32 %v3621_v33, %v3211_v49  ;;  %v2594_v35 = vadd.f32 %v9846_v5, %v9675_v8 }
 0x551   :  { %v4113_v27 = vadd.f32 %v4112_v18, %v3622_v7  ;;  %v4629_v43 = vpop.f32.mrf.mxu0  ;;  %v5010_v58 = vpop.f32.mrf.mxu1  ;;  %v11450_v7 = vld [vmem:[#allocation15_spill] sm:$0xff] }
 0x552   :  { %v11451_v26 = vand.u32 4294901760, %v11450_v7 }
 0x553   :  { %v4630_v17 = vadd.f32 %v4629_v43, %v4113_v27  ;;  %3705 = vmatmul.f32.gmra.mxu2 %v9624_v47  ;;  %4219 = vmatmul.f32.gmra.mxu3 %v11439_v40  ;;  %v3231_v27 = vadd.f32 %v9660_v39, %v2594_v35  ;;  %v11455_v39 = vld [vmem:[#allocation14_spill] sm:$0xff] }
 0x554   :  { %4692 = vmatmul.f32.gmra.mxu0 %v9585_v28  ;;  %5073 = vmatmul.f32.gmra.mxu1 %v9616_v38 }
 0x555   :  { %v5007_v57 = vadd.f32 %v5006_v45, %v4630_v17  ;;  %v3227_v45 = vadd.f32 %v9642_v44, %v2586_v46  ;;  %v11452_v44 = vld [vmem:[#allocation11_spill] sm:$0xff]  ;;  %v2602_v17 = vadd.f32 %v9846_v5, %v9690_v50 }
 0x556   :  { %v3626_v24 = vpop.f32.mrf.mxu2  ;;  %v4124_v10 = vpop.f32.mrf.mxu3 }
 0x557   :  { %5282 = vst [vmem:[#allocation2 + $0xc8] sm:$0xff] %v5007_v57  ;;  %v3627_v48 = vadd.f32 %v3626_v24, %v3215_v32  ;;  %v11453_v24 = vld [vmem:[#allocation19_spill] sm:$0xff] }
 0x559   :  { %v4119_v62 = vadd.f32 %v4118_v15, %v3627_v48  ;;  %v4633_v12 = vpop.f32.mrf.mxu0  ;;  %v5014_v47 = vpop.f32.mrf.mxu1 }
 0x55b   :  { %v4634_v37 = vadd.f32 %v4633_v12, %v4119_v62  ;;  %3710 = vmatmul.f32.gmra.mxu2 %v9650_v20  ;;  %4225 = vmatmul.f32.gmra.mxu3 %v11442_v0  ;;  %v3235_v62 = vadd.f32 %v11456_v52, %v2602_v17 }
 0x55c   :  { %4696 = vmatmul.f32.gmra.mxu0 %v9616_v38  ;;  %5077 = vmatmul.f32.gmra.mxu1 %v9644_v3 }
 0x55d   :  { %v5011_v28 = vadd.f32 %v5010_v58, %v4634_v37  ;;  %v11457_v37 = vld [vmem:[#allocation257_spill] sm:$0xff] }
 0x55e   :  { %v3631_v60 = vpop.f32.mrf.mxu2  ;;  %v4130_v2 = vpop.f32.mrf.mxu3 }
 0x55f   :  { %5283 = vst [vmem:[#allocation2 + $0xd0] sm:$0xff] %v5011_v28  ;;  %v3632_v31 = vadd.f32 %v3631_v60, %v3219_v42  ;;  %v11458_v60 = vld [vmem:[#allocation23_spill] sm:$0xff] }
 0x561   :  { %v4125_v11 = vadd.f32 %v4124_v10, %v3632_v31  ;;  %v4637_v54 = vpop.f32.mrf.mxu0  ;;  %v5018_v20 = vpop.f32.mrf.mxu1  ;;  %v11454_v10 = vand.u32 4294901760, %v11453_v24 }
 0x563   :  { %v4638_v16 = vadd.f32 %v4637_v54, %v4125_v11  ;;  %3715 = vmatmul.f32.gmra.mxu2 %v11441_v9  ;;  %4231 = vmatmul.f32.gmra.mxu3 %v11445_v23  ;;  %v2610_v9 = vadd.f32 %v9846_v5, %v11457_v37  ;;  %v11461_v11 = vld [vmem:[#allocation13_spill] sm:$0xff]  ;;  %v11462_v23 = vld [vmem:[#allocation259_spill] sm:$0xff] }
 0x564   :  { %4700 = vmatmul.f32.gmra.mxu0 %v9644_v3  ;;  %5081 = vmatmul.f32.gmra.mxu1 %v11446_v14 }
 0x565   :  { %v5015_v38 = vadd.f32 %v5014_v47, %v4638_v16  ;;  %v3239_v54 = vadd.f32 %v11461_v11, %v2610_v9 }
 0x566   :  { %v3636_v21 = vpop.f32.mrf.mxu2  ;;  %v4136_v55 = vpop.f32.mrf.mxu3 }
 0x567   :  { %5284 = vst [vmem:[#allocation2 + $0xd8] sm:$0xff] %v5015_v38  ;;  %v3637_v1 = vadd.f32 %v3636_v21, %v3223_v34  ;;  %v2618_v38 = vadd.f32 %v9846_v5, %v11462_v23 }
 0x569   :  { %v4131_v4 = vadd.f32 %v4130_v2, %v3637_v1  ;;  %v4641_v18 = vpop.f32.mrf.mxu0  ;;  %v5022_v53 = vpop.f32.mrf.mxu1  ;;  %v11459_v2 = vand.u32 4294901760, %v11458_v60  ;;  %v11463_v1 = vld [vmem:[#allocation27_spill] sm:$0xff] }
 0x56a   :  { %v11464_v46 = vand.u32 4294901760, %v11463_v1 }
 0x56b   :  { %v4642_v30 = vadd.f32 %v4641_v18, %v4131_v4  ;;  %3720 = vmatmul.f32.gmra.mxu2 %v11444_v13  ;;  %4237 = vmatmul.f32.gmra.mxu3 %v11448_v25  ;;  %v11465_v18 = vld [vmem:[#allocation21_spill] sm:$0xff] }
 0x56c   :  { %4704 = vmatmul.f32.gmra.mxu0 %v11446_v14  ;;  %5085 = vmatmul.f32.gmra.mxu1 %v11449_v51 }
 0x56d   :  { %v5019_v3 = vadd.f32 %v5018_v20, %v4642_v30 }
 0x56e   :  { %v3641_v56 = vpop.f32.mrf.mxu2  ;;  %v4142_v59 = vpop.f32.mrf.mxu3 }
 0x56f   :  { %5285 = vst [vmem:[#allocation2 + $0xe0] sm:$0xff] %v5019_v3  ;;  %v3642_v63 = vadd.f32 %v3641_v56, %v3227_v45  ;;  %v10130_v3 = vld [vmem:[%s10491_s2] ss:$0 sm:$0xff] }
 0x571   :  { %v4137_v41 = vadd.f32 %v4136_v55, %v3642_v63  ;;  %v4645_v49 = vpop.f32.mrf.mxu0  ;;  %v5026_v33 = vpop.f32.mrf.mxu1 }
 0x573   :  { %v4646_v15 = vadd.f32 %v4645_v49, %v4137_v41  ;;  %3725 = vmatmul.f32.gmra.mxu2 %v11447_v29  ;;  %4243 = vmatmul.f32.gmra.mxu3 %v11451_v26  ;;  %v11468_v41 = vld [vmem:[#allocation31_spill] sm:$0xff] }
 0x574   :  { %4708 = vmatmul.f32.gmra.mxu0 %v11449_v51  ;;  %5089 = vmatmul.f32.gmra.mxu1 %v11452_v44  ;;  %v11467_v51 = vld [vmem:[#allocation261_spill] sm:$0xff]  ;;  %v11469_v49 = vand.u32 4294901760, %v11468_v41 }
 0x575   :  { %v5023_v61 = vadd.f32 %v5022_v53, %v4646_v15  ;;  %v11466_v53 = vld [vmem:[#allocation16_spill] sm:$0xff]  ;;  %v2626_v45 = vadd.f32 %v10130_v3, %v11467_v51  ;;  %v11470_v15 = vld [vmem:[#allocation25_spill] sm:$0xff] }
 0x576   :  { %v3646_v43 = vpop.f32.mrf.mxu2  ;;  %v4148_v58 = vpop.f32.mrf.mxu3  ;;  %v3243_v30 = vadd.f32 %v11466_v53, %v2618_v38 }
 0x577   :  { %5286 = vst [vmem:[#allocation2 + $0xe8] sm:$0xff] %v5023_v61  ;;  %v3647_v8 = vadd.f32 %v3646_v43, %v3231_v27  ;;  %v11472_v43 = vld [vmem:[#allocation262_spill] sm:$0xff] }
 0x579   :  { %v4143_v40 = vadd.f32 %v4142_v59, %v3647_v8  ;;  %v4649_v57 = vpop.f32.mrf.mxu0  ;;  %v5030_v36 = vpop.f32.mrf.mxu1 }
 0x57b   :  { %v4650_v32 = vadd.f32 %v4649_v57, %v4143_v40  ;;  %3730 = vmatmul.f32.gmra.mxu2 %v11450_v7  ;;  %4249 = vmatmul.f32.gmra.mxu3 %v11454_v10  ;;  %v11471_v7 = vld [vmem:[#allocation20_spill] sm:$0xff]  ;;  %v11475_v10 = vld [vmem:[#allocation29_spill] sm:$0xff] }
 0x57c   :  { %4712 = vmatmul.f32.gmra.mxu0 %v11452_v44  ;;  %5093 = vmatmul.f32.gmra.mxu1 %v11455_v39  ;;  %v3247_v26 = vadd.f32 %v11471_v7, %v2626_v45 }
 0x57d   :  { %v5027_v48 = vadd.f32 %v5026_v33, %v4650_v32 }
 0x57e   :  { %v3651_v12 = vpop.f32.mrf.mxu2  ;;  %v4154_v47 = vpop.f32.mrf.mxu3 }
 0x57f   :  { %5287 = vst [vmem:[#allocation2 + $0xf0] sm:$0xff] %v5027_v48  ;;  %v3652_v50 = vadd.f32 %v3651_v12, %v3235_v62  ;;  %v11476_v48 = vld [vmem:[#allocation260_spill] sm:$0xff] }
 0x581   :  { %v4149_v0 = vadd.f32 %v4148_v58, %v3652_v50  ;;  %v4653_v28 = vpop.f32.mrf.mxu0  ;;  %v5034_v6 = vpop.f32.mrf.mxu1  ;;  %v2634_v58 = vadd.f32 %v10130_v3, %v11472_v43 }
 0x583   :  { %v4654_v42 = vadd.f32 %v4653_v28, %v4149_v0  ;;  %3735 = vmatmul.f32.gmra.mxu2 %v11453_v24  ;;  %4255 = vmatmul.f32.gmra.mxu3 %v11459_v2  ;;  %v11480_v2 = vld [vmem:[#allocation33_spill] sm:$0xff] }
 0x584   :  { %4716 = vmatmul.f32.gmra.mxu0 %v11455_v39  ;;  %5097 = vmatmul.f32.gmra.mxu1 %v11460_v19  ;;  %v3251_v39 = vadd.f32 %v11476_v48, %v2634_v58 }
 0x585   :  { %v5031_v31 = vadd.f32 %v5030_v36, %v4654_v42  ;;  %v11473_v36 = vld [vmem:[#allocation35_spill] sm:$0xff] }
 0x586   :  { %v3656_v20 = vpop.f32.mrf.mxu2  ;;  %v4160_v16 = vpop.f32.mrf.mxu3  ;;  %v11474_v32 = vand.u32 4294901760, %v11473_v36 }
 0x587   :  { %5288 = vst [vmem:[#allocation2 + $0xf8] sm:$0xff] %v5031_v31  ;;  %v3657_v13 = vadd.f32 %v3656_v20, %v3239_v54  ;;  %v11481_v31 = vld [vmem:[#allocation263_spill] sm:$0xff] }
 0x589   :  { %v4155_v14 = vadd.f32 %v4154_v47, %v3657_v13  ;;  %v4657_v34 = vpop.f32.mrf.mxu0  ;;  %v5038_v21 = vpop.f32.mrf.mxu1  ;;  %v11477_v47 = vld [vmem:[#allocation264_spill] sm:$0xff] }
 0x58a   :  { %v2642_v50 = vadd.f32 %v10130_v3, %v11477_v47 }
 0x58b   :  { %v4658_v55 = vadd.f32 %v4657_v34, %v4155_v14  ;;  %3740 = vmatmul.f32.gmra.mxu2 %v11458_v60  ;;  %4261 = vmatmul.f32.gmra.mxu3 %v11464_v46  ;;  %v11485_v46 = vld [vmem:[#allocation37_spill] sm:$0xff] }
 0x58c   :  { %4720 = vmatmul.f32.gmra.mxu0 %v11460_v19  ;;  %5101 = vmatmul.f32.gmra.mxu1 %v11465_v18  ;;  %v3255_v19 = vadd.f32 %v11481_v31, %v2642_v50 }
 0x58d   :  { %v5035_v4 = vadd.f32 %v5034_v6, %v4658_v55  ;;  %v11478_v6 = vld [vmem:[#allocation39_spill] sm:$0xff] }
 0x58e   :  { %v3661_v29 = vpop.f32.mrf.mxu2  ;;  %v4166_v25 = vpop.f32.mrf.mxu3  ;;  %v11479_v42 = vand.u32 4294901760, %v11478_v6 }
 0x58f   :  { %5289 = vst [vmem:[#allocation2 + $0x100] sm:$0xff] %v5035_v4  ;;  %v3662_v5 = vadd.f32 %v3661_v29, %v3243_v30  ;;  %v11486_v4 = vld [vmem:[#allocation265_spill] sm:$0xff] }
 0x591   :  { %v4161_v56 = vadd.f32 %v4160_v16, %v3662_v5  ;;  %v4661_v59 = vpop.f32.mrf.mxu0  ;;  %v5042_v63 = vpop.f32.mrf.mxu1  ;;  %v11482_v16 = vld [vmem:[#allocation268_spill] sm:$0xff] }
 0x592   :  { %v2650_v13 = vadd.f32 %v10130_v3, %v11482_v16 }
 0x593   :  { %v4662_v35 = vadd.f32 %v4661_v59, %v4161_v56  ;;  %3745 = vmatmul.f32.gmra.mxu2 %v11463_v1  ;;  %4267 = vmatmul.f32.gmra.mxu3 %v11469_v49  ;;  %v11490_v49 = vld [vmem:[#allocation40_spill] sm:$0xff] }
 0x594   :  { %4724 = vmatmul.f32.gmra.mxu0 %v11465_v18  ;;  %5105 = vmatmul.f32.gmra.mxu1 %v11470_v15  ;;  %v3259_v18 = vadd.f32 %v11486_v4, %v2650_v13 }
 0x595   :  { %v5039_v33 = vadd.f32 %v5038_v21, %v4662_v35  ;;  %v11483_v21 = vld [vmem:[#allocation41_spill] sm:$0xff] }
 0x596   :  { %v3666_v61 = vpop.f32.mrf.mxu2  ;;  %v4172_v44 = vpop.f32.mrf.mxu3  ;;  %v11484_v55 = vand.u32 4294901760, %v11483_v21 }
 0x597   :  { %5290 = vst [vmem:[#allocation2 + $0x108] sm:$0xff] %v5039_v33  ;;  %v3667_v27 = vadd.f32 %v3666_v61, %v3247_v26  ;;  %v11491_v33 = vld [vmem:[#allocation267_spill] sm:$0xff] }
 0x599   :  { %v4167_v8 = vadd.f32 %v4166_v25, %v3667_v27  ;;  %v4665_v17 = vpop.f32.mrf.mxu0  ;;  %v5046_v40 = vpop.f32.mrf.mxu1  ;;  %v11487_v25 = vld [vmem:[#allocation271_spill] sm:$0xff] }
 0x59a   :  { %v2658_v5 = vadd.f32 %v10130_v3, %v11487_v25 }
 0x59b   :  { %v4666_v57 = vadd.f32 %v4665_v17, %v4167_v8  ;;  %3750 = vmatmul.f32.gmra.mxu2 %v11468_v41  ;;  %4273 = vmatmul.f32.gmra.mxu3 %v11474_v32  ;;  %v11495_v32 = vld [vmem:[#allocation43_spill] sm:$0xff] }
 0x59c   :  { %4728 = vmatmul.f32.gmra.mxu0 %v11470_v15  ;;  %5109 = vmatmul.f32.gmra.mxu1 %v11475_v10  ;;  %v3263_v15 = vadd.f32 %v11491_v33, %v2658_v5 }
 0x59d   :  { %v5043_v24 = vadd.f32 %v5042_v63, %v4666_v57  ;;  %v11488_v63 = vld [vmem:[#allocation44_spill] sm:$0xff] }
 0x59e   :  { %v3671_v52 = vpop.f32.mrf.mxu2  ;;  %v4178_v62 = vpop.f32.mrf.mxu3  ;;  %v11489_v35 = vand.u32 4294901760, %v11488_v63 }
 0x59f   :  { %5291 = vst [vmem:[#allocation2 + $0x110] sm:$0xff] %v5043_v24  ;;  %v3672_v12 = vadd.f32 %v3671_v52, %v3251_v39  ;;  %v11496_v24 = vld [vmem:[#allocation272_spill] sm:$0xff] }
 0x5a1   :  { %v4173_v37 = vadd.f32 %v4172_v44, %v3672_v12  ;;  %v4669_v9 = vpop.f32.mrf.mxu0  ;;  %v5050_v0 = vpop.f32.mrf.mxu1  ;;  %v11492_v44 = vld [vmem:[#allocation273_spill] sm:$0xff] }
 0x5a2   :  { %v2666_v27 = vadd.f32 %v10130_v3, %v11492_v44 }
 0x5a3   :  { %v4670_v28 = vadd.f32 %v4669_v9, %v4173_v37  ;;  %3755 = vmatmul.f32.gmra.mxu2 %v11473_v36  ;;  %4279 = vmatmul.f32.gmra.mxu3 %v11479_v42  ;;  %v11500_v42 = vld [vmem:[#allocation46_spill] sm:$0xff] }
 0x5a4   :  { %4732 = vmatmul.f32.gmra.mxu0 %v11475_v10  ;;  %5113 = vmatmul.f32.gmra.mxu1 %v11480_v2  ;;  %v3267_v10 = vadd.f32 %v11496_v24, %v2666_v27 }
 0x5a5   :  { %v5047_v60 = vadd.f32 %v5046_v40, %v4670_v28  ;;  %v11493_v40 = vld [vmem:[#allocation47_spill] sm:$0xff] }
 0x5a6   :  { %v3676_v11 = vpop.f32.mrf.mxu2  ;;  %v4184_v54 = vpop.f32.mrf.mxu3  ;;  %v11494_v57 = vand.u32 4294901760, %v11493_v40 }
 0x5a7   :  { %5292 = vst [vmem:[#allocation2 + $0x118] sm:$0xff] %v5047_v60  ;;  %v3677_v20 = vadd.f32 %v3676_v11, %v3255_v19  ;;  %v11501_v60 = vld [vmem:[#allocation5_spill] sm:$0xff] }
 0x5a9   :  { %v4179_v23 = vadd.f32 %v4178_v62, %v3677_v20  ;;  %v4673_v38 = vpop.f32.mrf.mxu0  ;;  %v5054_v14 = vpop.f32.mrf.mxu1  ;;  %v11497_v62 = vld [vmem:[#allocation274_spill] sm:$0xff] }
 0x5aa   :  { %v2674_v12 = vadd.f32 %v10130_v3, %v11497_v62 }
 0x5ab   :  { %v4674_v34 = vadd.f32 %v4673_v38, %v4179_v23  ;;  %3760 = vmatmul.f32.gmra.mxu2 %v11478_v6  ;;  %4285 = vmatmul.f32.gmra.mxu3 %v11484_v55  ;;  %v11505_v55 = vld [vmem:[#allocation49_spill] sm:$0xff] }
 0x5ac   :  { %4736 = vmatmul.f32.gmra.mxu0 %v11480_v2  ;;  %5117 = vmatmul.f32.gmra.mxu1 %v11485_v46  ;;  %v3271_v2 = vadd.f32 %v11501_v60, %v2674_v12 }
 0x5ad   :  { %v5051_v1 = vadd.f32 %v5050_v0, %v4674_v34  ;;  %v11498_v0 = vld [vmem:[#allocation50_spill] sm:$0xff] }
 0x5ae   :  { %v3681_v53 = vpop.f32.mrf.mxu2  ;;  %v4190_v30 = vpop.f32.mrf.mxu3  ;;  %v11499_v28 = vand.u32 4294901760, %v11498_v0 }
 0x5af   :  { %5293 = vst [vmem:[#allocation2 + $0x120] sm:$0xff] %v5051_v1  ;;  %v3682_v29 = vadd.f32 %v3681_v53, %v3259_v18  ;;  %v11506_v1 = vld [vmem:[#allocation275_spill] sm:$0xff] }
 0x5b1   :  { %v4185_v51 = vadd.f32 %v4184_v54, %v3682_v29  ;;  %v4677_v45 = vpop.f32.mrf.mxu0  ;;  %v5058_v56 = vpop.f32.mrf.mxu1  ;;  %v11502_v54 = vld [vmem:[#allocation276_spill] sm:$0xff] }
 0x5b2   :  { %v2682_v20 = vadd.f32 %v10130_v3, %v11502_v54 }
 0x5b3   :  { %v4678_v59 = vadd.f32 %v4677_v45, %v4185_v51  ;;  %3765 = vmatmul.f32.gmra.mxu2 %v11483_v21  ;;  %4291 = vmatmul.f32.gmra.mxu3 %v11489_v35  ;;  %v11510_v35 = vld [vmem:[#allocation52_spill] sm:$0xff] }
 0x5b4   :  { %4740 = vmatmul.f32.gmra.mxu0 %v11485_v46  ;;  %5121 = vmatmul.f32.gmra.mxu1 %v11490_v49  ;;  %v3275_v46 = vadd.f32 %v11506_v1, %v2682_v20 }
 0x5b5   :  { %v5055_v41 = vadd.f32 %v5054_v14, %v4678_v59  ;;  %v11503_v14 = vld [vmem:[#allocation53_spill] sm:$0xff] }
 0x5b6   :  { %v3686_v7 = vpop.f32.mrf.mxu2  ;;  %v4196_v26 = vpop.f32.mrf.mxu3  ;;  %v11504_v34 = vand.u32 4294901760, %v11503_v14 }
 0x5b7   :  { %5294 = vst [vmem:[#allocation2 + $0x128] sm:$0xff] %v5055_v41  ;;  %v3687_v61 = vadd.f32 %v3686_v7, %v3263_v15  ;;  %v11511_v41 = vld [vmem:[#allocation277_spill] sm:$0xff] }
 0x5b9   :  { %v4191_v43 = vadd.f32 %v4190_v30, %v3687_v61  ;;  %v4681_v58 = vpop.f32.mrf.mxu0  ;;  %v5062_v8 = vpop.f32.mrf.mxu1  ;;  %v11507_v30 = vld [vmem:[#allocation57_spill] sm:$0xff] }
 0x5ba   :  { %v2690_v29 = vadd.f32 %v10130_v3, %v11507_v30 }
 0x5bb   :  { %v4682_v17 = vadd.f32 %v4681_v58, %v4191_v43  ;;  %3770 = vmatmul.f32.gmra.mxu2 %v11488_v63  ;;  %4297 = vmatmul.f32.gmra.mxu3 %v11494_v57  ;;  %v11515_v57 = vld [vmem:[#allocation54_spill] sm:$0xff] }
 0x5bc   :  { %4744 = vmatmul.f32.gmra.mxu0 %v11490_v49  ;;  %5125 = vmatmul.f32.gmra.mxu1 %v11495_v32  ;;  %v3279_v49 = vadd.f32 %v11511_v41, %v2690_v29 }
 0x5bd   :  { %v5059_v36 = vadd.f32 %v5058_v56, %v4682_v17  ;;  %v11508_v56 = vld [vmem:[#allocation55_spill] sm:$0xff] }
 0x5be   :  { %v3691_v48 = vpop.f32.mrf.mxu2  ;;  %v4202_v39 = vpop.f32.mrf.mxu3  ;;  %v11509_v59 = vand.u32 4294901760, %v11508_v56 }
 0x5bf   :  { %5295 = vst [vmem:[#allocation2 + $0x130] sm:$0xff] %v5059_v36  ;;  %v3692_v52 = vadd.f32 %v3691_v48, %v3267_v10  ;;  %v11516_v36 = vld [vmem:[#allocation278_spill] sm:$0xff] }
 0x5c1   :  { %v4197_v47 = vadd.f32 %v4196_v26, %v3692_v52  ;;  %v4685_v50 = vpop.f32.mrf.mxu0  ;;  %v5066_v37 = vpop.f32.mrf.mxu1  ;;  %v11512_v26 = vld [vmem:[#allocation64_spill] sm:$0xff] }
 0x5c2   :  { %v2698_v61 = vadd.f32 %v10130_v3, %v11512_v26 }
 0x5c3   :  { %v4686_v9 = vadd.f32 %v4685_v50, %v4197_v47  ;;  %3775 = vmatmul.f32.gmra.mxu2 %v11493_v40  ;;  %4303 = vmatmul.f32.gmra.mxu3 %v11499_v28  ;;  %v11520_v28 = vld [vmem:[#allocation56_spill] sm:$0xff] }
 0x5c4   :  { %4748 = vmatmul.f32.gmra.mxu0 %v11495_v32  ;;  %5129 = vmatmul.f32.gmra.mxu1 %v11500_v42  ;;  %v3283_v32 = vadd.f32 %v11516_v36, %v2698_v61 }
 0x5c5   :  { %v5063_v6 = vadd.f32 %v5062_v8, %v4686_v9  ;;  %v11513_v8 = vld [vmem:[#allocation59_spill] sm:$0xff] }
 0x5c6   :  { %v3696_v31 = vpop.f32.mrf.mxu2  ;;  %v4208_v19 = vpop.f32.mrf.mxu3  ;;  %v11514_v17 = vand.u32 4294901760, %v11513_v8 }
 0x5c7   :  { %5296 = vst [vmem:[#allocation2 + $0x138] sm:$0xff] %v5063_v6  ;;  %v3697_v11 = vadd.f32 %v3696_v31, %v3271_v2  ;;  %v11521_v6 = vld [vmem:[#allocation89_spill] sm:$0xff] }
 0x5c9   :  { %v4203_v16 = vadd.f32 %v4202_v39, %v3697_v11  ;;  %v4689_v13 = vpop.f32.mrf.mxu0  ;;  %v5070_v23 = vpop.f32.mrf.mxu1  ;;  %v11517_v39 = vld [vmem:[#allocation94_spill] sm:$0xff] }
 0x5ca   :  { %v2706_v52 = vadd.f32 %v10130_v3, %v11517_v39 }
 0x5cb   :  { %v4690_v38 = vadd.f32 %v4689_v13, %v4203_v16  ;;  %3780 = vmatmul.f32.gmra.mxu2 %v11498_v0  ;;  %4309 = vmatmul.f32.gmra.mxu3 %v11504_v34  ;;  %v11525_v34 = vld [vmem:[#allocation63_spill] sm:$0xff] }
 0x5cc   :  { %4752 = vmatmul.f32.gmra.mxu0 %v11500_v42  ;;  %5133 = vmatmul.f32.gmra.mxu1 %v11505_v55  ;;  %v3287_v42 = vadd.f32 %v11521_v6, %v2706_v52 }
 0x5cd   :  { %v5067_v21 = vadd.f32 %v5066_v37, %v4690_v38  ;;  %v11518_v37 = vld [vmem:[#allocation65_spill] sm:$0xff] }
 0x5ce   :  { %v3701_v4 = vpop.f32.mrf.mxu2  ;;  %v4214_v18 = vpop.f32.mrf.mxu3  ;;  %v11519_v9 = vand.u32 4294901760, %v11518_v37 }
 0x5cf   :  { %5297 = vst [vmem:[#allocation2 + $0x140] sm:$0xff] %v5067_v21  ;;  %v3702_v53 = vadd.f32 %v3701_v4, %v3275_v46  ;;  %v11526_v21 = vld [vmem:[#allocation96_spill] sm:$0xff] }
 0x5d1   :  { %v4209_v25 = vadd.f32 %v4208_v19, %v3702_v53  ;;  %v4693_v5 = vpop.f32.mrf.mxu0  ;;  %v5074_v51 = vpop.f32.mrf.mxu1  ;;  %v11522_v19 = vld [vmem:[#allocation102_spill] sm:$0xff] }
 0x5d2   :  { %v2714_v11 = vadd.f32 %v10130_v3, %v11522_v19 }
 0x5d3   :  { %v4694_v45 = vadd.f32 %v4693_v5, %v4209_v25  ;;  %3785 = vmatmul.f32.gmra.mxu2 %v11503_v14  ;;  %4315 = vmatmul.f32.gmra.mxu3 %v11509_v59  ;;  %v11530_v59 = vld [vmem:[#allocation66_spill] sm:$0xff] }
 0x5d4   :  { %4756 = vmatmul.f32.gmra.mxu0 %v11505_v55  ;;  %5137 = vmatmul.f32.gmra.mxu1 %v11510_v35  ;;  %v3291_v55 = vadd.f32 %v11526_v21, %v2714_v11 }
 0x5d5   :  { %v5071_v63 = vadd.f32 %v5070_v23, %v4694_v45  ;;  %v11523_v23 = vld [vmem:[#allocation67_spill] sm:$0xff] }
 0x5d6   :  { %v3706_v33 = vpop.f32.mrf.mxu2  ;;  %v4220_v15 = vpop.f32.mrf.mxu3  ;;  %v11524_v38 = vand.u32 4294901760, %v11523_v23 }
 0x5d7   :  { %5298 = vst [vmem:[#allocation2 + $0x148] sm:$0xff] %v5071_v63  ;;  %v3707_v7 = vadd.f32 %v3706_v33, %v3279_v49  ;;  %v11531_v63 = vld [vmem:[#allocation100_spill] sm:$0xff] }
 0x5d9   :  { %v4215_v44 = vadd.f32 %v4214_v18, %v3707_v7  ;;  %v4697_v27 = vpop.f32.mrf.mxu0  ;;  %v5078_v43 = vpop.f32.mrf.mxu1  ;;  %v11527_v18 = vld [vmem:[#allocation110_spill] sm:$0xff] }
 0x5da   :  { %v2722_v53 = vadd.f32 %v10130_v3, %v11527_v18 }
 0x5db   :  { %v4698_v58 = vadd.f32 %v4697_v27, %v4215_v44  ;;  %3790 = vmatmul.f32.gmra.mxu2 %v11508_v56  ;;  %4321 = vmatmul.f32.gmra.mxu3 %v11514_v17  ;;  %v11535_v17 = vld [vmem:[#allocation68_spill] sm:$0xff] }
 0x5dc   :  { %4760 = vmatmul.f32.gmra.mxu0 %v11510_v35  ;;  %5141 = vmatmul.f32.gmra.mxu1 %v11515_v57  ;;  %v3295_v35 = vadd.f32 %v11531_v63, %v2722_v53 }
 0x5dd   :  { %v5075_v40 = vadd.f32 %v5074_v51, %v4698_v58  ;;  %v11528_v51 = vld [vmem:[#allocation70_spill] sm:$0xff] }
 0x5de   :  { %v3711_v24 = vpop.f32.mrf.mxu2  ;;  %v4226_v10 = vpop.f32.mrf.mxu3  ;;  %v11529_v45 = vand.u32 4294901760, %v11528_v51 }
 0x5df   :  { %5299 = vst [vmem:[#allocation2 + $0x150] sm:$0xff] %v5075_v40  ;;  %v3712_v48 = vadd.f32 %v3711_v24, %v3283_v32  ;;  %v11536_v40 = vld [vmem:[#allocation108_spill] sm:$0xff] }
 0x5e1   :  { %v4221_v62 = vadd.f32 %v4220_v15, %v3712_v48  ;;  %v4701_v12 = vpop.f32.mrf.mxu0  ;;  %v5082_v47 = vpop.f32.mrf.mxu1  ;;  %v11532_v15 = vld [vmem:[#allocation114_spill] sm:$0xff] }
 0x5e2   :  { %v2730_v7 = vadd.f32 %v10130_v3, %v11532_v15 }
 0x5e3   :  { %v4702_v50 = vadd.f32 %v4701_v12, %v4221_v62  ;;  %3795 = vmatmul.f32.gmra.mxu2 %v11513_v8  ;;  %4327 = vmatmul.f32.gmra.mxu3 %v11519_v9  ;;  %v11540_v9 = vld [vmem:[#allocation74_spill] sm:$0xff] }
 0x5e4   :  { %4764 = vmatmul.f32.gmra.mxu0 %v11515_v57  ;;  %5145 = vmatmul.f32.gmra.mxu1 %v11520_v28  ;;  %v3299_v57 = vadd.f32 %v11536_v40, %v2730_v7 }
 0x5e5   :  { %v5079_v0 = vadd.f32 %v5078_v43, %v4702_v50  ;;  %v11533_v43 = vld [vmem:[#allocation76_spill] sm:$0xff] }
 0x5e6   :  { %v3716_v60 = vpop.f32.mrf.mxu2  ;;  %v4232_v2 = vpop.f32.mrf.mxu3  ;;  %v11534_v58 = vand.u32 4294901760, %v11533_v43 }
 0x5e7   :  { %5300 = vst [vmem:[#allocation2 + $0x158] sm:$0xff] %v5079_v0  ;;  %v3717_v31 = vadd.f32 %v3716_v60, %v3287_v42  ;;  %v11541_v0 = vld [vmem:[#allocation117_spill] sm:$0xff] }
 0x5e9   :  { %v4227_v54 = vadd.f32 %v4226_v10, %v3717_v31  ;;  %v4705_v20 = vpop.f32.mrf.mxu0  ;;  %v5086_v16 = vpop.f32.mrf.mxu1  ;;  %v11537_v10 = vld [vmem:[#allocation119_spill] sm:$0xff] }
 0x5ea   :  { %v2738_v48 = vadd.f32 %v10130_v3, %v11537_v10 }
 0x5eb   :  { %v4706_v13 = vadd.f32 %v4705_v20, %v4227_v54  ;;  %3800 = vmatmul.f32.gmra.mxu2 %v11518_v37  ;;  %4333 = vmatmul.f32.gmra.mxu3 %v11524_v38  ;;  %v11545_v38 = vld [vmem:[#allocation77_spill] sm:$0xff] }
 0x5ec   :  { %4768 = vmatmul.f32.gmra.mxu0 %v11520_v28  ;;  %5149 = vmatmul.f32.gmra.mxu1 %v11525_v34  ;;  %v3303_v28 = vadd.f32 %v11541_v0, %v2738_v48 }
 0x5ed   :  { %v5083_v14 = vadd.f32 %v5082_v47, %v4706_v13  ;;  %v11538_v47 = vld [vmem:[#allocation78_spill] sm:$0xff] }
 0x5ee   :  { %v3721_v1 = vpop.f32.mrf.mxu2  ;;  %v4238_v46 = vpop.f32.mrf.mxu3  ;;  %v11539_v50 = vand.u32 4294901760, %v11538_v47 }
 0x5ef   :  { %5301 = vst [vmem:[#allocation2 + $0x160] sm:$0xff] %v5083_v14  ;;  %v3722_v4 = vadd.f32 %v3721_v1, %v3291_v55  ;;  %v11546_v14 = vld [vmem:[#allocation123_spill] sm:$0xff] }
 0x5f1   :  { %v4233_v30 = vadd.f32 %v4232_v2, %v3722_v4  ;;  %v4709_v29 = vpop.f32.mrf.mxu0  ;;  %v5090_v25 = vpop.f32.mrf.mxu1  ;;  %v11542_v2 = vld [vmem:[#allocation128_spill] sm:$0xff] }
 0x5f2   :  { %v2746_v31 = vadd.f32 %v10130_v3, %v11542_v2 }
 0x5f3   :  { %v4710_v5 = vadd.f32 %v4709_v29, %v4233_v30  ;;  %3805 = vmatmul.f32.gmra.mxu2 %v11523_v23  ;;  %4339 = vmatmul.f32.gmra.mxu3 %v11529_v45  ;;  %v11550_v45 = vld [vmem:[#allocation82_spill] sm:$0xff] }
 0x5f4   :  { %4772 = vmatmul.f32.gmra.mxu0 %v11525_v34  ;;  %5153 = vmatmul.f32.gmra.mxu1 %v11530_v59  ;;  %v3307_v34 = vadd.f32 %v11546_v14, %v2746_v31 }
 0x5f5   :  { %v5087_v56 = vadd.f32 %v5086_v16, %v4710_v5  ;;  %v11543_v16 = vld [vmem:[#allocation84_spill] sm:$0xff] }
 0x5f6   :  { %v3726_v41 = vpop.f32.mrf.mxu2  ;;  %v4244_v49 = vpop.f32.mrf.mxu3  ;;  %v11544_v13 = vand.u32 4294901760, %v11543_v16 }
 0x5f7   :  { %5302 = vst [vmem:[#allocation2 + $0x168] sm:$0xff] %v5087_v56  ;;  %v3727_v33 = vadd.f32 %v3726_v41, %v3295_v35  ;;  %v11551_v56 = vld [vmem:[#allocation131_spill] sm:$0xff] }
 0x5f9   :  { %v4239_v26 = vadd.f32 %v4238_v46, %v3727_v33  ;;  %v4713_v61 = vpop.f32.mrf.mxu0  ;;  %v5094_v44 = vpop.f32.mrf.mxu1  ;;  %v11547_v46 = vld [vmem:[#allocation140_spill] sm:$0xff] }
 0x5fa   :  { %v2754_v4 = vadd.f32 %v10130_v3, %v11547_v46 }
 0x5fb   :  { %v4714_v27 = vadd.f32 %v4713_v61, %v4239_v26  ;;  %3810 = vmatmul.f32.gmra.mxu2 %v11528_v51  ;;  %4345 = vmatmul.f32.gmra.mxu3 %v11534_v58  ;;  %v11555_v58 = vld [vmem:[#allocation85_spill] sm:$0xff] }
 0x5fc   :  { %4776 = vmatmul.f32.gmra.mxu0 %v11530_v59  ;;  %5157 = vmatmul.f32.gmra.mxu1 %v11535_v17  ;;  %v3311_v59 = vadd.f32 %v11551_v56, %v2754_v4 }
 0x5fd   :  { %v5091_v8 = vadd.f32 %v5090_v25, %v4714_v27  ;;  %v11548_v25 = vld [vmem:[#allocation86_spill] sm:$0xff] }
 0x5fe   :  { %v3731_v36 = vpop.f32.mrf.mxu2  ;;  %v4250_v32 = vpop.f32.mrf.mxu3  ;;  %v11549_v5 = vand.u32 4294901760, %v11548_v25 }
 0x5ff   :  { %5303 = vst [vmem:[#allocation2 + $0x170] sm:$0xff] %v5091_v8  ;;  %v3732_v24 = vadd.f32 %v3731_v36, %v3299_v57  ;;  %v11556_v8 = vld [vmem:[#allocation138_spill] sm:$0xff] }
 0x601   :  { %v4245_v39 = vadd.f32 %v4244_v49, %v3732_v24  ;;  %v4717_v52 = vpop.f32.mrf.mxu0  ;;  %v5098_v62 = vpop.f32.mrf.mxu1  ;;  %v11552_v49 = vld [vmem:[#allocation146_spill] sm:$0xff] }
 0x602   :  { %v2762_v33 = vadd.f32 %v10130_v3, %v11552_v49 }
 0x603   :  { %v4718_v12 = vadd.f32 %v4717_v52, %v4245_v39  ;;  %3815 = vmatmul.f32.gmra.mxu2 %v11533_v43  ;;  %4351 = vmatmul.f32.gmra.mxu3 %v11539_v50  ;;  %v11560_v50 = vld [vmem:[#allocation88_spill] sm:$0xff] }
 0x604   :  { %4780 = vmatmul.f32.gmra.mxu0 %v11535_v17  ;;  %5161 = vmatmul.f32.gmra.mxu1 %v11540_v9  ;;  %v3315_v17 = vadd.f32 %v11556_v8, %v2762_v33 }
 0x605   :  { %v5095_v37 = vadd.f32 %v5094_v44, %v4718_v12  ;;  %v11553_v44 = vld [vmem:[#allocation91_spill] sm:$0xff] }
 0x606   :  { %v3736_v6 = vpop.f32.mrf.mxu2  ;;  %v4256_v42 = vpop.f32.mrf.mxu3  ;;  %v11554_v27 = vand.u32 4294901760, %v11553_v44 }
 0x607   :  { %5304 = vst [vmem:[#allocation2 + $0x178] sm:$0xff] %v5095_v37  ;;  %v3737_v60 = vadd.f32 %v3736_v6, %v3303_v28  ;;  %v11561_v37 = vld [vmem:[#allocation143_spill] sm:$0xff] }
 0x609   :  { %v4251_v19 = vadd.f32 %v4250_v32, %v3737_v60  ;;  %v4721_v11 = vpop.f32.mrf.mxu0  ;;  %v5102_v54 = vpop.f32.mrf.mxu1  ;;  %v11557_v32 = vld [vmem:[#allocation150_spill] sm:$0xff] }
 0x60a   :  { %v2770_v24 = vadd.f32 %v10130_v3, %v11557_v32 }
 0x60b   :  { %v4722_v20 = vadd.f32 %v4721_v11, %v4251_v19  ;;  %3820 = vmatmul.f32.gmra.mxu2 %v11538_v47  ;;  %4357 = vmatmul.f32.gmra.mxu3 %v11544_v13  ;;  %v11565_v13 = vld [vmem:[#allocation97_spill] sm:$0xff] }
 0x60c   :  { %4784 = vmatmul.f32.gmra.mxu0 %v11540_v9  ;;  %5165 = vmatmul.f32.gmra.mxu1 %v11545_v38  ;;  %v3319_v9 = vadd.f32 %v11561_v37, %v2770_v24 }
 0x60d   :  { %v5099_v23 = vadd.f32 %v5098_v62, %v4722_v20  ;;  %v11558_v62 = vld [vmem:[#allocation99_spill] sm:$0xff] }
 0x60e   :  { %v3741_v21 = vpop.f32.mrf.mxu2  ;;  %v4262_v55 = vpop.f32.mrf.mxu3  ;;  %v11559_v12 = vand.u32 4294901760, %v11558_v62 }
 0x60f   :  { %5305 = vst [vmem:[#allocation2 + $0x180] sm:$0xff] %v5099_v23  ;;  %v3742_v1 = vadd.f32 %v3741_v21, %v3307_v34  ;;  %v11566_v23 = vld [vmem:[#allocation152_spill] sm:$0xff] }
 0x611   :  { %v4257_v18 = vadd.f32 %v4256_v42, %v3742_v1  ;;  %v4725_v53 = vpop.f32.mrf.mxu0  ;;  %v5106_v30 = vpop.f32.mrf.mxu1  ;;  %v11562_v42 = vld [vmem:[#allocation157_spill] sm:$0xff] }
 0x612   :  { %v2778_v60 = vadd.f32 %v10130_v3, %v11562_v42 }
 0x613   :  { %v4726_v29 = vadd.f32 %v4725_v53, %v4257_v18  ;;  %3825 = vmatmul.f32.gmra.mxu2 %v11543_v16  ;;  %4363 = vmatmul.f32.gmra.mxu3 %v11549_v5  ;;  %v11570_v5 = vld [vmem:[#allocation101_spill] sm:$0xff] }
 0x614   :  { %4788 = vmatmul.f32.gmra.mxu0 %v11545_v38  ;;  %5169 = vmatmul.f32.gmra.mxu1 %v11550_v45  ;;  %v3323_v38 = vadd.f32 %v11566_v23, %v2778_v60 }
 0x615   :  { %v5103_v51 = vadd.f32 %v5102_v54, %v4726_v29  ;;  %v11563_v54 = vld [vmem:[#allocation103_spill] sm:$0xff] }
 0x616   :  { %v3746_v63 = vpop.f32.mrf.mxu2  ;;  %v4268_v35 = vpop.f32.mrf.mxu3  ;;  %v11564_v20 = vand.u32 4294901760, %v11563_v54 }
 0x617   :  { %5306 = vst [vmem:[#allocation2 + $0x188] sm:$0xff] %v5103_v51  ;;  %v3747_v41 = vadd.f32 %v3746_v63, %v3311_v59  ;;  %v11571_v51 = vld [vmem:[#allocation158_spill] sm:$0xff] }
 0x619   :  { %v4263_v15 = vadd.f32 %v4262_v55, %v3747_v41  ;;  %v4729_v7 = vpop.f32.mrf.mxu0  ;;  %v5110_v26 = vpop.f32.mrf.mxu1  ;;  %v11567_v55 = vld [vmem:[#allocation162_spill] sm:$0xff] }
 0x61a   :  { %v2786_v1 = vadd.f32 %v10130_v3, %v11567_v55 }
 0x61b   :  { %v4730_v61 = vadd.f32 %v4729_v7, %v4263_v15  ;;  %3830 = vmatmul.f32.gmra.mxu2 %v11548_v25  ;;  %4369 = vmatmul.f32.gmra.mxu3 %v11554_v27  ;;  %v11575_v27 = vld [vmem:[#allocation104_spill] sm:$0xff] }
 0x61c   :  { %4792 = vmatmul.f32.gmra.mxu0 %v11550_v45  ;;  %5173 = vmatmul.f32.gmra.mxu1 %v11555_v58  ;;  %v3327_v45 = vadd.f32 %v11571_v51, %v2786_v1 }
 0x61d   :  { %v5107_v43 = vadd.f32 %v5106_v30, %v4730_v61  ;;  %v11568_v30 = vld [vmem:[#allocation106_spill] sm:$0xff] }
 0x61e   :  { %v3751_v40 = vpop.f32.mrf.mxu2  ;;  %v4274_v57 = vpop.f32.mrf.mxu3  ;;  %v11569_v29 = vand.u32 4294901760, %v11568_v30 }
 0x61f   :  { %5307 = vst [vmem:[#allocation2 + $0x190] sm:$0xff] %v5107_v43  ;;  %v3752_v36 = vadd.f32 %v3751_v40, %v3315_v17  ;;  %v11576_v43 = vld [vmem:[#allocation164_spill] sm:$0xff] }
 0x621   :  { %v4269_v10 = vadd.f32 %v4268_v35, %v3752_v36  ;;  %v4733_v48 = vpop.f32.mrf.mxu0  ;;  %v5114_v39 = vpop.f32.mrf.mxu1  ;;  %v11572_v35 = vld [vmem:[#allocation166_spill] sm:$0xff] }
 0x622   :  { %v2794_v41 = vadd.f32 %v10130_v3, %v11572_v35 }
 0x623   :  { %v4734_v52 = vadd.f32 %v4733_v48, %v4269_v10  ;;  %3835 = vmatmul.f32.gmra.mxu2 %v11553_v44  ;;  %4375 = vmatmul.f32.gmra.mxu3 %v11559_v12  ;;  %v11580_v12 = vld [vmem:[#allocation115_spill] sm:$0xff] }
 0x624   :  { %4796 = vmatmul.f32.gmra.mxu0 %v11555_v58  ;;  %5177 = vmatmul.f32.gmra.mxu1 %v11560_v50  ;;  %v3331_v58 = vadd.f32 %v11576_v43, %v2794_v41 }
 0x625   :  { %v5111_v47 = vadd.f32 %v5110_v26, %v4734_v52  ;;  %v11573_v26 = vld [vmem:[#allocation118_spill] sm:$0xff] }
 0x626   :  { %v3756_v0 = vpop.f32.mrf.mxu2  ;;  %v4280_v28 = vpop.f32.mrf.mxu3  ;;  %v11574_v61 = vand.u32 4294901760, %v11573_v26 }
 0x627   :  { %5308 = vst [vmem:[#allocation2 + $0x198] sm:$0xff] %v5111_v47  ;;  %v3757_v6 = vadd.f32 %v3756_v0, %v3319_v9  ;;  %v11581_v47 = vld [vmem:[#allocation169_spill] sm:$0xff] }
 0x629   :  { %v4275_v2 = vadd.f32 %v4274_v57, %v3757_v6  ;;  %v4737_v31 = vpop.f32.mrf.mxu0  ;;  %v5118_v19 = vpop.f32.mrf.mxu1  ;;  %v11577_v57 = vld [vmem:[#allocation174_spill] sm:$0xff] }
 0x62a   :  { %v2802_v36 = vadd.f32 %v10130_v3, %v11577_v57 }
 0x62b   :  { %v4738_v11 = vadd.f32 %v4737_v31, %v4275_v2  ;;  %3840 = vmatmul.f32.gmra.mxu2 %v11558_v62  ;;  %4381 = vmatmul.f32.gmra.mxu3 %v11564_v20  ;;  %v11585_v20 = vld [vmem:[#allocation120_spill] sm:$0xff] }
 0x62c   :  { %4800 = vmatmul.f32.gmra.mxu0 %v11560_v50  ;;  %5181 = vmatmul.f32.gmra.mxu1 %v11565_v13  ;;  %v3335_v50 = vadd.f32 %v11581_v47, %v2802_v36 }
 0x62d   :  { %v5115_v16 = vadd.f32 %v5114_v39, %v4738_v11  ;;  %v11578_v39 = vld [vmem:[#allocation125_spill] sm:$0xff] }
 0x62e   :  { %v3761_v14 = vpop.f32.mrf.mxu2  ;;  %v4286_v34 = vpop.f32.mrf.mxu3  ;;  %v11579_v52 = vand.u32 4294901760, %v11578_v39 }
 0x62f   :  { %5309 = vst [vmem:[#allocation2 + $0x1a0] sm:$0xff] %v5115_v16  ;;  %v3762_v21 = vadd.f32 %v3761_v14, %v3323_v38  ;;  %v11586_v16 = vld [vmem:[#allocation176_spill] sm:$0xff] }
 0x631   :  { %v4281_v46 = vadd.f32 %v4280_v28, %v3762_v21  ;;  %v4741_v4 = vpop.f32.mrf.mxu0  ;;  %v5122_v18 = vpop.f32.mrf.mxu1  ;;  %v11582_v28 = vld [vmem:[#allocation178_spill] sm:$0xff] }
 0x632   :  { %v2810_v6 = vadd.f32 %v10130_v3, %v11582_v28 }
 0x633   :  { %v4742_v53 = vadd.f32 %v4741_v4, %v4281_v46  ;;  %3845 = vmatmul.f32.gmra.mxu2 %v11563_v54  ;;  %4387 = vmatmul.f32.gmra.mxu3 %v11569_v29  ;;  %v11590_v29 = vld [vmem:[#allocation132_spill] sm:$0xff] }
 0x634   :  { %4804 = vmatmul.f32.gmra.mxu0 %v11565_v13  ;;  %5185 = vmatmul.f32.gmra.mxu1 %v11570_v5  ;;  %v3339_v13 = vadd.f32 %v11586_v16, %v2810_v6 }
 0x635   :  { %v5119_v25 = vadd.f32 %v5118_v19, %v4742_v53  ;;  %v11583_v19 = vld [vmem:[#allocation136_spill] sm:$0xff] }
 0x636   :  { %v3766_v56 = vpop.f32.mrf.mxu2  ;;  %v4292_v59 = vpop.f32.mrf.mxu3  ;;  %v11584_v11 = vand.u32 4294901760, %v11583_v19 }
 0x637   :  { %5310 = vst [vmem:[#allocation2 + $0x1a8] sm:$0xff] %v5119_v25  ;;  %v3767_v63 = vadd.f32 %v3766_v56, %v3327_v45  ;;  %v11591_v25 = vld [vmem:[#allocation180_spill] sm:$0xff] }
 0x639   :  { %v4287_v49 = vadd.f32 %v4286_v34, %v3767_v63  ;;  %v4745_v33 = vpop.f32.mrf.mxu0  ;;  %v5126_v15 = vpop.f32.mrf.mxu1  ;;  %v11587_v34 = vld [vmem:[#allocation185_spill] sm:$0xff] }
 0x63a   :  { %v2818_v21 = vadd.f32 %v10130_v3, %v11587_v34 }
 0x63b   :  { %v4746_v7 = vadd.f32 %v4745_v33, %v4287_v49  ;;  %3850 = vmatmul.f32.gmra.mxu2 %v11568_v30  ;;  %4393 = vmatmul.f32.gmra.mxu3 %v11574_v61  ;;  %v11595_v61 = vld [vmem:[#allocation137_spill] sm:$0xff] }
 0x63c   :  { %4808 = vmatmul.f32.gmra.mxu0 %v11570_v5  ;;  %5189 = vmatmul.f32.gmra.mxu1 %v11575_v27  ;;  %v3343_v5 = vadd.f32 %v11591_v25, %v2818_v21 }
 0x63d   :  { %v5123_v44 = vadd.f32 %v5122_v18, %v4746_v7  ;;  %v11588_v18 = vld [vmem:[#allocation139_spill] sm:$0xff] }
 0x63e   :  { %v3771_v8 = vpop.f32.mrf.mxu2  ;;  %v4298_v17 = vpop.f32.mrf.mxu3  ;;  %v11589_v53 = vand.u32 4294901760, %v11588_v18 }
 0x63f   :  { %5311 = vst [vmem:[#allocation2 + $0x1b0] sm:$0xff] %v5123_v44  ;;  %v3772_v40 = vadd.f32 %v3771_v8, %v3331_v58  ;;  %v11596_v44 = vld [vmem:[#allocation187_spill] sm:$0xff] }
 0x641   :  { %v4293_v32 = vadd.f32 %v4292_v59, %v3772_v40  ;;  %v4749_v24 = vpop.f32.mrf.mxu0  ;;  %v5130_v10 = vpop.f32.mrf.mxu1  ;;  %v11592_v59 = vld [vmem:[#allocation189_spill] sm:$0xff] }
 0x642   :  { %v2826_v63 = vadd.f32 %v10130_v3, %v11592_v59 }
 0x643   :  { %v4750_v48 = vadd.f32 %v4749_v24, %v4293_v32  ;;  %3855 = vmatmul.f32.gmra.mxu2 %v11573_v26  ;;  %4399 = vmatmul.f32.gmra.mxu3 %v11579_v52  ;;  %v11600_v52 = vld [vmem:[#allocation142_spill] sm:$0xff] }
 0x644   :  { %4812 = vmatmul.f32.gmra.mxu0 %v11575_v27  ;;  %5193 = vmatmul.f32.gmra.mxu1 %v11580_v12  ;;  %v3347_v27 = vadd.f32 %v11596_v44, %v2826_v63 }
 0x645   :  { %v5127_v62 = vadd.f32 %v5126_v15, %v4750_v48  ;;  %v11593_v15 = vld [vmem:[#allocation145_spill] sm:$0xff] }
 0x646   :  { %v3776_v37 = vpop.f32.mrf.mxu2  ;;  %v4304_v9 = vpop.f32.mrf.mxu3  ;;  %v11594_v7 = vand.u32 4294901760, %v11593_v15 }
 0x647   :  { %5312 = vst [vmem:[#allocation2 + $0x1b8] sm:$0xff] %v5127_v62  ;;  %v3777_v0 = vadd.f32 %v3776_v37, %v3335_v50  ;;  %v11601_v62 = vld [vmem:[#allocation191_spill] sm:$0xff] }
 0x649   :  { %v4299_v42 = vadd.f32 %v4298_v17, %v3777_v0  ;;  %v4753_v60 = vpop.f32.mrf.mxu0  ;;  %v5134_v2 = vpop.f32.mrf.mxu1  ;;  %v11597_v17 = vld [vmem:[#allocation195_spill] sm:$0xff] }
 0x64a   :  { %v2834_v40 = vadd.f32 %v10130_v3, %v11597_v17 }
 0x64b   :  { %v4754_v31 = vadd.f32 %v4753_v60, %v4299_v42  ;;  %3860 = vmatmul.f32.gmra.mxu2 %v11578_v39  ;;  %4405 = vmatmul.f32.gmra.mxu3 %v11584_v11  ;;  %v11605_v11 = vld [vmem:[#allocation153_spill] sm:$0xff] }
 0x64c   :  { %4816 = vmatmul.f32.gmra.mxu0 %v11580_v12  ;;  %5197 = vmatmul.f32.gmra.mxu1 %v11585_v20  ;;  %v3351_v12 = vadd.f32 %v11601_v62, %v2834_v40 }
 0x64d   :  { %v5131_v54 = vadd.f32 %v5130_v10, %v4754_v31  ;;  %v11598_v10 = vld [vmem:[#allocation155_spill] sm:$0xff] }
 0x64e   :  { %v3781_v23 = vpop.f32.mrf.mxu2  ;;  %v4310_v38 = vpop.f32.mrf.mxu3  ;;  %v11599_v48 = vand.u32 4294901760, %v11598_v10 }
 0x64f   :  { %5313 = vst [vmem:[#allocation2 + $0x1c0] sm:$0xff] %v5131_v54  ;;  %v3782_v14 = vadd.f32 %v3781_v23, %v3339_v13  ;;  %v11606_v54 = vld [vmem:[#allocation196_spill] sm:$0xff] }
 0x651   :  { %v4305_v55 = vadd.f32 %v4304_v9, %v3782_v14  ;;  %v4757_v1 = vpop.f32.mrf.mxu0  ;;  %v5138_v46 = vpop.f32.mrf.mxu1  ;;  %v11602_v9 = vld [vmem:[#allocation199_spill] sm:$0xff] }
 0x652   :  { %v2842_v0 = vadd.f32 %v10130_v3, %v11602_v9 }
 0x653   :  { %v4758_v4 = vadd.f32 %v4757_v1, %v4305_v55  ;;  %3865 = vmatmul.f32.gmra.mxu2 %v11583_v19  ;;  %4411 = vmatmul.f32.gmra.mxu3 %v11589_v53  ;;  %v11610_v53 = vld [vmem:[#allocation156_spill] sm:$0xff] }
 0x654   :  { %4820 = vmatmul.f32.gmra.mxu0 %v11585_v20  ;;  %5201 = vmatmul.f32.gmra.mxu1 %v11590_v29  ;;  %v3355_v20 = vadd.f32 %v11606_v54, %v2842_v0 }
 0x655   :  { %v5135_v30 = vadd.f32 %v5134_v2, %v4758_v4  ;;  %v11603_v2 = vld [vmem:[#allocation159_spill] sm:$0xff] }
 0x656   :  { %v3786_v51 = vpop.f32.mrf.mxu2  ;;  %v4316_v45 = vpop.f32.mrf.mxu3  ;;  %v11604_v31 = vand.u32 4294901760, %v11603_v2 }
 0x657   :  { %5314 = vst [vmem:[#allocation2 + $0x1c8] sm:$0xff] %v5135_v30  ;;  %v3787_v56 = vadd.f32 %v3786_v51, %v3343_v5  ;;  %v11611_v30 = vld [vmem:[#allocation201_spill] sm:$0xff] }
 0x659   :  { %v4311_v35 = vadd.f32 %v4310_v38, %v3787_v56  ;;  %v4761_v41 = vpop.f32.mrf.mxu0  ;;  %v5142_v49 = vpop.f32.mrf.mxu1  ;;  %v11607_v38 = vld [vmem:[#allocation205_spill] sm:$0xff] }
 0x65a   :  { %v2850_v14 = vadd.f32 %v10130_v3, %v11607_v38 }
 0x65b   :  { %v4762_v33 = vadd.f32 %v4761_v41, %v4311_v35  ;;  %3870 = vmatmul.f32.gmra.mxu2 %v11588_v18  ;;  %4417 = vmatmul.f32.gmra.mxu3 %v11594_v7  ;;  %v11615_v7 = vld [vmem:[#allocation168_spill] sm:$0xff] }
 0x65c   :  { %4824 = vmatmul.f32.gmra.mxu0 %v11590_v29  ;;  %5205 = vmatmul.f32.gmra.mxu1 %v11595_v61  ;;  %v3359_v29 = vadd.f32 %v11611_v30, %v2850_v14 }
 0x65d   :  { %v5139_v26 = vadd.f32 %v5138_v46, %v4762_v33  ;;  %v11608_v46 = vld [vmem:[#allocation173_spill] sm:$0xff] }
 0x65e   :  { %v3791_v43 = vpop.f32.mrf.mxu2  ;;  %v4322_v58 = vpop.f32.mrf.mxu3  ;;  %v11609_v4 = vand.u32 4294901760, %v11608_v46 }
 0x65f   :  { %5315 = vst [vmem:[#allocation2 + $0x1d0] sm:$0xff] %v5139_v26  ;;  %v3792_v8 = vadd.f32 %v3791_v43, %v3347_v27  ;;  %v11616_v26 = vld [vmem:[#allocation207_spill] sm:$0xff] }
 0x661   :  { %v4317_v57 = vadd.f32 %v4316_v45, %v3792_v8  ;;  %v4765_v36 = vpop.f32.mrf.mxu0  ;;  %v5146_v32 = vpop.f32.mrf.mxu1  ;;  %v11612_v45 = vld [vmem:[#allocation211_spill] sm:$0xff] }
 0x662   :  { %v2858_v56 = vadd.f32 %v10130_v3, %v11612_v45 }
 0x663   :  { %v4766_v24 = vadd.f32 %v4765_v36, %v4317_v57  ;;  %3875 = vmatmul.f32.gmra.mxu2 %v11593_v15  ;;  %4423 = vmatmul.f32.gmra.mxu3 %v11599_v48  ;;  %v11620_v48 = vld [vmem:[#allocation175_spill] sm:$0xff] }
 0x664   :  { %4828 = vmatmul.f32.gmra.mxu0 %v11595_v61  ;;  %5209 = vmatmul.f32.gmra.mxu1 %v11600_v52  ;;  %v3363_v61 = vadd.f32 %v11616_v26, %v2858_v56 }
 0x665   :  { %v5143_v39 = vadd.f32 %v5142_v49, %v4766_v24  ;;  %v11613_v49 = vld [vmem:[#allocation177_spill] sm:$0xff] }
 0x666   :  { %v3796_v47 = vpop.f32.mrf.mxu2  ;;  %v4328_v50 = vpop.f32.mrf.mxu3  ;;  %v11614_v33 = vand.u32 4294901760, %v11613_v49 }
 0x667   :  { %5316 = vst [vmem:[#allocation2 + $0x1d8] sm:$0xff] %v5143_v39  ;;  %v3797_v37 = vadd.f32 %v3796_v47, %v3351_v12  ;;  %v11621_v39 = vld [vmem:[#allocation212_spill] sm:$0xff] }
 0x669   :  { %v4323_v28 = vadd.f32 %v4322_v58, %v3797_v37  ;;  %v4769_v6 = vpop.f32.mrf.mxu0  ;;  %v5150_v42 = vpop.f32.mrf.mxu1  ;;  %v11617_v58 = vld [vmem:[#allocation215_spill] sm:$0xff] }
 0x66a   :  { %v2866_v8 = vadd.f32 %v10130_v3, %v11617_v58 }
 0x66b   :  { %v4770_v60 = vadd.f32 %v4769_v6, %v4323_v28  ;;  %3880 = vmatmul.f32.gmra.mxu2 %v11598_v10  ;;  %4429 = vmatmul.f32.gmra.mxu3 %v11604_v31  ;;  %v11625_v31 = vld [vmem:[#allocation179_spill] sm:$0xff] }
 0x66c   :  { %4832 = vmatmul.f32.gmra.mxu0 %v11600_v52  ;;  %5213 = vmatmul.f32.gmra.mxu1 %v11605_v11  ;;  %v3367_v52 = vadd.f32 %v11621_v39, %v2866_v8 }
 0x66d   :  { %v5147_v19 = vadd.f32 %v5146_v32, %v4770_v60  ;;  %v11618_v32 = vld [vmem:[#allocation182_spill] sm:$0xff] }
 0x66e   :  { %v3801_v16 = vpop.f32.mrf.mxu2  ;;  %v4334_v13 = vpop.f32.mrf.mxu3  ;;  %v11619_v24 = vand.u32 4294901760, %v11618_v32 }
 0x66f   :  { %5317 = vst [vmem:[#allocation2 + $0x1e0] sm:$0xff] %v5147_v19  ;;  %v3802_v23 = vadd.f32 %v3801_v16, %v3355_v20  ;;  %v11626_v19 = vld [vmem:[#allocation216_spill] sm:$0xff] }
 0x671   :  { %v4329_v34 = vadd.f32 %v4328_v50, %v3802_v23  ;;  %v4773_v21 = vpop.f32.mrf.mxu0  ;;  %v5154_v55 = vpop.f32.mrf.mxu1  ;;  %v11622_v50 = vld [vmem:[#allocation219_spill] sm:$0xff] }
 0x672   :  { %v2874_v37 = vadd.f32 %v10130_v3, %v11622_v50 }
 0x673   :  { %v4774_v1 = vadd.f32 %v4773_v21, %v4329_v34  ;;  %3885 = vmatmul.f32.gmra.mxu2 %v11603_v2  ;;  %4435 = vmatmul.f32.gmra.mxu3 %v11609_v4  ;;  %v11630_v4 = vld [vmem:[#allocation190_spill] sm:$0xff] }
 0x674   :  { %4836 = vmatmul.f32.gmra.mxu0 %v11605_v11  ;;  %5217 = vmatmul.f32.gmra.mxu1 %v11610_v53  ;;  %v3371_v11 = vadd.f32 %v11626_v19, %v2874_v37 }
 0x675   :  { %v5151_v18 = vadd.f32 %v5150_v42, %v4774_v1  ;;  %v11623_v42 = vld [vmem:[#allocation193_spill] sm:$0xff] }
 0x676   :  { %v3806_v25 = vpop.f32.mrf.mxu2  ;;  %v4340_v5 = vpop.f32.mrf.mxu3  ;;  %v11624_v60 = vand.u32 4294901760, %v11623_v42 }
 0x677   :  { %5318 = vst [vmem:[#allocation2 + $0x1e8] sm:$0xff] %v5151_v18  ;;  %v3807_v51 = vadd.f32 %v3806_v25, %v3359_v29  ;;  %v11631_v18 = vld [vmem:[#allocation220_spill] sm:$0xff] }
 0x679   :  { %v4335_v59 = vadd.f32 %v4334_v13, %v3807_v51  ;;  %v4777_v63 = vpop.f32.mrf.mxu0  ;;  %v5158_v35 = vpop.f32.mrf.mxu1  ;;  %v11627_v13 = vld [vmem:[#allocation223_spill] sm:$0xff] }
 0x67a   :  { %v2882_v23 = vadd.f32 %v10130_v3, %v11627_v13 }
 0x67b   :  { %v4778_v41 = vadd.f32 %v4777_v63, %v4335_v59  ;;  %3890 = vmatmul.f32.gmra.mxu2 %v11608_v46  ;;  %4441 = vmatmul.f32.gmra.mxu3 %v11614_v33  ;;  %v11635_v33 = vld [vmem:[#allocation197_spill] sm:$0xff] }
 0x67c   :  { %4840 = vmatmul.f32.gmra.mxu0 %v11610_v53  ;;  %5221 = vmatmul.f32.gmra.mxu1 %v11615_v7  ;;  %v3375_v53 = vadd.f32 %v11631_v18, %v2882_v23 }
 0x67d   :  { %v5155_v15 = vadd.f32 %v5154_v55, %v4778_v41  ;;  %v11628_v55 = vld [vmem:[#allocation198_spill] sm:$0xff] }
 0x67e   :  { %v3811_v44 = vpop.f32.mrf.mxu2  ;;  %v4346_v27 = vpop.f32.mrf.mxu3  ;;  %v11629_v1 = vand.u32 4294901760, %v11628_v55 }
 0x67f   :  { %5319 = vst [vmem:[#allocation2 + $0x1f0] sm:$0xff] %v5155_v15  ;;  %v3812_v43 = vadd.f32 %v3811_v44, %v3363_v61  ;;  %v11636_v15 = vld [vmem:[#allocation224_spill] sm:$0xff] }
 0x681   :  { %v4341_v17 = vadd.f32 %v4340_v5, %v3812_v43  ;;  %v4781_v40 = vpop.f32.mrf.mxu0  ;;  %v5162_v57 = vpop.f32.mrf.mxu1  ;;  %v11632_v5 = vld [vmem:[#allocation227_spill] sm:$0xff] }
 0x682   :  { %v2890_v51 = vadd.f32 %v10130_v3, %v11632_v5 }
 0x683   :  { %v4782_v36 = vadd.f32 %v4781_v40, %v4341_v17  ;;  %3895 = vmatmul.f32.gmra.mxu2 %v11613_v49  ;;  %4447 = vmatmul.f32.gmra.mxu3 %v11619_v24  ;;  %v11640_v24 = vld [vmem:[#allocation200_spill] sm:$0xff] }
 0x684   :  { %4844 = vmatmul.f32.gmra.mxu0 %v11615_v7  ;;  %5225 = vmatmul.f32.gmra.mxu1 %v11620_v48  ;;  %v3379_v7 = vadd.f32 %v11636_v15, %v2890_v51 }
 0x685   :  { %v5159_v10 = vadd.f32 %v5158_v35, %v4782_v36  ;;  %v11633_v35 = vld [vmem:[#allocation203_spill] sm:$0xff] }
 0x686   :  { %v3816_v62 = vpop.f32.mrf.mxu2  ;;  %v4352_v12 = vpop.f32.mrf.mxu3  ;;  %v11634_v41 = vand.u32 4294901760, %v11633_v35 }
 0x687   :  { %5320 = vst [vmem:[#allocation2 + $0x1f8] sm:$0xff] %v5159_v10  ;;  %v3817_v47 = vadd.f32 %v3816_v62, %v3367_v52  ;;  %v11641_v10 = vld [vmem:[#allocation228_spill] sm:$0xff]  ;;  %v10415_v62 = vld [vmem:[%s10491_s2] ss:$0 sm:$0xff]  ;;  %s5604_s2 = smov [#allocation2]  }
 0x688   :  { %s5349_s14 = sshll.u32 %s5604_s2, 4  ;;  %s5350_s14 = int_to_ptr.vmem [resolvable:$true] %s5349_s14 }
 0x689   :  { %v4347_v9 = vadd.f32 %v4346_v27, %v3817_v47  ;;  %v4785_v0 = vpop.f32.mrf.mxu0  ;;  %v5166_v28 = vpop.f32.mrf.mxu1  ;;  %v11637_v27 = vld [vmem:[#allocation231_spill] sm:$0xff] }
 0x68a   :  { %v2898_v43 = vadd.f32 %v10130_v3, %v11637_v27 }
 0x68b   :  { %v4786_v6 = vadd.f32 %v4785_v0, %v4347_v9  ;;  %3900 = vmatmul.f32.gmra.mxu2 %v11618_v32  ;;  %4453 = vmatmul.f32.gmra.mxu3 %v11624_v60  ;;  %v11645_v60 = vld [vmem:[#allocation210_spill] sm:$0xff] }
 0x68c   :  { %4848 = vmatmul.f32.gmra.mxu0 %v11620_v48  ;;  %5229 = vmatmul.f32.gmra.mxu1 %v11625_v31  ;;  %v3383_v48 = vadd.f32 %v11641_v10, %v2898_v43 }
 0x68d   :  { %v5163_v2 = vadd.f32 %v5162_v57, %v4786_v6  ;;  %v11638_v57 = vld [vmem:[#allocation213_spill] sm:$0xff] }
 0x68e   :  { %v3821_v54 = vpop.f32.mrf.mxu2  ;;  %v4358_v20 = vpop.f32.mrf.mxu3  ;;  %v11639_v36 = vand.u32 4294901760, %v11638_v57 }
 0x68f   :  { %5321 = vst [vmem:[#allocation2 + $0x200] sm:$0xff] %v5163_v2  ;;  %v3822_v16 = vadd.f32 %v3821_v54, %v3371_v11  ;;  %v11646_v2 = vld [vmem:[#allocation232_spill] sm:$0xff] }
 0x691   :  { %v4353_v38 = vadd.f32 %v4352_v12, %v3822_v16  ;;  %v4789_v14 = vpop.f32.mrf.mxu0  ;;  %v5170_v34 = vpop.f32.mrf.mxu1  ;;  %v11642_v12 = vld [vmem:[#allocation235_spill] sm:$0xff] }
 0x692   :  { %v2906_v47 = vadd.f32 %v10415_v62, %v11642_v12  ;;  %v11658_v12 = vld [vmem:[#allocation249_spill] sm:$0xff] }
 0x693   :  { %v4790_v21 = vadd.f32 %v4789_v14, %v4353_v38  ;;  %3905 = vmatmul.f32.gmra.mxu2 %v11623_v42  ;;  %4459 = vmatmul.f32.gmra.mxu3 %v11629_v1  ;;  %v11650_v1 = vld [vmem:[#allocation236_spill] sm:$0xff] }
 0x694   :  { %4852 = vmatmul.f32.gmra.mxu0 %v11625_v31  ;;  %5233 = vmatmul.f32.gmra.mxu1 %v11630_v4  ;;  %v3387_v31 = vadd.f32 %v11646_v2, %v2906_v47 }
 0x695   :  { %v5167_v46 = vadd.f32 %v5166_v28, %v4790_v21  ;;  %v11643_v28 = vld [vmem:[#allocation239_spill] sm:$0xff] }
 0x696   :  { %v3826_v30 = vpop.f32.mrf.mxu2  ;;  %v4364_v29 = vpop.f32.mrf.mxu3  ;;  %v11644_v6 = vand.u32 4294901760, %v11643_v28 }
 0x697   :  { %5322 = vst [vmem:[#allocation2 + $0x208] sm:$0xff] %v5167_v46  ;;  %v3827_v25 = vadd.f32 %v3826_v30, %v3375_v53  ;;  %v11651_v46 = vld [vmem:[#allocation237_spill] sm:$0xff] }
 0x699   :  { %v4359_v45 = vadd.f32 %v4358_v20, %v3827_v25  ;;  %v4793_v56 = vpop.f32.mrf.mxu0  ;;  %v5174_v59 = vpop.f32.mrf.mxu1  ;;  %v11647_v20 = vld [vmem:[#allocation240_spill] sm:$0xff] }
 0x69a   :  { %v2914_v16 = vadd.f32 %v10415_v62, %v11647_v20 }
 0x69b   :  { %v4794_v63 = vadd.f32 %v4793_v56, %v4359_v45  ;;  %3910 = vmatmul.f32.gmra.mxu2 %v11628_v55  ;;  %4465 = vmatmul.f32.gmra.mxu3 %v11634_v41 }
 0x69c   :  { %4856 = vmatmul.f32.gmra.mxu0 %v11630_v4  ;;  %5237 = vmatmul.f32.gmra.mxu1 %v11635_v33  ;;  %v3391_v4 = vadd.f32 %v11651_v46, %v2914_v16 }
 0x69d   :  { %v5171_v49 = vadd.f32 %v5170_v34, %v4794_v63  ;;  %v11648_v34 = vld [vmem:[#allocation247_spill] sm:$0xff]  ;;  %v11653_v63 = vld [vmem:[#allocation246_spill] sm:$0xff] }
 0x69e   :  { %v3831_v26 = vpop.f32.mrf.mxu2  ;;  %v4370_v61 = vpop.f32.mrf.mxu3  ;;  %v11649_v21 = vand.u32 4294901760, %v11648_v34 }
 0x69f   :  { %5323 = vst [vmem:[#allocation2 + $0x210] sm:$0xff] %v5171_v49  ;;  %v3832_v44 = vadd.f32 %v3831_v26, %v3379_v7  ;;  %v11655_v7 = vld [vmem:[#allocation248_spill] sm:$0xff] }
 0x6a0   :  { %v2930_v26 = vadd.f32 %v10415_v62, %v11655_v7 }
 0x6a1   :  { %v4365_v58 = vadd.f32 %v4364_v29, %v3832_v44  ;;  %v4797_v8 = vpop.f32.mrf.mxu0  ;;  %v5178_v17 = vpop.f32.mrf.mxu1  ;;  %v11652_v29 = vld [vmem:[#allocation244_spill] sm:$0xff] }
 0x6a2   :  { %v2922_v25 = vadd.f32 %v10415_v62, %v11652_v29 }
 0x6a3   :  { %v4798_v40 = vadd.f32 %v4797_v8, %v4365_v58  ;;  %3915 = vmatmul.f32.gmra.mxu2 %v11633_v35  ;;  %4471 = vmatmul.f32.gmra.mxu3 %v11639_v36  ;;  %v11654_v35 = vld [vmem:[#allocation242_spill] sm:$0xff]  ;;  %v11656_v8 = vld [vmem:[#allocation245_spill] sm:$0xff] }
 0x6a4   :  { %4860 = vmatmul.f32.gmra.mxu0 %v11635_v33  ;;  %5241 = vmatmul.f32.gmra.mxu1 %v11640_v24  ;;  %v3395_v41 = vadd.f32 %v11654_v35, %v2922_v25 }
 0x6a5   :  { %v5175_v32 = vadd.f32 %v5174_v59, %v4798_v40 }
 0x6a6   :  { %v3836_v39 = vpop.f32.mrf.mxu2  ;;  %v4376_v52 = vpop.f32.mrf.mxu3 }
 0x6a7   :  { %5324 = vst [vmem:[#allocation2 + $0x218] sm:$0xff] %v5175_v32  ;;  %v3837_v3 = vadd.f32 %v3836_v39, %v3383_v48  ;;  %v11657_v32 = vld [vmem:[#allocation250_spill] sm:$0xff] }
 0x6a9   :  { %v4371_v50 = vadd.f32 %v4370_v61, %v3837_v3  ;;  %v4801_v37 = vpop.f32.mrf.mxu0  ;;  %v5182_v9 = vpop.f32.mrf.mxu1 }
 0x6ab   :  { %v4802_v0 = vadd.f32 %v4801_v37, %v4371_v50  ;;  %3920 = vmatmul.f32.gmra.mxu2 %v11638_v57  ;;  %4477 = vmatmul.f32.gmra.mxu3 %v11644_v6 }
 0x6ac   :  { %4864 = vmatmul.f32.gmra.mxu0 %v11640_v24  ;;  %5245 = vmatmul.f32.gmra.mxu1 %v11645_v60  ;;  %v2938_v24 = vadd.f32 %v10415_v62, %v11657_v32 }
 0x6ad   :  { %v5179_v42 = vadd.f32 %v5178_v17, %v4802_v0  ;;  %v3399_v17 = vadd.f32 %v11656_v8, %v2930_v26  ;;  %v11659_v0 = vld [vmem:[#allocation252_spill] sm:$0xff] }
 0x6ae   :  { %v3841_v19 = vpop.f32.mrf.mxu2  ;;  %v4382_v11 = vpop.f32.mrf.mxu3  ;;  %v3403_v47 = vadd.f32 %v11658_v12, %v2938_v24 }
 0x6af   :  { %5325 = vst [vmem:[#allocation2 + $0x220] sm:$0xff] %v5179_v42  ;;  %v3842_v54 = vadd.f32 %v3841_v19, %v3387_v31  ;;  %v11660_v19 = vld [vmem:[#allocation251_spill] sm:$0xff] }
 0x6b1   :  { %v4377_v13 = vadd.f32 %v4376_v52, %v3842_v54  ;;  %v4805_v23 = vpop.f32.mrf.mxu0  ;;  %v5186_v38 = vpop.f32.mrf.mxu1 }
 0x6b3   :  { %v4806_v14 = vadd.f32 %v4805_v23, %v4377_v13  ;;  %3925 = vmatmul.f32.gmra.mxu2 %v11643_v28  ;;  %4483 = vmatmul.f32.gmra.mxu3 %v11649_v21  ;;  %v2946_v28 = vadd.f32 %v10415_v62, %v11659_v0  ;;  %v11661_v13 = vld [vmem:[#allocation255_spill] sm:$0xff] }
 0x6b4   :  { %4868 = vmatmul.f32.gmra.mxu0 %v11645_v60  ;;  %5249 = vmatmul.f32.gmra.mxu1 %v11650_v1  ;;  %v2954_v23 = vadd.f32 %v10415_v62, %v11661_v13 }
 0x6b5   :  { %v5183_v55 = vadd.f32 %v5182_v9, %v4806_v14 }
 0x6b6   :  { %v3846_v18 = vpop.f32.mrf.mxu2  ;;  %v4388_v53 = vpop.f32.mrf.mxu3 }
 0x6b7   :  { %5326 = vst [vmem:[#allocation2 + $0x228] sm:$0xff] %v5183_v55  ;;  %v3847_v30 = vadd.f32 %v3846_v18, %v3391_v4 }
 0x6b9   :  { %v4383_v5 = vadd.f32 %v4382_v11, %v3847_v30  ;;  %v4809_v51 = vpop.f32.mrf.mxu0  ;;  %v5190_v45 = vpop.f32.mrf.mxu1  ;;  %v3407_v11 = vadd.f32 %v11660_v19, %v2946_v28  ;;  %v11663_v30 = vld [vmem:[#allocation256_spill] sm:$0xff] }
 0x6ba   :  { %v2962_v29 = vadd.f32 %v10415_v62, %v11663_v30 }
 0x6bb   :  { %v4810_v56 = vadd.f32 %v4809_v51, %v4383_v5  ;;  %3930 = vmatmul.f32.gmra.mxu2 %v11648_v34 }
 0x6bc   :  { %4872 = vmatmul.f32.gmra.mxu0 %v11650_v1  ;;  %5253 = vmatmul.f32.gmra.mxu1 %v11653_v63  ;;  %v11662_v1 = vld [vmem:[#allocation253_spill] sm:$0xff] }
 0x6bd   :  { %v5187_v59 = vadd.f32 %v5186_v38, %v4810_v56  ;;  %v3411_v46 = vadd.f32 %v11662_v1, %v2954_v23 }
 0x6be   :  { %v3851_v49 = vpop.f32.mrf.mxu2  ;;  %v4394_v33 = vpop.f32.mrf.mxu3 }
 0x6bf   :  { %5327 = vst [vmem:[#allocation2 + $0x230] sm:$0xff] %v5187_v59  ;;  %v3852_v15 = vadd.f32 %v3851_v49, %v3395_v41  ;;  %v11664_v59 = vld [vmem:[#allocation18_spill] sm:$0xff] }
 0x6c1   :  { %v4389_v61 = vadd.f32 %v4388_v53, %v3852_v15  ;;  %v4813_v44 = vpop.f32.mrf.mxu0  ;;  %v5194_v27 = vpop.f32.mrf.mxu1 }
 0x6c3   :  { %v4814_v43 = vadd.f32 %v4813_v44, %v4389_v61 }
 0x6c4   :  { %4876 = vmatmul.f32.gmra.mxu0 %v11653_v63  ;;  %v3415_v63 = vadd.f32 %v11664_v59, %v2962_v29 }
 0x6c5   :  { %v5191_v58 = vadd.f32 %v5190_v45, %v4814_v43  ;;  %v11666_v43 = vld [vmem:[#allocation22_spill] sm:$0xff] }
 0x6c6   :  { %v3856_v40 = vpop.f32.mrf.mxu2  ;;  %v4400_v57 = vpop.f32.mrf.mxu3 }
 0x6c7   :  { %5328 = vst [vmem:[#allocation2 + $0x238] sm:$0xff] %v5191_v58  ;;  %v3857_v36 = vadd.f32 %v3856_v40, %v3399_v17 }
 0x6c9   :  { %v4395_v10 = vadd.f32 %v4394_v33, %v3857_v36  ;;  %v4817_v48 = vpop.f32.mrf.mxu0  ;;  %v5198_v39 = vpop.f32.mrf.mxu1  ;;  %v11665_v33 = vld [vmem:[#allocation258_spill] sm:$0xff] }
 0x6ca   :  { %v2970_v15 = vadd.f32 %v10415_v62, %v11665_v33 }
 0x6cb   :  { %v4818_v52 = vadd.f32 %v4817_v48, %v4395_v10 }
 0x6cc   :  { %v3419_v58 = vadd.f32 %v11666_v43, %v2970_v15 }
 0x6cd   :  { %v5195_v3 = vadd.f32 %v5194_v27, %v4818_v52  ;;  %v11668_v52 = vld [vmem:[#allocation26_spill] sm:$0xff] }
 0x6ce   :  { %v3861_v50 = vpop.f32.mrf.mxu2  ;;  %v4406_v37 = vpop.f32.mrf.mxu3 }
 0x6cf   :  { %5329 = vst [vmem:[#allocation2 + $0x240] sm:$0xff] %v5195_v3  ;;  %v3862_v9 = vadd.f32 %v3861_v50, %v3403_v47 }
 0x6d1   :  { %v4401_v6 = vadd.f32 %v4400_v57, %v3862_v9  ;;  %v4821_v42 = vpop.f32.mrf.mxu0  ;;  %v5202_v60 = vpop.f32.mrf.mxu1  ;;  %v11667_v57 = vld [vmem:[#allocation30_spill] sm:$0xff] }
 0x6d2   :  { %v2978_v36 = vadd.f32 %v10415_v62, %v11667_v57 }
 0x6d3   :  { %v4822_v2 = vadd.f32 %v4821_v42, %v4401_v6 }
 0x6d4   :  { %v3423_v3 = vadd.f32 %v11668_v52, %v2978_v36 }
 0x6d5   :  { %v5199_v31 = vadd.f32 %v5198_v39, %v4822_v2  ;;  %v11670_v2 = vld [vmem:[#allocation24_spill] sm:$0xff] }
 0x6d6   :  { %v3866_v54 = vpop.f32.mrf.mxu2  ;;  %v4412_v20 = vpop.f32.mrf.mxu3 }
 0x6d7   :  { %5330 = vst [vmem:[#allocation2 + $0x248] sm:$0xff] %v5199_v31  ;;  %v3867_v16 = vadd.f32 %v3866_v54, %v3407_v11 }
 0x6d9   :  { %v4407_v38 = vadd.f32 %v4406_v37, %v3867_v16  ;;  %v4825_v14 = vpop.f32.mrf.mxu0  ;;  %v5206_v34 = vpop.f32.mrf.mxu1  ;;  %v11669_v37 = vld [vmem:[#allocation34_spill] sm:$0xff] }
 0x6da   :  { %v2986_v9 = vadd.f32 %v10415_v62, %v11669_v37 }
 0x6db   :  { %v4826_v21 = vadd.f32 %v4825_v14, %v4407_v38 }
 0x6dc   :  { %v3427_v31 = vadd.f32 %v11670_v2, %v2986_v9 }
 0x6dd   :  { %v5203_v55 = vadd.f32 %v5202_v60, %v4826_v21  ;;  %v11672_v21 = vld [vmem:[#allocation28_spill] sm:$0xff] }
 0x6de   :  { %v3871_v4 = vpop.f32.mrf.mxu2  ;;  %v4418_v18 = vpop.f32.mrf.mxu3 }
 0x6df   :  { %5331 = vst [vmem:[#allocation2 + $0x250] sm:$0xff] %v5203_v55  ;;  %v3872_v53 = vadd.f32 %v3871_v4, %v3411_v46 }
 0x6e1   :  { %v4413_v25 = vadd.f32 %v4412_v20, %v3872_v53  ;;  %v4829_v5 = vpop.f32.mrf.mxu0  ;;  %v5210_v51 = vpop.f32.mrf.mxu1  ;;  %v11671_v20 = vld [vmem:[#allocation38_spill] sm:$0xff] }
 0x6e2   :  { %v2994_v16 = vadd.f32 %v10415_v62, %v11671_v20 }
 0x6e3   :  { %v4830_v45 = vadd.f32 %v4829_v5, %v4413_v25 }
 0x6e4   :  { %v3431_v55 = vadd.f32 %v11672_v21, %v2994_v16 }
 0x6e5   :  { %v5207_v56 = vadd.f32 %v5206_v34, %v4830_v45  ;;  %v11674_v45 = vld [vmem:[#allocation32_spill] sm:$0xff] }
 0x6e6   :  { %v3876_v35 = vpop.f32.mrf.mxu2  ;;  %v4424_v41 = vpop.f32.mrf.mxu3 }
 0x6e7   :  { %5332 = vst [vmem:[#allocation2 + $0x258] sm:$0xff] %v5207_v56  ;;  %v3877_v49 = vadd.f32 %v3876_v35, %v3415_v63 }
 0x6e9   :  { %v4419_v7 = vadd.f32 %v4418_v18, %v3877_v49  ;;  %v4833_v26 = vpop.f32.mrf.mxu0  ;;  %v5214_v61 = vpop.f32.mrf.mxu1  ;;  %v11673_v18 = vld [vmem:[#allocation36_spill] sm:$0xff] }
 0x6ea   :  { %v3002_v53 = vadd.f32 %v10415_v62, %v11673_v18 }
 0x6eb   :  { %v4834_v44 = vadd.f32 %v4833_v26, %v4419_v7 }
 0x6ec   :  { %v3435_v56 = vadd.f32 %v11674_v45, %v3002_v53 }
 0x6ed   :  { %v5211_v27 = vadd.f32 %v5210_v51, %v4834_v44  ;;  %v11676_v44 = vld [vmem:[#allocation266_spill] sm:$0xff] }
 0x6ee   :  { %v3881_v8 = vpop.f32.mrf.mxu2  ;;  %v4430_v17 = vpop.f32.mrf.mxu3 }
 0x6ef   :  { %5333 = vst [vmem:[#allocation2 + $0x260] sm:$0xff] %v5211_v27  ;;  %v3882_v40 = vadd.f32 %v3881_v8, %v3419_v58 }
 0x6f1   :  { %v4425_v32 = vadd.f32 %v4424_v41, %v3882_v40  ;;  %v4837_v24 = vpop.f32.mrf.mxu0  ;;  %v5218_v10 = vpop.f32.mrf.mxu1  ;;  %v11675_v41 = vld [vmem:[#allocation269_spill] sm:$0xff] }
 0x6f2   :  { %v3010_v49 = vadd.f32 %v10415_v62, %v11675_v41 }
 0x6f3   :  { %v4838_v48 = vadd.f32 %v4837_v24, %v4425_v32 }
 0x6f4   :  { %v3439_v27 = vadd.f32 %v11676_v44, %v3010_v49 }
 0x6f5   :  { %v5215_v39 = vadd.f32 %v5214_v61, %v4838_v48  ;;  %v11678_v48 = vld [vmem:[#allocation270_spill] sm:$0xff] }
 0x6f6   :  { %v3886_v12 = vpop.f32.mrf.mxu2  ;;  %v4436_v47 = vpop.f32.mrf.mxu3 }
 0x6f7   :  { %5334 = vst [vmem:[#allocation2 + $0x268] sm:$0xff] %v5215_v39  ;;  %v3887_v50 = vadd.f32 %v3886_v12, %v3423_v3  ;;  %v11679_v12 = vld [vmem:[#allocation6_spill] sm:$0xff] }
 0x6f9   :  { %v4431_v0 = vadd.f32 %v4430_v17, %v3887_v50  ;;  %v4841_v28 = vpop.f32.mrf.mxu0  ;;  %v5222_v6 = vpop.f32.mrf.mxu1  ;;  %v11677_v17 = vld [vmem:[#allocation42_spill] sm:$0xff] }
 0x6fa   :  { %v3018_v40 = vadd.f32 %v10415_v62, %v11677_v17 }
 0x6fb   :  { %v4842_v42 = vadd.f32 %v4841_v28, %v4431_v0 }
 0x6fc   :  { %v3443_v39 = vadd.f32 %v11678_v48, %v3018_v40 }
 0x6fd   :  { %v5219_v60 = vadd.f32 %v5218_v10, %v4842_v42 }
 0x6fe   :  { %v3891_v19 = vpop.f32.mrf.mxu2  ;;  %v4442_v11 = vpop.f32.mrf.mxu3 }
 0x6ff   :  { %5335 = vst [vmem:[#allocation2 + $0x270] sm:$0xff] %v5219_v60  ;;  %v3892_v54 = vadd.f32 %v3891_v19, %v3427_v31  ;;  %v11681_v19 = vld [vmem:[#allocation58_spill] sm:$0xff] }
 0x701   :  { %v4437_v13 = vadd.f32 %v4436_v47, %v3892_v54  ;;  %v4845_v23 = vpop.f32.mrf.mxu0  ;;  %v5226_v38 = vpop.f32.mrf.mxu1  ;;  %v3026_v47 = vadd.f32 %v10415_v62, %v11679_v12 }
 0x703   :  { %v4846_v14 = vadd.f32 %v4845_v23, %v4437_v13 }
 0x705   :  { %v5223_v34 = vadd.f32 %v5222_v6, %v4846_v14  ;;  %v11680_v6 = vld [vmem:[#allocation45_spill] sm:$0xff] }
 0x706   :  { %v3896_v1 = vpop.f32.mrf.mxu2  ;;  %v4448_v46 = vpop.f32.mrf.mxu3  ;;  %v3447_v42 = vadd.f32 %v11680_v6, %v3026_v47 }
 0x707   :  { %5336 = vst [vmem:[#allocation2 + $0x278] sm:$0xff] %v5223_v34  ;;  %v3897_v4 = vadd.f32 %v3896_v1, %v3431_v55  ;;  %v11683_v1 = vld [vmem:[#allocation61_spill] sm:$0xff] }
 0x709   :  { %v4443_v30 = vadd.f32 %v4442_v11, %v3897_v4  ;;  %v4849_v29 = vpop.f32.mrf.mxu0  ;;  %v5230_v25 = vpop.f32.mrf.mxu1  ;;  %v3034_v11 = vadd.f32 %v10415_v62, %v11681_v19 }
 0x70b   :  { %v4850_v5 = vadd.f32 %v4849_v29, %v4443_v30  ;;  %v11684_v29 = vld [vmem:[#allocation51_spill] sm:$0xff] }
 0x70d   :  { %v5227_v51 = vadd.f32 %v5226_v38, %v4850_v5  ;;  %v11682_v38 = vld [vmem:[#allocation48_spill] sm:$0xff] }
 0x70e   :  { %v3901_v59 = vpop.f32.mrf.mxu2  ;;  %v4454_v63 = vpop.f32.mrf.mxu3  ;;  %v3451_v14 = vadd.f32 %v11682_v38, %v3034_v11 }
 0x70f   :  { %5337 = vst [vmem:[#allocation2 + $0x280] sm:$0xff] %v5227_v51  ;;  %v3902_v35 = vadd.f32 %v3901_v59, %v3435_v56 }
 0x711   :  { %v4449_v33 = vadd.f32 %v4448_v46, %v3902_v35  ;;  %v4853_v15 = vpop.f32.mrf.mxu0  ;;  %v5234_v7 = vpop.f32.mrf.mxu1  ;;  %v3042_v46 = vadd.f32 %v10415_v62, %v11683_v1 }
 0x713   :  { %v4854_v26 = vadd.f32 %v4853_v15, %v4449_v33 }
 0x715   :  { %v5231_v61 = vadd.f32 %v5230_v25, %v4854_v26  ;;  %v3455_v25 = vadd.f32 %v11684_v29, %v3042_v46 }
 0x716   :  { %v3906_v43 = vpop.f32.mrf.mxu2  ;;  %v4460_v8 = vpop.f32.mrf.mxu3 }
 0x717   :  { %5338 = vst [vmem:[#allocation2 + $0x288] sm:$0xff] %v5231_v61  ;;  %v3907_v58 = vadd.f32 %v3906_v43, %v3439_v27 }
 0x719   :  { %v4455_v57 = vadd.f32 %v4454_v63, %v3907_v58  ;;  %v4857_v36 = vpop.f32.mrf.mxu0  ;;  %v5238_v24 = vpop.f32.mrf.mxu1 }
 0x71b   :  { %v4858_v32 = vadd.f32 %v4857_v36, %v4455_v57 }
 0x71d   :  { %v5235_v10 = vadd.f32 %v5234_v7, %v4858_v32 }
 0x71e   :  { %v3911_v52 = vpop.f32.mrf.mxu2  ;;  %v4466_v37 = vpop.f32.mrf.mxu3 }
 0x71f   :  { %5339 = vst [vmem:[#allocation2 + $0x290] sm:$0xff] %v5235_v10  ;;  %v3912_v3 = vadd.f32 %v3911_v52, %v3443_v39 }
 0x721   :  { %v4461_v50 = vadd.f32 %v4460_v8, %v3912_v3  ;;  %v4861_v9 = vpop.f32.mrf.mxu0  ;;  %v5242_v60 = vpop.f32.mrf.mxu1 }
 0x723   :  { %v4862_v0 = vadd.f32 %v4861_v9, %v4461_v50 }
 0x725   :  { %v5239_v28 = vadd.f32 %v5238_v24, %v4862_v0 }
 0x726   :  { %v3916_v2 = vpop.f32.mrf.mxu2  ;;  %v4472_v13 = vpop.f32.mrf.mxu3 }
 0x727   :  { %5340 = vst [vmem:[#allocation2 + $0x298] sm:$0xff] %v5239_v28  ;;  %v3917_v31 = vadd.f32 %v3916_v2, %v3447_v42 }
 0x729   :  { %v4467_v54 = vadd.f32 %v4466_v37, %v3917_v31  ;;  %v4865_v20 = vpop.f32.mrf.mxu0  ;;  %v5246_v55 = vpop.f32.mrf.mxu1 }
 0x72b   :  { %v4866_v16 = vadd.f32 %v4865_v20, %v4467_v54 }
 0x72d   :  { %v5243_v23 = vadd.f32 %v5242_v60, %v4866_v16 }
 0x72e   :  { %v3921_v34 = vpop.f32.mrf.mxu2  ;;  %v4478_v5 = vpop.f32.mrf.mxu3 }
 0x72f   :  { %5341 = vst [vmem:[#allocation2 + $0x2a0] sm:$0xff] %v5243_v23  ;;  %v3922_v21 = vadd.f32 %v3921_v34, %v3451_v14 }
 0x731   :  { %v4473_v4 = vadd.f32 %v4472_v13, %v3922_v21  ;;  %v4869_v18 = vpop.f32.mrf.mxu0  ;;  %v5250_v59 = vpop.f32.mrf.mxu1 }
 0x733   :  { %v4870_v53 = vadd.f32 %v4869_v18, %v4473_v4 }
 0x735   :  { %v5247_v30 = vadd.f32 %v5246_v55, %v4870_v53 }
 0x736   :  { %v3926_v51 = vpop.f32.mrf.mxu2  ;;  %v4484_v62 = vpop.f32.mrf.mxu3 }
 0x737   :  { %5342 = vst [vmem:[#allocation2 + $0x2a8] sm:$0xff] %v5247_v30  ;;  %v3927_v45 = vadd.f32 %v3926_v51, %v3455_v25 }
 0x739   :  { %v4479_v56 = vadd.f32 %v4478_v5, %v3927_v45  ;;  %v4873_v63 = vpop.f32.mrf.mxu0  ;;  %v5254_v61 = vpop.f32.mrf.mxu1 }
 0x73b   :  { %v4874_v35 = vadd.f32 %v4873_v63, %v4479_v56 }
 0x73d   :  { %v5251_v41 = vadd.f32 %v5250_v59, %v4874_v35 }
 0x73e   :  { %v3931_v49 = vpop.f32.mrf.mxu2 }
 0x73f   :  { %5343 = vst [vmem:[#allocation2 + $0x2b0] sm:$0xff] %v5251_v41  ;;  %v3932_v33 = vadd.f32 %v3931_v49, %v9874_v22 }
 0x741   :  { %v4485_v15 = vadd.f32 %v4484_v62, %v3932_v33  ;;  %v4877_v7 = vpop.f32.mrf.mxu0 }
 0x743   :  { %v4878_v26 = vadd.f32 %v4877_v7, %v4485_v15 }
 0x745   :  { %v5255_v44 = vadd.f32 %v5254_v61, %v4878_v26 }
 0x747   :  { %5344 = vst [vmem:[#allocation2 + $0x2b8] sm:$0xff] %v5255_v44 }
 0x748   :  { %5357 = dma.vmem_to_hbm [thread:$0]  %s5350_s14, 11264, %s5352_s17, [#allocation3], %s5605_s18, %s5605_s18, %s5606_s19  }
 0x749   :  { %5601 = dma.done.wait [#allocation3], 11264  }
 0x74a   :  { %5602 = vsyncadd [#allocation3], 4294956032 }
 0x74b   :  { %5362 = vsyncpa [#allocation3], 1 }

</bundles_post_ra>
